<compile_context>
chip_gen: v5e
topology: v5e:2x2
jax: 0.10.0
libtpu: 0.0.40
codegen_flags: <defaults>
</compile_context>

<pallas_src>
import functools

import jax
import jax.numpy as jnp
from jax.experimental import pallas as pl
from jax.experimental.pallas import tpu as pltpu


# ----------------------------- Pallas kernels ------------------------------

def _conv_bn_relu_kernel(p_ref, w_ref, bias_ref, o_ref):
    # p_ref: (TM, K) bf16, w_ref: (K, Cout) bf16 (BN scale folded), bias f32.
    acc = jnp.dot(p_ref[...], w_ref[...], preferred_element_type=jnp.float32)
    o_ref[...] = jnp.maximum(acc + bias_ref[...], 0.0).astype(o_ref.dtype)


def _dual_conv_bn_relu_kernel(pa_ref, pb_ref, wa_ref, wb_ref,
                              ba_ref, bb_ref, o_ref, *, ca):
    # Two convs (different inputs) written into one channel-concatenated tile
    # via direct slice stores (no in-kernel concatenate copy).
    a = jnp.dot(pa_ref[...], wa_ref[...], preferred_element_type=jnp.float32)
    o_ref[:, :ca] = jnp.maximum(a + ba_ref[...], 0.0).astype(o_ref.dtype)
    b = jnp.dot(pb_ref[...], wb_ref[...], preferred_element_type=jnp.float32)
    o_ref[:, ca:] = jnp.maximum(b + bb_ref[...], 0.0).astype(o_ref.dtype)


def _conv_pool_concat_kernel(p_ref, w_ref, bias_ref, o_ref, *, taps, cin, cout):
    # Conv and max-pool share the same (taps*cin)-wide patch tile; output is
    # the channel-concatenated [conv || pool] tile written via slice stores.
    p = p_ref[...]                                            # (TM, taps*cin)
    conv = jnp.dot(p, w_ref[...], preferred_element_type=jnp.float32)
    o_ref[:, :cout] = jnp.maximum(conv + bias_ref[...], 0.0).astype(o_ref.dtype)
    # Unrolled VPU maximum chain over the window taps (channels stay on lanes).
    m = p[:, 0:cin]
    for t in range(1, taps):
        m = jnp.maximum(m, p[:, t * cin:(t + 1) * cin])
    o_ref[:, cout:] = m


def _dual_1x1_kernel(x_ref, wl_ref, wr_ref, bl_ref, br_ref, ol_ref, or_ref):
    # Two 1x1 convs sharing the same input tile; two separate outputs so the
    # wrapper never slices a fused array back apart through HBM.
    x = x_ref[...]
    l = jnp.dot(x, wl_ref[...], preferred_element_type=jnp.float32)
    ol_ref[...] = jnp.maximum(l + bl_ref[...], 0.0).astype(ol_ref.dtype)
    r = jnp.dot(x, wr_ref[...], preferred_element_type=jnp.float32)
    or_ref[...] = jnp.maximum(r + br_ref[...], 0.0).astype(or_ref.dtype)


# ------------------------------- JAX glue ----------------------------------

def _im2col(x, kh, kw, sh, sw, ph, pw):
    """x: (B,H,W,C) bf16 -> patches (B*OH*OW, kh*kw*C), tap-major/chan-minor."""
    if ph or pw:
        x = jnp.pad(x, ((0, 0), (ph, ph), (pw, pw), (0, 0)))
    B, H, W, C = x.shape
    OH = (H - kh) // sh + 1
    OW = (W - kw) // sw + 1
    cols = []
    for i in range(kh):
        for j in range(kw):
            cols.append(x[:, i:i + sh * OH:sh, j:j + sw * OW:sw, :])
    patches = jnp.concatenate(cols, axis=-1)                  # (B,OH,OW,kh*kw*C)
    return patches.reshape(B * OH * OW, kh * kw * C), B, OH, OW


def _pick_tile_m(m, bytes_per_row):
    """Largest M tile that (a) keeps double-buffered row tiles well inside
    VMEM on every generation (v7x: 64 MiB physical / 32 MiB scoped) and
    (b) leaves >= 2 grid steps so both v7x TensorCores get work."""
    if m <= 8:
        return m
    budget = 4 * 1024 * 1024                                  # per-buffer budget
    tile = budget // max(int(bytes_per_row), 1)
    tile = min(tile, 1024)
    half = (-(-m // 2) + 7) // 8 * 8                          # ceil(m/2) -> mult of 8
    tile = min(tile, half)
    tile = max(tile - tile % 8, 8)
    return tile


_CPARAMS = pltpu.CompilerParams(
    dimension_semantics=("parallel",),
    vmem_limit_bytes=32 * 1024 * 1024,
)


def conv_bn_relu(x, p, ksize, stride, padding):
    """Conv2d(bias=False)+BN(eval)+ReLU. x: (B,H,W,Cin) NHWC bf16."""
    kh, kw = ksize
    sh, sw = stride
    ph, pw = padding
    patches, B, OH, OW = _im2col(x, kh, kw, sh, sw, ph, pw)
    M, K = patches.shape
    Cout = p["w2d"].shape[1]
    tile_m = _pick_tile_m(M, K * 2 + Cout * 2)
    out = pl.pallas_call(
        _conv_bn_relu_kernel,
        out_shape=jax.ShapeDtypeStruct((M, Cout), jnp.bfloat16),
        grid=(pl.cdiv(M, tile_m),),
        in_specs=[
            pl.BlockSpec((tile_m, K), lambda i: (i, 0)),
            pl.BlockSpec((K, Cout), lambda i: (0, 0)),
            pl.BlockSpec((1, Cout), lambda i: (0, 0)),
        ],
        out_specs=pl.BlockSpec((tile_m, Cout), lambda i: (i, 0)),
        compiler_params=_CPARAMS,
    )(patches, p["w2d"], p["bias"])
    return out.reshape(B, OH, OW, Cout)


def conv_pool_concat(x, p, ksize, stride):
    """Fused [conv3x3/s (BN+ReLU) || maxpool3x3/s] -> channel concat.
    Both branches share identical window geometry (k=3, pad=0, same stride)."""
    kh, kw = ksize
    sh, sw = stride
    patches, B, OH, OW = _im2col(x, kh, kw, sh, sw, 0, 0)
    M, K = patches.shape
    cin = x.shape[-1]
    taps = kh * kw
    Cout = p["w2d"].shape[1]
    width = Cout + cin
    tile_m = _pick_tile_m(M, K * 2 + width * 2)
    kernel = functools.partial(_conv_pool_concat_kernel,
                               taps=taps, cin=cin, cout=Cout)
    out = pl.pallas_call(
        kernel,
        out_shape=jax.ShapeDtypeStruct((M, width), jnp.bfloat16),
        grid=(pl.cdiv(M, tile_m),),
        in_specs=[
            pl.BlockSpec((tile_m, K), lambda i: (i, 0)),
            pl.BlockSpec((K, Cout), lambda i: (0, 0)),
            pl.BlockSpec((1, Cout), lambda i: (0, 0)),
        ],
        out_specs=pl.BlockSpec((tile_m, width), lambda i: (i, 0)),
        compiler_params=_CPARAMS,
    )(patches, p["w2d"], p["bias"])
    return out.reshape(B, OH, OW, width)


def dual_conv1x1_bn_relu(x, p_left, p_right):
    """Two 1x1 convs that share the same input, emitted as two outputs of a
    single pallas_call (layer3 left/right heads reading layer2 once)."""
    B, OH, OW, C = x.shape
    flat = x.reshape(B * OH * OW, C)
    M = flat.shape[0]
    Cl = p_left["w2d"].shape[1]
    Cr = p_right["w2d"].shape[1]
    tile_m = _pick_tile_m(M, C * 2 + (Cl + Cr) * 2)
    left, right = pl.pallas_call(
        _dual_1x1_kernel,
        out_shape=(jax.ShapeDtypeStruct((M, Cl), jnp.bfloat16),
                   jax.ShapeDtypeStruct((M, Cr), jnp.bfloat16)),
        grid=(pl.cdiv(M, tile_m),),
        in_specs=[
            pl.BlockSpec((tile_m, C), lambda i: (i, 0)),
            pl.BlockSpec((C, Cl), lambda i: (0, 0)),
            pl.BlockSpec((C, Cr), lambda i: (0, 0)),
            pl.BlockSpec((1, Cl), lambda i: (0, 0)),
            pl.BlockSpec((1, Cr), lambda i: (0, 0)),
        ],
        out_specs=(pl.BlockSpec((tile_m, Cl), lambda i: (i, 0)),
                   pl.BlockSpec((tile_m, Cr), lambda i: (i, 0))),
        compiler_params=_CPARAMS,
    )(flat, p_left["w2d"], p_right["w2d"], p_left["bias"], p_right["bias"])
    return left.reshape(B, OH, OW, Cl), right.reshape(B, OH, OW, Cr)


def dual_conv_bn_relu(xa, xb, pa, pb, ksize):
    """Two 3x3/s1/p0 convs (different inputs, same spatial geometry) written
    into one channel-concatenated output (layer3 left || right tails)."""
    kh, kw = ksize
    patches_a, B, OH, OW = _im2col(xa, kh, kw, 1, 1, 0, 0)
    patches_b, _, _, _ = _im2col(xb, kh, kw, 1, 1, 0, 0)
    M, Ka = patches_a.shape
    Kb = patches_b.shape[1]
    Ca = pa["w2d"].shape[1]
    Cb = pb["w2d"].shape[1]
    width = Ca + Cb
    tile_m = _pick_tile_m(M, (Ka + Kb) * 2 + width * 2)
    kernel = functools.partial(_dual_conv_bn_relu_kernel, ca=Ca)
    out = pl.pallas_call(
        kernel,
        out_shape=jax.ShapeDtypeStruct((M, width), jnp.bfloat16),
        grid=(pl.cdiv(M, tile_m),),
        in_specs=[
            pl.BlockSpec((tile_m, Ka), lambda i: (i, 0)),
            pl.BlockSpec((tile_m, Kb), lambda i: (i, 0)),
            pl.BlockSpec((Ka, Ca), lambda i: (0, 0)),
            pl.BlockSpec((Kb, Cb), lambda i: (0, 0)),
            pl.BlockSpec((1, Ca), lambda i: (0, 0)),
            pl.BlockSpec((1, Cb), lambda i: (0, 0)),
        ],
        out_specs=pl.BlockSpec((tile_m, width), lambda i: (i, 0)),
        compiler_params=_CPARAMS,
    )(patches_a, patches_b, pa["w2d"], pb["w2d"], pa["bias"], pb["bias"])
    return out.reshape(B, OH, OW, width)


# --------------------------- parameter creation -----------------------------

def init_basic_conv(key, cin, cout, kh, kw):
    kwgt, kbn = jax.random.split(key)
    fan_in = cin * kh * kw
    w = jax.random.normal(kwgt, (cout, cin, kh, kw), jnp.float32) / jnp.sqrt(fan_in)
    # BatchNorm (eval-mode) parameters, deterministic but non-trivial.
    gamma = 1.0 + 0.1 * jax.random.normal(kbn, (cout,), jnp.float32)
    beta = jnp.full((cout,), 0.01, jnp.float32)
    running_mean = jnp.zeros((cout,), jnp.float32)
    running_var = jnp.ones((cout,), jnp.float32)
    eps = 1e-3
    scale = gamma / jnp.sqrt(running_var + eps)
    bias = beta - running_mean * scale
    # Hoisted relayout: (Cout,Cin,kh,kw) -> (kh*kw*Cin, Cout); row order
    # (kh, kw, Cin) matches im2col tap-major/channel-minor order.  BN scale is
    # folded into the weight columns in f32, then cast to bf16 for the MXU.
    w2d = jnp.transpose(w, (2, 3, 1, 0)).reshape(kh * kw * cin, cout)
    w2d = w2d * scale[None, :]
    # NOTE: kernel sizes are deliberately NOT stored here (they must stay
    # static Python ints under jit; storing them in the pytree made tracers).
    return {"w2d": w2d.astype(jnp.bfloat16), "bias": bias.reshape(1, cout)}


def stem_init(key):
    keys = jax.random.split(key, 11)
    return {
        "l1_0": init_basic_conv(keys[0], 3, 32, 3, 3),
        "l1_1": init_basic_conv(keys[1], 32, 32, 3, 3),
        "l1_2": init_basic_conv(keys[2], 32, 64, 3, 3),
        "l2_conv": init_basic_conv(keys[3], 64, 96, 3, 3),
        "l3l_0": init_basic_conv(keys[4], 160, 64, 1, 1),
        "l3l_1": init_basic_conv(keys[5], 64, 96, 3, 3),
        "l3r_0": init_basic_conv(keys[6], 160, 64, 1, 1),
        "l3r_1": init_basic_conv(keys[7], 64, 64, 7, 1),
        "l3r_2": init_basic_conv(keys[8], 64, 64, 1, 7),
        "l3r_3": init_basic_conv(keys[9], 64, 96, 3, 3),
        "l4_conv": init_basic_conv(keys[10], 192, 192, 3, 3),
    }


# ------------------------------- Stem forward -------------------------------

def stem_forward(params, x_nchw):
    # NCHW -> NHWC, cast once to bf16 (all inter-layer activations are bf16).
    x = jnp.transpose(x_nchw, (0, 2, 3, 1)).astype(jnp.bfloat16)

    # layer1
    y = conv_bn_relu(x, params["l1_0"], (3, 3), (2, 2), (0, 0))
    y = conv_bn_relu(y, params["l1_1"], (3, 3), (1, 1), (0, 0))
    y = conv_bn_relu(y, params["l1_2"], (3, 3), (1, 1), (1, 1))

    # layer2: conv(96) || maxpool(64) fused into one kernel -> (..., 160)
    l2 = conv_pool_concat(y, params["l2_conv"], (3, 3), (2, 2))

    # layer3: both 1x1 heads read l2 once, emitted as two separate outputs.
    left, right = dual_conv1x1_bn_relu(l2, params["l3l_0"], params["l3r_0"])
    right = conv_bn_relu(right, params["l3r_1"], (7, 1), (1, 1), (3, 0))  # (7,1)
    right = conv_bn_relu(right, params["l3r_2"], (1, 7), (1, 1), (0, 3))  # (1,7)
    # final 3x3 convs of both branches fused + channel concat -> (..., 192)
    l3 = dual_conv_bn_relu(left, right, params["l3l_1"], params["l3r_3"], (3, 3))

    # layer4: conv(192) || maxpool(192) fused -> (..., 384)
    out = conv_pool_concat(l3, params["l4_conv"], (3, 3), (2, 2))

    # NHWC -> NCHW, back to f32 only at the very end.
    return jnp.transpose(out, (0, 3, 1, 2)).astype(jnp.float32)


# ---------------------------------- main ------------------------------------

if __name__ == "__main__":
    key = jax.random.PRNGKey(0)
    kparams, kx = jax.random.split(key)
    params = stem_init(kparams)

    # Smallest convenient spatial size that keeps every stage valid: 35x35.
    x = jax.random.normal(kx, (2, 3, 35, 35), jnp.float32)

    out = jax.block_until_ready(jax.jit(stem_forward)(params, x))

    expected_shape = (2, 384, 2, 2)
    assert out.shape == expected_shape, (out.shape, expected_shape)
    assert bool(jnp.all(jnp.isfinite(out)))
    print("KERNEL_OK")
</pallas_src>

<mosaic_0001>
module attributes {stable_mosaic.version = 11 : i64} {
  func.func @_conv_bn_relu_kernel(%arg0: i32, %arg1: memref<296x27xbf16, #tpu.memory_space<vmem>>, %arg2: memref<27x32xbf16, #tpu.memory_space<vmem>>, %arg3: memref<1x32xf32, #tpu.memory_space<vmem>>, %arg4: memref<296x32xbf16, #tpu.memory_space<vmem>>) attributes {dimension_semantics = [#tpu.dimension_semantics<parallel>], iteration_bounds = array<i64: 2>, scalar_prefetch = 0 : i64, scratch_operands = 0 : i64, tpu.core_type = #tpu.core_type<tc>, window_params = [{transform_indices = @transform_0, window_bounds = array<i64: 296, 27>}, {pipeline_mode = #tpu.pipeline_mode<synchronous>, transform_indices = @transform_1, window_bounds = array<i64: 27, 32>}, {pipeline_mode = #tpu.pipeline_mode<synchronous>, transform_indices = @transform_2, window_bounds = array<i64: 1, 32>}, {transform_indices = @transform_3, window_bounds = array<i64: 296, 32>}]} {
    %c0 = arith.constant 0 : index
    %c0_0 = arith.constant 0 : index
    %0 = vector.load %arg1[%c0, %c0_0] : memref<296x27xbf16, #tpu.memory_space<vmem>>, vector<296x27xbf16>
    %c0_1 = arith.constant 0 : index
    %c0_2 = arith.constant 0 : index
    %1 = vector.load %arg2[%c0_1, %c0_2] : memref<27x32xbf16, #tpu.memory_space<vmem>>, vector<27x32xbf16>
    %cst = arith.constant dense<0.000000e+00> : vector<296x32xf32>
    %2 = tpu.matmul %0, %1, %cst {dimension_numbers = #tpu.dot_dimension_numbers<[1], [0], [0], [1], [0, 0, 1, 1], [], []>} : vector<296x27xbf16>, vector<27x32xbf16>, vector<296x32xf32> -> vector<296x32xf32>
    %c0_3 = arith.constant 0 : index
    %c0_4 = arith.constant 0 : index
    %3 = vector.load %arg3[%c0_3, %c0_4] : memref<1x32xf32, #tpu.memory_space<vmem>>, vector<1x32xf32>
    %4 = vector.broadcast %3 : vector<1x32xf32> to vector<296x32xf32>
    %5 = arith.addf %2, %4 : vector<296x32xf32>
    %cst_5 = arith.constant 0.000000e+00 : f32
    %6 = vector.broadcast %cst_5 : f32 to vector<296x32xf32>
    %7 = arith.maximumf %5, %6 : vector<296x32xf32>
    %8 = arith.truncf %7 : vector<296x32xf32> to vector<296x32xbf16>
    %c0_6 = arith.constant 0 : index
    %c0_7 = arith.constant 0 : index
    %9 = vector.load %arg4[%c0_6, %c0_7] : memref<296x32xbf16, #tpu.memory_space<vmem>>, vector<296x32xbf16>
    tpu.vector_store %arg4[%c0_6, %c0_7], %8 {strides = array<i32>} : memref<296x32xbf16, #tpu.memory_space<vmem>>, vector<296x32xbf16>,
    return
  }
  func.func @transform_0(%arg0: i32) -> (i32, i32) {
    %c0_i32 = arith.constant 0 : i32
    %c0_i32_0 = arith.constant 0 : i32
    return %arg0, %c0_i32 : i32, i32
  }
  func.func @transform_1(%arg0: i32) -> (i32, i32) {
    %c0_i32 = arith.constant 0 : i32
    %c0_i32_0 = arith.constant 0 : i32
    %c0_i32_1 = arith.constant 0 : i32
    return %c0_i32, %c0_i32_0 : i32, i32
  }
  func.func @transform_2(%arg0: i32) -> (i32, i32) {
    %c0_i32 = arith.constant 0 : i32
    %c0_i32_0 = arith.constant 0 : i32
    %c0_i32_1 = arith.constant 0 : i32
    return %c0_i32, %c0_i32_0 : i32, i32
  }
  func.func @transform_3(%arg0: i32) -> (i32, i32) {
    %c0_i32 = arith.constant 0 : i32
    %c0_i32_0 = arith.constant 0 : i32
    return %arg0, %c0_i32 : i32, i32
  }
}

module attributes {stable_mosaic.version = 11 : i64} {
  func.func @_conv_bn_relu_kernel(%arg0: i32, %arg1: memref<232x288xbf16, #tpu.memory_space<vmem>>, %arg2: memref<288x32xbf16, #tpu.memory_space<vmem>>, %arg3: memref<1x32xf32, #tpu.memory_space<vmem>>, %arg4: memref<232x32xbf16, #tpu.memory_space<vmem>>) attributes {dimension_semantics = [#tpu.dimension_semantics<parallel>], iteration_bounds = array<i64: 2>, scalar_prefetch = 0 : i64, scratch_operands = 0 : i64, tpu.core_type = #tpu.core_type<tc>, window_params = [{transform_indices = @transform_0, window_bounds = array<i64: 232, 288>}, {pipeline_mode = #tpu.pipeline_mode<synchronous>, transform_indices = @transform_1, window_bounds = array<i64: 288, 32>}, {pipeline_mode = #tpu.pipeline_mode<synchronous>, transform_indices = @transform_2, window_bounds = array<i64: 1, 32>}, {transform_indices = @transform_3, window_bounds = array<i64: 232, 32>}]} {
    %c0 = arith.constant 0 : index
    %c0_0 = arith.constant 0 : index
    %0 = vector.load %arg1[%c0, %c0_0] : memref<232x288xbf16, #tpu.memory_space<vmem>>, vector<232x288xbf16>
    %c0_1 = arith.constant 0 : index
    %c0_2 = arith.constant 0 : index
    %1 = vector.load %arg2[%c0_1, %c0_2] : memref<288x32xbf16, #tpu.memory_space<vmem>>, vector<288x32xbf16>
    %cst = arith.constant dense<0.000000e+00> : vector<232x32xf32>
    %2 = tpu.matmul %0, %1, %cst {dimension_numbers = #tpu.dot_dimension_numbers<[1], [0], [0], [1], [0, 0, 1, 1], [], []>} : vector<232x288xbf16>, vector<288x32xbf16>, vector<232x32xf32> -> vector<232x32xf32>
    %c0_3 = arith.constant 0 : index
    %c0_4 = arith.constant 0 : index
    %3 = vector.load %arg3[%c0_3, %c0_4] : memref<1x32xf32, #tpu.memory_space<vmem>>, vector<1x32xf32>
    %4 = vector.broadcast %3 : vector<1x32xf32> to vector<232x32xf32>
    %5 = arith.addf %2, %4 : vector<232x32xf32>
    %cst_5 = arith.constant 0.000000e+00 : f32
    %6 = vector.broadcast %cst_5 : f32 to vector<232x32xf32>
    %7 = arith.maximumf %5, %6 : vector<232x32xf32>
    %8 = arith.truncf %7 : vector<232x32xf32> to vector<232x32xbf16>
    %c0_6 = arith.constant 0 : index
    %c0_7 = arith.constant 0 : index
    %9 = vector.load %arg4[%c0_6, %c0_7] : memref<232x32xbf16, #tpu.memory_space<vmem>>, vector<232x32xbf16>
    tpu.vector_store %arg4[%c0_6, %c0_7], %8 {strides = array<i32>} : memref<232x32xbf16, #tpu.memory_space<vmem>>, vector<232x32xbf16>,
    return
  }
  func.func @transform_0(%arg0: i32) -> (i32, i32) {
    %c0_i32 = arith.constant 0 : i32
    %c0_i32_0 = arith.constant 0 : i32
    return %arg0, %c0_i32 : i32, i32
  }
  func.func @transform_1(%arg0: i32) -> (i32, i32) {
    %c0_i32 = arith.constant 0 : i32
    %c0_i32_0 = arith.constant 0 : i32
    %c0_i32_1 = arith.constant 0 : i32
    return %c0_i32, %c0_i32_0 : i32, i32
  }
  func.func @transform_2(%arg0: i32) -> (i32, i32) {
    %c0_i32 = arith.constant 0 : i32
    %c0_i32_0 = arith.constant 0 : i32
    %c0_i32_1 = arith.constant 0 : i32
    return %c0_i32, %c0_i32_0 : i32, i32
  }
  func.func @transform_3(%arg0: i32) -> (i32, i32) {
    %c0_i32 = arith.constant 0 : i32
    %c0_i32_0 = arith.constant 0 : i32
    return %arg0, %c0_i32 : i32, i32
  }
}

module attributes {stable_mosaic.version = 11 : i64} {
  func.func @_conv_bn_relu_kernel(%arg0: i32, %arg1: memref<232x288xbf16, #tpu.memory_space<vmem>>, %arg2: memref<288x64xbf16, #tpu.memory_space<vmem>>, %arg3: memref<1x64xf32, #tpu.memory_space<vmem>>, %arg4: memref<232x64xbf16, #tpu.memory_space<vmem>>) attributes {dimension_semantics = [#tpu.dimension_semantics<parallel>], iteration_bounds = array<i64: 2>, scalar_prefetch = 0 : i64, scratch_operands = 0 : i64, tpu.core_type = #tpu.core_type<tc>, window_params = [{transform_indices = @transform_0, window_bounds = array<i64: 232, 288>}, {pipeline_mode = #tpu.pipeline_mode<synchronous>, transform_indices = @transform_1, window_bounds = array<i64: 288, 64>}, {pipeline_mode = #tpu.pipeline_mode<synchronous>, transform_indices = @transform_2, window_bounds = array<i64: 1, 64>}, {transform_indices = @transform_3, window_bounds = array<i64: 232, 64>}]} {
    %c0 = arith.constant 0 : index
    %c0_0 = arith.constant 0 : index
    %0 = vector.load %arg1[%c0, %c0_0] : memref<232x288xbf16, #tpu.memory_space<vmem>>, vector<232x288xbf16>
    %c0_1 = arith.constant 0 : index
    %c0_2 = arith.constant 0 : index
    %1 = vector.load %arg2[%c0_1, %c0_2] : memref<288x64xbf16, #tpu.memory_space<vmem>>, vector<288x64xbf16>
    %cst = arith.constant dense<0.000000e+00> : vector<232x64xf32>
    %2 = tpu.matmul %0, %1, %cst {dimension_numbers = #tpu.dot_dimension_numbers<[1], [0], [0], [1], [0, 0, 1, 1], [], []>} : vector<232x288xbf16>, vector<288x64xbf16>, vector<232x64xf32> -> vector<232x64xf32>
    %c0_3 = arith.constant 0 : index
    %c0_4 = arith.constant 0 : index
    %3 = vector.load %arg3[%c0_3, %c0_4] : memref<1x64xf32, #tpu.memory_space<vmem>>, vector<1x64xf32>
    %4 = vector.broadcast %3 : vector<1x64xf32> to vector<232x64xf32>
    %5 = arith.addf %2, %4 : vector<232x64xf32>
    %cst_5 = arith.constant 0.000000e+00 : f32
    %6 = vector.broadcast %cst_5 : f32 to vector<232x64xf32>
    %7 = arith.maximumf %5, %6 : vector<232x64xf32>
    %8 = arith.truncf %7 : vector<232x64xf32> to vector<232x64xbf16>
    %c0_6 = arith.constant 0 : index
    %c0_7 = arith.constant 0 : index
    %9 = vector.load %arg4[%c0_6, %c0_7] : memref<232x64xbf16, #tpu.memory_space<vmem>>, vector<232x64xbf16>
    tpu.vector_store %arg4[%c0_6, %c0_7], %8 {strides = array<i32>} : memref<232x64xbf16, #tpu.memory_space<vmem>>, vector<232x64xbf16>,
    return
  }
  func.func @transform_0(%arg0: i32) -> (i32, i32) {
    %c0_i32 = arith.constant 0 : i32
    %c0_i32_0 = arith.constant 0 : i32
    return %arg0, %c0_i32 : i32, i32
  }
  func.func @transform_1(%arg0: i32) -> (i32, i32) {
    %c0_i32 = arith.constant 0 : i32
    %c0_i32_0 = arith.constant 0 : i32
    %c0_i32_1 = arith.constant 0 : i32
    return %c0_i32, %c0_i32_0 : i32, i32
  }
  func.func @transform_2(%arg0: i32) -> (i32, i32) {
    %c0_i32 = arith.constant 0 : i32
    %c0_i32_0 = arith.constant 0 : i32
    %c0_i32_1 = arith.constant 0 : i32
    return %c0_i32, %c0_i32_0 : i32, i32
  }
  func.func @transform_3(%arg0: i32) -> (i32, i32) {
    %c0_i32 = arith.constant 0 : i32
    %c0_i32_0 = arith.constant 0 : i32
    return %arg0, %c0_i32 : i32, i32
  }
}

module attributes {stable_mosaic.version = 11 : i64} {
  func.func @_conv_pool_concat_kernel(%arg0: i32, %arg1: memref<56x576xbf16, #tpu.memory_space<vmem>>, %arg2: memref<576x96xbf16, #tpu.memory_space<vmem>>, %arg3: memref<1x96xf32, #tpu.memory_space<vmem>>, %arg4: memref<56x160xbf16, #tpu.memory_space<vmem>>) attributes {dimension_semantics = [#tpu.dimension_semantics<parallel>], iteration_bounds = array<i64: 2>, scalar_prefetch = 0 : i64, scratch_operands = 0 : i64, tpu.core_type = #tpu.core_type<tc>, window_params = [{transform_indices = @transform_0, window_bounds = array<i64: 56, 576>}, {pipeline_mode = #tpu.pipeline_mode<synchronous>, transform_indices = @transform_1, window_bounds = array<i64: 576, 96>}, {pipeline_mode = #tpu.pipeline_mode<synchronous>, transform_indices = @transform_2, window_bounds = array<i64: 1, 96>}, {transform_indices = @transform_3, window_bounds = array<i64: 56, 160>}]} {
    %c0 = arith.constant 0 : index
    %c0_0 = arith.constant 0 : index
    %0 = vector.load %arg1[%c0, %c0_0] : memref<56x576xbf16, #tpu.memory_space<vmem>>, vector<56x576xbf16>
    %c0_1 = arith.constant 0 : index
    %c0_2 = arith.constant 0 : index
    %1 = vector.load %arg2[%c0_1, %c0_2] : memref<576x96xbf16, #tpu.memory_space<vmem>>, vector<576x96xbf16>
    %cst = arith.constant dense<0.000000e+00> : vector<56x96xf32>
    %2 = tpu.matmul %0, %1, %cst {dimension_numbers = #tpu.dot_dimension_numbers<[1], [0], [0], [1], [0, 0, 1, 1], [], []>} : vector<56x576xbf16>, vector<576x96xbf16>, vector<56x96xf32> -> vector<56x96xf32>
    %c0_3 = arith.constant 0 : index
    %c0_4 = arith.constant 0 : index
    %3 = vector.load %arg3[%c0_3, %c0_4] : memref<1x96xf32, #tpu.memory_space<vmem>>, vector<1x96xf32>
    %4 = vector.broadcast %3 : vector<1x96xf32> to vector<56x96xf32>
    %5 = arith.addf %2, %4 : vector<56x96xf32>
    %cst_5 = arith.constant 0.000000e+00 : f32
    %6 = vector.broadcast %cst_5 : f32 to vector<56x96xf32>
    %7 = arith.maximumf %5, %6 : vector<56x96xf32>
    %8 = arith.truncf %7 : vector<56x96xf32> to vector<56x96xbf16>
    %c0_6 = arith.constant 0 : index
    %c0_7 = arith.constant 0 : index
    %9 = vector.load %arg4[%c0_6, %c0_7] : memref<56x160xbf16, #tpu.memory_space<vmem>>, vector<56x96xbf16>
    tpu.vector_store %arg4[%c0_6, %c0_7], %8 {strides = array<i32>} : memref<56x160xbf16, #tpu.memory_space<vmem>>, vector<56x96xbf16>,
    %10 = vector.extract_strided_slice %0 {offsets = [0, 0], sizes = [56, 64], strides = [1, 1]} : vector<56x576xbf16> to vector<56x64xbf16>
    %11 = vector.extract_strided_slice %0 {offsets = [0, 64], sizes = [56, 64], strides = [1, 1]} : vector<56x576xbf16> to vector<56x64xbf16>
    %12 = arith.maximumf %10, %11 : vector<56x64xbf16>
    %13 = vector.extract_strided_slice %0 {offsets = [0, 128], sizes = [56, 64], strides = [1, 1]} : vector<56x576xbf16> to vector<56x64xbf16>
    %14 = arith.maximumf %12, %13 : vector<56x64xbf16>
    %15 = vector.extract_strided_slice %0 {offsets = [0, 192], sizes = [56, 64], strides = [1, 1]} : vector<56x576xbf16> to vector<56x64xbf16>
    %16 = arith.maximumf %14, %15 : vector<56x64xbf16>
    %17 = vector.extract_strided_slice %0 {offsets = [0, 256], sizes = [56, 64], strides = [1, 1]} : vector<56x576xbf16> to vector<56x64xbf16>
    %18 = arith.maximumf %16, %17 : vector<56x64xbf16>
    %19 = vector.extract_strided_slice %0 {offsets = [0, 320], sizes = [56, 64], strides = [1, 1]} : vector<56x576xbf16> to vector<56x64xbf16>
    %20 = arith.maximumf %18, %19 : vector<56x64xbf16>
    %21 = vector.extract_strided_slice %0 {offsets = [0, 384], sizes = [56, 64], strides = [1, 1]} : vector<56x576xbf16> to vector<56x64xbf16>
    %22 = arith.maximumf %20, %21 : vector<56x64xbf16>
    %23 = vector.extract_strided_slice %0 {offsets = [0, 448], sizes = [56, 64], strides = [1, 1]} : vector<56x576xbf16> to vector<56x64xbf16>
    %24 = arith.maximumf %22, %23 : vector<56x64xbf16>
    %25 = vector.extract_strided_slice %0 {offsets = [0, 512], sizes = [56, 64], strides = [1, 1]} : vector<56x576xbf16> to vector<56x64xbf16>
    %26 = arith.maximumf %24, %25 : vector<56x64xbf16>
    %c0_8 = arith.constant 0 : index
    %c96 = arith.constant 96 : index
    %27 = vector.load %arg4[%c0_8, %c96] : memref<56x160xbf16, #tpu.memory_space<vmem>>, vector<56x64xbf16>
    tpu.vector_store %arg4[%c0_8, %c96], %26 {strides = array<i32>} : memref<56x160xbf16, #tpu.memory_space<vmem>>, vector<56x64xbf16>,
    return
  }
  func.func @transform_0(%arg0: i32) -> (i32, i32) {
    %c0_i32 = arith.constant 0 : i32
    %c0_i32_0 = arith.constant 0 : i32
    return %arg0, %c0_i32 : i32, i32
  }
  func.func @transform_1(%arg0: i32) -> (i32, i32) {
    %c0_i32 = arith.constant 0 : i32
    %c0_i32_0 = arith.constant 0 : i32
    %c0_i32_1 = arith.constant 0 : i32
    return %c0_i32, %c0_i32_0 : i32, i32
  }
  func.func @transform_2(%arg0: i32) -> (i32, i32) {
    %c0_i32 = arith.constant 0 : i32
    %c0_i32_0 = arith.constant 0 : i32
    %c0_i32_1 = arith.constant 0 : i32
    return %c0_i32, %c0_i32_0 : i32, i32
  }
  func.func @transform_3(%arg0: i32) -> (i32, i32) {
    %c0_i32 = arith.constant 0 : i32
    %c0_i32_0 = arith.constant 0 : i32
    return %arg0, %c0_i32 : i32, i32
  }
}

module attributes {stable_mosaic.version = 11 : i64} {
  func.func @_dual_1x1_kernel(%arg0: i32, %arg1: memref<56x160xbf16, #tpu.memory_space<vmem>>, %arg2: memref<160x64xbf16, #tpu.memory_space<vmem>>, %arg3: memref<160x64xbf16, #tpu.memory_space<vmem>>, %arg4: memref<1x64xf32, #tpu.memory_space<vmem>>, %arg5: memref<1x64xf32, #tpu.memory_space<vmem>>, %arg6: memref<56x64xbf16, #tpu.memory_space<vmem>>, %arg7: memref<56x64xbf16, #tpu.memory_space<vmem>>) attributes {dimension_semantics = [#tpu.dimension_semantics<parallel>], iteration_bounds = array<i64: 2>, scalar_prefetch = 0 : i64, scratch_operands = 0 : i64, tpu.core_type = #tpu.core_type<tc>, window_params = [{transform_indices = @transform_0, window_bounds = array<i64: 56, 160>}, {pipeline_mode = #tpu.pipeline_mode<synchronous>, transform_indices = @transform_1, window_bounds = array<i64: 160, 64>}, {pipeline_mode = #tpu.pipeline_mode<synchronous>, transform_indices = @transform_2, window_bounds = array<i64: 160, 64>}, {pipeline_mode = #tpu.pipeline_mode<synchronous>, transform_indices = @transform_3, window_bounds = array<i64: 1, 64>}, {pipeline_mode = #tpu.pipeline_mode<synchronous>, transform_indices = @transform_4, window_bounds = array<i64: 1, 64>}, {transform_indices = @transform_5, window_bounds = array<i64: 56, 64>}, {transform_indices = @transform_6, window_bounds = array<i64: 56, 64>}]} {
    %c0 = arith.constant 0 : index
    %c0_0 = arith.constant 0 : index
    %0 = vector.load %arg1[%c0, %c0_0] : memref<56x160xbf16, #tpu.memory_space<vmem>>, vector<56x160xbf16>
    %c0_1 = arith.constant 0 : index
    %c0_2 = arith.constant 0 : index
    %1 = vector.load %arg2[%c0_1, %c0_2] : memref<160x64xbf16, #tpu.memory_space<vmem>>, vector<160x64xbf16>
    %cst = arith.constant dense<0.000000e+00> : vector<56x64xf32>
    %2 = tpu.matmul %0, %1, %cst {dimension_numbers = #tpu.dot_dimension_numbers<[1], [0], [0], [1], [0, 0, 1, 1], [], []>} : vector<56x160xbf16>, vector<160x64xbf16>, vector<56x64xf32> -> vector<56x64xf32>
    %c0_3 = arith.constant 0 : index
    %c0_4 = arith.constant 0 : index
    %3 = vector.load %arg4[%c0_3, %c0_4] : memref<1x64xf32, #tpu.memory_space<vmem>>, vector<1x64xf32>
    %4 = vector.broadcast %3 : vector<1x64xf32> to vector<56x64xf32>
    %5 = arith.addf %2, %4 : vector<56x64xf32>
    %cst_5 = arith.constant 0.000000e+00 : f32
    %6 = vector.broadcast %cst_5 : f32 to vector<56x64xf32>
    %7 = arith.maximumf %5, %6 : vector<56x64xf32>
    %8 = arith.truncf %7 : vector<56x64xf32> to vector<56x64xbf16>
    %c0_6 = arith.constant 0 : index
    %c0_7 = arith.constant 0 : index
    %9 = vector.load %arg6[%c0_6, %c0_7] : memref<56x64xbf16, #tpu.memory_space<vmem>>, vector<56x64xbf16>
    tpu.vector_store %arg6[%c0_6, %c0_7], %8 {strides = array<i32>} : memref<56x64xbf16, #tpu.memory_space<vmem>>, vector<56x64xbf16>,
    %c0_8 = arith.constant 0 : index
    %c0_9 = arith.constant 0 : index
    %10 = vector.load %arg3[%c0_8, %c0_9] : memref<160x64xbf16, #tpu.memory_space<vmem>>, vector<160x64xbf16>
    %cst_10 = arith.constant dense<0.000000e+00> : vector<56x64xf32>
    %11 = tpu.matmul %0, %10, %cst_10 {dimension_numbers = #tpu.dot_dimension_numbers<[1], [0], [0], [1], [0, 0, 1, 1], [], []>} : vector<56x160xbf16>, vector<160x64xbf16>, vector<56x64xf32> -> vector<56x64xf32>
    %c0_11 = arith.constant 0 : index
    %c0_12 = arith.constant 0 : index
    %12 = vector.load %arg5[%c0_11, %c0_12] : memref<1x64xf32, #tpu.memory_space<vmem>>, vector<1x64xf32>
    %13 = vector.broadcast %12 : vector<1x64xf32> to vector<56x64xf32>
    %14 = arith.addf %11, %13 : vector<56x64xf32>
    %cst_13 = arith.constant 0.000000e+00 : f32
    %15 = vector.broadcast %cst_13 : f32 to vector<56x64xf32>
    %16 = arith.maximumf %14, %15 : vector<56x64xf32>
    %17 = arith.truncf %16 : vector<56x64xf32> to vector<56x64xbf16>
    %c0_14 = arith.constant 0 : index
    %c0_15 = arith.constant 0 : index
    %18 = vector.load %arg7[%c0_14, %c0_15] : memref<56x64xbf16, #tpu.memory_space<vmem>>, vector<56x64xbf16>
    tpu.vector_store %arg7[%c0_14, %c0_15], %17 {strides = array<i32>} : memref<56x64xbf16, #tpu.memory_space<vmem>>, vector<56x64xbf16>,
    return
  }
  func.func @transform_0(%arg0: i32) -> (i32, i32) {
    %c0_i32 = arith.constant 0 : i32
    %c0_i32_0 = arith.constant 0 : i32
    return %arg0, %c0_i32 : i32, i32
  }
  func.func @transform_1(%arg0: i32) -> (i32, i32) {
    %c0_i32 = arith.constant 0 : i32
    %c0_i32_0 = arith.constant 0 : i32
    %c0_i32_1 = arith.constant 0 : i32
    return %c0_i32, %c0_i32_0 : i32, i32
  }
  func.func @transform_2(%arg0: i32) -> (i32, i32) {
    %c0_i32 = arith.constant 0 : i32
    %c0_i32_0 = arith.constant 0 : i32
    %c0_i32_1 = arith.constant 0 : i32
    return %c0_i32, %c0_i32_0 : i32, i32
  }
  func.func @transform_3(%arg0: i32) -> (i32, i32) {
    %c0_i32 = arith.constant 0 : i32
    %c0_i32_0 = arith.constant 0 : i32
    %c0_i32_1 = arith.constant 0 : i32
    return %c0_i32, %c0_i32_0 : i32, i32
  }
  func.func @transform_4(%arg0: i32) -> (i32, i32) {
    %c0_i32 = arith.constant 0 : i32
    %c0_i32_0 = arith.constant 0 : i32
    %c0_i32_1 = arith.constant 0 : i32
    return %c0_i32, %c0_i32_0 : i32, i32
  }
  func.func @transform_5(%arg0: i32) -> (i32, i32) {
    %c0_i32 = arith.constant 0 : i32
    %c0_i32_0 = arith.constant 0 : i32
    return %arg0, %c0_i32 : i32, i32
  }
  func.func @transform_6(%arg0: i32) -> (i32, i32) {
    %c0_i32 = arith.constant 0 : i32
    %c0_i32_0 = arith.constant 0 : i32
    return %arg0, %c0_i32 : i32, i32
  }
}

module attributes {stable_mosaic.version = 11 : i64} {
  func.func @_conv_bn_relu_kernel(%arg0: i32, %arg1: memref<56x448xbf16, #tpu.memory_space<vmem>>, %arg2: memref<448x64xbf16, #tpu.memory_space<vmem>>, %arg3: memref<1x64xf32, #tpu.memory_space<vmem>>, %arg4: memref<56x64xbf16, #tpu.memory_space<vmem>>) attributes {dimension_semantics = [#tpu.dimension_semantics<parallel>], iteration_bounds = array<i64: 2>, scalar_prefetch = 0 : i64, scratch_operands = 0 : i64, tpu.core_type = #tpu.core_type<tc>, window_params = [{transform_indices = @transform_0, window_bounds = array<i64: 56, 448>}, {pipeline_mode = #tpu.pipeline_mode<synchronous>, transform_indices = @transform_1, window_bounds = array<i64: 448, 64>}, {pipeline_mode = #tpu.pipeline_mode<synchronous>, transform_indices = @transform_2, window_bounds = array<i64: 1, 64>}, {transform_indices = @transform_3, window_bounds = array<i64: 56, 64>}]} {
    %c0 = arith.constant 0 : index
    %c0_0 = arith.constant 0 : index
    %0 = vector.load %arg1[%c0, %c0_0] : memref<56x448xbf16, #tpu.memory_space<vmem>>, vector<56x448xbf16>
    %c0_1 = arith.constant 0 : index
    %c0_2 = arith.constant 0 : index
    %1 = vector.load %arg2[%c0_1, %c0_2] : memref<448x64xbf16, #tpu.memory_space<vmem>>, vector<448x64xbf16>
    %cst = arith.constant dense<0.000000e+00> : vector<56x64xf32>
    %2 = tpu.matmul %0, %1, %cst {dimension_numbers = #tpu.dot_dimension_numbers<[1], [0], [0], [1], [0, 0, 1, 1], [], []>} : vector<56x448xbf16>, vector<448x64xbf16>, vector<56x64xf32> -> vector<56x64xf32>
    %c0_3 = arith.constant 0 : index
    %c0_4 = arith.constant 0 : index
    %3 = vector.load %arg3[%c0_3, %c0_4] : memref<1x64xf32, #tpu.memory_space<vmem>>, vector<1x64xf32>
    %4 = vector.broadcast %3 : vector<1x64xf32> to vector<56x64xf32>
    %5 = arith.addf %2, %4 : vector<56x64xf32>
    %cst_5 = arith.constant 0.000000e+00 : f32
    %6 = vector.broadcast %cst_5 : f32 to vector<56x64xf32>
    %7 = arith.maximumf %5, %6 : vector<56x64xf32>
    %8 = arith.truncf %7 : vector<56x64xf32> to vector<56x64xbf16>
    %c0_6 = arith.constant 0 : index
    %c0_7 = arith.constant 0 : index
    %9 = vector.load %arg4[%c0_6, %c0_7] : memref<56x64xbf16, #tpu.memory_space<vmem>>, vector<56x64xbf16>
    tpu.vector_store %arg4[%c0_6, %c0_7], %8 {strides = array<i32>} : memref<56x64xbf16, #tpu.memory_space<vmem>>, vector<56x64xbf16>,
    return
  }
  func.func @transform_0(%arg0: i32) -> (i32, i32) {
    %c0_i32 = arith.constant 0 : i32
    %c0_i32_0 = arith.constant 0 : i32
    return %arg0, %c0_i32 : i32, i32
  }
  func.func @transform_1(%arg0: i32) -> (i32, i32) {
    %c0_i32 = arith.constant 0 : i32
    %c0_i32_0 = arith.constant 0 : i32
    %c0_i32_1 = arith.constant 0 : i32
    return %c0_i32, %c0_i32_0 : i32, i32
  }
  func.func @transform_2(%arg0: i32) -> (i32, i32) {
    %c0_i32 = arith.constant 0 : i32
    %c0_i32_0 = arith.constant 0 : i32
    %c0_i32_1 = arith.constant 0 : i32
    return %c0_i32, %c0_i32_0 : i32, i32
  }
  func.func @transform_3(%arg0: i32) -> (i32, i32) {
    %c0_i32 = arith.constant 0 : i32
    %c0_i32_0 = arith.constant 0 : i32
    return %arg0, %c0_i32 : i32, i32
  }
}

module attributes {stable_mosaic.version = 11 : i64} {
  func.func @_dual_conv_bn_relu_kernel(%arg0: i32, %arg1: memref<32x576xbf16, #tpu.memory_space<vmem>>, %arg2: memref<32x576xbf16, #tpu.memory_space<vmem>>, %arg3: memref<576x96xbf16, #tpu.memory_space<vmem>>, %arg4: memref<576x96xbf16, #tpu.memory_space<vmem>>, %arg5: memref<1x96xf32, #tpu.memory_space<vmem>>, %arg6: memref<1x96xf32, #tpu.memory_space<vmem>>, %arg7: memref<32x192xbf16, #tpu.memory_space<vmem>>) attributes {dimension_semantics = [#tpu.dimension_semantics<parallel>], iteration_bounds = array<i64: 2>, scalar_prefetch = 0 : i64, scratch_operands = 0 : i64, tpu.core_type = #tpu.core_type<tc>, window_params = [{transform_indices = @transform_0, window_bounds = array<i64: 32, 576>}, {transform_indices = @transform_1, window_bounds = array<i64: 32, 576>}, {pipeline_mode = #tpu.pipeline_mode<synchronous>, transform_indices = @transform_2, window_bounds = array<i64: 576, 96>}, {pipeline_mode = #tpu.pipeline_mode<synchronous>, transform_indices = @transform_3, window_bounds = array<i64: 576, 96>}, {pipeline_mode = #tpu.pipeline_mode<synchronous>, transform_indices = @transform_4, window_bounds = array<i64: 1, 96>}, {pipeline_mode = #tpu.pipeline_mode<synchronous>, transform_indices = @transform_5, window_bounds = array<i64: 1, 96>}, {transform_indices = @transform_6, window_bounds = array<i64: 32, 192>}]} {
    %c0 = arith.constant 0 : index
    %c0_0 = arith.constant 0 : index
    %0 = vector.load %arg1[%c0, %c0_0] : memref<32x576xbf16, #tpu.memory_space<vmem>>, vector<32x576xbf16>
    %c0_1 = arith.constant 0 : index
    %c0_2 = arith.constant 0 : index
    %1 = vector.load %arg3[%c0_1, %c0_2] : memref<576x96xbf16, #tpu.memory_space<vmem>>, vector<576x96xbf16>
    %cst = arith.constant dense<0.000000e+00> : vector<32x96xf32>
    %2 = tpu.matmul %0, %1, %cst {dimension_numbers = #tpu.dot_dimension_numbers<[1], [0], [0], [1], [0, 0, 1, 1], [], []>} : vector<32x576xbf16>, vector<576x96xbf16>, vector<32x96xf32> -> vector<32x96xf32>
    %c0_3 = arith.constant 0 : index
    %c0_4 = arith.constant 0 : index
    %3 = vector.load %arg5[%c0_3, %c0_4] : memref<1x96xf32, #tpu.memory_space<vmem>>, vector<1x96xf32>
    %4 = vector.broadcast %3 : vector<1x96xf32> to vector<32x96xf32>
    %5 = arith.addf %2, %4 : vector<32x96xf32>
    %cst_5 = arith.constant 0.000000e+00 : f32
    %6 = vector.broadcast %cst_5 : f32 to vector<32x96xf32>
    %7 = arith.maximumf %5, %6 : vector<32x96xf32>
    %8 = arith.truncf %7 : vector<32x96xf32> to vector<32x96xbf16>
    %c0_6 = arith.constant 0 : index
    %c0_7 = arith.constant 0 : index
    %9 = vector.load %arg7[%c0_6, %c0_7] : memref<32x192xbf16, #tpu.memory_space<vmem>>, vector<32x96xbf16>
    tpu.vector_store %arg7[%c0_6, %c0_7], %8 {strides = array<i32>} : memref<32x192xbf16, #tpu.memory_space<vmem>>, vector<32x96xbf16>,
    %c0_8 = arith.constant 0 : index
    %c0_9 = arith.constant 0 : index
    %10 = vector.load %arg2[%c0_8, %c0_9] : memref<32x576xbf16, #tpu.memory_space<vmem>>, vector<32x576xbf16>
    %c0_10 = arith.constant 0 : index
    %c0_11 = arith.constant 0 : index
    %11 = vector.load %arg4[%c0_10, %c0_11] : memref<576x96xbf16, #tpu.memory_space<vmem>>, vector<576x96xbf16>
    %cst_12 = arith.constant dense<0.000000e+00> : vector<32x96xf32>
    %12 = tpu.matmul %10, %11, %cst_12 {dimension_numbers = #tpu.dot_dimension_numbers<[1], [0], [0], [1], [0, 0, 1, 1], [], []>} : vector<32x576xbf16>, vector<576x96xbf16>, vector<32x96xf32> -> vector<32x96xf32>
    %c0_13 = arith.constant 0 : index
    %c0_14 = arith.constant 0 : index
    %13 = vector.load %arg6[%c0_13, %c0_14] : memref<1x96xf32, #tpu.memory_space<vmem>>, vector<1x96xf32>
    %14 = vector.broadcast %13 : vector<1x96xf32> to vector<32x96xf32>
    %15 = arith.addf %12, %14 : vector<32x96xf32>
    %cst_15 = arith.constant 0.000000e+00 : f32
    %16 = vector.broadcast %cst_15 : f32 to vector<32x96xf32>
    %17 = arith.maximumf %15, %16 : vector<32x96xf32>
    %18 = arith.truncf %17 : vector<32x96xf32> to vector<32x96xbf16>
    %c0_16 = arith.constant 0 : index
    %c96 = arith.constant 96 : index
    %19 = vector.load %arg7[%c0_16, %c96] : memref<32x192xbf16, #tpu.memory_space<vmem>>, vector<32x96xbf16>
    tpu.vector_store %arg7[%c0_16, %c96], %18 {strides = array<i32>} : memref<32x192xbf16, #tpu.memory_space<vmem>>, vector<32x96xbf16>,
    return
  }
  func.func @transform_0(%arg0: i32) -> (i32, i32) {
    %c0_i32 = arith.constant 0 : i32
    %c0_i32_0 = arith.constant 0 : i32
    return %arg0, %c0_i32 : i32, i32
  }
  func.func @transform_1(%arg0: i32) -> (i32, i32) {
    %c0_i32 = arith.constant 0 : i32
    %c0_i32_0 = arith.constant 0 : i32
    return %arg0, %c0_i32 : i32, i32
  }
  func.func @transform_2(%arg0: i32) -> (i32, i32) {
    %c0_i32 = arith.constant 0 : i32
    %c0_i32_0 = arith.constant 0 : i32
    %c0_i32_1 = arith.constant 0 : i32
    return %c0_i32, %c0_i32_0 : i32, i32
  }
  func.func @transform_3(%arg0: i32) -> (i32, i32) {
    %c0_i32 = arith.constant 0 : i32
    %c0_i32_0 = arith.constant 0 : i32
    %c0_i32_1 = arith.constant 0 : i32
    return %c0_i32, %c0_i32_0 : i32, i32
  }
  func.func @transform_4(%arg0: i32) -> (i32, i32) {
    %c0_i32 = arith.constant 0 : i32
    %c0_i32_0 = arith.constant 0 : i32
    %c0_i32_1 = arith.constant 0 : i32
    return %c0_i32, %c0_i32_0 : i32, i32
  }
  func.func @transform_5(%arg0: i32) -> (i32, i32) {
    %c0_i32 = arith.constant 0 : i32
    %c0_i32_0 = arith.constant 0 : i32
    %c0_i32_1 = arith.constant 0 : i32
    return %c0_i32, %c0_i32_0 : i32, i32
  }
  func.func @transform_6(%arg0: i32) -> (i32, i32) {
    %c0_i32 = arith.constant 0 : i32
    %c0_i32_0 = arith.constant 0 : i32
    return %arg0, %c0_i32 : i32, i32
  }
}

module attributes {stable_mosaic.version = 11 : i64} {
  func.func @_conv_pool_concat_kernel(%arg0: i32, %arg1: memref<8x1728xbf16, #tpu.memory_space<vmem>>, %arg2: memref<1728x192xbf16, #tpu.memory_space<vmem>>, %arg3: memref<1x192xf32, #tpu.memory_space<vmem>>, %arg4: memref<8x384xbf16, #tpu.memory_space<vmem>>) attributes {dimension_semantics = [#tpu.dimension_semantics<parallel>], iteration_bounds = array<i64: 1>, scalar_prefetch = 0 : i64, scratch_operands = 0 : i64, tpu.core_type = #tpu.core_type<tc>, window_params = [{transform_indices = @transform_0, window_bounds = array<i64: 8, 1728>}, {pipeline_mode = #tpu.pipeline_mode<synchronous>, transform_indices = @transform_1, window_bounds = array<i64: 1728, 192>}, {pipeline_mode = #tpu.pipeline_mode<synchronous>, transform_indices = @transform_2, window_bounds = array<i64: 1, 192>}, {transform_indices = @transform_3, window_bounds = array<i64: 8, 384>}]} {
    %c0 = arith.constant 0 : index
    %c0_0 = arith.constant 0 : index
    %0 = vector.load %arg1[%c0, %c0_0] : memref<8x1728xbf16, #tpu.memory_space<vmem>>, vector<8x1728xbf16>
    %c0_1 = arith.constant 0 : index
    %c0_2 = arith.constant 0 : index
    %1 = vector.load %arg2[%c0_1, %c0_2] : memref<1728x192xbf16, #tpu.memory_space<vmem>>, vector<1728x192xbf16>
    %cst = arith.constant dense<0.000000e+00> : vector<8x192xf32>
    %2 = tpu.matmul %0, %1, %cst {dimension_numbers = #tpu.dot_dimension_numbers<[1], [0], [0], [1], [0, 0, 1, 1], [], []>} : vector<8x1728xbf16>, vector<1728x192xbf16>, vector<8x192xf32> -> vector<8x192xf32>
    %c0_3 = arith.constant 0 : index
    %c0_4 = arith.constant 0 : index
    %3 = vector.load %arg3[%c0_3, %c0_4] : memref<1x192xf32, #tpu.memory_space<vmem>>, vector<1x192xf32>
    %4 = vector.broadcast %3 : vector<1x192xf32> to vector<8x192xf32>
    %5 = arith.addf %2, %4 : vector<8x192xf32>
    %cst_5 = arith.constant 0.000000e+00 : f32
    %6 = vector.broadcast %cst_5 : f32 to vector<8x192xf32>
    %7 = arith.maximumf %5, %6 : vector<8x192xf32>
    %8 = arith.truncf %7 : vector<8x192xf32> to vector<8x192xbf16>
    %c0_6 = arith.constant 0 : index
    %c0_7 = arith.constant 0 : index
    %9 = vector.load %arg4[%c0_6, %c0_7] : memref<8x384xbf16, #tpu.memory_space<vmem>>, vector<8x192xbf16>
    tpu.vector_store %arg4[%c0_6, %c0_7], %8 {strides = array<i32>} : memref<8x384xbf16, #tpu.memory_space<vmem>>, vector<8x192xbf16>,
    %10 = vector.extract_strided_slice %0 {offsets = [0, 0], sizes = [8, 192], strides = [1, 1]} : vector<8x1728xbf16> to vector<8x192xbf16>
    %11 = vector.extract_strided_slice %0 {offsets = [0, 192], sizes = [8, 192], strides = [1, 1]} : vector<8x1728xbf16> to vector<8x192xbf16>
    %12 = arith.maximumf %10, %11 : vector<8x192xbf16>
    %13 = vector.extract_strided_slice %0 {offsets = [0, 384], sizes = [8, 192], strides = [1, 1]} : vector<8x1728xbf16> to vector<8x192xbf16>
    %14 = arith.maximumf %12, %13 : vector<8x192xbf16>
    %15 = vector.extract_strided_slice %0 {offsets = [0, 576], sizes = [8, 192], strides = [1, 1]} : vector<8x1728xbf16> to vector<8x192xbf16>
    %16 = arith.maximumf %14, %15 : vector<8x192xbf16>
    %17 = vector.extract_strided_slice %0 {offsets = [0, 768], sizes = [8, 192], strides = [1, 1]} : vector<8x1728xbf16> to vector<8x192xbf16>
    %18 = arith.maximumf %16, %17 : vector<8x192xbf16>
    %19 = vector.extract_strided_slice %0 {offsets = [0, 960], sizes = [8, 192], strides = [1, 1]} : vector<8x1728xbf16> to vector<8x192xbf16>
    %20 = arith.maximumf %18, %19 : vector<8x192xbf16>
    %21 = vector.extract_strided_slice %0 {offsets = [0, 1152], sizes = [8, 192], strides = [1, 1]} : vector<8x1728xbf16> to vector<8x192xbf16>
    %22 = arith.maximumf %20, %21 : vector<8x192xbf16>
    %23 = vector.extract_strided_slice %0 {offsets = [0, 1344], sizes = [8, 192], strides = [1, 1]} : vector<8x1728xbf16> to vector<8x192xbf16>
    %24 = arith.maximumf %22, %23 : vector<8x192xbf16>
    %25 = vector.extract_strided_slice %0 {offsets = [0, 1536], sizes = [8, 192], strides = [1, 1]} : vector<8x1728xbf16> to vector<8x192xbf16>
    %26 = arith.maximumf %24, %25 : vector<8x192xbf16>
    %c0_8 = arith.constant 0 : index
    %c192 = arith.constant 192 : index
    %27 = vector.load %arg4[%c0_8, %c192] : memref<8x384xbf16, #tpu.memory_space<vmem>>, vector<8x192xbf16>
    tpu.vector_store %arg4[%c0_8, %c192], %26 {strides = array<i32>} : memref<8x384xbf16, #tpu.memory_space<vmem>>, vector<8x192xbf16>,
    return
  }
  func.func @transform_0(%arg0: i32) -> (i32, i32) {
    %c0_i32 = arith.constant 0 : i32
    %c0_i32_0 = arith.constant 0 : i32
    return %arg0, %c0_i32 : i32, i32
  }
  func.func @transform_1(%arg0: i32) -> (i32, i32) {
    %c0_i32 = arith.constant 0 : i32
    %c0_i32_0 = arith.constant 0 : i32
    %c0_i32_1 = arith.constant 0 : i32
    return %c0_i32, %c0_i32_0 : i32, i32
  }
  func.func @transform_2(%arg0: i32) -> (i32, i32) {
    %c0_i32 = arith.constant 0 : i32
    %c0_i32_0 = arith.constant 0 : i32
    %c0_i32_1 = arith.constant 0 : i32
    return %c0_i32, %c0_i32_0 : i32, i32
  }
  func.func @transform_3(%arg0: i32) -> (i32, i32) {
    %c0_i32 = arith.constant 0 : i32
    %c0_i32_0 = arith.constant 0 : i32
    return %arg0, %c0_i32 : i32, i32
  }
}

</mosaic_0001>

<bundles_post_ra>
// kernel: stem_forward.9
= control target key start
LH: loop header
LB: loop body
LE: loop exit
PB: predicated region body
PF: predicated region fallthrough
CT: control target
= control target key end

     0   :  { %s1310_s12 = smov 0   ;;  %s1312_s13 = smov 0   ;;  %s1657_s0 = inlined_call_operand.vmem [shape: bf16[578,27], index: 0, kind: input, shape index: {}]   ;;  %s1658_s1 = inlined_call_operand.vmem [shape: bf16[27,32], index: 1, kind: input, shape index: {}]   ;;  %s1659_s2 = inlined_call_operand.vmem [shape: f32[1,32], index: 2, kind: input, shape index: {}]   ;;  %s1660_s3 = inlined_call_operand.vmem [shape: bf16[578,32], index: 3, kind: output, shape index: {}]  }
   0x1   :  { %s1314_s14 = smov 0  }
   0x2 LB: > { %s1323_s15 = sadd.s32 4294967295, %s1255_s14   ;;  %s1325_s16 = sadd.s32 1, %s1255_s14   ;;  %s1255_s14 = sphi %s1314_s14, %s1669_s14   ;;  %s1251_s13 = sphi %s1312_s13, %s1668_s13   ;;  %s1247_s12 = sphi %s1310_s12, %s1667_s12  }
   0x3   : > { %s85_s17 = ssub.s32 %s1255_s14, %s1325_s16  ;;  %s88_s18 = sadd.s32 1, %s1251_s13 }
   0x4   : > { %p86_p0 = scmp.eq.s32.totalorder %s85_s17, 0  ;;  %p98_p1 = scmp.ne.s32.totalorder %s1251_s13, %s1247_s12 }
   0x5   : > { %p99_p2 = scmp.eq.s32.totalorder %s1323_s15, 1  ;;  %p965_p3 = scmp.ge.s32.totalorder %s1255_s14, 1 }
   0x6   : > { %s1333_s19 = scalar_select %p86_p0, %s1251_s13, %s88_s18  }
   0x7   : > { %p1335_p4 = por %p99_p2, %p98_p1  ;;  %p146_p5 = scmp.lt.s32.totalorder %s1255_s14, 3 }
   0x9   : > { %p147_p6 = pnand %p965_p3, %p146_p5 }
   0xa   : > { %s1346_s25 = smul.u32 (!%p147_p6), 37, %s1323_s15  ;;  %s170_s6 = sand.u32 (!%p147_p6), 1, %s1247_s12  }
   0xb   : > { %150 = sbr.rel (%p147_p6) target bundleno = 305 (0x131), region = 32 }
   0xc   : > { %p178_p7 = scmp.lt.s32.totalorder (!%p147_p6), %s1346_s25, 72  ;;  %s1110_s9 = smul.u32 (!%p147_p6), 148, %s170_s6 }
   0xe   : > { %s1404_s10 = scalar_lea.vmem (!%p147_p6), [#allocation2], %s1110_s9  }
  0x10   : > { %v1045_v0 = vld [vmem:[%s1658_s1 + $0x8] sm:$0xf]  ;;  %v1100_v1 = vld [vmem:[%s1658_s1 + $0x8] sm:$0x30]  ;;  %vm400_vm0 = vcmask 1044480   ;;  %vm401_vm1 = vcmask 1045504  }
  0x11   : > { %v1046_v2 = vor.u32 %v1100_v1, %v1045_v0  ;;  %v1289_v3 = vmov 65535   ;;  %s179_s26 = scalar_select %p178_p7, %s1346_s25, 72  ;;  %v1099_v7 = vld [vmem:[%s1658_s1] sm:$0xff]  ;;  %vm342_vm2 = vcmask 220160   ;;  %vm584_vm3 = vcmask 257024  }
  0x12   : > { %v402_v4 = vsel %vm400_vm0, 4294967295, %v1289_v3  ;;  %v1400_v29 = vld [vmem:[%s1659_s2] ss:$0 sm:$0xff]  ;;  %s630_s11 = ssub.s32 (%p1335_p4), 73, %s1346_s25  ;;  %s1101_s12 = smul.u32 (%p1335_p4), 148, %s1323_s15 }
  0x13   : > { %v403_v5 = vsel %vm401_vm1, %v402_v4, 0  ;;  %s966_s29 = sshll.u32 %s179_s26, 2  ;;  %p631_p8 = scmp.lt.s32.totalorder (%p1335_p4), %s630_s11, 37 }
  0x14   : > { %v405_v6 = vand.u32 %v1046_v2, %v403_v5  ;;  %s1356_s5 = scalar_lea.vmem %s1657_s0, %s966_s29  ;;  %s1522_s18 = scalar_lea.vmem (%p1335_p4), %s1660_s3, %s1101_s12  }
  0x15   : > { %v1081_v8 = vld [vmem:[%s1356_s5] sm:$0xff]  ;;  %v1086_v9 = vld [vmem:[%s1356_s5 + $0x28] sm:$0xff]  ;;  %v1091_v10 = vld [vmem:[%s1356_s5 + $0x50] sm:$0xff] }
  0x16   : > { %413 = vmatpush.bf16.msra.mxu0 %v405_v6  ;;  %1104 = vmatpush.bf16.msra.mxu1 %v405_v6  ;;  %v1096_v11 = vld [vmem:[%s1356_s5 + $0x78] sm:$0xff]  ;;  %v1082_v12 = vld [vmem:[%s1356_s5 + $0x8] sm:$0xff]  ;;  %v1087_v13 = vld [vmem:[%s1356_s5 + $0x30] sm:$0xff] }
  0x17   : > { %1105 = vmatpush.bf16.msra.mxu2 %v405_v6  ;;  %1106 = vmatpush.bf16.msra.mxu3 %v405_v6  ;;  %v1092_v14 = vld [vmem:[%s1356_s5 + $0x58] sm:$0xff]  ;;  %v1097_v15 = vld [vmem:[%s1356_s5 + $0x80] sm:$0xff]  ;;  %v1083_v16 = vld [vmem:[%s1356_s5 + $0x10] sm:$0xff] }
  0x18   : > { %v1088_v17 = vld [vmem:[%s1356_s5 + $0x38] sm:$0xff]  ;;  %v1093_v18 = vld [vmem:[%s1356_s5 + $0x60] sm:$0xff]  ;;  %v1098_v19 = vld [vmem:[%s1356_s5 + $0x88] sm:$0xff] }
  0x19   : > { %v229_v20 = vld [vmem:[%s1356_s5 + $0x90] sm:$0xf]  ;;  %v1084_v22 = vld [vmem:[%s1356_s5 + $0x18] sm:$0xff]  ;;  %v1089_v23 = vld [vmem:[%s1356_s5 + $0x40] sm:$0xff] }
  0x1a   : > { %414 = vmatpush.bf16.msra.mxu0 %v1099_v7  ;;  %1107 = vmatpush.bf16.msra.mxu1 %v1099_v7  ;;  %v311_v21 = vunpack.c.l.b16 %v229_v20  ;;  %v1094_v24 = vld [vmem:[%s1356_s5 + $0x68] sm:$0xff]  ;;  %v1085_v26 = vld [vmem:[%s1356_s5 + $0x20] sm:$0xff]  ;;  %v1095_v28 = vld [vmem:[%s1356_s5 + $0x70] sm:$0xff] }
  0x1b   : > { %1108 = vmatpush.bf16.msra.mxu2 %v1099_v7  ;;  %1109 = vmatpush.bf16.msra.mxu3 %v1099_v7  ;;  %v1090_v27 = vld [vmem:[%s1356_s5 + $0x48] sm:$0xff] }
  0x1c   : > { %v330_v25 = vpack.c.b16 %v311_v21, %v311_v21 }
  0x1d   : > { %1047 = vmatmul.msk.bf16.vlgmr.msra.gmra.mxu0 %vm342_vm2, %v1081_v8  ;;  %1052 = vmatmul.msk.bf16.vlgmr.msra.gmra.mxu1 %vm342_vm2, %v1086_v9 }
  0x1e   : > { %1057 = vmatmul.msk.bf16.vlgmr.msra.gmra.mxu2 %vm342_vm2, %v1091_v10  ;;  %1062 = vmatmul.msk.bf16.vlgmr.msra.gmra.mxu3 %vm342_vm2, %v1096_v11 }
  0x2d   : > { %1048 = vmatmul.msk.bf16.gmra.mxu0 %vm342_vm2, %v1082_v12  ;;  %1053 = vmatmul.msk.bf16.gmra.mxu1 %vm342_vm2, %v1087_v13 }
  0x2e   : > { %1058 = vmatmul.msk.bf16.gmra.mxu2 %vm342_vm2, %v1092_v14  ;;  %1063 = vmatmul.msk.bf16.gmra.mxu3 %vm342_vm2, %v1097_v15 }
  0x3d   : > { %1049 = vmatmul.msk.bf16.gmra.mxu0 %vm342_vm2, %v1083_v16  ;;  %1054 = vmatmul.msk.bf16.gmra.mxu1 %vm342_vm2, %v1088_v17 }
  0x3e   : > { %1059 = vmatmul.msk.bf16.gmra.mxu2 %vm342_vm2, %v1093_v18  ;;  %1064 = vmatmul.msk.bf16.gmra.mxu3 %vm342_vm2, %v1098_v19 }
  0x4d   : > { %1050 = vmatmul.msk.bf16.gmra.mxu0 %vm342_vm2, %v1084_v22  ;;  %1055 = vmatmul.msk.bf16.gmra.mxu1 %vm342_vm2, %v1089_v23 }
  0x4e   : > { %1060 = vmatmul.msk.bf16.gmra.mxu2 %vm342_vm2, %v1094_v24  ;;  %1065 = vmatmul.msk.bf16.gmra.mxu3 %vm342_vm2, %v330_v25 }
  0x5d   : > { %1051 = vmatmul.msk.bf16.gmra.mxu0 %vm342_vm2, %v1085_v26  ;;  %1056 = vmatmul.msk.bf16.gmra.mxu1 %vm342_vm2, %v1090_v27 }
  0x5e   : > { %1061 = vmatmul.msk.bf16.gmra.mxu2 %vm342_vm2, %v1095_v28 }
  0x9a   : > { %v416_v30 = vpop.f32.mrf.mxu0  ;;  %v441_v31 = vpop.f32.mrf.mxu1 }
  0x9b   : > { %v417_v32 = vadd.f32 %v1400_v29, %v416_v30  ;;  %v442_v33 = vadd.f32 %v1400_v29, %v441_v31 }
  0x9d   : > { %v510_v34 = vmax.f32 %v417_v32, 0.0  ;;  %v520_v35 = vmax.f32 %v442_v33, 0.0 }
  0x9f   : > { %v547_v36 = vpack.c.bf16 %v510_v34, %v510_v34  ;;  %v557_v37 = vpack.c.bf16 %v520_v35, %v520_v35 }
  0xa1   : > { %585 = vst.msk [vmem:[%s1404_s10] sm:$0xf] %vm584_vm3, %v547_v36  ;;  %v466_v38 = vpop.f32.mrf.mxu2  ;;  %v491_v39 = vpop.f32.mrf.mxu3 }
  0xa2   : > { %595 = vst.msk [vmem:[%s1404_s10 + $0x28] sm:$0xf] %vm584_vm3, %v557_v37  ;;  %v467_v40 = vadd.f32 %v1400_v29, %v466_v38  ;;  %v418_v41 = vpop.f32.mrf.mxu0  ;;  %v443_v42 = vpop.f32.mrf.mxu1  ;;  %v492_v43 = vadd.f32 %v1400_v29, %v491_v39 }
  0xa3   : > { %v419_v44 = vadd.f32 %v1400_v29, %v418_v41  ;;  %v444_v45 = vadd.f32 %v1400_v29, %v443_v42 }
  0xa4   : > { %v530_v46 = vmax.f32 %v467_v40, 0.0  ;;  %v540_v47 = vmax.f32 %v492_v43, 0.0 }
  0xa5   : > { %v511_v48 = vmax.f32 %v419_v44, 0.0  ;;  %v521_v49 = vmax.f32 %v444_v45, 0.0 }
  0xa6   : > { %v567_v50 = vpack.c.bf16 %v530_v46, %v530_v46  ;;  %v577_v53 = vpack.c.bf16 %v540_v47, %v540_v47 }
  0xa7   : > { %v548_v51 = vpack.c.bf16 %v511_v48, %v511_v48  ;;  %v558_v52 = vpack.c.bf16 %v521_v49, %v521_v49 }
  0xa8   : > { %605 = vst.msk [vmem:[%s1404_s10 + $0x50] sm:$0xf] %vm584_vm3, %v567_v50 }
  0xa9   : > { %586 = vst.msk [vmem:[%s1404_s10 + $0x4] sm:$0xf] %vm584_vm3, %v548_v51  ;;  %v468_v54 = vpop.f32.mrf.mxu2  ;;  %v493_v55 = vpop.f32.mrf.mxu3 }
  0xaa   : > { %596 = vst.msk [vmem:[%s1404_s10 + $0x2c] sm:$0xf] %vm584_vm3, %v558_v52  ;;  %v469_v56 = vadd.f32 %v1400_v29, %v468_v54  ;;  %v421_v57 = vpop.f32.mrf.mxu0  ;;  %v446_v58 = vpop.f32.mrf.mxu1  ;;  %v494_v59 = vadd.f32 %v1400_v29, %v493_v55 }
  0xab   : > { %v422_v60 = vadd.f32 %v1400_v29, %v421_v57  ;;  %v447_v61 = vadd.f32 %v1400_v29, %v446_v58  ;;  %615 = vst.msk [vmem:[%s1404_s10 + $0x78] sm:$0xf] %vm584_vm3, %v577_v53 }
  0xac   : > { %v531_v62 = vmax.f32 %v469_v56, 0.0  ;;  %v541_v63 = vmax.f32 %v494_v59, 0.0 }
  0xad   : > { %v512_v0 = vmax.f32 %v422_v60, 0.0  ;;  %v522_v1 = vmax.f32 %v447_v61, 0.0 }
  0xae   : > { %v568_v2 = vpack.c.bf16 %v531_v62, %v531_v62  ;;  %v578_v5 = vpack.c.bf16 %v541_v63, %v541_v63 }
  0xaf   : > { %v549_v3 = vpack.c.bf16 %v512_v0, %v512_v0  ;;  %v559_v4 = vpack.c.bf16 %v522_v1, %v522_v1 }
  0xb0   : > { %606 = vst.msk [vmem:[%s1404_s10 + $0x54] sm:$0xf] %vm584_vm3, %v568_v2 }
  0xb1   : > { %587 = vst.msk [vmem:[%s1404_s10 + $0x8] sm:$0xf] %vm584_vm3, %v549_v3  ;;  %v471_v6 = vpop.f32.mrf.mxu2  ;;  %v496_v7 = vpop.f32.mrf.mxu3 }
  0xb2   : > { %597 = vst.msk [vmem:[%s1404_s10 + $0x30] sm:$0xf] %vm584_vm3, %v559_v4  ;;  %v472_v8 = vadd.f32 %v1400_v29, %v471_v6  ;;  %v423_v9 = vpop.f32.mrf.mxu0  ;;  %v448_v10 = vpop.f32.mrf.mxu1  ;;  %v497_v11 = vadd.f32 %v1400_v29, %v496_v7 }
  0xb3   : > { %v424_v12 = vadd.f32 %v1400_v29, %v423_v9  ;;  %v449_v13 = vadd.f32 %v1400_v29, %v448_v10  ;;  %616 = vst.msk [vmem:[%s1404_s10 + $0x7c] sm:$0xf] %vm584_vm3, %v578_v5 }
  0xb4   : > { %v532_v14 = vmax.f32 %v472_v8, 0.0  ;;  %v542_v15 = vmax.f32 %v497_v11, 0.0 }
  0xb5   : > { %v513_v16 = vmax.f32 %v424_v12, 0.0  ;;  %v523_v17 = vmax.f32 %v449_v13, 0.0 }
  0xb6   : > { %v569_v18 = vpack.c.bf16 %v532_v14, %v532_v14  ;;  %v579_v21 = vpack.c.bf16 %v542_v15, %v542_v15 }
  0xb7   : > { %v550_v19 = vpack.c.bf16 %v513_v16, %v513_v16  ;;  %v560_v20 = vpack.c.bf16 %v523_v17, %v523_v17 }
  0xb8   : > { %607 = vst.msk [vmem:[%s1404_s10 + $0x58] sm:$0xf] %vm584_vm3, %v569_v18 }
  0xb9   : > { %588 = vst.msk [vmem:[%s1404_s10 + $0xc] sm:$0xf] %vm584_vm3, %v550_v19  ;;  %v473_v22 = vpop.f32.mrf.mxu2  ;;  %v498_v23 = vpop.f32.mrf.mxu3 }
  0xba   : > { %598 = vst.msk [vmem:[%s1404_s10 + $0x34] sm:$0xf] %vm584_vm3, %v560_v20  ;;  %v474_v24 = vadd.f32 %v1400_v29, %v473_v22  ;;  %v426_v25 = vpop.f32.mrf.mxu0  ;;  %v451_v26 = vpop.f32.mrf.mxu1  ;;  %v499_v27 = vadd.f32 %v1400_v29, %v498_v23 }
  0xbb   : > { %v427_v28 = vadd.f32 %v1400_v29, %v426_v25  ;;  %v452_v30 = vadd.f32 %v1400_v29, %v451_v26  ;;  %617 = vst.msk [vmem:[%s1404_s10 + $0x80] sm:$0xf] %vm584_vm3, %v579_v21 }
  0xbc   : > { %v533_v31 = vmax.f32 %v474_v24, 0.0  ;;  %v543_v32 = vmax.f32 %v499_v27, 0.0 }
  0xbd   : > { %v514_v33 = vmax.f32 %v427_v28, 0.0  ;;  %v524_v34 = vmax.f32 %v452_v30, 0.0 }
  0xbe   : > { %v570_v35 = vpack.c.bf16 %v533_v31, %v533_v31  ;;  %v580_v38 = vpack.c.bf16 %v543_v32, %v543_v32 }
  0xbf   : > { %v551_v36 = vpack.c.bf16 %v514_v33, %v514_v33  ;;  %v561_v37 = vpack.c.bf16 %v524_v34, %v524_v34 }
  0xc0   : > { %608 = vst.msk [vmem:[%s1404_s10 + $0x5c] sm:$0xf] %vm584_vm3, %v570_v35 }
  0xc1   : > { %589 = vst.msk [vmem:[%s1404_s10 + $0x10] sm:$0xf] %vm584_vm3, %v551_v36  ;;  %v476_v39 = vpop.f32.mrf.mxu2  ;;  %v501_v40 = vpop.f32.mrf.mxu3 }
  0xc2   : > { %599 = vst.msk [vmem:[%s1404_s10 + $0x38] sm:$0xf] %vm584_vm3, %v561_v37  ;;  %v477_v41 = vadd.f32 %v1400_v29, %v476_v39  ;;  %v428_v42 = vpop.f32.mrf.mxu0  ;;  %v453_v43 = vpop.f32.mrf.mxu1  ;;  %v502_v44 = vadd.f32 %v1400_v29, %v501_v40 }
  0xc3   : > { %v429_v45 = vadd.f32 %v1400_v29, %v428_v42  ;;  %v454_v46 = vadd.f32 %v1400_v29, %v453_v43  ;;  %618 = vst.msk [vmem:[%s1404_s10 + $0x84] sm:$0xf] %vm584_vm3, %v580_v38 }
  0xc4   : > { %v534_v47 = vmax.f32 %v477_v41, 0.0  ;;  %v544_v48 = vmax.f32 %v502_v44, 0.0 }
  0xc5   : > { %v515_v49 = vmax.f32 %v429_v45, 0.0  ;;  %v525_v50 = vmax.f32 %v454_v46, 0.0 }
  0xc6   : > { %v571_v51 = vpack.c.bf16 %v534_v47, %v534_v47  ;;  %v581_v54 = vpack.c.bf16 %v544_v48, %v544_v48 }
  0xc7   : > { %v552_v52 = vpack.c.bf16 %v515_v49, %v515_v49  ;;  %v562_v53 = vpack.c.bf16 %v525_v50, %v525_v50 }
  0xc8   : > { %609 = vst.msk [vmem:[%s1404_s10 + $0x60] sm:$0xf] %vm584_vm3, %v571_v51 }
  0xc9   : > { %590 = vst.msk [vmem:[%s1404_s10 + $0x14] sm:$0xf] %vm584_vm3, %v552_v52  ;;  %v478_v55 = vpop.f32.mrf.mxu2  ;;  %v503_v56 = vpop.f32.mrf.mxu3 }
  0xca   : > { %600 = vst.msk [vmem:[%s1404_s10 + $0x3c] sm:$0xf] %vm584_vm3, %v562_v53  ;;  %v479_v57 = vadd.f32 %v1400_v29, %v478_v55  ;;  %v431_v58 = vpop.f32.mrf.mxu0  ;;  %v456_v59 = vpop.f32.mrf.mxu1  ;;  %v504_v60 = vadd.f32 %v1400_v29, %v503_v56 }
  0xcb   : > { %v432_v61 = vadd.f32 %v1400_v29, %v431_v58  ;;  %v457_v62 = vadd.f32 %v1400_v29, %v456_v59  ;;  %619 = vst.msk [vmem:[%s1404_s10 + $0x88] sm:$0xf] %vm584_vm3, %v581_v54 }
  0xcc   : > { %v535_v63 = vmax.f32 %v479_v57, 0.0  ;;  %v545_v0 = vmax.f32 %v504_v60, 0.0 }
  0xcd   : > { %v516_v1 = vmax.f32 %v432_v61, 0.0  ;;  %v526_v2 = vmax.f32 %v457_v62, 0.0 }
  0xce   : > { %v572_v3 = vpack.c.bf16 %v535_v63, %v535_v63  ;;  %v582_v6 = vpack.c.bf16 %v545_v0, %v545_v0 }
  0xcf   : > { %v553_v4 = vpack.c.bf16 %v516_v1, %v516_v1  ;;  %v563_v5 = vpack.c.bf16 %v526_v2, %v526_v2 }
  0xd0   : > { %610 = vst.msk [vmem:[%s1404_s10 + $0x64] sm:$0xf] %vm584_vm3, %v572_v3 }
  0xd1   : > { %591 = vst.msk [vmem:[%s1404_s10 + $0x18] sm:$0xf] %vm584_vm3, %v553_v4  ;;  %v481_v7 = vpop.f32.mrf.mxu2  ;;  %v506_v8 = vpop.f32.mrf.mxu3 }
  0xd2   : > { %601 = vst.msk [vmem:[%s1404_s10 + $0x40] sm:$0xf] %vm584_vm3, %v563_v5  ;;  %v482_v9 = vadd.f32 %v1400_v29, %v481_v7  ;;  %v433_v10 = vpop.f32.mrf.mxu0  ;;  %v458_v11 = vpop.f32.mrf.mxu1  ;;  %v507_v12 = vadd.f32 %v1400_v29, %v506_v8 }
  0xd3   : > { %v434_v13 = vadd.f32 %v1400_v29, %v433_v10  ;;  %v459_v14 = vadd.f32 %v1400_v29, %v458_v11  ;;  %620 = vst.msk [vmem:[%s1404_s10 + $0x8c] sm:$0xf] %vm584_vm3, %v582_v6 }
  0xd4   : > { %v536_v15 = vmax.f32 %v482_v9, 0.0  ;;  %v546_v16 = vmax.f32 %v507_v12, 0.0 }
  0xd5   : > { %v517_v17 = vmax.f32 %v434_v13, 0.0  ;;  %v527_v18 = vmax.f32 %v459_v14, 0.0 }
  0xd6   : > { %v573_v19 = vpack.c.bf16 %v536_v15, %v536_v15  ;;  %v583_v22 = vpack.c.bf16 %v546_v16, %v546_v16 }
  0xd7   : > { %v554_v20 = vpack.c.bf16 %v517_v17, %v517_v17  ;;  %v564_v21 = vpack.c.bf16 %v527_v18, %v527_v18 }
  0xd8   : > { %611 = vst.msk [vmem:[%s1404_s10 + $0x68] sm:$0xf] %vm584_vm3, %v573_v19 }
  0xd9   : > { %592 = vst.msk [vmem:[%s1404_s10 + $0x1c] sm:$0xf] %vm584_vm3, %v554_v20  ;;  %v483_v23 = vpop.f32.mrf.mxu2  ;;  %v508_v24 = vpop.f32.mrf.mxu3 }
  0xda   : > { %602 = vst.msk [vmem:[%s1404_s10 + $0x44] sm:$0xf] %vm584_vm3, %v564_v21  ;;  %v484_v25 = vadd.f32 %v1400_v29, %v483_v23  ;;  %v436_v26 = vpop.f32.mrf.mxu0  ;;  %v461_v27 = vpop.f32.mrf.mxu1 }
  0xdb   : > { %v437_v28 = vadd.f32 %v1400_v29, %v436_v26  ;;  %v462_v30 = vadd.f32 %v1400_v29, %v461_v27  ;;  %621 = vst.msk [vmem:[%s1404_s10 + $0x90] sm:$0xf] %vm584_vm3, %v583_v22 }
  0xdc   : > { %v537_v31 = vmax.f32 %v484_v25, 0.0 }
  0xdd   : > { %v518_v32 = vmax.f32 %v437_v28, 0.0  ;;  %v528_v33 = vmax.f32 %v462_v30, 0.0 }
  0xde   : > { %v574_v34 = vpack.c.bf16 %v537_v31, %v537_v31 }
  0xdf   : > { %v555_v35 = vpack.c.bf16 %v518_v32, %v518_v32  ;;  %v565_v36 = vpack.c.bf16 %v528_v33, %v528_v33 }
  0xe0   : > { %612 = vst.msk [vmem:[%s1404_s10 + $0x6c] sm:$0xf] %vm584_vm3, %v574_v34 }
  0xe1   : > { %593 = vst.msk [vmem:[%s1404_s10 + $0x20] sm:$0xf] %vm584_vm3, %v555_v35  ;;  %v486_v37 = vpop.f32.mrf.mxu2 }
  0xe2   : > { %603 = vst.msk [vmem:[%s1404_s10 + $0x48] sm:$0xf] %vm584_vm3, %v565_v36  ;;  %v487_v38 = vadd.f32 %v1400_v29, %v486_v37  ;;  %v438_v39 = vpop.f32.mrf.mxu0  ;;  %v463_v40 = vpop.f32.mrf.mxu1 }
  0xe3   : > { %v439_v41 = vadd.f32 %v1400_v29, %v438_v39  ;;  %v464_v42 = vadd.f32 %v1400_v29, %v463_v40 }
  0xe4   : > { %v538_v43 = vmax.f32 %v487_v38, 0.0 }
  0xe5   : > { %v519_v44 = vmax.f32 %v439_v41, 0.0  ;;  %v529_v45 = vmax.f32 %v464_v42, 0.0 }
  0xe6   : > { %v575_v46 = vpack.c.bf16 %v538_v43, %v538_v43 }
  0xe7   : > { %v556_v47 = vpack.c.bf16 %v519_v44, %v519_v44  ;;  %v566_v48 = vpack.c.bf16 %v529_v45, %v529_v45 }
  0xe8   : > { %613 = vst.msk [vmem:[%s1404_s10 + $0x70] sm:$0xf] %vm584_vm3, %v575_v46 }
  0xe9   : > { %594 = vst.msk [vmem:[%s1404_s10 + $0x24] sm:$0xf] %vm584_vm3, %v556_v47  ;;  %v488_v49 = vpop.f32.mrf.mxu2 }
  0xea   : > { %604 = vst.msk [vmem:[%s1404_s10 + $0x4c] sm:$0xf] %vm584_vm3, %v566_v48  ;;  %v489_v50 = vadd.f32 %v1400_v29, %v488_v49 }
  0xec   : > { %v539_v51 = vmax.f32 %v489_v50, 0.0  ;;  %628 = sbr.rel (!%p1335_p4) target bundleno = 305 (0x131), region = 36 }
  0xee   : > { %v576_v52 = vpack.c.bf16 %v539_v51, %v539_v51 }
  0xf0   : > { %614 = vst.msk [vmem:[%s1404_s10 + $0x74] sm:$0xf] %vm584_vm3, %v576_v52 }
  0xf1   : > { %s1671_s11 = smov (!%p631_p8, %s630_s11), 37 }
  0xf2   : > { %s1066_s21 = sshll.u32 %s1671_s11, 2 }
  0xf3   : > { %p1069_p9 = scmp.eq.s32.totalorder %s1066_s21, 0 }
  0xf4   : > { %s1528_s22 = sshrl.u32 (!%p1069_p9), %s1671_s11, 5 }
  0xf5   : > { %639 = sbr.rel (%p1069_p9) target bundleno = 305 (0x131), region = 40  ;;  %p1070_p10 = scmp.le.s32.totalorder (!%p1069_p9), %s1528_s22, 0 }
  0xfa   : > { %918 = sbr.rel (%p1070_p10) target bundleno = 288 (0x120), region = 112  ;;  %s1662_s15 = smov (!%p1070_p10), %s1522_s18 }
  0xfb   : > { %s1663_s20 = smov (!%p1070_p10), %s1404_s10  ;;  %s1537_s23 = smov (!%p1070_p10), 0  }
  0xfc   : > { %s1539_s24 = smov (!%p1070_p10), 0  }
  0xff LB: >> { %v656_v29 = vld [vmem:[%s1263_s20] sm:$0xf]  ;;  %v658_v53 = vld [vmem:[%s1263_s20 + $0x4] sm:$0xf]  ;;  %v660_v54 = vld [vmem:[%s1263_s20 + $0x8] sm:$0xf]  ;;  %s1271_s24 = sphi %s1539_s24, %s650_s24   ;;  %s1267_s23 = sphi %s1537_s23, %s1666_s23   ;;  %s1263_s20 = sphi %s1663_s20, %s1665_s20   ;;  %s1259_s15 = sphi %s1662_s15, %s1664_s15  }
 0x100   : >> { %657 = vst [vmem:[%s1259_s15] sm:$0xf] %v656_v29  ;;  %v662_v55 = vld [vmem:[%s1263_s20 + $0xc] sm:$0xf]  ;;  %v664_v56 = vld [vmem:[%s1263_s20 + $0x10] sm:$0xf]  ;;  %s720_s25 = sadd.s32 1, %s1267_s23 }
 0x101   : >> { %659 = vst [vmem:[%s1259_s15 + $0x4] sm:$0xf] %v658_v53  ;;  %v666_v57 = vld [vmem:[%s1263_s20 + $0x14] sm:$0xf]  ;;  %v668_v58 = vld [vmem:[%s1263_s20 + $0x18] sm:$0xf]  ;;  %p721_p11 = scmp.ge.s32.totalorder %s720_s25, %s1528_s22 }
 0x102   : >> { %661 = vst [vmem:[%s1259_s15 + $0x8] sm:$0xf] %v660_v54  ;;  %v670_v59 = vld [vmem:[%s1263_s20 + $0x1c] sm:$0xf]  ;;  %v672_v60 = vld [vmem:[%s1263_s20 + $0x20] sm:$0xf] }
 0x103   : >> { %663 = vst [vmem:[%s1259_s15 + $0xc] sm:$0xf] %v662_v55  ;;  %v674_v61 = vld [vmem:[%s1263_s20 + $0x24] sm:$0xf]  ;;  %v676_v62 = vld [vmem:[%s1263_s20 + $0x28] sm:$0xf] }
 0x104   : >> { %665 = vst [vmem:[%s1259_s15 + $0x10] sm:$0xf] %v664_v56  ;;  %v678_v63 = vld [vmem:[%s1263_s20 + $0x2c] sm:$0xf]  ;;  %v680_v0 = vld [vmem:[%s1263_s20 + $0x30] sm:$0xf] }
 0x105   : >> { %667 = vst [vmem:[%s1259_s15 + $0x14] sm:$0xf] %v666_v57  ;;  %v682_v1 = vld [vmem:[%s1263_s20 + $0x34] sm:$0xf]  ;;  %v684_v2 = vld [vmem:[%s1263_s20 + $0x38] sm:$0xf] }
 0x106   : >> { %669 = vst [vmem:[%s1259_s15 + $0x18] sm:$0xf] %v668_v58  ;;  %v686_v3 = vld [vmem:[%s1263_s20 + $0x3c] sm:$0xf]  ;;  %v688_v4 = vld [vmem:[%s1263_s20 + $0x40] sm:$0xf] }
 0x107   : >> { %671 = vst [vmem:[%s1259_s15 + $0x1c] sm:$0xf] %v670_v59  ;;  %v690_v5 = vld [vmem:[%s1263_s20 + $0x44] sm:$0xf]  ;;  %s1673_s25 = smov (%p721_p11, %s720_s25), 0  ;;  %s650_s24 = sadd.s32 1, %s1271_s24  }
 0x108   : >> { %673 = vst [vmem:[%s1259_s15 + $0x20] sm:$0xf] %v672_v60  ;;  %v692_v6 = vld [vmem:[%s1263_s20 + $0x48] sm:$0xf]  ;;  %v694_v7 = vld [vmem:[%s1263_s20 + $0x4c] sm:$0xf]  ;;  %p649_p12 = scmp.ge.s32.totalorder %s650_s24, %s1528_s22  ;;  %s1666_s23 = smov %s1673_s25 }
 0x109   : >> { %675 = vst [vmem:[%s1259_s15 + $0x24] sm:$0xf] %v674_v61  ;;  %s1071_s26 = sshll.u32 %s1673_s25, 7  ;;  %v696_v8 = vld [vmem:[%s1263_s20 + $0x50] sm:$0xf] }
 0x10a   : >> { %677 = vst [vmem:[%s1259_s15 + $0x28] sm:$0xf] %v676_v62  ;;  %s1598_s27 = scalar_lea.vmem %s1404_s10, %s1071_s26 [#allocation2]   ;;  %s726_s28 = scalar_lea.vmem %s1522_s18, %s1071_s26   ;;  %v698_v9 = vld [vmem:[%s1263_s20 + $0x54] sm:$0xf]  ;;  %v700_v10 = vld [vmem:[%s1263_s20 + $0x58] sm:$0xf] }
 0x10b   : >> { %679 = vst [vmem:[%s1259_s15 + $0x2c] sm:$0xf] %v678_v63  ;;  %v702_v11 = vld [vmem:[%s1263_s20 + $0x5c] sm:$0xf]  ;;  %v704_v12 = vld [vmem:[%s1263_s20 + $0x60] sm:$0xf] }
 0x10c   : >> { %681 = vst [vmem:[%s1259_s15 + $0x30] sm:$0xf] %v680_v0  ;;  %v706_v13 = vld [vmem:[%s1263_s20 + $0x64] sm:$0xf]  ;;  %v708_v14 = vld [vmem:[%s1263_s20 + $0x68] sm:$0xf] }
 0x10d   : >> { %683 = vst [vmem:[%s1259_s15 + $0x34] sm:$0xf] %v682_v1  ;;  %v710_v15 = vld [vmem:[%s1263_s20 + $0x6c] sm:$0xf]  ;;  %v712_v16 = vld [vmem:[%s1263_s20 + $0x70] sm:$0xf] }
 0x10e   : >> { %685 = vst [vmem:[%s1259_s15 + $0x38] sm:$0xf] %v684_v2  ;;  %v714_v17 = vld [vmem:[%s1263_s20 + $0x74] sm:$0xf]  ;;  %v716_v18 = vld [vmem:[%s1263_s20 + $0x78] sm:$0xf] }
 0x10f   : >> { %687 = vst [vmem:[%s1259_s15 + $0x3c] sm:$0xf] %v686_v3  ;;  %v718_v19 = vld [vmem:[%s1263_s20 + $0x7c] sm:$0xf]  ;;  %s1665_s20 = smov %s1598_s27 }
 0x110   : >> { %689 = vst [vmem:[%s1259_s15 + $0x40] sm:$0xf] %v688_v4 }
 0x111   : >> { %691 = vst [vmem:[%s1259_s15 + $0x44] sm:$0xf] %v690_v5 }
 0x112   : >> { %693 = vst [vmem:[%s1259_s15 + $0x48] sm:$0xf] %v692_v6 }
 0x113   : >> { %695 = vst [vmem:[%s1259_s15 + $0x4c] sm:$0xf] %v694_v7 }
 0x114   : >> { %697 = vst [vmem:[%s1259_s15 + $0x50] sm:$0xf] %v696_v8 }
 0x115   : >> { %699 = vst [vmem:[%s1259_s15 + $0x54] sm:$0xf] %v698_v9 }
 0x116   : >> { %701 = vst [vmem:[%s1259_s15 + $0x58] sm:$0xf] %v700_v10 }
 0x117   : >> { %703 = vst [vmem:[%s1259_s15 + $0x5c] sm:$0xf] %v702_v11 }
 0x118   : >> { %705 = vst [vmem:[%s1259_s15 + $0x60] sm:$0xf] %v704_v12 }
 0x119   : >> { %707 = vst [vmem:[%s1259_s15 + $0x64] sm:$0xf] %v706_v13 }
 0x11a   : >> { %709 = vst [vmem:[%s1259_s15 + $0x68] sm:$0xf] %v708_v14 }
 0x11b   : >> { %711 = vst [vmem:[%s1259_s15 + $0x6c] sm:$0xf] %v710_v15  ;;  %652 = sbr.rel (!%p649_p12) target bundleno = 255 (0xff), region = 118 }
 0x11c   : >> { %713 = vst [vmem:[%s1259_s15 + $0x70] sm:$0xf] %v712_v16 }
 0x11d   : >> { %715 = vst [vmem:[%s1259_s15 + $0x74] sm:$0xf] %v714_v17 }
 0x11e   : >> { %717 = vst [vmem:[%s1259_s15 + $0x78] sm:$0xf] %v716_v18 }
 0x11f   : >> { %719 = vst [vmem:[%s1259_s15 + $0x7c] sm:$0xf] %v718_v19  ;;  %s1664_s15 = smov %s726_s28 }
 0x120 PF: > { %s1639_s29 = sand.u32 31, %s1671_s11   ;;  %s1102_s30 = sshll.u32 %s1528_s22, 7 }
 0x121   : > { %s731_s4 = scalar_lea.vmem %s1404_s10, %s1102_s30 [#allocation2]   ;;  %s733_s5 = scalar_lea.vmem %s1522_s18, %s1102_s30  }
 0x122   : > { %p1076_p13 = scmp.le.s32.totalorder %s1639_s29, 0 }
 0x123   : > { %s1273_s6 = smov (!%p1076_p13), %s733_s5   ;;  %s1277_s7 = smov (!%p1076_p13), %s731_s4  }
 0x124   : > { %932 = sbr.rel (%p1076_p13) target bundleno = 305 (0x131), region = 123  ;;  %s1281_s8 = smov (!%p1076_p13), 0  }
 0x125   : > { %s1285_s9 = smov (!%p1076_p13), 0  }
 0x129 LB: >> { %v743_v20 = vld [vmem:[%s1279_s7] sm:$0xf]  ;;  %s745_s11 = sadd.s32 1, %s1283_s8  ;;  %s737_s9 = sadd.s32 1, %s1287_s9   ;;  %s1287_s9 = sphi %s1285_s9, %s737_s9   ;;  %s1283_s8 = sphi %s1281_s8, %s1282_s8   ;;  %s1279_s7 = sphi %s1277_s7, %s750_s7   ;;  %s1275_s6 = sphi %s1273_s6, %s751_s6  }
 0x12a   : >> { %744 = vst [vmem:[%s1275_s6] sm:$0xf] %v743_v20  ;;  %p746_p0 = scmp.ge.s32.totalorder %s745_s11, %s1639_s29  ;;  %p736_p1 = scmp.ge.s32.totalorder %s737_s9, %s1639_s29 }
 0x12c   : >> { %s1675_s11 = smov (%p746_p0, %s745_s11), 0  ;;  %739 = sbr.rel (!%p736_p1) target bundleno = 297 (0x129), region = 129 }
 0x12d   : >> { %s1077_s10 = sshll.u32 %s1675_s11, 2  ;;  %s1282_s8 = smov %s1675_s11  }
 0x12e   : >> { %s750_s7 = scalar_lea.vmem %s731_s4, %s1077_s10 [#allocation2]   ;;  %s751_s6 = scalar_lea.vmem %s733_s5, %s1077_s10  }
 0x131 PF: > { %p10_p2 = scmp.ge.s32.totalorder %s1325_s16, 4   ;;  %s1667_s12 = smov %s1251_s13 }
 0x132   : > { %s1668_s13 = smov %s1333_s19  ;;  %s1669_s14 = smov %s1325_s16 }
 0x133   :  { %12 = sbr.rel (!%p10_p2) target bundleno = 2 (0x2), region = 140 }

// kernel: stem_forward.10
= control target key start
LH: loop header
LB: loop body
LE: loop exit
PB: predicated region body
PF: predicated region fallthrough
CT: control target
= control target key end

     0   :  { %s1897_s12 = smov 0   ;;  %s1899_s13 = smov 0   ;;  %s2367_s0 = inlined_call_operand.vmem [shape: bf16[450,288], index: 0, kind: input, shape index: {}]   ;;  %s2368_s1 = inlined_call_operand.vmem [shape: bf16[288,32], index: 1, kind: input, shape index: {}]   ;;  %s2369_s2 = inlined_call_operand.vmem [shape: f32[1,32], index: 2, kind: input, shape index: {}]   ;;  %s2370_s3 = inlined_call_operand.vmem [shape: bf16[450,32], index: 3, kind: output, shape index: {}]  }
   0x1   :  { %s1901_s14 = smov 0  }
   0x2 LB: > { %s1910_s15 = sadd.s32 4294967295, %s1843_s14   ;;  %s1912_s16 = sadd.s32 1, %s1843_s14   ;;  %s1843_s14 = sphi %s1901_s14, %s2379_s14   ;;  %s1839_s13 = sphi %s1899_s13, %s2378_s13   ;;  %s1835_s12 = sphi %s1897_s12, %s2377_s12  }
   0x3   : > { %s85_s17 = ssub.s32 %s1843_s14, %s1912_s16  ;;  %s88_s18 = sadd.s32 1, %s1839_s13 }
   0x4   : > { %p86_p0 = scmp.eq.s32.totalorder %s85_s17, 0  ;;  %p98_p1 = scmp.ne.s32.totalorder %s1839_s13, %s1835_s12 }
   0x5   : > { %p99_p2 = scmp.eq.s32.totalorder %s1910_s15, 1  ;;  %p1343_p3 = scmp.ge.s32.totalorder %s1843_s14, 1 }
   0x6   : > { %s1920_s19 = scalar_select %p86_p0, %s1839_s13, %s88_s18  }
   0x7   : > { %p1922_p4 = por %p99_p2, %p98_p1  ;;  %p149_p5 = scmp.lt.s32.totalorder %s1843_s14, 3 }
   0x9   : > { %p150_p6 = pnand %p1343_p3, %p149_p5 }
   0xa   : > { %s1940_s27 = smul.u32 (!%p150_p6), 29, %s1910_s15  ;;  %s175_s25 = sand.u32 (!%p150_p6), 1, %s1835_s12  }
   0xb   : > { %153 = sbr.rel (%p150_p6) target bundleno = 441 (0x1b9), region = 32 }
   0xc   : > { %p184_p7 = scmp.lt.s32.totalorder (!%p150_p6), %s1940_s27, 56  ;;  %s1691_s26 = smul.u32 (!%p150_p6), 116, %s175_s25 }
   0xe   : > { %s2101_s12 = scalar_lea.vmem (!%p150_p6), [#allocation2], %s1691_s26  }
  0x10   : > { %v1661_v0 = vld [vmem:[%s2368_s1 + $0x38] sm:$0xff]  ;;  %v1937_v2 = vld [vmem:[%s2368_s1 + $0x88] sm:$0xff]  ;;  %v1660_v3 = vld [vmem:[%s2368_s1 + $0x30] sm:$0xff]  ;;  %s185_s7 = scalar_select %p184_p7, %s1940_s27, 56  ;;  %vm627_vm0 = vcmask 261120   ;;  %vm980_vm1 = vcmask 257024  }
  0x11   : > { %v1932_v1 = vld [vmem:[%s2368_s1 + $0x78] sm:$0xff]  ;;  %673 = vmatpush.bf16.msra.mxu0 %v1661_v0  ;;  %1673 = vmatpush.bf16.msra.mxu3 %v1661_v0  ;;  %v1668_v4 = vld [vmem:[%s2368_s1 + $0x70] sm:$0xff]  ;;  %v1954_v5 = vld [vmem:[%s2368_s1 + $0x80] sm:$0xff]  ;;  %s1672_s28 = smul.u32 (%p1922_p4), 116, %s1910_s15 }
  0x12   : > { %756 = vmatpush.bf16.msra.mxu1 %v1932_v1  ;;  %845 = vmatpush.bf16.msra.mxu2 %v1937_v2  ;;  %v1659_v6 = vld [vmem:[%s2368_s1 + $0x28] sm:$0xff]  ;;  %s1692_s10 = smul.u32 12, %s185_s7  ;;  %v1658_v11 = vld [vmem:[%s2368_s1 + $0x20] sm:$0xff]  ;;  %v1657_v13 = vld [vmem:[%s2368_s1 + $0x18] sm:$0xff] }
  0x13   : > { %v1667_v7 = vld [vmem:[%s2368_s1 + $0x68] sm:$0xff]  ;;  %v1666_v12 = vld [vmem:[%s2368_s1 + $0x60] sm:$0xff]  ;;  %v1665_v14 = vld [vmem:[%s2368_s1 + $0x58] sm:$0xff]  ;;  %s2242_s4 = scalar_lea.vmem (%p1922_p4), %s2370_s3, %s1672_s28  }
  0x14   : > { %s1967_s21 = scalar_lea.vmem %s2367_s0, %s1692_s10  ;;  %v1656_v15 = vld [vmem:[%s2368_s1 + $0x10] sm:$0xff]  ;;  %v1655_v19 = vld [vmem:[%s2368_s1 + $0x8] sm:$0xff]  ;;  %v1654_v22 = vld [vmem:[%s2368_s1] sm:$0xff] }
  0x15   : > { %674 = vmatpush.bf16.msra.mxu0 %v1660_v3  ;;  %1674 = vmatpush.bf16.msra.mxu3 %v1660_v3  ;;  %v1355_v8 = vld [vmem:[%s1967_s21 + $0x8] sm:$0xf]  ;;  %v1614_v9 = vld [vmem:[%s1967_s21 + $0x10] sm:$0xf0]  ;;  %v1367_v17 = vld [vmem:[%s1967_s21 + $0x20] sm:$0xf] }
  0x16   : > { %757 = vmatpush.bf16.msra.mxu1 %v1668_v4  ;;  %846 = vmatpush.bf16.msra.mxu2 %v1954_v5  ;;  %v1356_v10 = vor.u32 %v1614_v9, %v1355_v8  ;;  %v1664_v16 = vld [vmem:[%s2368_s1 + $0x50] sm:$0xff]  ;;  %v1617_v18 = vld [vmem:[%s1967_s21 + $0x28] sm:$0xf0]  ;;  %v1347_v23 = vld [vmem:[%s1967_s21] sm:$0xf] }
  0x17   : > { %v1663_v20 = vld [vmem:[%s2368_s1 + $0x48] sm:$0xff]  ;;  %v1368_v21 = vor.u32 %v1617_v18, %v1367_v17  ;;  %v1646_v26 = vld [vmem:[%s1967_s21 + $0x110] sm:$0xf0]  ;;  %v1662_v27 = vld [vmem:[%s2368_s1 + $0x40] sm:$0xff] }
  0x18   : > { %v1613_v24 = vld [vmem:[%s1967_s21 + $0x8] sm:$0xf0]  ;;  %v1479_v25 = vld [vmem:[%s1967_s21 + $0x108] sm:$0xf]  ;;  %v1612_v28 = vld [vmem:[%s1967_s21 + $0x4] sm:$0xf] }
  0x19   : > { %675 = vmatpush.bf16.msra.mxu0 %v1659_v6  ;;  %1675 = vmatpush.bf16.msra.mxu3 %v1659_v6  ;;  %v1349_v29 = vld [vmem:[%s1967_s21 + $0xc] sm:$0xf0]  ;;  %v1348_v30 = vor.u32 %v1613_v24, %v1347_v23  ;;  %v1480_v31 = vor.u32 %v1646_v26, %v1479_v25  ;;  %v1379_v33 = vld [vmem:[%s1967_s21 + $0x38] sm:$0xf]  ;;  %v1620_v34 = vld [vmem:[%s1967_s21 + $0x40] sm:$0xf0] }
  0x1a   : > { %758 = vmatpush.bf16.msra.mxu1 %v1667_v7  ;;  %1585 = vmatmul.msk.bf16.vlgmr.msra.gmra.mxu2 %vm627_vm0, %v1356_v10  ;;  %v1352_v32 = vor.u32 %v1612_v28, %v1349_v29  ;;  %v1380_v35 = vor.u32 %v1620_v34, %v1379_v33  ;;  %v1359_v36 = vld [vmem:[%s1967_s21 + $0x18] sm:$0xf]  ;;  %v1616_v37 = vld [vmem:[%s1967_s21 + $0x20] sm:$0xf0]  ;;  %v1491_v38 = vld [vmem:[%s1967_s21 + $0x120] sm:$0xf] }
  0x1b   : > { %v1649_v39 = vld [vmem:[%s1967_s21 + $0x128] sm:$0xf0]  ;;  %v1615_v40 = vld [vmem:[%s1967_s21 + $0x1c] sm:$0xf]  ;;  %v1361_v41 = vld [vmem:[%s1967_s21 + $0x24] sm:$0xf0]  ;;  %v1360_v42 = vor.u32 %v1616_v37, %v1359_v36 }
  0x1c   : > { %v1492_v43 = vor.u32 %v1649_v39, %v1491_v38  ;;  %v1364_v44 = vor.u32 %v1615_v40, %v1361_v41  ;;  %v1391_v45 = vld [vmem:[%s1967_s21 + $0x50] sm:$0xf]  ;;  %v1623_v46 = vld [vmem:[%s1967_s21 + $0x58] sm:$0xf0]  ;;  %v1503_v50 = vld [vmem:[%s1967_s21 + $0x138] sm:$0xf] }
  0x1d   : > { %676 = vmatpush.bf16.msra.mxu0 %v1658_v11  ;;  %1676 = vmatpush.bf16.msra.mxu3 %v1658_v11  ;;  %v1392_v47 = vor.u32 %v1623_v46, %v1391_v45  ;;  %v1371_v48 = vld [vmem:[%s1967_s21 + $0x30] sm:$0xf]  ;;  %v1619_v49 = vld [vmem:[%s1967_s21 + $0x38] sm:$0xf0]  ;;  %v1652_v51 = vld [vmem:[%s1967_s21 + $0x140] sm:$0xf0] }
  0x1e   : > { %759 = vmatpush.bf16.msra.mxu1 %v1666_v12  ;;  %v1618_v52 = vld [vmem:[%s1967_s21 + $0x34] sm:$0xf]  ;;  %v1373_v53 = vld [vmem:[%s1967_s21 + $0x3c] sm:$0xf0]  ;;  %v1372_v54 = vor.u32 %v1619_v49, %v1371_v48  ;;  %v1504_v55 = vor.u32 %v1652_v51, %v1503_v50  ;;  %v1403_v57 = vld [vmem:[%s1967_s21 + $0x68] sm:$0xf] }
  0x1f   : > { %v1376_v56 = vor.u32 %v1618_v52, %v1373_v53  ;;  %v1626_v58 = vld [vmem:[%s1967_s21 + $0x70] sm:$0xf0]  ;;  %v1383_v62 = vld [vmem:[%s1967_s21 + $0x48] sm:$0xf]  ;;  %v1621_v0 = vld [vmem:[%s1967_s21 + $0x4c] sm:$0xf] }
  0x20   : > { %v2035_v59 = vld [vmem:[%s1967_s21 + $0x150] sm:$0xff]  ;;  %v1404_v60 = vor.u32 %v1626_v58, %v1403_v57  ;;  %v1629_v6 = vld [vmem:[%s1967_s21 + $0x88] sm:$0xf0]  ;;  %v1395_v8 = vld [vmem:[%s1967_s21 + $0x60] sm:$0xf] }
  0x21   : > { %677 = vmatpush.bf16.msra.mxu0 %v1657_v13  ;;  %1677 = vmatpush.bf16.msra.mxu3 %v1657_v13  ;;  %v441_v61 = vunpack.c.l.b16 %v2035_v59  ;;  %v1622_v63 = vld [vmem:[%s1967_s21 + $0x50] sm:$0xf0]  ;;  %v1625_v9 = vld [vmem:[%s1967_s21 + $0x68] sm:$0xf0]  ;;  %v1481_v11 = vld [vmem:[%s1967_s21 + $0x114] sm:$0xf0] }
  0x22   : > { %760 = vmatpush.bf16.msra.mxu1 %v1665_v14  ;;  %v1645_v10 = vld [vmem:[%s1967_s21 + $0x10c] sm:$0xf]  ;;  %v1397_v13 = vld [vmem:[%s1967_s21 + $0x6c] sm:$0xf0]  ;;  %v1427_v17 = vld [vmem:[%s1967_s21 + $0x98] sm:$0xf] }
  0x23   : > { %v486_v3 = vpack.c.b16 %v441_v61, %v441_v61  ;;  %v1632_v18 = vld [vmem:[%s1967_s21 + $0xa0] sm:$0xf0]  ;;  %v1493_v23 = vld [vmem:[%s1967_s21 + $0x12c] sm:$0xf0]  ;;  %v1627_v24 = vld [vmem:[%s1967_s21 + $0x7c] sm:$0xf] }
  0x24   : > { %v1409_v25 = vld [vmem:[%s1967_s21 + $0x84] sm:$0xf0]  ;;  %v1439_v29 = vld [vmem:[%s1967_s21 + $0xb0] sm:$0xf]  ;;  %v1631_v33 = vld [vmem:[%s1967_s21 + $0x98] sm:$0xf0] }
  0x25   : > { %678 = vmatpush.bf16.msra.mxu0 %v1656_v15  ;;  %1678 = vmatpush.bf16.msra.mxu3 %v1656_v15  ;;  %v1484_v15 = vor.u32 %v1645_v10, %v1481_v11  ;;  %v1412_v28 = vor.u32 %v1627_v24, %v1409_v25  ;;  %v1651_v34 = vld [vmem:[%s1967_s21 + $0x13c] sm:$0xf]  ;;  %v1630_v36 = vld [vmem:[%s1967_s21 + $0x94] sm:$0xf]  ;;  %v1421_v37 = vld [vmem:[%s1967_s21 + $0x9c] sm:$0xf0] }
  0x26   : > { %761 = vmatpush.bf16.msra.mxu1 %v1664_v16  ;;  %v1424_v40 = vor.u32 %v1630_v36, %v1421_v37  ;;  %v1451_v41 = vld [vmem:[%s1967_s21 + $0xc8] sm:$0xf]  ;;  %v1634_v46 = vld [vmem:[%s1967_s21 + $0xb0] sm:$0xf0]  ;;  %v1433_v48 = vld [vmem:[%s1967_s21 + $0xb4] sm:$0xf0] }
  0x27   : > { %v1431_v45 = vld [vmem:[%s1967_s21 + $0xa8] sm:$0xf]  ;;  %v1463_v53 = vld [vmem:[%s1967_s21 + $0xe0] sm:$0xf]  ;;  %v1637_v58 = vld [vmem:[%s1967_s21 + $0xc8] sm:$0xf0] }
  0x28   : > { %v1432_v49 = vor.u32 %v1634_v46, %v1431_v45  ;;  %v1443_v57 = vld [vmem:[%s1967_s21 + $0xc0] sm:$0xf]  ;;  %v1475_v11 = vld [vmem:[%s1967_s21 + $0xf8] sm:$0xf]  ;;  %v1639_v25 = vld [vmem:[%s1967_s21 + $0xdc] sm:$0xf] }
  0x29   : > { %679 = vmatpush.bf16.msra.mxu0 %v1655_v19  ;;  %1679 = vmatpush.bf16.msra.mxu3 %v1655_v19  ;;  %v1428_v19 = vor.u32 %v1632_v18, %v1427_v17  ;;  %v2087_v61 = vld [vmem:[%s2369_s2] ss:$0 sm:$0xff] }
  0x2a   : > { %762 = vmatpush.bf16.msra.mxu1 %v1663_v20  ;;  %1586 = vmatmul.msk.bf16.gmra.mxu2 %vm627_vm0, %v1368_v21  ;;  %v1628_v21 = vld [vmem:[%s1967_s21 + $0x80] sm:$0xf0] }
  0x2d   : > { %680 = vmatpush.bf16.msra.mxu0 %v1654_v22  ;;  %1680 = vmatpush.bf16.msra.mxu3 %v1654_v22  ;;  %v1648_v22 = vld [vmem:[%s1967_s21 + $0x124] sm:$0xf] }
  0x2e   : > { %763 = vmatpush.bf16.msra.mxu1 %v1662_v27 }
  0x30   : > { %681 = vmatmul.bf16.vlgmr.msra.gmra.mxu0 %v1348_v30  ;;  %736 = vmatmul.bf16.vlgmr.msra.gmra.mxu3 %v1480_v31  ;;  %v1635_v30 = vld [vmem:[%s1967_s21 + $0xb8] sm:$0xf0] }
  0x31   : > { %1681 = vmatpush.bf16.msrb.mxu3 %v1932_v1  ;;  %764 = vmatmul.bf16.vlgmr.msra.gmra.mxu1 %v1352_v32  ;;  %v1385_v1 = vld [vmem:[%s1967_s21 + $0x54] sm:$0xf0]  ;;  %v1440_v31 = vor.u32 %v1635_v30, %v1439_v29  ;;  %v1419_v32 = vld [vmem:[%s1967_s21 + $0x90] sm:$0xf] }
  0x32   : > { %v1420_v38 = vor.u32 %v1631_v33, %v1419_v32 }
  0x35   : > { %1682 = vmatpush.bf16.msrb.mxu3 %v1668_v4  ;;  %v1388_v4 = vor.u32 %v1621_v0, %v1385_v1  ;;  %v1444_v0 = vor.u32 %v1637_v58, %v1443_v57 }
  0x39   : > { %1683 = vmatpush.bf16.msrb.mxu3 %v1667_v7 }
  0x3a   : > { %1587 = vmatmul.msk.bf16.gmra.mxu2 %vm627_vm0, %v1380_v35  ;;  %v1505_v35 = vld [vmem:[%s1967_s21 + $0x144] sm:$0xf0] }
  0x3b   : > { %v1508_v39 = vor.u32 %v1651_v34, %v1505_v35 }
  0x3d   : > { %1684 = vmatpush.bf16.msrb.mxu3 %v1666_v12  ;;  %v1624_v12 = vld [vmem:[%s1967_s21 + $0x64] sm:$0xf] }
  0x40   : > { %686 = vmatmul.bf16.gmra.mxu0 %v1360_v42  ;;  %741 = vmatmul.bf16.gmra.mxu3 %v1492_v43  ;;  %v1638_v42 = vld [vmem:[%s1967_s21 + $0xd0] sm:$0xf0] }
  0x41   : > { %1685 = vmatpush.bf16.msrb.mxu3 %v1665_v14  ;;  %769 = vmatmul.bf16.gmra.mxu1 %v1364_v44  ;;  %v1396_v14 = vor.u32 %v1625_v9, %v1395_v8  ;;  %v1452_v43 = vor.u32 %v1638_v42, %v1451_v41  ;;  %v442_v44 = vunpack.c.h.b16 %v2035_v59  ;;  %v1511_v59 = vld [vmem:[%s1967_s21 + $0x140] sm:$0xf]  ;;  %v1487_v41 = vld [vmem:[%s1967_s21 + $0x110] sm:$0xf]  ;;  %v1647_v42 = vld [vmem:[%s1967_s21 + $0x118] sm:$0xf0] }
  0x43   : > { %v487_v50 = vpack.c.b16 %v442_v44, %v442_v44 }
  0x45   : > { %1686 = vmatpush.bf16.msrb.mxu3 %v1664_v16  ;;  %v1400_v16 = vor.u32 %v1624_v12, %v1397_v13  ;;  %v1644_v12 = vld [vmem:[%s1967_s21 + $0x100] sm:$0xf0] }
  0x49   : > { %1687 = vmatpush.bf16.msrb.mxu3 %v1663_v20  ;;  %v1407_v20 = vld [vmem:[%s1967_s21 + $0x78] sm:$0xf] }
  0x4a   : > { %1588 = vmatmul.msk.bf16.gmra.mxu2 %vm627_vm0, %v1392_v47  ;;  %v1408_v26 = vor.u32 %v1628_v21, %v1407_v20  ;;  %v1633_v47 = vld [vmem:[%s1967_s21 + $0xac] sm:$0xf] }
  0x4b   : > { %v1436_v51 = vor.u32 %v1633_v47, %v1433_v48  ;;  %v1488_v48 = vor.u32 %v1647_v42, %v1487_v41 }
  0x4d   : > { %1688 = vmatpush.bf16.msrb.mxu3 %v1662_v27  ;;  %v1496_v27 = vor.u32 %v1648_v22, %v1493_v23  ;;  %v1455_v22 = vld [vmem:[%s1967_s21 + $0xd8] sm:$0xf]  ;;  %v1640_v23 = vld [vmem:[%s1967_s21 + $0xe0] sm:$0xf0] }
  0x4e   : > { %v1456_v29 = vor.u32 %v1640_v23, %v1455_v22 }
  0x50   : > { %691 = vmatmul.bf16.gmra.mxu0 %v1372_v54  ;;  %746 = vmatmul.bf16.gmra.mxu3 %v1504_v55  ;;  %v1641_v54 = vld [vmem:[%s1967_s21 + $0xe8] sm:$0xf0] }
  0x51   : > { %1689 = vmatpush.bf16.msra.mxu3 %v1937_v2  ;;  %774 = vmatmul.bf16.gmra.mxu1 %v1376_v56  ;;  %v1384_v2 = vor.u32 %v1622_v63, %v1383_v62  ;;  %v1464_v56 = vor.u32 %v1641_v54, %v1463_v53  ;;  %v1636_v62 = vld [vmem:[%s1967_s21 + $0xc4] sm:$0xf]  ;;  %v1445_v63 = vld [vmem:[%s1967_s21 + $0xcc] sm:$0xf0]  ;;  %v1642_v53 = vld [vmem:[%s1967_s21 + $0xf4] sm:$0xf] }
  0x52   : > { %v1469_v54 = vld [vmem:[%s1967_s21 + $0xfc] sm:$0xf0] }
  0x55   : > { %1690 = vmatpush.bf16.msra.mxu3 %v1954_v5  ;;  %v1415_v5 = vld [vmem:[%s1967_s21 + $0x80] sm:$0xf] }
  0x56   : > { %v1416_v7 = vor.u32 %v1629_v6, %v1415_v5 }
  0x5a   : > { %1589 = vmatmul.msk.bf16.gmra.mxu2 %vm627_vm0, %v1404_v60  ;;  %v1653_v60 = vld [vmem:[%s1967_s21 + $0x148] sm:$0xf0] }
  0x5b   : > { %v1512_v1 = vor.u32 %v1653_v60, %v1511_v59  ;;  %v1472_v59 = vor.u32 %v1642_v53, %v1469_v54 }
  0x60   : > { %696 = vmatmul.bf16.gmra.mxu0 %v1384_v2  ;;  %751 = vmatmul.bf16.gmra.mxu3 %v486_v3  ;;  %v1448_v3 = vor.u32 %v1636_v62, %v1445_v63 }
  0x61   : > { %779 = vmatmul.bf16.gmra.mxu1 %v1388_v4 }
  0x6a   : > { %1590 = vmatmul.msk.bf16.gmra.mxu2 %vm627_vm0, %v1416_v7 }
  0x70   : > { %701 = vmatmul.bf16.gmra.mxu0 %v1396_v14  ;;  %819 = vmatmul.bf16.vlgmr.msrb.gmra.mxu3 %v1484_v15  ;;  %v258_v14 = vld [vmem:[%s1967_s21 + $0x158] sm:$0xf] }
  0x71   : > { %784 = vmatmul.bf16.gmra.mxu1 %v1400_v16  ;;  %v443_v21 = vunpack.c.l.b16 %v258_v14 }
  0x73   : > { %v488_v30 = vpack.c.b16 %v443_v21, %v443_v21 }
  0x7a   : > { %1591 = vmatmul.msk.bf16.gmra.mxu2 %vm627_vm0, %v1428_v19  ;;  %v1476_v19 = vor.u32 %v1644_v12, %v1475_v11 }
  0x80   : > { %706 = vmatmul.bf16.gmra.mxu0 %v1408_v26  ;;  %824 = vmatmul.bf16.gmra.mxu3 %v1496_v27  ;;  %v1457_v26 = vld [vmem:[%s1967_s21 + $0xe4] sm:$0xf0] }
  0x81   : > { %789 = vmatmul.bf16.gmra.mxu1 %v1412_v28  ;;  %v1460_v32 = vor.u32 %v1639_v25, %v1457_v26 }
  0x8a   : > { %1592 = vmatmul.msk.bf16.gmra.mxu2 %vm627_vm0, %v1440_v31 }
  0x90   : > { %711 = vmatmul.bf16.gmra.mxu0 %v1420_v38  ;;  %829 = vmatmul.bf16.gmra.mxu3 %v1508_v39 }
  0x91   : > { %794 = vmatmul.bf16.gmra.mxu1 %v1424_v40 }
  0x9a   : > { %1593 = vmatmul.msk.bf16.gmra.mxu2 %vm627_vm0, %v1452_v43 }
  0x9d   : > { %v848_v52 = vpop.f32.mrf.mxu2 }
  0xa0   : > { %716 = vmatmul.bf16.gmra.mxu0 %v1432_v49  ;;  %834 = vmatmul.bf16.gmra.mxu3 %v487_v50  ;;  %v1467_v50 = vld [vmem:[%s1967_s21 + $0xf0] sm:$0xf] }
  0xa1   : > { %799 = vmatmul.bf16.gmra.mxu1 %v1436_v51  ;;  %v1643_v51 = vld [vmem:[%s1967_s21 + $0xf8] sm:$0xf0] }
  0xa2   : > { %v1468_v57 = vor.u32 %v1643_v51, %v1467_v50 }
  0xa5   : > { %v850_v55 = vpop.f32.mrf.mxu2 }
  0xaa   : > { %1594 = vmatmul.msk.bf16.gmra.mxu2 %vm627_vm0, %v1464_v56 }
  0xad   : > { %v682_v2 = vpop.f32.mrf.mxu0  ;;  %v853_v5 = vpop.f32.mrf.mxu2 }
  0xae   : > { %v683_v4 = vadd.f32 %v2087_v61, %v682_v2  ;;  %v765_v6 = vpop.f32.mrf.mxu1 }
  0xb0   : > { %v766_v7 = vadd.f32 %v765_v6, %v683_v4  ;;  %721 = vmatmul.bf16.gmra.mxu0 %v1444_v0  ;;  %1598 = vmatmul.msk.bf16.vlgmr.msra.gmra.mxu3 %vm627_vm0, %v1512_v1  ;;  %v1650_v6 = vld [vmem:[%s1967_s21 + $0x130] sm:$0xf0] }
  0xb1   : > { %804 = vmatmul.bf16.gmra.mxu1 %v1448_v3 }
  0xb2   : > { %v849_v8 = vadd.f32 %v848_v52, %v766_v7 }
  0xb3   : > { %v2095_v9 = vpop.f32.mrf.mxu3 }
  0xb4   : > { %v922_v10 = vmax.f32 %v849_v8, 0.0 }
  0xb5   : > { %v684_v13 = vpop.f32.mrf.mxu0  ;;  %v855_v17 = vpop.f32.mrf.mxu2 }
  0xb6   : > { %v951_v15 = vpack.c.bf16 %v922_v10, %v922_v10  ;;  %v685_v16 = vadd.f32 %v2087_v61, %v684_v13  ;;  %v767_v18 = vpop.f32.mrf.mxu1 }
  0xb8   : > { %981 = vst.msk [vmem:[%s2101_s12] sm:$0xf] %vm980_vm1, %v951_v15  ;;  %v768_v20 = vadd.f32 %v767_v18, %v685_v16 }
  0xba   : > { %v851_v24 = vadd.f32 %v850_v55, %v768_v20  ;;  %1595 = vmatmul.msk.bf16.gmra.mxu2 %vm627_vm0, %v1476_v19 }
  0xbb   : > { %v2110_v27 = vpop.f32.mrf.mxu3 }
  0xbc   : > { %v923_v28 = vmax.f32 %v851_v24, 0.0 }
  0xbd   : > { %v687_v31 = vpop.f32.mrf.mxu0  ;;  %v858_v35 = vpop.f32.mrf.mxu2 }
  0xbe   : > { %v952_v33 = vpack.c.bf16 %v923_v28, %v923_v28  ;;  %v688_v34 = vadd.f32 %v2087_v61, %v687_v31  ;;  %v770_v36 = vpop.f32.mrf.mxu1 }
  0xc0   : > { %982 = vst.msk [vmem:[%s2101_s12 + $0x4] sm:$0xf] %vm980_vm1, %v952_v33  ;;  %v771_v37 = vadd.f32 %v770_v36, %v688_v34  ;;  %726 = vmatmul.bf16.gmra.mxu0 %v1456_v29  ;;  %1599 = vmatmul.msk.bf16.gmra.mxu3 %vm627_vm0, %v488_v30 }
  0xc1   : > { %809 = vmatmul.bf16.gmra.mxu1 %v1460_v32 }
  0xc2   : > { %v854_v38 = vadd.f32 %v853_v5, %v771_v37  ;;  %v1499_v5 = vld [vmem:[%s1967_s21 + $0x128] sm:$0xf]  ;;  %s1018_s21 = ssub.s32 (%p1922_p4), 57, %s1940_s27 }
  0xc3   : > { %v2116_v39 = vpop.f32.mrf.mxu3  ;;  %v1500_v13 = vor.u32 %v1650_v6, %v1499_v5  ;;  %p1019_p8 = scmp.lt.s32.totalorder (%p1922_p4), %s1018_s21, 29 }
  0xc4   : > { %v924_v40 = vmax.f32 %v854_v38, 0.0 }
  0xc5   : > { %v689_v43 = vpop.f32.mrf.mxu0  ;;  %v860_v46 = vpop.f32.mrf.mxu2 }
  0xc6   : > { %v953_v44 = vpack.c.bf16 %v924_v40, %v924_v40  ;;  %v690_v45 = vadd.f32 %v2087_v61, %v689_v43  ;;  %v772_v47 = vpop.f32.mrf.mxu1 }
  0xc8   : > { %983 = vst.msk [vmem:[%s2101_s12 + $0x8] sm:$0xf] %vm980_vm1, %v953_v44  ;;  %v773_v49 = vadd.f32 %v772_v47, %v690_v45  ;;  %v738_v44 = vadd.f32 %v2087_v61, %v2095_v9 }
  0xca   : > { %v856_v52 = vadd.f32 %v855_v17, %v773_v49  ;;  %1596 = vmatmul.msk.bf16.gmra.mxu2 %vm627_vm0, %v1488_v48 }
  0xcb   : > { %v2128_v55 = vpop.f32.mrf.mxu3 }
  0xcc   : > { %v925_v56 = vmax.f32 %v856_v52, 0.0 }
  0xcd   : > { %v692_v58 = vpop.f32.mrf.mxu0  ;;  %v863_v63 = vpop.f32.mrf.mxu2 }
  0xce   : > { %v954_v60 = vpack.c.bf16 %v925_v56, %v925_v56  ;;  %v693_v62 = vadd.f32 %v2087_v61, %v692_v58  ;;  %v775_v0 = vpop.f32.mrf.mxu1  ;;  %v740_v56 = vadd.f32 %v2087_v61, %v2110_v27 }
  0xd0   : > { %984 = vst.msk [vmem:[%s2101_s12 + $0xc] sm:$0xf] %vm980_vm1, %v954_v60  ;;  %v776_v1 = vadd.f32 %v775_v0, %v693_v62  ;;  %731 = vmatmul.bf16.gmra.mxu0 %v1468_v57 }
  0xd1   : > { %814 = vmatmul.bf16.gmra.mxu1 %v1472_v59 }
  0xd2   : > { %v859_v2 = vadd.f32 %v858_v35, %v776_v1 }
  0xd3   : > { %v2133_v3 = vpop.f32.mrf.mxu3 }
  0xd4   : > { %v926_v4 = vmax.f32 %v859_v2, 0.0 }
  0xd5   : > { %v694_v7 = vpop.f32.mrf.mxu0  ;;  %v865_v11 = vpop.f32.mrf.mxu2 }
  0xd6   : > { %v955_v8 = vpack.c.bf16 %v926_v4, %v926_v4  ;;  %v695_v10 = vadd.f32 %v2087_v61, %v694_v7  ;;  %v777_v12 = vpop.f32.mrf.mxu1  ;;  %v743_v4 = vadd.f32 %v2087_v61, %v2116_v39 }
  0xd8   : > { %985 = vst.msk [vmem:[%s2101_s12 + $0x10] sm:$0xf] %vm980_vm1, %v955_v8  ;;  %v778_v14 = vadd.f32 %v777_v12, %v695_v10 }
  0xda   : > { %v861_v15 = vadd.f32 %v860_v46, %v778_v14  ;;  %1597 = vmatmul.msk.bf16.gmra.mxu2 %vm627_vm0, %v1500_v13 }
  0xdb   : > { %v2141_v16 = vpop.f32.mrf.mxu3 }
  0xdc   : > { %v927_v17 = vmax.f32 %v861_v15, 0.0  ;;  %v745_v15 = vadd.f32 %v2087_v61, %v2128_v55 }
  0xdd   : > { %v697_v18 = vpop.f32.mrf.mxu0  ;;  %v868_v21 = vpop.f32.mrf.mxu2 }
  0xde   : > { %v956_v19 = vpack.c.bf16 %v927_v17, %v927_v17  ;;  %v698_v20 = vadd.f32 %v2087_v61, %v697_v18  ;;  %v780_v22 = vpop.f32.mrf.mxu1 }
  0xe0   : > { %986 = vst.msk [vmem:[%s2101_s12 + $0x14] sm:$0xf] %vm980_vm1, %v956_v19  ;;  %v781_v23 = vadd.f32 %v780_v22, %v698_v20 }
  0xe2   : > { %v864_v24 = vadd.f32 %v863_v63, %v781_v23 }
  0xe3   : > { %v2146_v25 = vpop.f32.mrf.mxu3 }
  0xe4   : > { %v928_v26 = vmax.f32 %v864_v24, 0.0 }
  0xe5   : > { %v699_v28 = vpop.f32.mrf.mxu0  ;;  %v870_v31 = vpop.f32.mrf.mxu2 }
  0xe6   : > { %v957_v29 = vpack.c.bf16 %v928_v26, %v928_v26  ;;  %v700_v30 = vadd.f32 %v2087_v61, %v699_v28  ;;  %v782_v32 = vpop.f32.mrf.mxu1 }
  0xe8   : > { %987 = vst.msk [vmem:[%s2101_s12 + $0x18] sm:$0xf] %vm980_vm1, %v957_v29  ;;  %v783_v33 = vadd.f32 %v782_v32, %v700_v30 }
  0xea   : > { %v866_v34 = vadd.f32 %v865_v11, %v783_v33 }
  0xeb   : > { %v754_v35 = vpop.f32.mrf.mxu3 }
  0xec   : > { %v929_v36 = vmax.f32 %v866_v34, 0.0 }
  0xed   : > { %v702_v37 = vpop.f32.mrf.mxu0  ;;  %v873_v41 = vpop.f32.mrf.mxu2 }
  0xee   : > { %v958_v38 = vpack.c.bf16 %v929_v36, %v929_v36  ;;  %v703_v40 = vadd.f32 %v2087_v61, %v702_v37  ;;  %v785_v42 = vpop.f32.mrf.mxu1 }
  0xf0   : > { %988 = vst.msk [vmem:[%s2101_s12 + $0x1c] sm:$0xf] %vm980_vm1, %v958_v38  ;;  %v786_v43 = vadd.f32 %v785_v42, %v703_v40 }
  0xf2   : > { %v869_v45 = vadd.f32 %v868_v21, %v786_v43 }
  0xf3   : > { %v820_v46 = vpop.f32.mrf.mxu3 }
  0xf4   : > { %v930_v47 = vmax.f32 %v869_v45, 0.0  ;;  %v2156_v48 = vadd.f32 %v820_v46, %v738_v44 }
  0xf5   : > { %v704_v49 = vpop.f32.mrf.mxu0  ;;  %v875_v52 = vpop.f32.mrf.mxu2 }
  0xf6   : > { %v959_v50 = vpack.c.bf16 %v930_v47, %v930_v47  ;;  %v705_v51 = vadd.f32 %v2087_v61, %v704_v49  ;;  %v787_v53 = vpop.f32.mrf.mxu1 }
  0xf8   : > { %989 = vst.msk [vmem:[%s2101_s12 + $0x20] sm:$0xf] %vm980_vm1, %v959_v50  ;;  %v788_v54 = vadd.f32 %v787_v53, %v705_v51 }
  0xfa   : > { %v871_v57 = vadd.f32 %v870_v31, %v788_v54 }
  0xfb   : > { %v822_v9 = vpop.f32.mrf.mxu3 }
  0xfc   : > { %v931_v58 = vmax.f32 %v871_v57, 0.0  ;;  %v2163_v59 = vadd.f32 %v822_v9, %v740_v56 }
  0xfd   : > { %v707_v60 = vpop.f32.mrf.mxu0  ;;  %v878_v0 = vpop.f32.mrf.mxu2 }
  0xfe   : > { %v960_v62 = vpack.c.bf16 %v931_v58, %v931_v58  ;;  %v708_v63 = vadd.f32 %v2087_v61, %v707_v60  ;;  %v790_v1 = vpop.f32.mrf.mxu1 }
 0x100   : > { %990 = vst.msk [vmem:[%s2101_s12 + $0x24] sm:$0xf] %vm980_vm1, %v960_v62  ;;  %v791_v2 = vadd.f32 %v790_v1, %v708_v63 }
 0x102   : > { %v874_v5 = vadd.f32 %v873_v41, %v791_v2  ;;  %v748_v2 = vadd.f32 %v2087_v61, %v2133_v3 }
 0x103   : > { %v825_v27 = vpop.f32.mrf.mxu3 }
 0x104   : > { %v932_v6 = vmax.f32 %v874_v5, 0.0  ;;  %v2170_v7 = vadd.f32 %v825_v27, %v743_v4 }
 0x105   : > { %v709_v8 = vpop.f32.mrf.mxu0  ;;  %v880_v12 = vpop.f32.mrf.mxu2 }
 0x106   : > { %v961_v10 = vpack.c.bf16 %v932_v6, %v932_v6  ;;  %v710_v11 = vadd.f32 %v2087_v61, %v709_v8  ;;  %v792_v13 = vpop.f32.mrf.mxu1 }
 0x108   : > { %991 = vst.msk [vmem:[%s2101_s12 + $0x28] sm:$0xf] %vm980_vm1, %v961_v10  ;;  %v793_v14 = vadd.f32 %v792_v13, %v710_v11 }
 0x10a   : > { %v876_v17 = vadd.f32 %v875_v52, %v793_v14 }
 0x10b   : > { %v827_v39 = vpop.f32.mrf.mxu3 }
 0x10c   : > { %v933_v18 = vmax.f32 %v876_v17, 0.0  ;;  %v2177_v19 = vadd.f32 %v827_v39, %v745_v15  ;;  %v750_v39 = vadd.f32 %v2087_v61, %v2141_v16 }
 0x10d   : > { %v712_v20 = vpop.f32.mrf.mxu0  ;;  %v883_v23 = vpop.f32.mrf.mxu2 }
 0x10e   : > { %v962_v21 = vpack.c.bf16 %v933_v18, %v933_v18  ;;  %v713_v22 = vadd.f32 %v2087_v61, %v712_v20  ;;  %v795_v24 = vpop.f32.mrf.mxu1 }
 0x110   : > { %992 = vst.msk [vmem:[%s2101_s12 + $0x2c] sm:$0xf] %vm980_vm1, %v962_v21  ;;  %v796_v26 = vadd.f32 %v795_v24, %v713_v22 }
 0x112   : > { %v879_v28 = vadd.f32 %v878_v0, %v796_v26 }
 0x113   : > { %v830_v29 = vpop.f32.mrf.mxu3 }
 0x114   : > { %v934_v30 = vmax.f32 %v879_v28, 0.0  ;;  %v831_v5 = vadd.f32 %v830_v29, %v748_v2 }
 0x115   : > { %v714_v55 = vpop.f32.mrf.mxu0  ;;  %v885_v33 = vpop.f32.mrf.mxu2 }
 0x116   : > { %v963_v31 = vpack.c.bf16 %v934_v30, %v934_v30  ;;  %v715_v32 = vadd.f32 %v2087_v61, %v714_v55  ;;  %v797_v34 = vpop.f32.mrf.mxu1 }
 0x118   : > { %993 = vst.msk [vmem:[%s2101_s12 + $0x30] sm:$0xf] %vm980_vm1, %v963_v31  ;;  %v798_v35 = vadd.f32 %v797_v34, %v715_v32  ;;  %v753_v31 = vadd.f32 %v2087_v61, %v2146_v25 }
 0x11a   : > { %v881_v36 = vadd.f32 %v880_v12, %v798_v35 }
 0x11b   : > { %v832_v37 = vpop.f32.mrf.mxu3 }
 0x11c   : > { %v935_v38 = vmax.f32 %v881_v36, 0.0  ;;  %v833_v20 = vadd.f32 %v832_v37, %v750_v39 }
 0x11d   : > { %v717_v40 = vpop.f32.mrf.mxu0  ;;  %v888_v43 = vpop.f32.mrf.mxu2 }
 0x11e   : > { %v964_v41 = vpack.c.bf16 %v935_v38, %v935_v38  ;;  %v718_v42 = vadd.f32 %v2087_v61, %v717_v40  ;;  %v800_v44 = vpop.f32.mrf.mxu1 }
 0x120   : > { %994 = vst.msk [vmem:[%s2101_s12 + $0x34] sm:$0xf] %vm980_vm1, %v964_v41  ;;  %v801_v45 = vadd.f32 %v800_v44, %v718_v42 }
 0x122   : > { %v884_v46 = vadd.f32 %v883_v23, %v801_v45 }
 0x123   : > { %v835_v47 = vpop.f32.mrf.mxu3 }
 0x124   : > { %v936_v49 = vmax.f32 %v884_v46, 0.0  ;;  %v836_v34 = vadd.f32 %v835_v47, %v753_v31 }
 0x125   : > { %v719_v50 = vpop.f32.mrf.mxu0  ;;  %v890_v53 = vpop.f32.mrf.mxu2 }
 0x126   : > { %v965_v51 = vpack.c.bf16 %v936_v49, %v936_v49  ;;  %v720_v52 = vadd.f32 %v2087_v61, %v719_v50  ;;  %v802_v54 = vpop.f32.mrf.mxu1 }
 0x128   : > { %995 = vst.msk [vmem:[%s2101_s12 + $0x38] sm:$0xf] %vm980_vm1, %v965_v51  ;;  %v803_v56 = vadd.f32 %v802_v54, %v720_v52 }
 0x12a   : > { %v886_v57 = vadd.f32 %v885_v33, %v803_v56 }
 0x12b   : > { %v837_v9 = vpop.f32.mrf.mxu3 }
 0x12c   : > { %v937_v58 = vmax.f32 %v886_v57, 0.0 }
 0x12d   : > { %v722_v60 = vpop.f32.mrf.mxu0  ;;  %v893_v0 = vpop.f32.mrf.mxu2 }
 0x12e   : > { %v966_v62 = vpack.c.bf16 %v937_v58, %v937_v58  ;;  %v723_v63 = vadd.f32 %v2087_v61, %v722_v60  ;;  %v805_v1 = vpop.f32.mrf.mxu1 }
 0x130   : > { %996 = vst.msk [vmem:[%s2101_s12 + $0x3c] sm:$0xf] %vm980_vm1, %v966_v62  ;;  %v806_v4 = vadd.f32 %v805_v1, %v723_v63 }
 0x132   : > { %v889_v27 = vadd.f32 %v888_v43, %v806_v4 }
 0x133   : > { %v913_v6 = vpop.f32.mrf.mxu3 }
 0x134   : > { %v938_v8 = vmax.f32 %v889_v27, 0.0  ;;  %v914_v10 = vadd.f32 %v913_v6, %v831_v5 }
 0x135   : > { %v724_v11 = vpop.f32.mrf.mxu0  ;;  %v895_v15 = vpop.f32.mrf.mxu2 }
 0x136   : > { %v967_v12 = vpack.c.bf16 %v938_v8, %v938_v8  ;;  %v948_v13 = vmax.f32 %v914_v10, 0.0  ;;  %v725_v14 = vadd.f32 %v2087_v61, %v724_v11  ;;  %v807_v17 = vpop.f32.mrf.mxu1 }
 0x138   : > { %997 = vst.msk [vmem:[%s2101_s12 + $0x40] sm:$0xf] %vm980_vm1, %v967_v12  ;;  %v977_v3 = vpack.c.bf16 %v948_v13, %v948_v13  ;;  %v808_v18 = vadd.f32 %v807_v17, %v725_v14 }
 0x13a   : > { %1007 = vst.msk [vmem:[%s2101_s12 + $0x68] sm:$0xf] %vm980_vm1, %v977_v3  ;;  %v891_v21 = vadd.f32 %v890_v53, %v808_v18 }
 0x13b   : > { %v915_v22 = vpop.f32.mrf.mxu3 }
 0x13c   : > { %v939_v23 = vmax.f32 %v891_v21, 0.0  ;;  %v916_v24 = vadd.f32 %v915_v22, %v833_v20 }
 0x13d   : > { %v727_v26 = vpop.f32.mrf.mxu0  ;;  %v898_v55 = vpop.f32.mrf.mxu2 }
 0x13e   : > { %v968_v28 = vpack.c.bf16 %v939_v23, %v939_v23  ;;  %v949_v29 = vmax.f32 %v916_v24, 0.0  ;;  %v728_v30 = vadd.f32 %v2087_v61, %v727_v26  ;;  %v810_v16 = vpop.f32.mrf.mxu1 }
 0x140   : > { %998 = vst.msk [vmem:[%s2101_s12 + $0x44] sm:$0xf] %vm980_vm1, %v968_v28  ;;  %v978_v32 = vpack.c.bf16 %v949_v29, %v949_v29  ;;  %v811_v33 = vadd.f32 %v810_v16, %v728_v30 }
 0x142   : > { %1008 = vst.msk [vmem:[%s2101_s12 + $0x6c] sm:$0xf] %vm980_vm1, %v978_v32  ;;  %v894_v35 = vadd.f32 %v893_v0, %v811_v33 }
 0x143   : > { %v918_v36 = vpop.f32.mrf.mxu3 }
 0x144   : > { %v940_v37 = vmax.f32 %v894_v35, 0.0  ;;  %v919_v38 = vadd.f32 %v918_v36, %v836_v34 }
 0x145   : > { %v729_v40 = vpop.f32.mrf.mxu0  ;;  %v900_v25 = vpop.f32.mrf.mxu2 }
 0x146   : > { %v969_v41 = vpack.c.bf16 %v940_v37, %v940_v37  ;;  %v950_v42 = vmax.f32 %v919_v38, 0.0  ;;  %v730_v43 = vadd.f32 %v2087_v61, %v729_v40  ;;  %v812_v44 = vpop.f32.mrf.mxu1 }
 0x148   : > { %999 = vst.msk [vmem:[%s2101_s12 + $0x48] sm:$0xf] %vm980_vm1, %v969_v41  ;;  %v979_v45 = vpack.c.bf16 %v950_v42, %v950_v42  ;;  %v813_v46 = vadd.f32 %v812_v44, %v730_v43 }
 0x14a   : > { %1009 = vst.msk [vmem:[%s2101_s12 + $0x70] sm:$0xf] %vm980_vm1, %v979_v45  ;;  %v896_v47 = vadd.f32 %v895_v15, %v813_v46 }
 0x14b   : > { %v920_v49 = vpop.f32.mrf.mxu3 }
 0x14c   : > { %v941_v50 = vmax.f32 %v896_v47, 0.0 }
 0x14d   : > { %v732_v51 = vpop.f32.mrf.mxu0  ;;  %v903_v54 = vpop.f32.mrf.mxu2 }
 0x14e   : > { %v970_v52 = vpack.c.bf16 %v941_v50, %v941_v50  ;;  %v733_v53 = vadd.f32 %v2087_v61, %v732_v51  ;;  %v815_v56 = vpop.f32.mrf.mxu1  ;;  %v904_v57 = vadd.f32 %v903_v54, %v2156_v48 }
 0x150   : > { %1000 = vst.msk [vmem:[%s2101_s12 + $0x4c] sm:$0xf] %vm980_vm1, %v970_v52  ;;  %v816_v9 = vadd.f32 %v815_v56, %v733_v53  ;;  %v944_v58 = vmax.f32 %v904_v57, 0.0 }
 0x152   : > { %v899_v60 = vadd.f32 %v898_v55, %v816_v9  ;;  %v973_v62 = vpack.c.bf16 %v944_v58, %v944_v58 }
 0x154   : > { %v942_v63 = vmax.f32 %v899_v60, 0.0  ;;  %1003 = vst.msk [vmem:[%s2101_s12 + $0x58] sm:$0xf] %vm980_vm1, %v973_v62 }
 0x155   : > { %v734_v0 = vpop.f32.mrf.mxu0  ;;  %v905_v4 = vpop.f32.mrf.mxu2 }
 0x156   : > { %v971_v1 = vpack.c.bf16 %v942_v63, %v942_v63  ;;  %v735_v2 = vadd.f32 %v2087_v61, %v734_v0  ;;  %v817_v5 = vpop.f32.mrf.mxu1  ;;  %v906_v48 = vadd.f32 %v905_v4, %v2163_v59 }
 0x158   : > { %1001 = vst.msk [vmem:[%s2101_s12 + $0x50] sm:$0xf] %vm980_vm1, %v971_v1  ;;  %v818_v27 = vadd.f32 %v817_v5, %v735_v2  ;;  %v945_v6 = vmax.f32 %v906_v48, 0.0 }
 0x15a   : > { %v901_v8 = vadd.f32 %v900_v25, %v818_v27  ;;  %v974_v10 = vpack.c.bf16 %v945_v6, %v945_v6 }
 0x15c   : > { %v943_v11 = vmax.f32 %v901_v8, 0.0  ;;  %1004 = vst.msk [vmem:[%s2101_s12 + $0x5c] sm:$0xf] %vm980_vm1, %v974_v10 }
 0x15d   : > { %v908_v13 = vpop.f32.mrf.mxu2 }
 0x15e   : > { %v972_v12 = vpack.c.bf16 %v943_v11, %v943_v11  ;;  %v909_v14 = vadd.f32 %v908_v13, %v2170_v7 }
 0x160   : > { %1002 = vst.msk [vmem:[%s2101_s12 + $0x54] sm:$0xf] %vm980_vm1, %v972_v12  ;;  %v946_v61 = vmax.f32 %v909_v14, 0.0 }
 0x162   : > { %v975_v15 = vpack.c.bf16 %v946_v61, %v946_v61 }
 0x164   : > { %1005 = vst.msk [vmem:[%s2101_s12 + $0x60] sm:$0xf] %vm980_vm1, %v975_v15 }
 0x165   : > { %v910_v59 = vpop.f32.mrf.mxu2 }
 0x166   : > { %v911_v17 = vadd.f32 %v910_v59, %v2177_v19 }
 0x168   : > { %v947_v39 = vmax.f32 %v911_v17, 0.0  ;;  %1016 = sbr.rel (!%p1922_p4) target bundleno = 441 (0x1b9), region = 36 }
 0x16a   : > { %v976_v3 = vpack.c.bf16 %v947_v39, %v947_v39 }
 0x16c   : > { %1006 = vst.msk [vmem:[%s2101_s12 + $0x64] sm:$0xf] %vm980_vm1, %v976_v3 }
 0x16d   : > { %s2381_s21 = smov (!%p1019_p8, %s1018_s21), 29 }
 0x16e   : > { %s1600_s5 = sshll.u32 %s2381_s21, 2 }
 0x16f   : > { %p1603_p9 = scmp.eq.s32.totalorder %s1600_s5, 0 }
 0x170   : > { %1783 = sdivrem.u32 (!%p1603_p9), %s2381_s21, 29 }
 0x171   : > { %1027 = sbr.rel (%p1603_p9) target bundleno = 441 (0x1b9), region = 40 }
 0x179   : > { %s2248_s20 = spop.drf %1783 }
 0x17a   : > { %s1785_s6 = spop.drf %1783  ;;  %p1604_p10 = scmp.le.s32.totalorder %s2248_s20, 0 }
 0x17b   : > { %s2372_s15 = smov (!%p1604_p10), %s2242_s4  ;;  %s2373_s27 = smov (!%p1604_p10), %s2101_s12 }
 0x17c   : > { %1296 = sbr.rel (%p1604_p10) target bundleno = 415 (0x19f), region = 112  ;;  %s2257_s7 = smov (!%p1604_p10), 0  }
 0x17d   : > { %s2259_s8 = smov (!%p1604_p10), 0  }
 0x181 LB: >> { %v1045_v7 = vld [vmem:[%s1851_s27] sm:$0xf]  ;;  %v1047_v19 = vld [vmem:[%s1851_s27 + $0x4] sm:$0xf]  ;;  %v1049_v18 = vld [vmem:[%s1851_s27 + $0x8] sm:$0xf]  ;;  %s1859_s8 = sphi %s2259_s8, %s1039_s8   ;;  %s1855_s7 = sphi %s2257_s7, %s2376_s7   ;;  %s1851_s27 = sphi %s2373_s27, %s2375_s27   ;;  %s1847_s15 = sphi %s2372_s15, %s2374_s15  }
 0x182   : >> { %1046 = vst [vmem:[%s1847_s15] sm:$0xf] %v1045_v7  ;;  %v1051_v20 = vld [vmem:[%s1851_s27 + $0xc] sm:$0xf]  ;;  %v1053_v21 = vld [vmem:[%s1851_s27 + $0x10] sm:$0xf]  ;;  %s1103_s9 = sadd.s32 1, %s1855_s7 }
 0x183   : >> { %1048 = vst [vmem:[%s1847_s15 + $0x4] sm:$0xf] %v1047_v19  ;;  %v1055_v22 = vld [vmem:[%s1851_s27 + $0x14] sm:$0xf]  ;;  %v1057_v23 = vld [vmem:[%s1851_s27 + $0x18] sm:$0xf]  ;;  %p1104_p11 = scmp.ge.s32.totalorder %s1103_s9, %s2248_s20 }
 0x184   : >> { %1050 = vst [vmem:[%s1847_s15 + $0x8] sm:$0xf] %v1049_v18  ;;  %v1059_v24 = vld [vmem:[%s1851_s27 + $0x1c] sm:$0xf]  ;;  %v1061_v26 = vld [vmem:[%s1851_s27 + $0x20] sm:$0xf] }
 0x185   : >> { %1052 = vst [vmem:[%s1847_s15 + $0xc] sm:$0xf] %v1051_v20  ;;  %v1063_v28 = vld [vmem:[%s1851_s27 + $0x24] sm:$0xf]  ;;  %v1065_v29 = vld [vmem:[%s1851_s27 + $0x28] sm:$0xf] }
 0x186   : >> { %1054 = vst [vmem:[%s1847_s15 + $0x10] sm:$0xf] %v1053_v21  ;;  %v1067_v30 = vld [vmem:[%s1851_s27 + $0x2c] sm:$0xf]  ;;  %v1069_v55 = vld [vmem:[%s1851_s27 + $0x30] sm:$0xf] }
 0x187   : >> { %1056 = vst [vmem:[%s1847_s15 + $0x14] sm:$0xf] %v1055_v22  ;;  %v1071_v16 = vld [vmem:[%s1851_s27 + $0x34] sm:$0xf]  ;;  %v1073_v31 = vld [vmem:[%s1851_s27 + $0x38] sm:$0xf] }
 0x188   : >> { %1058 = vst [vmem:[%s1847_s15 + $0x18] sm:$0xf] %v1057_v23  ;;  %v1075_v32 = vld [vmem:[%s1851_s27 + $0x3c] sm:$0xf]  ;;  %v1077_v33 = vld [vmem:[%s1851_s27 + $0x40] sm:$0xf] }
 0x189   : >> { %1060 = vst [vmem:[%s1847_s15 + $0x1c] sm:$0xf] %v1059_v24  ;;  %s2383_s9 = smov (%p1104_p11, %s1103_s9), 0  ;;  %v1079_v34 = vld [vmem:[%s1851_s27 + $0x44] sm:$0xf]  ;;  %s1039_s8 = sadd.s32 1, %s1859_s8  }
 0x18a   : >> { %1062 = vst [vmem:[%s1847_s15 + $0x20] sm:$0xf] %v1061_v26  ;;  %v1081_v35 = vld [vmem:[%s1851_s27 + $0x48] sm:$0xf]  ;;  %s1106_s10 = smul.u32 116, %s2383_s9  ;;  %p1038_p12 = scmp.ge.s32.totalorder %s1039_s8, %s2248_s20 }
 0x18b   : >> { %1064 = vst [vmem:[%s1847_s15 + $0x24] sm:$0xf] %v1063_v28  ;;  %v1083_v36 = vld [vmem:[%s1851_s27 + $0x4c] sm:$0xf]  ;;  %v1085_v37 = vld [vmem:[%s1851_s27 + $0x50] sm:$0xf]  ;;  %s2376_s7 = smov %s2383_s9 }
 0x18c   : >> { %1066 = vst [vmem:[%s1847_s15 + $0x28] sm:$0xf] %v1065_v29  ;;  %s1108_s11 = scalar_lea.vmem %s2101_s12, %s1106_s10 [#allocation2]   ;;  %s1109_s14 = scalar_lea.vmem %s2242_s4, %s1106_s10   ;;  %v1087_v38 = vld [vmem:[%s1851_s27 + $0x54] sm:$0xf]  ;;  %v1089_v40 = vld [vmem:[%s1851_s27 + $0x58] sm:$0xf] }
 0x18d   : >> { %1068 = vst [vmem:[%s1847_s15 + $0x2c] sm:$0xf] %v1067_v30  ;;  %v1091_v41 = vld [vmem:[%s1851_s27 + $0x5c] sm:$0xf]  ;;  %v1093_v42 = vld [vmem:[%s1851_s27 + $0x60] sm:$0xf] }
 0x18e   : >> { %1070 = vst [vmem:[%s1847_s15 + $0x30] sm:$0xf] %v1069_v55  ;;  %v1095_v43 = vld [vmem:[%s1851_s27 + $0x64] sm:$0xf]  ;;  %v1097_v25 = vld [vmem:[%s1851_s27 + $0x68] sm:$0xf] }
 0x18f   : >> { %1072 = vst [vmem:[%s1847_s15 + $0x34] sm:$0xf] %v1071_v16  ;;  %v1099_v44 = vld [vmem:[%s1851_s27 + $0x6c] sm:$0xf]  ;;  %v1101_v45 = vld [vmem:[%s1851_s27 + $0x70] sm:$0xf]  ;;  %s2375_s27 = smov %s1108_s11 }
 0x190   : >> { %1074 = vst [vmem:[%s1847_s15 + $0x38] sm:$0xf] %v1073_v31 }
 0x191   : >> { %1076 = vst [vmem:[%s1847_s15 + $0x3c] sm:$0xf] %v1075_v32 }
 0x192   : >> { %1078 = vst [vmem:[%s1847_s15 + $0x40] sm:$0xf] %v1077_v33 }
 0x193   : >> { %1080 = vst [vmem:[%s1847_s15 + $0x44] sm:$0xf] %v1079_v34 }
 0x194   : >> { %1082 = vst [vmem:[%s1847_s15 + $0x48] sm:$0xf] %v1081_v35 }
 0x195   : >> { %1084 = vst [vmem:[%s1847_s15 + $0x4c] sm:$0xf] %v1083_v36 }
 0x196   : >> { %1086 = vst [vmem:[%s1847_s15 + $0x50] sm:$0xf] %v1085_v37 }
 0x197   : >> { %1088 = vst [vmem:[%s1847_s15 + $0x54] sm:$0xf] %v1087_v38 }
 0x198   : >> { %1090 = vst [vmem:[%s1847_s15 + $0x58] sm:$0xf] %v1089_v40 }
 0x199   : >> { %1092 = vst [vmem:[%s1847_s15 + $0x5c] sm:$0xf] %v1091_v41 }
 0x19a   : >> { %1094 = vst [vmem:[%s1847_s15 + $0x60] sm:$0xf] %v1093_v42  ;;  %1041 = sbr.rel (!%p1038_p12) target bundleno = 385 (0x181), region = 118 }
 0x19b   : >> { %1096 = vst [vmem:[%s1847_s15 + $0x64] sm:$0xf] %v1095_v43 }
 0x19c   : >> { %1098 = vst [vmem:[%s1847_s15 + $0x68] sm:$0xf] %v1097_v25 }
 0x19d   : >> { %1100 = vst [vmem:[%s1847_s15 + $0x6c] sm:$0xf] %v1099_v44 }
 0x19e   : >> { %1102 = vst [vmem:[%s1847_s15 + $0x70] sm:$0xf] %v1101_v45  ;;  %s2374_s15 = smov %s1109_s14 }
 0x19f PF: > { %1786 = sdivrem.u32 %s2381_s21, 29 }
 0x1a0   : > { %s1605_s17 = smul.u32 116, %s2248_s20 }
 0x1a2   : > { %s2352_s18 = scalar_lea.vmem %s2101_s12, %s1605_s17 [#allocation2]   ;;  %s1116_s22 = scalar_lea.vmem %s2242_s4, %s1605_s17  }
 0x1a8   : > { %s1787_s23 = spop.drf %1786 }
 0x1a9   : > { %s1788_s24 = spop.drf %1786 }
 0x1aa   : > { %p1607_p13 = scmp.le.s32.totalorder %s1788_s24, 0 }
 0x1ab   : > { %s1861_s25 = smov (!%p1607_p13), %s1116_s22   ;;  %s1865_s26 = smov (!%p1607_p13), %s2352_s18  }
 0x1ac   : > { %1310 = sbr.rel (%p1607_p13) target bundleno = 441 (0x1b9), region = 123  ;;  %s1869_s28 = smov (!%p1607_p13), 0  }
 0x1ad   : > { %s1873_s29 = smov (!%p1607_p13), 0  }
 0x1b1 LB: >> { %v1126_v46 = vld [vmem:[%s1867_s26] sm:$0xf]  ;;  %s1128_s12 = sadd.s32 1, %s1871_s28  ;;  %s1120_s29 = sadd.s32 1, %s1875_s29   ;;  %s1875_s29 = sphi %s1873_s29, %s1120_s29   ;;  %s1871_s28 = sphi %s1869_s28, %s1870_s28   ;;  %s1867_s26 = sphi %s1865_s26, %s1133_s26   ;;  %s1863_s25 = sphi %s1861_s25, %s1134_s25  }
 0x1b2   : >> { %1127 = vst [vmem:[%s1863_s25] sm:$0xf] %v1126_v46  ;;  %p1129_p0 = scmp.ge.s32.totalorder %s1128_s12, %s1788_s24  ;;  %p1119_p1 = scmp.ge.s32.totalorder %s1120_s29, %s1788_s24 }
 0x1b4   : >> { %s2385_s12 = smov (%p1129_p0, %s1128_s12), 0  ;;  %1122 = sbr.rel (!%p1119_p1) target bundleno = 433 (0x1b1), region = 129 }
 0x1b5   : >> { %s1608_s21 = sshll.u32 %s2385_s12, 2  ;;  %s1870_s28 = smov %s2385_s12  }
 0x1b6   : >> { %s1133_s26 = scalar_lea.vmem %s2352_s18, %s1608_s21 [#allocation2]   ;;  %s1134_s25 = scalar_lea.vmem %s1116_s22, %s1608_s21  }
 0x1b9 PF: > { %p10_p2 = scmp.ge.s32.totalorder %s1912_s16, 4   ;;  %s2377_s12 = smov %s1839_s13 }
 0x1ba   : > { %s2378_s13 = smov %s1920_s19  ;;  %s2379_s14 = smov %s1912_s16 }
 0x1bb   :  { %12 = sbr.rel (!%p10_p2) target bundleno = 2 (0x2), region = 140 }

// kernel: stem_forward.11
= control target key start
LH: loop header
LB: loop body
LE: loop exit
PB: predicated region body
PF: predicated region fallthrough
CT: control target
= control target key end

     0   :  { %s1897_s12 = smov 0   ;;  %s1899_s13 = smov 0   ;;  %s2367_s0 = inlined_call_operand.vmem [shape: bf16[450,288], index: 0, kind: input, shape index: {}]   ;;  %s2368_s1 = inlined_call_operand.vmem [shape: bf16[288,64], index: 1, kind: input, shape index: {}]   ;;  %s2369_s2 = inlined_call_operand.vmem [shape: f32[1,64], index: 2, kind: input, shape index: {}]   ;;  %s2370_s3 = inlined_call_operand.vmem [shape: bf16[450,64], index: 3, kind: output, shape index: {}]  }
   0x1   :  { %s1901_s14 = smov 0  }
   0x2 LB: > { %s1910_s15 = sadd.s32 4294967295, %s1843_s14   ;;  %s1912_s16 = sadd.s32 1, %s1843_s14   ;;  %s1843_s14 = sphi %s1901_s14, %s2379_s14   ;;  %s1839_s13 = sphi %s1899_s13, %s2378_s13   ;;  %s1835_s12 = sphi %s1897_s12, %s2377_s12  }
   0x3   : > { %s85_s17 = ssub.s32 %s1843_s14, %s1912_s16  ;;  %s88_s18 = sadd.s32 1, %s1839_s13 }
   0x4   : > { %p86_p0 = scmp.eq.s32.totalorder %s85_s17, 0  ;;  %p98_p1 = scmp.ne.s32.totalorder %s1839_s13, %s1835_s12 }
   0x5   : > { %p99_p2 = scmp.eq.s32.totalorder %s1910_s15, 1  ;;  %p1343_p3 = scmp.ge.s32.totalorder %s1843_s14, 1 }
   0x6   : > { %s1920_s19 = scalar_select %p86_p0, %s1839_s13, %s88_s18  }
   0x7   : > { %p1922_p4 = por %p99_p2, %p98_p1  ;;  %p149_p5 = scmp.lt.s32.totalorder %s1843_s14, 3 }
   0x9   : > { %p150_p6 = pnand %p1343_p3, %p149_p5 }
   0xa   : > { %s1940_s27 = smul.u32 (!%p150_p6), 29, %s1910_s15  ;;  %s175_s25 = sand.u32 (!%p150_p6), 1, %s1835_s12  }
   0xb   : > { %153 = sbr.rel (%p150_p6) target bundleno = 441 (0x1b9), region = 32 }
   0xc   : > { %p184_p7 = scmp.lt.s32.totalorder (!%p150_p6), %s1940_s27, 56  ;;  %s1691_s26 = smul.u32 (!%p150_p6), 116, %s175_s25 }
   0xe   : > { %s2101_s12 = scalar_lea.vmem (!%p150_p6), [#allocation2], %s1691_s26  }
  0x10   : > { %v1661_v0 = vld [vmem:[%s2368_s1 + $0x38] sm:$0xff]  ;;  %v1937_v2 = vld [vmem:[%s2368_s1 + $0x88] sm:$0xff]  ;;  %v1660_v3 = vld [vmem:[%s2368_s1 + $0x30] sm:$0xff]  ;;  %s185_s7 = scalar_select %p184_p7, %s1940_s27, 56  ;;  %vm627_vm0 = vcmask 261120   ;;  %vm980_vm1 = vcmask 519168  }
  0x11   : > { %v1932_v1 = vld [vmem:[%s2368_s1 + $0x78] sm:$0xff]  ;;  %673 = vmatpush.bf16.msra.mxu0 %v1661_v0  ;;  %1673 = vmatpush.bf16.msra.mxu3 %v1661_v0  ;;  %v1668_v4 = vld [vmem:[%s2368_s1 + $0x70] sm:$0xff]  ;;  %v1954_v5 = vld [vmem:[%s2368_s1 + $0x80] sm:$0xff]  ;;  %s1672_s28 = smul.u32 (%p1922_p4), 116, %s1910_s15 }
  0x12   : > { %756 = vmatpush.bf16.msra.mxu1 %v1932_v1  ;;  %845 = vmatpush.bf16.msra.mxu2 %v1937_v2  ;;  %v1659_v6 = vld [vmem:[%s2368_s1 + $0x28] sm:$0xff]  ;;  %s1692_s10 = smul.u32 12, %s185_s7  ;;  %v1658_v11 = vld [vmem:[%s2368_s1 + $0x20] sm:$0xff]  ;;  %v1657_v13 = vld [vmem:[%s2368_s1 + $0x18] sm:$0xff] }
  0x13   : > { %v1667_v7 = vld [vmem:[%s2368_s1 + $0x68] sm:$0xff]  ;;  %v1666_v12 = vld [vmem:[%s2368_s1 + $0x60] sm:$0xff]  ;;  %v1665_v14 = vld [vmem:[%s2368_s1 + $0x58] sm:$0xff]  ;;  %s2242_s4 = scalar_lea.vmem (%p1922_p4), %s2370_s3, %s1672_s28  }
  0x14   : > { %s1967_s21 = scalar_lea.vmem %s2367_s0, %s1692_s10  ;;  %v1656_v15 = vld [vmem:[%s2368_s1 + $0x10] sm:$0xff]  ;;  %v1655_v19 = vld [vmem:[%s2368_s1 + $0x8] sm:$0xff]  ;;  %v1654_v22 = vld [vmem:[%s2368_s1] sm:$0xff] }
  0x15   : > { %674 = vmatpush.bf16.msra.mxu0 %v1660_v3  ;;  %1674 = vmatpush.bf16.msra.mxu3 %v1660_v3  ;;  %v1355_v8 = vld [vmem:[%s1967_s21 + $0x8] sm:$0xf]  ;;  %v1614_v9 = vld [vmem:[%s1967_s21 + $0x10] sm:$0xf0]  ;;  %v1367_v17 = vld [vmem:[%s1967_s21 + $0x20] sm:$0xf] }
  0x16   : > { %757 = vmatpush.bf16.msra.mxu1 %v1668_v4  ;;  %846 = vmatpush.bf16.msra.mxu2 %v1954_v5  ;;  %v1356_v10 = vor.u32 %v1614_v9, %v1355_v8  ;;  %v1664_v16 = vld [vmem:[%s2368_s1 + $0x50] sm:$0xff]  ;;  %v1617_v18 = vld [vmem:[%s1967_s21 + $0x28] sm:$0xf0]  ;;  %v1347_v23 = vld [vmem:[%s1967_s21] sm:$0xf] }
  0x17   : > { %v1663_v20 = vld [vmem:[%s2368_s1 + $0x48] sm:$0xff]  ;;  %v1368_v21 = vor.u32 %v1617_v18, %v1367_v17  ;;  %v1646_v26 = vld [vmem:[%s1967_s21 + $0x110] sm:$0xf0]  ;;  %v1662_v27 = vld [vmem:[%s2368_s1 + $0x40] sm:$0xff] }
  0x18   : > { %v1613_v24 = vld [vmem:[%s1967_s21 + $0x8] sm:$0xf0]  ;;  %v1479_v25 = vld [vmem:[%s1967_s21 + $0x108] sm:$0xf]  ;;  %v1612_v28 = vld [vmem:[%s1967_s21 + $0x4] sm:$0xf] }
  0x19   : > { %675 = vmatpush.bf16.msra.mxu0 %v1659_v6  ;;  %1675 = vmatpush.bf16.msra.mxu3 %v1659_v6  ;;  %v1349_v29 = vld [vmem:[%s1967_s21 + $0xc] sm:$0xf0]  ;;  %v1348_v30 = vor.u32 %v1613_v24, %v1347_v23  ;;  %v1480_v31 = vor.u32 %v1646_v26, %v1479_v25  ;;  %v1379_v33 = vld [vmem:[%s1967_s21 + $0x38] sm:$0xf]  ;;  %v1620_v34 = vld [vmem:[%s1967_s21 + $0x40] sm:$0xf0] }
  0x1a   : > { %758 = vmatpush.bf16.msra.mxu1 %v1667_v7  ;;  %1585 = vmatmul.msk.bf16.vlgmr.msra.gmra.mxu2 %vm627_vm0, %v1356_v10  ;;  %v1352_v32 = vor.u32 %v1612_v28, %v1349_v29  ;;  %v1380_v35 = vor.u32 %v1620_v34, %v1379_v33  ;;  %v1359_v36 = vld [vmem:[%s1967_s21 + $0x18] sm:$0xf]  ;;  %v1616_v37 = vld [vmem:[%s1967_s21 + $0x20] sm:$0xf0]  ;;  %v1491_v38 = vld [vmem:[%s1967_s21 + $0x120] sm:$0xf] }
  0x1b   : > { %v1649_v39 = vld [vmem:[%s1967_s21 + $0x128] sm:$0xf0]  ;;  %v1615_v40 = vld [vmem:[%s1967_s21 + $0x1c] sm:$0xf]  ;;  %v1361_v41 = vld [vmem:[%s1967_s21 + $0x24] sm:$0xf0]  ;;  %v1360_v42 = vor.u32 %v1616_v37, %v1359_v36 }
  0x1c   : > { %v1492_v43 = vor.u32 %v1649_v39, %v1491_v38  ;;  %v1364_v44 = vor.u32 %v1615_v40, %v1361_v41  ;;  %v1391_v45 = vld [vmem:[%s1967_s21 + $0x50] sm:$0xf]  ;;  %v1623_v46 = vld [vmem:[%s1967_s21 + $0x58] sm:$0xf0]  ;;  %v1503_v50 = vld [vmem:[%s1967_s21 + $0x138] sm:$0xf] }
  0x1d   : > { %676 = vmatpush.bf16.msra.mxu0 %v1658_v11  ;;  %1676 = vmatpush.bf16.msra.mxu3 %v1658_v11  ;;  %v1392_v47 = vor.u32 %v1623_v46, %v1391_v45  ;;  %v1371_v48 = vld [vmem:[%s1967_s21 + $0x30] sm:$0xf]  ;;  %v1619_v49 = vld [vmem:[%s1967_s21 + $0x38] sm:$0xf0]  ;;  %v1652_v51 = vld [vmem:[%s1967_s21 + $0x140] sm:$0xf0] }
  0x1e   : > { %759 = vmatpush.bf16.msra.mxu1 %v1666_v12  ;;  %v1618_v52 = vld [vmem:[%s1967_s21 + $0x34] sm:$0xf]  ;;  %v1373_v53 = vld [vmem:[%s1967_s21 + $0x3c] sm:$0xf0]  ;;  %v1372_v54 = vor.u32 %v1619_v49, %v1371_v48  ;;  %v1504_v55 = vor.u32 %v1652_v51, %v1503_v50  ;;  %v1403_v57 = vld [vmem:[%s1967_s21 + $0x68] sm:$0xf] }
  0x1f   : > { %v1376_v56 = vor.u32 %v1618_v52, %v1373_v53  ;;  %v1626_v58 = vld [vmem:[%s1967_s21 + $0x70] sm:$0xf0]  ;;  %v1383_v62 = vld [vmem:[%s1967_s21 + $0x48] sm:$0xf]  ;;  %v1621_v0 = vld [vmem:[%s1967_s21 + $0x4c] sm:$0xf] }
  0x20   : > { %v2035_v59 = vld [vmem:[%s1967_s21 + $0x150] sm:$0xff]  ;;  %v1404_v60 = vor.u32 %v1626_v58, %v1403_v57  ;;  %v1629_v6 = vld [vmem:[%s1967_s21 + $0x88] sm:$0xf0]  ;;  %v1395_v8 = vld [vmem:[%s1967_s21 + $0x60] sm:$0xf] }
  0x21   : > { %677 = vmatpush.bf16.msra.mxu0 %v1657_v13  ;;  %1677 = vmatpush.bf16.msra.mxu3 %v1657_v13  ;;  %v441_v61 = vunpack.c.l.b16 %v2035_v59  ;;  %v1622_v63 = vld [vmem:[%s1967_s21 + $0x50] sm:$0xf0]  ;;  %v1625_v9 = vld [vmem:[%s1967_s21 + $0x68] sm:$0xf0]  ;;  %v1481_v11 = vld [vmem:[%s1967_s21 + $0x114] sm:$0xf0] }
  0x22   : > { %760 = vmatpush.bf16.msra.mxu1 %v1665_v14  ;;  %v1645_v10 = vld [vmem:[%s1967_s21 + $0x10c] sm:$0xf]  ;;  %v1397_v13 = vld [vmem:[%s1967_s21 + $0x6c] sm:$0xf0]  ;;  %v1427_v17 = vld [vmem:[%s1967_s21 + $0x98] sm:$0xf] }
  0x23   : > { %v486_v3 = vpack.c.b16 %v441_v61, %v441_v61  ;;  %v1632_v18 = vld [vmem:[%s1967_s21 + $0xa0] sm:$0xf0]  ;;  %v1493_v23 = vld [vmem:[%s1967_s21 + $0x12c] sm:$0xf0]  ;;  %v1627_v24 = vld [vmem:[%s1967_s21 + $0x7c] sm:$0xf] }
  0x24   : > { %v1409_v25 = vld [vmem:[%s1967_s21 + $0x84] sm:$0xf0]  ;;  %v1439_v29 = vld [vmem:[%s1967_s21 + $0xb0] sm:$0xf]  ;;  %v1631_v33 = vld [vmem:[%s1967_s21 + $0x98] sm:$0xf0] }
  0x25   : > { %678 = vmatpush.bf16.msra.mxu0 %v1656_v15  ;;  %1678 = vmatpush.bf16.msra.mxu3 %v1656_v15  ;;  %v1484_v15 = vor.u32 %v1645_v10, %v1481_v11  ;;  %v1412_v28 = vor.u32 %v1627_v24, %v1409_v25  ;;  %v1651_v34 = vld [vmem:[%s1967_s21 + $0x13c] sm:$0xf]  ;;  %v1630_v36 = vld [vmem:[%s1967_s21 + $0x94] sm:$0xf]  ;;  %v1421_v37 = vld [vmem:[%s1967_s21 + $0x9c] sm:$0xf0] }
  0x26   : > { %761 = vmatpush.bf16.msra.mxu1 %v1664_v16  ;;  %v1424_v40 = vor.u32 %v1630_v36, %v1421_v37  ;;  %v1451_v41 = vld [vmem:[%s1967_s21 + $0xc8] sm:$0xf]  ;;  %v1634_v46 = vld [vmem:[%s1967_s21 + $0xb0] sm:$0xf0]  ;;  %v1433_v48 = vld [vmem:[%s1967_s21 + $0xb4] sm:$0xf0] }
  0x27   : > { %v1431_v45 = vld [vmem:[%s1967_s21 + $0xa8] sm:$0xf]  ;;  %v1463_v53 = vld [vmem:[%s1967_s21 + $0xe0] sm:$0xf]  ;;  %v1637_v58 = vld [vmem:[%s1967_s21 + $0xc8] sm:$0xf0] }
  0x28   : > { %v1432_v49 = vor.u32 %v1634_v46, %v1431_v45  ;;  %v1443_v57 = vld [vmem:[%s1967_s21 + $0xc0] sm:$0xf]  ;;  %v1475_v11 = vld [vmem:[%s1967_s21 + $0xf8] sm:$0xf]  ;;  %v1639_v25 = vld [vmem:[%s1967_s21 + $0xdc] sm:$0xf] }
  0x29   : > { %679 = vmatpush.bf16.msra.mxu0 %v1655_v19  ;;  %1679 = vmatpush.bf16.msra.mxu3 %v1655_v19  ;;  %v1428_v19 = vor.u32 %v1632_v18, %v1427_v17  ;;  %v2087_v61 = vld [vmem:[%s2369_s2] ss:$0 sm:$0xff] }
  0x2a   : > { %762 = vmatpush.bf16.msra.mxu1 %v1663_v20  ;;  %1586 = vmatmul.msk.bf16.gmra.mxu2 %vm627_vm0, %v1368_v21  ;;  %v1628_v21 = vld [vmem:[%s1967_s21 + $0x80] sm:$0xf0] }
  0x2d   : > { %680 = vmatpush.bf16.msra.mxu0 %v1654_v22  ;;  %1680 = vmatpush.bf16.msra.mxu3 %v1654_v22  ;;  %v1648_v22 = vld [vmem:[%s1967_s21 + $0x124] sm:$0xf] }
  0x2e   : > { %763 = vmatpush.bf16.msra.mxu1 %v1662_v27 }
  0x30   : > { %681 = vmatmul.bf16.vlgmr.msra.gmra.mxu0 %v1348_v30  ;;  %736 = vmatmul.bf16.vlgmr.msra.gmra.mxu3 %v1480_v31  ;;  %v1635_v30 = vld [vmem:[%s1967_s21 + $0xb8] sm:$0xf0] }
  0x31   : > { %1681 = vmatpush.bf16.msrb.mxu3 %v1932_v1  ;;  %764 = vmatmul.bf16.vlgmr.msra.gmra.mxu1 %v1352_v32  ;;  %v1385_v1 = vld [vmem:[%s1967_s21 + $0x54] sm:$0xf0]  ;;  %v1440_v31 = vor.u32 %v1635_v30, %v1439_v29  ;;  %v1419_v32 = vld [vmem:[%s1967_s21 + $0x90] sm:$0xf] }
  0x32   : > { %v1420_v38 = vor.u32 %v1631_v33, %v1419_v32 }
  0x35   : > { %1682 = vmatpush.bf16.msrb.mxu3 %v1668_v4  ;;  %v1388_v4 = vor.u32 %v1621_v0, %v1385_v1  ;;  %v1444_v0 = vor.u32 %v1637_v58, %v1443_v57 }
  0x39   : > { %1683 = vmatpush.bf16.msrb.mxu3 %v1667_v7 }
  0x3a   : > { %1587 = vmatmul.msk.bf16.gmra.mxu2 %vm627_vm0, %v1380_v35  ;;  %v1505_v35 = vld [vmem:[%s1967_s21 + $0x144] sm:$0xf0] }
  0x3b   : > { %v1508_v39 = vor.u32 %v1651_v34, %v1505_v35 }
  0x3d   : > { %1684 = vmatpush.bf16.msrb.mxu3 %v1666_v12  ;;  %v1624_v12 = vld [vmem:[%s1967_s21 + $0x64] sm:$0xf] }
  0x40   : > { %686 = vmatmul.bf16.gmra.mxu0 %v1360_v42  ;;  %741 = vmatmul.bf16.gmra.mxu3 %v1492_v43  ;;  %v1638_v42 = vld [vmem:[%s1967_s21 + $0xd0] sm:$0xf0] }
  0x41   : > { %1685 = vmatpush.bf16.msrb.mxu3 %v1665_v14  ;;  %769 = vmatmul.bf16.gmra.mxu1 %v1364_v44  ;;  %v1396_v14 = vor.u32 %v1625_v9, %v1395_v8  ;;  %v1452_v43 = vor.u32 %v1638_v42, %v1451_v41  ;;  %v442_v44 = vunpack.c.h.b16 %v2035_v59  ;;  %v1511_v59 = vld [vmem:[%s1967_s21 + $0x140] sm:$0xf]  ;;  %v1487_v41 = vld [vmem:[%s1967_s21 + $0x110] sm:$0xf]  ;;  %v1647_v42 = vld [vmem:[%s1967_s21 + $0x118] sm:$0xf0] }
  0x43   : > { %v487_v50 = vpack.c.b16 %v442_v44, %v442_v44 }
  0x45   : > { %1686 = vmatpush.bf16.msrb.mxu3 %v1664_v16  ;;  %v1400_v16 = vor.u32 %v1624_v12, %v1397_v13  ;;  %v1644_v12 = vld [vmem:[%s1967_s21 + $0x100] sm:$0xf0] }
  0x49   : > { %1687 = vmatpush.bf16.msrb.mxu3 %v1663_v20  ;;  %v1407_v20 = vld [vmem:[%s1967_s21 + $0x78] sm:$0xf] }
  0x4a   : > { %1588 = vmatmul.msk.bf16.gmra.mxu2 %vm627_vm0, %v1392_v47  ;;  %v1408_v26 = vor.u32 %v1628_v21, %v1407_v20  ;;  %v1633_v47 = vld [vmem:[%s1967_s21 + $0xac] sm:$0xf] }
  0x4b   : > { %v1436_v51 = vor.u32 %v1633_v47, %v1433_v48  ;;  %v1488_v48 = vor.u32 %v1647_v42, %v1487_v41 }
  0x4d   : > { %1688 = vmatpush.bf16.msrb.mxu3 %v1662_v27  ;;  %v1496_v27 = vor.u32 %v1648_v22, %v1493_v23  ;;  %v1455_v22 = vld [vmem:[%s1967_s21 + $0xd8] sm:$0xf]  ;;  %v1640_v23 = vld [vmem:[%s1967_s21 + $0xe0] sm:$0xf0] }
  0x4e   : > { %v1456_v29 = vor.u32 %v1640_v23, %v1455_v22 }
  0x50   : > { %691 = vmatmul.bf16.gmra.mxu0 %v1372_v54  ;;  %746 = vmatmul.bf16.gmra.mxu3 %v1504_v55  ;;  %v1641_v54 = vld [vmem:[%s1967_s21 + $0xe8] sm:$0xf0] }
  0x51   : > { %1689 = vmatpush.bf16.msra.mxu3 %v1937_v2  ;;  %774 = vmatmul.bf16.gmra.mxu1 %v1376_v56  ;;  %v1384_v2 = vor.u32 %v1622_v63, %v1383_v62  ;;  %v1464_v56 = vor.u32 %v1641_v54, %v1463_v53  ;;  %v1636_v62 = vld [vmem:[%s1967_s21 + $0xc4] sm:$0xf]  ;;  %v1445_v63 = vld [vmem:[%s1967_s21 + $0xcc] sm:$0xf0]  ;;  %v1642_v53 = vld [vmem:[%s1967_s21 + $0xf4] sm:$0xf] }
  0x52   : > { %v1469_v54 = vld [vmem:[%s1967_s21 + $0xfc] sm:$0xf0] }
  0x55   : > { %1690 = vmatpush.bf16.msra.mxu3 %v1954_v5  ;;  %v1415_v5 = vld [vmem:[%s1967_s21 + $0x80] sm:$0xf] }
  0x56   : > { %v1416_v7 = vor.u32 %v1629_v6, %v1415_v5 }
  0x5a   : > { %1589 = vmatmul.msk.bf16.gmra.mxu2 %vm627_vm0, %v1404_v60  ;;  %v1653_v60 = vld [vmem:[%s1967_s21 + $0x148] sm:$0xf0] }
  0x5b   : > { %v1512_v1 = vor.u32 %v1653_v60, %v1511_v59  ;;  %v1472_v59 = vor.u32 %v1642_v53, %v1469_v54 }
  0x60   : > { %696 = vmatmul.bf16.gmra.mxu0 %v1384_v2  ;;  %751 = vmatmul.bf16.gmra.mxu3 %v486_v3  ;;  %v1448_v3 = vor.u32 %v1636_v62, %v1445_v63 }
  0x61   : > { %779 = vmatmul.bf16.gmra.mxu1 %v1388_v4 }
  0x6a   : > { %1590 = vmatmul.msk.bf16.gmra.mxu2 %vm627_vm0, %v1416_v7 }
  0x70   : > { %701 = vmatmul.bf16.gmra.mxu0 %v1396_v14  ;;  %819 = vmatmul.bf16.vlgmr.msrb.gmra.mxu3 %v1484_v15  ;;  %v258_v14 = vld [vmem:[%s1967_s21 + $0x158] sm:$0xf] }
  0x71   : > { %784 = vmatmul.bf16.gmra.mxu1 %v1400_v16  ;;  %v443_v21 = vunpack.c.l.b16 %v258_v14 }
  0x73   : > { %v488_v30 = vpack.c.b16 %v443_v21, %v443_v21 }
  0x7a   : > { %1591 = vmatmul.msk.bf16.gmra.mxu2 %vm627_vm0, %v1428_v19  ;;  %v1476_v19 = vor.u32 %v1644_v12, %v1475_v11 }
  0x80   : > { %706 = vmatmul.bf16.gmra.mxu0 %v1408_v26  ;;  %824 = vmatmul.bf16.gmra.mxu3 %v1496_v27  ;;  %v1457_v26 = vld [vmem:[%s1967_s21 + $0xe4] sm:$0xf0] }
  0x81   : > { %789 = vmatmul.bf16.gmra.mxu1 %v1412_v28  ;;  %v1460_v32 = vor.u32 %v1639_v25, %v1457_v26 }
  0x8a   : > { %1592 = vmatmul.msk.bf16.gmra.mxu2 %vm627_vm0, %v1440_v31 }
  0x90   : > { %711 = vmatmul.bf16.gmra.mxu0 %v1420_v38  ;;  %829 = vmatmul.bf16.gmra.mxu3 %v1508_v39 }
  0x91   : > { %794 = vmatmul.bf16.gmra.mxu1 %v1424_v40 }
  0x9a   : > { %1593 = vmatmul.msk.bf16.gmra.mxu2 %vm627_vm0, %v1452_v43 }
  0x9d   : > { %v848_v52 = vpop.f32.mrf.mxu2 }
  0xa0   : > { %716 = vmatmul.bf16.gmra.mxu0 %v1432_v49  ;;  %834 = vmatmul.bf16.gmra.mxu3 %v487_v50  ;;  %v1467_v50 = vld [vmem:[%s1967_s21 + $0xf0] sm:$0xf] }
  0xa1   : > { %799 = vmatmul.bf16.gmra.mxu1 %v1436_v51  ;;  %v1643_v51 = vld [vmem:[%s1967_s21 + $0xf8] sm:$0xf0] }
  0xa2   : > { %v1468_v57 = vor.u32 %v1643_v51, %v1467_v50 }
  0xa5   : > { %v850_v55 = vpop.f32.mrf.mxu2 }
  0xaa   : > { %1594 = vmatmul.msk.bf16.gmra.mxu2 %vm627_vm0, %v1464_v56 }
  0xad   : > { %v682_v2 = vpop.f32.mrf.mxu0  ;;  %v853_v5 = vpop.f32.mrf.mxu2 }
  0xae   : > { %v683_v4 = vadd.f32 %v2087_v61, %v682_v2  ;;  %v765_v6 = vpop.f32.mrf.mxu1 }
  0xb0   : > { %v766_v7 = vadd.f32 %v765_v6, %v683_v4  ;;  %721 = vmatmul.bf16.gmra.mxu0 %v1444_v0  ;;  %1598 = vmatmul.msk.bf16.vlgmr.msra.gmra.mxu3 %vm627_vm0, %v1512_v1  ;;  %v1650_v6 = vld [vmem:[%s1967_s21 + $0x130] sm:$0xf0] }
  0xb1   : > { %804 = vmatmul.bf16.gmra.mxu1 %v1448_v3 }
  0xb2   : > { %v849_v8 = vadd.f32 %v848_v52, %v766_v7 }
  0xb3   : > { %v2095_v9 = vpop.f32.mrf.mxu3 }
  0xb4   : > { %v922_v10 = vmax.f32 %v849_v8, 0.0 }
  0xb5   : > { %v684_v13 = vpop.f32.mrf.mxu0  ;;  %v855_v17 = vpop.f32.mrf.mxu2 }
  0xb6   : > { %v951_v15 = vpack.c.bf16 %v922_v10, %v922_v10  ;;  %v685_v16 = vadd.f32 %v2087_v61, %v684_v13  ;;  %v767_v18 = vpop.f32.mrf.mxu1 }
  0xb8   : > { %981 = vst.msk [vmem:[%s2101_s12] sm:$0xf] %vm980_vm1, %v951_v15  ;;  %v768_v20 = vadd.f32 %v767_v18, %v685_v16 }
  0xba   : > { %v851_v24 = vadd.f32 %v850_v55, %v768_v20  ;;  %1595 = vmatmul.msk.bf16.gmra.mxu2 %vm627_vm0, %v1476_v19 }
  0xbb   : > { %v2110_v27 = vpop.f32.mrf.mxu3 }
  0xbc   : > { %v923_v28 = vmax.f32 %v851_v24, 0.0 }
  0xbd   : > { %v687_v31 = vpop.f32.mrf.mxu0  ;;  %v858_v35 = vpop.f32.mrf.mxu2 }
  0xbe   : > { %v952_v33 = vpack.c.bf16 %v923_v28, %v923_v28  ;;  %v688_v34 = vadd.f32 %v2087_v61, %v687_v31  ;;  %v770_v36 = vpop.f32.mrf.mxu1 }
  0xc0   : > { %982 = vst.msk [vmem:[%s2101_s12 + $0x4] sm:$0xf] %vm980_vm1, %v952_v33  ;;  %v771_v37 = vadd.f32 %v770_v36, %v688_v34  ;;  %726 = vmatmul.bf16.gmra.mxu0 %v1456_v29  ;;  %1599 = vmatmul.msk.bf16.gmra.mxu3 %vm627_vm0, %v488_v30 }
  0xc1   : > { %809 = vmatmul.bf16.gmra.mxu1 %v1460_v32 }
  0xc2   : > { %v854_v38 = vadd.f32 %v853_v5, %v771_v37  ;;  %v1499_v5 = vld [vmem:[%s1967_s21 + $0x128] sm:$0xf]  ;;  %s1018_s21 = ssub.s32 (%p1922_p4), 57, %s1940_s27 }
  0xc3   : > { %v2116_v39 = vpop.f32.mrf.mxu3  ;;  %v1500_v13 = vor.u32 %v1650_v6, %v1499_v5  ;;  %p1019_p8 = scmp.lt.s32.totalorder (%p1922_p4), %s1018_s21, 29 }
  0xc4   : > { %v924_v40 = vmax.f32 %v854_v38, 0.0 }
  0xc5   : > { %v689_v43 = vpop.f32.mrf.mxu0  ;;  %v860_v46 = vpop.f32.mrf.mxu2 }
  0xc6   : > { %v953_v44 = vpack.c.bf16 %v924_v40, %v924_v40  ;;  %v690_v45 = vadd.f32 %v2087_v61, %v689_v43  ;;  %v772_v47 = vpop.f32.mrf.mxu1 }
  0xc8   : > { %983 = vst.msk [vmem:[%s2101_s12 + $0x8] sm:$0xf] %vm980_vm1, %v953_v44  ;;  %v773_v49 = vadd.f32 %v772_v47, %v690_v45  ;;  %v738_v44 = vadd.f32 %v2087_v61, %v2095_v9 }
  0xca   : > { %v856_v52 = vadd.f32 %v855_v17, %v773_v49  ;;  %1596 = vmatmul.msk.bf16.gmra.mxu2 %vm627_vm0, %v1488_v48 }
  0xcb   : > { %v2128_v55 = vpop.f32.mrf.mxu3 }
  0xcc   : > { %v925_v56 = vmax.f32 %v856_v52, 0.0 }
  0xcd   : > { %v692_v58 = vpop.f32.mrf.mxu0  ;;  %v863_v63 = vpop.f32.mrf.mxu2 }
  0xce   : > { %v954_v60 = vpack.c.bf16 %v925_v56, %v925_v56  ;;  %v693_v62 = vadd.f32 %v2087_v61, %v692_v58  ;;  %v775_v0 = vpop.f32.mrf.mxu1  ;;  %v740_v56 = vadd.f32 %v2087_v61, %v2110_v27 }
  0xd0   : > { %984 = vst.msk [vmem:[%s2101_s12 + $0xc] sm:$0xf] %vm980_vm1, %v954_v60  ;;  %v776_v1 = vadd.f32 %v775_v0, %v693_v62  ;;  %731 = vmatmul.bf16.gmra.mxu0 %v1468_v57 }
  0xd1   : > { %814 = vmatmul.bf16.gmra.mxu1 %v1472_v59 }
  0xd2   : > { %v859_v2 = vadd.f32 %v858_v35, %v776_v1 }
  0xd3   : > { %v2133_v3 = vpop.f32.mrf.mxu3 }
  0xd4   : > { %v926_v4 = vmax.f32 %v859_v2, 0.0 }
  0xd5   : > { %v694_v7 = vpop.f32.mrf.mxu0  ;;  %v865_v11 = vpop.f32.mrf.mxu2 }
  0xd6   : > { %v955_v8 = vpack.c.bf16 %v926_v4, %v926_v4  ;;  %v695_v10 = vadd.f32 %v2087_v61, %v694_v7  ;;  %v777_v12 = vpop.f32.mrf.mxu1  ;;  %v743_v4 = vadd.f32 %v2087_v61, %v2116_v39 }
  0xd8   : > { %985 = vst.msk [vmem:[%s2101_s12 + $0x10] sm:$0xf] %vm980_vm1, %v955_v8  ;;  %v778_v14 = vadd.f32 %v777_v12, %v695_v10 }
  0xda   : > { %v861_v15 = vadd.f32 %v860_v46, %v778_v14  ;;  %1597 = vmatmul.msk.bf16.gmra.mxu2 %vm627_vm0, %v1500_v13 }
  0xdb   : > { %v2141_v16 = vpop.f32.mrf.mxu3 }
  0xdc   : > { %v927_v17 = vmax.f32 %v861_v15, 0.0  ;;  %v745_v15 = vadd.f32 %v2087_v61, %v2128_v55 }
  0xdd   : > { %v697_v18 = vpop.f32.mrf.mxu0  ;;  %v868_v21 = vpop.f32.mrf.mxu2 }
  0xde   : > { %v956_v19 = vpack.c.bf16 %v927_v17, %v927_v17  ;;  %v698_v20 = vadd.f32 %v2087_v61, %v697_v18  ;;  %v780_v22 = vpop.f32.mrf.mxu1 }
  0xe0   : > { %986 = vst.msk [vmem:[%s2101_s12 + $0x14] sm:$0xf] %vm980_vm1, %v956_v19  ;;  %v781_v23 = vadd.f32 %v780_v22, %v698_v20 }
  0xe2   : > { %v864_v24 = vadd.f32 %v863_v63, %v781_v23 }
  0xe3   : > { %v2146_v25 = vpop.f32.mrf.mxu3 }
  0xe4   : > { %v928_v26 = vmax.f32 %v864_v24, 0.0 }
  0xe5   : > { %v699_v28 = vpop.f32.mrf.mxu0  ;;  %v870_v31 = vpop.f32.mrf.mxu2 }
  0xe6   : > { %v957_v29 = vpack.c.bf16 %v928_v26, %v928_v26  ;;  %v700_v30 = vadd.f32 %v2087_v61, %v699_v28  ;;  %v782_v32 = vpop.f32.mrf.mxu1 }
  0xe8   : > { %987 = vst.msk [vmem:[%s2101_s12 + $0x18] sm:$0xf] %vm980_vm1, %v957_v29  ;;  %v783_v33 = vadd.f32 %v782_v32, %v700_v30 }
  0xea   : > { %v866_v34 = vadd.f32 %v865_v11, %v783_v33 }
  0xeb   : > { %v754_v35 = vpop.f32.mrf.mxu3 }
  0xec   : > { %v929_v36 = vmax.f32 %v866_v34, 0.0 }
  0xed   : > { %v702_v37 = vpop.f32.mrf.mxu0  ;;  %v873_v41 = vpop.f32.mrf.mxu2 }
  0xee   : > { %v958_v38 = vpack.c.bf16 %v929_v36, %v929_v36  ;;  %v703_v40 = vadd.f32 %v2087_v61, %v702_v37  ;;  %v785_v42 = vpop.f32.mrf.mxu1 }
  0xf0   : > { %988 = vst.msk [vmem:[%s2101_s12 + $0x1c] sm:$0xf] %vm980_vm1, %v958_v38  ;;  %v786_v43 = vadd.f32 %v785_v42, %v703_v40 }
  0xf2   : > { %v869_v45 = vadd.f32 %v868_v21, %v786_v43 }
  0xf3   : > { %v820_v46 = vpop.f32.mrf.mxu3 }
  0xf4   : > { %v930_v47 = vmax.f32 %v869_v45, 0.0  ;;  %v2156_v48 = vadd.f32 %v820_v46, %v738_v44 }
  0xf5   : > { %v704_v49 = vpop.f32.mrf.mxu0  ;;  %v875_v52 = vpop.f32.mrf.mxu2 }
  0xf6   : > { %v959_v50 = vpack.c.bf16 %v930_v47, %v930_v47  ;;  %v705_v51 = vadd.f32 %v2087_v61, %v704_v49  ;;  %v787_v53 = vpop.f32.mrf.mxu1 }
  0xf8   : > { %989 = vst.msk [vmem:[%s2101_s12 + $0x20] sm:$0xf] %vm980_vm1, %v959_v50  ;;  %v788_v54 = vadd.f32 %v787_v53, %v705_v51 }
  0xfa   : > { %v871_v57 = vadd.f32 %v870_v31, %v788_v54 }
  0xfb   : > { %v822_v9 = vpop.f32.mrf.mxu3 }
  0xfc   : > { %v931_v58 = vmax.f32 %v871_v57, 0.0  ;;  %v2163_v59 = vadd.f32 %v822_v9, %v740_v56 }
  0xfd   : > { %v707_v60 = vpop.f32.mrf.mxu0  ;;  %v878_v0 = vpop.f32.mrf.mxu2 }
  0xfe   : > { %v960_v62 = vpack.c.bf16 %v931_v58, %v931_v58  ;;  %v708_v63 = vadd.f32 %v2087_v61, %v707_v60  ;;  %v790_v1 = vpop.f32.mrf.mxu1 }
 0x100   : > { %990 = vst.msk [vmem:[%s2101_s12 + $0x24] sm:$0xf] %vm980_vm1, %v960_v62  ;;  %v791_v2 = vadd.f32 %v790_v1, %v708_v63 }
 0x102   : > { %v874_v5 = vadd.f32 %v873_v41, %v791_v2  ;;  %v748_v2 = vadd.f32 %v2087_v61, %v2133_v3 }
 0x103   : > { %v825_v27 = vpop.f32.mrf.mxu3 }
 0x104   : > { %v932_v6 = vmax.f32 %v874_v5, 0.0  ;;  %v2170_v7 = vadd.f32 %v825_v27, %v743_v4 }
 0x105   : > { %v709_v8 = vpop.f32.mrf.mxu0  ;;  %v880_v12 = vpop.f32.mrf.mxu2 }
 0x106   : > { %v961_v10 = vpack.c.bf16 %v932_v6, %v932_v6  ;;  %v710_v11 = vadd.f32 %v2087_v61, %v709_v8  ;;  %v792_v13 = vpop.f32.mrf.mxu1 }
 0x108   : > { %991 = vst.msk [vmem:[%s2101_s12 + $0x28] sm:$0xf] %vm980_vm1, %v961_v10  ;;  %v793_v14 = vadd.f32 %v792_v13, %v710_v11 }
 0x10a   : > { %v876_v17 = vadd.f32 %v875_v52, %v793_v14 }
 0x10b   : > { %v827_v39 = vpop.f32.mrf.mxu3 }
 0x10c   : > { %v933_v18 = vmax.f32 %v876_v17, 0.0  ;;  %v2177_v19 = vadd.f32 %v827_v39, %v745_v15  ;;  %v750_v39 = vadd.f32 %v2087_v61, %v2141_v16 }
 0x10d   : > { %v712_v20 = vpop.f32.mrf.mxu0  ;;  %v883_v23 = vpop.f32.mrf.mxu2 }
 0x10e   : > { %v962_v21 = vpack.c.bf16 %v933_v18, %v933_v18  ;;  %v713_v22 = vadd.f32 %v2087_v61, %v712_v20  ;;  %v795_v24 = vpop.f32.mrf.mxu1 }
 0x110   : > { %992 = vst.msk [vmem:[%s2101_s12 + $0x2c] sm:$0xf] %vm980_vm1, %v962_v21  ;;  %v796_v26 = vadd.f32 %v795_v24, %v713_v22 }
 0x112   : > { %v879_v28 = vadd.f32 %v878_v0, %v796_v26 }
 0x113   : > { %v830_v29 = vpop.f32.mrf.mxu3 }
 0x114   : > { %v934_v30 = vmax.f32 %v879_v28, 0.0  ;;  %v831_v5 = vadd.f32 %v830_v29, %v748_v2 }
 0x115   : > { %v714_v55 = vpop.f32.mrf.mxu0  ;;  %v885_v33 = vpop.f32.mrf.mxu2 }
 0x116   : > { %v963_v31 = vpack.c.bf16 %v934_v30, %v934_v30  ;;  %v715_v32 = vadd.f32 %v2087_v61, %v714_v55  ;;  %v797_v34 = vpop.f32.mrf.mxu1 }
 0x118   : > { %993 = vst.msk [vmem:[%s2101_s12 + $0x30] sm:$0xf] %vm980_vm1, %v963_v31  ;;  %v798_v35 = vadd.f32 %v797_v34, %v715_v32  ;;  %v753_v31 = vadd.f32 %v2087_v61, %v2146_v25 }
 0x11a   : > { %v881_v36 = vadd.f32 %v880_v12, %v798_v35 }
 0x11b   : > { %v832_v37 = vpop.f32.mrf.mxu3 }
 0x11c   : > { %v935_v38 = vmax.f32 %v881_v36, 0.0  ;;  %v833_v20 = vadd.f32 %v832_v37, %v750_v39 }
 0x11d   : > { %v717_v40 = vpop.f32.mrf.mxu0  ;;  %v888_v43 = vpop.f32.mrf.mxu2 }
 0x11e   : > { %v964_v41 = vpack.c.bf16 %v935_v38, %v935_v38  ;;  %v718_v42 = vadd.f32 %v2087_v61, %v717_v40  ;;  %v800_v44 = vpop.f32.mrf.mxu1 }
 0x120   : > { %994 = vst.msk [vmem:[%s2101_s12 + $0x34] sm:$0xf] %vm980_vm1, %v964_v41  ;;  %v801_v45 = vadd.f32 %v800_v44, %v718_v42 }
 0x122   : > { %v884_v46 = vadd.f32 %v883_v23, %v801_v45 }
 0x123   : > { %v835_v47 = vpop.f32.mrf.mxu3 }
 0x124   : > { %v936_v49 = vmax.f32 %v884_v46, 0.0  ;;  %v836_v34 = vadd.f32 %v835_v47, %v753_v31 }
 0x125   : > { %v719_v50 = vpop.f32.mrf.mxu0  ;;  %v890_v53 = vpop.f32.mrf.mxu2 }
 0x126   : > { %v965_v51 = vpack.c.bf16 %v936_v49, %v936_v49  ;;  %v720_v52 = vadd.f32 %v2087_v61, %v719_v50  ;;  %v802_v54 = vpop.f32.mrf.mxu1 }
 0x128   : > { %995 = vst.msk [vmem:[%s2101_s12 + $0x38] sm:$0xf] %vm980_vm1, %v965_v51  ;;  %v803_v56 = vadd.f32 %v802_v54, %v720_v52 }
 0x12a   : > { %v886_v57 = vadd.f32 %v885_v33, %v803_v56 }
 0x12b   : > { %v837_v9 = vpop.f32.mrf.mxu3 }
 0x12c   : > { %v937_v58 = vmax.f32 %v886_v57, 0.0 }
 0x12d   : > { %v722_v60 = vpop.f32.mrf.mxu0  ;;  %v893_v0 = vpop.f32.mrf.mxu2 }
 0x12e   : > { %v966_v62 = vpack.c.bf16 %v937_v58, %v937_v58  ;;  %v723_v63 = vadd.f32 %v2087_v61, %v722_v60  ;;  %v805_v1 = vpop.f32.mrf.mxu1 }
 0x130   : > { %996 = vst.msk [vmem:[%s2101_s12 + $0x3c] sm:$0xf] %vm980_vm1, %v966_v62  ;;  %v806_v4 = vadd.f32 %v805_v1, %v723_v63 }
 0x132   : > { %v889_v27 = vadd.f32 %v888_v43, %v806_v4 }
 0x133   : > { %v913_v6 = vpop.f32.mrf.mxu3 }
 0x134   : > { %v938_v8 = vmax.f32 %v889_v27, 0.0  ;;  %v914_v10 = vadd.f32 %v913_v6, %v831_v5 }
 0x135   : > { %v724_v11 = vpop.f32.mrf.mxu0  ;;  %v895_v15 = vpop.f32.mrf.mxu2 }
 0x136   : > { %v967_v12 = vpack.c.bf16 %v938_v8, %v938_v8  ;;  %v948_v13 = vmax.f32 %v914_v10, 0.0  ;;  %v725_v14 = vadd.f32 %v2087_v61, %v724_v11  ;;  %v807_v17 = vpop.f32.mrf.mxu1 }
 0x138   : > { %997 = vst.msk [vmem:[%s2101_s12 + $0x40] sm:$0xf] %vm980_vm1, %v967_v12  ;;  %v977_v3 = vpack.c.bf16 %v948_v13, %v948_v13  ;;  %v808_v18 = vadd.f32 %v807_v17, %v725_v14 }
 0x13a   : > { %1007 = vst.msk [vmem:[%s2101_s12 + $0x68] sm:$0xf] %vm980_vm1, %v977_v3  ;;  %v891_v21 = vadd.f32 %v890_v53, %v808_v18 }
 0x13b   : > { %v915_v22 = vpop.f32.mrf.mxu3 }
 0x13c   : > { %v939_v23 = vmax.f32 %v891_v21, 0.0  ;;  %v916_v24 = vadd.f32 %v915_v22, %v833_v20 }
 0x13d   : > { %v727_v26 = vpop.f32.mrf.mxu0  ;;  %v898_v55 = vpop.f32.mrf.mxu2 }
 0x13e   : > { %v968_v28 = vpack.c.bf16 %v939_v23, %v939_v23  ;;  %v949_v29 = vmax.f32 %v916_v24, 0.0  ;;  %v728_v30 = vadd.f32 %v2087_v61, %v727_v26  ;;  %v810_v16 = vpop.f32.mrf.mxu1 }
 0x140   : > { %998 = vst.msk [vmem:[%s2101_s12 + $0x44] sm:$0xf] %vm980_vm1, %v968_v28  ;;  %v978_v32 = vpack.c.bf16 %v949_v29, %v949_v29  ;;  %v811_v33 = vadd.f32 %v810_v16, %v728_v30 }
 0x142   : > { %1008 = vst.msk [vmem:[%s2101_s12 + $0x6c] sm:$0xf] %vm980_vm1, %v978_v32  ;;  %v894_v35 = vadd.f32 %v893_v0, %v811_v33 }
 0x143   : > { %v918_v36 = vpop.f32.mrf.mxu3 }
 0x144   : > { %v940_v37 = vmax.f32 %v894_v35, 0.0  ;;  %v919_v38 = vadd.f32 %v918_v36, %v836_v34 }
 0x145   : > { %v729_v40 = vpop.f32.mrf.mxu0  ;;  %v900_v25 = vpop.f32.mrf.mxu2 }
 0x146   : > { %v969_v41 = vpack.c.bf16 %v940_v37, %v940_v37  ;;  %v950_v42 = vmax.f32 %v919_v38, 0.0  ;;  %v730_v43 = vadd.f32 %v2087_v61, %v729_v40  ;;  %v812_v44 = vpop.f32.mrf.mxu1 }
 0x148   : > { %999 = vst.msk [vmem:[%s2101_s12 + $0x48] sm:$0xf] %vm980_vm1, %v969_v41  ;;  %v979_v45 = vpack.c.bf16 %v950_v42, %v950_v42  ;;  %v813_v46 = vadd.f32 %v812_v44, %v730_v43 }
 0x14a   : > { %1009 = vst.msk [vmem:[%s2101_s12 + $0x70] sm:$0xf] %vm980_vm1, %v979_v45  ;;  %v896_v47 = vadd.f32 %v895_v15, %v813_v46 }
 0x14b   : > { %v920_v49 = vpop.f32.mrf.mxu3 }
 0x14c   : > { %v941_v50 = vmax.f32 %v896_v47, 0.0 }
 0x14d   : > { %v732_v51 = vpop.f32.mrf.mxu0  ;;  %v903_v54 = vpop.f32.mrf.mxu2 }
 0x14e   : > { %v970_v52 = vpack.c.bf16 %v941_v50, %v941_v50  ;;  %v733_v53 = vadd.f32 %v2087_v61, %v732_v51  ;;  %v815_v56 = vpop.f32.mrf.mxu1  ;;  %v904_v57 = vadd.f32 %v903_v54, %v2156_v48 }
 0x150   : > { %1000 = vst.msk [vmem:[%s2101_s12 + $0x4c] sm:$0xf] %vm980_vm1, %v970_v52  ;;  %v816_v9 = vadd.f32 %v815_v56, %v733_v53  ;;  %v944_v58 = vmax.f32 %v904_v57, 0.0 }
 0x152   : > { %v899_v60 = vadd.f32 %v898_v55, %v816_v9  ;;  %v973_v62 = vpack.c.bf16 %v944_v58, %v944_v58 }
 0x154   : > { %v942_v63 = vmax.f32 %v899_v60, 0.0  ;;  %1003 = vst.msk [vmem:[%s2101_s12 + $0x58] sm:$0xf] %vm980_vm1, %v973_v62 }
 0x155   : > { %v734_v0 = vpop.f32.mrf.mxu0  ;;  %v905_v4 = vpop.f32.mrf.mxu2 }
 0x156   : > { %v971_v1 = vpack.c.bf16 %v942_v63, %v942_v63  ;;  %v735_v2 = vadd.f32 %v2087_v61, %v734_v0  ;;  %v817_v5 = vpop.f32.mrf.mxu1  ;;  %v906_v48 = vadd.f32 %v905_v4, %v2163_v59 }
 0x158   : > { %1001 = vst.msk [vmem:[%s2101_s12 + $0x50] sm:$0xf] %vm980_vm1, %v971_v1  ;;  %v818_v27 = vadd.f32 %v817_v5, %v735_v2  ;;  %v945_v6 = vmax.f32 %v906_v48, 0.0 }
 0x15a   : > { %v901_v8 = vadd.f32 %v900_v25, %v818_v27  ;;  %v974_v10 = vpack.c.bf16 %v945_v6, %v945_v6 }
 0x15c   : > { %v943_v11 = vmax.f32 %v901_v8, 0.0  ;;  %1004 = vst.msk [vmem:[%s2101_s12 + $0x5c] sm:$0xf] %vm980_vm1, %v974_v10 }
 0x15d   : > { %v908_v13 = vpop.f32.mrf.mxu2 }
 0x15e   : > { %v972_v12 = vpack.c.bf16 %v943_v11, %v943_v11  ;;  %v909_v14 = vadd.f32 %v908_v13, %v2170_v7 }
 0x160   : > { %1002 = vst.msk [vmem:[%s2101_s12 + $0x54] sm:$0xf] %vm980_vm1, %v972_v12  ;;  %v946_v61 = vmax.f32 %v909_v14, 0.0 }
 0x162   : > { %v975_v15 = vpack.c.bf16 %v946_v61, %v946_v61 }
 0x164   : > { %1005 = vst.msk [vmem:[%s2101_s12 + $0x60] sm:$0xf] %vm980_vm1, %v975_v15 }
 0x165   : > { %v910_v59 = vpop.f32.mrf.mxu2 }
 0x166   : > { %v911_v17 = vadd.f32 %v910_v59, %v2177_v19 }
 0x168   : > { %v947_v39 = vmax.f32 %v911_v17, 0.0  ;;  %1016 = sbr.rel (!%p1922_p4) target bundleno = 441 (0x1b9), region = 36 }
 0x16a   : > { %v976_v3 = vpack.c.bf16 %v947_v39, %v947_v39 }
 0x16c   : > { %1006 = vst.msk [vmem:[%s2101_s12 + $0x64] sm:$0xf] %vm980_vm1, %v976_v3 }
 0x16d   : > { %s2381_s21 = smov (!%p1019_p8, %s1018_s21), 29 }
 0x16e   : > { %s1600_s5 = sshll.u32 %s2381_s21, 2 }
 0x16f   : > { %p1603_p9 = scmp.eq.s32.totalorder %s1600_s5, 0 }
 0x170   : > { %1783 = sdivrem.u32 (!%p1603_p9), %s2381_s21, 29 }
 0x171   : > { %1027 = sbr.rel (%p1603_p9) target bundleno = 441 (0x1b9), region = 40 }
 0x179   : > { %s2248_s20 = spop.drf %1783 }
 0x17a   : > { %s1785_s6 = spop.drf %1783  ;;  %p1604_p10 = scmp.le.s32.totalorder %s2248_s20, 0 }
 0x17b   : > { %s2372_s15 = smov (!%p1604_p10), %s2242_s4  ;;  %s2373_s27 = smov (!%p1604_p10), %s2101_s12 }
 0x17c   : > { %1296 = sbr.rel (%p1604_p10) target bundleno = 415 (0x19f), region = 112  ;;  %s2257_s7 = smov (!%p1604_p10), 0  }
 0x17d   : > { %s2259_s8 = smov (!%p1604_p10), 0  }
 0x181 LB: >> { %v1045_v7 = vld [vmem:[%s1851_s27] sm:$0xf]  ;;  %v1047_v19 = vld [vmem:[%s1851_s27 + $0x4] sm:$0xf]  ;;  %v1049_v18 = vld [vmem:[%s1851_s27 + $0x8] sm:$0xf]  ;;  %s1859_s8 = sphi %s2259_s8, %s1039_s8   ;;  %s1855_s7 = sphi %s2257_s7, %s2376_s7   ;;  %s1851_s27 = sphi %s2373_s27, %s2375_s27   ;;  %s1847_s15 = sphi %s2372_s15, %s2374_s15  }
 0x182   : >> { %1046 = vst [vmem:[%s1847_s15] sm:$0xf] %v1045_v7  ;;  %v1051_v20 = vld [vmem:[%s1851_s27 + $0xc] sm:$0xf]  ;;  %v1053_v21 = vld [vmem:[%s1851_s27 + $0x10] sm:$0xf]  ;;  %s1103_s9 = sadd.s32 1, %s1855_s7 }
 0x183   : >> { %1048 = vst [vmem:[%s1847_s15 + $0x4] sm:$0xf] %v1047_v19  ;;  %v1055_v22 = vld [vmem:[%s1851_s27 + $0x14] sm:$0xf]  ;;  %v1057_v23 = vld [vmem:[%s1851_s27 + $0x18] sm:$0xf]  ;;  %p1104_p11 = scmp.ge.s32.totalorder %s1103_s9, %s2248_s20 }
 0x184   : >> { %1050 = vst [vmem:[%s1847_s15 + $0x8] sm:$0xf] %v1049_v18  ;;  %v1059_v24 = vld [vmem:[%s1851_s27 + $0x1c] sm:$0xf]  ;;  %v1061_v26 = vld [vmem:[%s1851_s27 + $0x20] sm:$0xf] }
 0x185   : >> { %1052 = vst [vmem:[%s1847_s15 + $0xc] sm:$0xf] %v1051_v20  ;;  %v1063_v28 = vld [vmem:[%s1851_s27 + $0x24] sm:$0xf]  ;;  %v1065_v29 = vld [vmem:[%s1851_s27 + $0x28] sm:$0xf] }
 0x186   : >> { %1054 = vst [vmem:[%s1847_s15 + $0x10] sm:$0xf] %v1053_v21  ;;  %v1067_v30 = vld [vmem:[%s1851_s27 + $0x2c] sm:$0xf]  ;;  %v1069_v55 = vld [vmem:[%s1851_s27 + $0x30] sm:$0xf] }
 0x187   : >> { %1056 = vst [vmem:[%s1847_s15 + $0x14] sm:$0xf] %v1055_v22  ;;  %v1071_v16 = vld [vmem:[%s1851_s27 + $0x34] sm:$0xf]  ;;  %v1073_v31 = vld [vmem:[%s1851_s27 + $0x38] sm:$0xf] }
 0x188   : >> { %1058 = vst [vmem:[%s1847_s15 + $0x18] sm:$0xf] %v1057_v23  ;;  %v1075_v32 = vld [vmem:[%s1851_s27 + $0x3c] sm:$0xf]  ;;  %v1077_v33 = vld [vmem:[%s1851_s27 + $0x40] sm:$0xf] }
 0x189   : >> { %1060 = vst [vmem:[%s1847_s15 + $0x1c] sm:$0xf] %v1059_v24  ;;  %s2383_s9 = smov (%p1104_p11, %s1103_s9), 0  ;;  %v1079_v34 = vld [vmem:[%s1851_s27 + $0x44] sm:$0xf]  ;;  %s1039_s8 = sadd.s32 1, %s1859_s8  }
 0x18a   : >> { %1062 = vst [vmem:[%s1847_s15 + $0x20] sm:$0xf] %v1061_v26  ;;  %v1081_v35 = vld [vmem:[%s1851_s27 + $0x48] sm:$0xf]  ;;  %s1106_s10 = smul.u32 116, %s2383_s9  ;;  %p1038_p12 = scmp.ge.s32.totalorder %s1039_s8, %s2248_s20 }
 0x18b   : >> { %1064 = vst [vmem:[%s1847_s15 + $0x24] sm:$0xf] %v1063_v28  ;;  %v1083_v36 = vld [vmem:[%s1851_s27 + $0x4c] sm:$0xf]  ;;  %v1085_v37 = vld [vmem:[%s1851_s27 + $0x50] sm:$0xf]  ;;  %s2376_s7 = smov %s2383_s9 }
 0x18c   : >> { %1066 = vst [vmem:[%s1847_s15 + $0x28] sm:$0xf] %v1065_v29  ;;  %s1108_s11 = scalar_lea.vmem %s2101_s12, %s1106_s10 [#allocation2]   ;;  %s1109_s14 = scalar_lea.vmem %s2242_s4, %s1106_s10   ;;  %v1087_v38 = vld [vmem:[%s1851_s27 + $0x54] sm:$0xf]  ;;  %v1089_v40 = vld [vmem:[%s1851_s27 + $0x58] sm:$0xf] }
 0x18d   : >> { %1068 = vst [vmem:[%s1847_s15 + $0x2c] sm:$0xf] %v1067_v30  ;;  %v1091_v41 = vld [vmem:[%s1851_s27 + $0x5c] sm:$0xf]  ;;  %v1093_v42 = vld [vmem:[%s1851_s27 + $0x60] sm:$0xf] }
 0x18e   : >> { %1070 = vst [vmem:[%s1847_s15 + $0x30] sm:$0xf] %v1069_v55  ;;  %v1095_v43 = vld [vmem:[%s1851_s27 + $0x64] sm:$0xf]  ;;  %v1097_v25 = vld [vmem:[%s1851_s27 + $0x68] sm:$0xf] }
 0x18f   : >> { %1072 = vst [vmem:[%s1847_s15 + $0x34] sm:$0xf] %v1071_v16  ;;  %v1099_v44 = vld [vmem:[%s1851_s27 + $0x6c] sm:$0xf]  ;;  %v1101_v45 = vld [vmem:[%s1851_s27 + $0x70] sm:$0xf]  ;;  %s2375_s27 = smov %s1108_s11 }
 0x190   : >> { %1074 = vst [vmem:[%s1847_s15 + $0x38] sm:$0xf] %v1073_v31 }
 0x191   : >> { %1076 = vst [vmem:[%s1847_s15 + $0x3c] sm:$0xf] %v1075_v32 }
 0x192   : >> { %1078 = vst [vmem:[%s1847_s15 + $0x40] sm:$0xf] %v1077_v33 }
 0x193   : >> { %1080 = vst [vmem:[%s1847_s15 + $0x44] sm:$0xf] %v1079_v34 }
 0x194   : >> { %1082 = vst [vmem:[%s1847_s15 + $0x48] sm:$0xf] %v1081_v35 }
 0x195   : >> { %1084 = vst [vmem:[%s1847_s15 + $0x4c] sm:$0xf] %v1083_v36 }
 0x196   : >> { %1086 = vst [vmem:[%s1847_s15 + $0x50] sm:$0xf] %v1085_v37 }
 0x197   : >> { %1088 = vst [vmem:[%s1847_s15 + $0x54] sm:$0xf] %v1087_v38 }
 0x198   : >> { %1090 = vst [vmem:[%s1847_s15 + $0x58] sm:$0xf] %v1089_v40 }
 0x199   : >> { %1092 = vst [vmem:[%s1847_s15 + $0x5c] sm:$0xf] %v1091_v41 }
 0x19a   : >> { %1094 = vst [vmem:[%s1847_s15 + $0x60] sm:$0xf] %v1093_v42  ;;  %1041 = sbr.rel (!%p1038_p12) target bundleno = 385 (0x181), region = 118 }
 0x19b   : >> { %1096 = vst [vmem:[%s1847_s15 + $0x64] sm:$0xf] %v1095_v43 }
 0x19c   : >> { %1098 = vst [vmem:[%s1847_s15 + $0x68] sm:$0xf] %v1097_v25 }
 0x19d   : >> { %1100 = vst [vmem:[%s1847_s15 + $0x6c] sm:$0xf] %v1099_v44 }
 0x19e   : >> { %1102 = vst [vmem:[%s1847_s15 + $0x70] sm:$0xf] %v1101_v45  ;;  %s2374_s15 = smov %s1109_s14 }
 0x19f PF: > { %1786 = sdivrem.u32 %s2381_s21, 29 }
 0x1a0   : > { %s1605_s17 = smul.u32 116, %s2248_s20 }
 0x1a2   : > { %s2352_s18 = scalar_lea.vmem %s2101_s12, %s1605_s17 [#allocation2]   ;;  %s1116_s22 = scalar_lea.vmem %s2242_s4, %s1605_s17  }
 0x1a8   : > { %s1787_s23 = spop.drf %1786 }
 0x1a9   : > { %s1788_s24 = spop.drf %1786 }
 0x1aa   : > { %p1607_p13 = scmp.le.s32.totalorder %s1788_s24, 0 }
 0x1ab   : > { %s1861_s25 = smov (!%p1607_p13), %s1116_s22   ;;  %s1865_s26 = smov (!%p1607_p13), %s2352_s18  }
 0x1ac   : > { %1310 = sbr.rel (%p1607_p13) target bundleno = 441 (0x1b9), region = 123  ;;  %s1869_s28 = smov (!%p1607_p13), 0  }
 0x1ad   : > { %s1873_s29 = smov (!%p1607_p13), 0  }
 0x1b1 LB: >> { %v1126_v46 = vld [vmem:[%s1867_s26] sm:$0xf]  ;;  %s1128_s12 = sadd.s32 1, %s1871_s28  ;;  %s1120_s29 = sadd.s32 1, %s1875_s29   ;;  %s1875_s29 = sphi %s1873_s29, %s1120_s29   ;;  %s1871_s28 = sphi %s1869_s28, %s1870_s28   ;;  %s1867_s26 = sphi %s1865_s26, %s1133_s26   ;;  %s1863_s25 = sphi %s1861_s25, %s1134_s25  }
 0x1b2   : >> { %1127 = vst [vmem:[%s1863_s25] sm:$0xf] %v1126_v46  ;;  %p1129_p0 = scmp.ge.s32.totalorder %s1128_s12, %s1788_s24  ;;  %p1119_p1 = scmp.ge.s32.totalorder %s1120_s29, %s1788_s24 }
 0x1b4   : >> { %s2385_s12 = smov (%p1129_p0, %s1128_s12), 0  ;;  %1122 = sbr.rel (!%p1119_p1) target bundleno = 433 (0x1b1), region = 129 }
 0x1b5   : >> { %s1608_s21 = sshll.u32 %s2385_s12, 2  ;;  %s1870_s28 = smov %s2385_s12  }
 0x1b6   : >> { %s1133_s26 = scalar_lea.vmem %s2352_s18, %s1608_s21 [#allocation2]   ;;  %s1134_s25 = scalar_lea.vmem %s1116_s22, %s1608_s21  }
 0x1b9 PF: > { %p10_p2 = scmp.ge.s32.totalorder %s1912_s16, 4   ;;  %s2377_s12 = smov %s1839_s13 }
 0x1ba   : > { %s2378_s13 = smov %s1920_s19  ;;  %s2379_s14 = smov %s1912_s16 }
 0x1bb   :  { %12 = sbr.rel (!%p10_p2) target bundleno = 2 (0x2), region = 140 }

// kernel: stem_forward.12
= control target key start
LH: loop header
LB: loop body
LE: loop exit
PB: predicated region body
PF: predicated region fallthrough
CT: control target
= control target key end

     0   :  { %s1972_s12 = smov 0   ;;  %s1974_s13 = smov 0   ;;  %s2497_s0 = inlined_call_operand.vmem [shape: bf16[98,576], index: 0, kind: input, shape index: {}]   ;;  %s2498_s1 = inlined_call_operand.vmem [shape: bf16[576,96], index: 1, kind: input, shape index: {}]   ;;  %s2499_s2 = inlined_call_operand.vmem [shape: f32[1,96], index: 2, kind: input, shape index: {}]   ;;  %s2500_s3 = inlined_call_operand.vmem [shape: bf16[98,160], index: 3, kind: output, shape index: {}]  }
   0x1   :  { %s1976_s14 = smov 0  }
   0x2 LB: > { %s1985_s15 = sadd.s32 4294967295, %s1916_s14   ;;  %s1987_s16 = sadd.s32 1, %s1916_s14   ;;  %s1916_s14 = sphi %s1976_s14, %s2509_s14   ;;  %s1912_s13 = sphi %s1974_s13, %s2508_s13   ;;  %s1908_s12 = sphi %s1972_s12, %s2507_s12  }
   0x3   : > { %s85_s17 = ssub.s32 %s1916_s14, %s1987_s16  ;;  %s88_s18 = sadd.s32 1, %s1912_s13 }
   0x4   : > { %p86_p0 = scmp.eq.s32.totalorder %s85_s17, 0  ;;  %p98_p1 = scmp.ne.s32.totalorder %s1912_s13, %s1908_s12 }
   0x5   : > { %p99_p2 = scmp.eq.s32.totalorder %s1985_s15, 1  ;;  %p1432_p3 = scmp.ge.s32.totalorder %s1916_s14, 1 }
   0x6   : > { %s1995_s19 = scalar_select %p86_p0, %s1912_s13, %s88_s18  }
   0x7   : > { %p1997_p4 = por %p99_p2, %p98_p1  ;;  %p149_p5 = scmp.lt.s32.totalorder %s1916_s14, 3 }
   0x9   : > { %p150_p6 = pnand %p1432_p3, %p149_p5 }
   0xa   : > { %s2005_s23 = smul.u32 (!%p150_p6), 7, %s1985_s15  ;;  %s1950_s18 = smov (!%p150_p6), 64  }
   0xb   : > { %153 = sbr.rel (%p150_p6) target bundleno = 374 (0x176), region = 32  ;;  %s175_s27 = sand.u32 (!%p150_p6), 1, %s1908_s12  }
   0xc   : > { %p184_p7 = scmp.lt.s32.totalorder (!%p150_p6), %s2005_s23, 12 }
  0x10   : > { %v1678_v0 = vld [vmem:[%s2498_s1 + $0x38] sm:$0xff]  ;;  %v1677_v1 = vld [vmem:[%s2498_s1 + $0x30] sm:$0xff]  ;;  %s185_s28 = scalar_select %p184_p7, %s2005_s23, 12  ;;  %v1676_v4 = vld [vmem:[%s2498_s1 + $0x28] sm:$0xff]  ;;  %vm607_vm0 = vcmask 523264   ;;  %vm774_vm1 = vcmask 781312  }
  0x11   : > { %1711 = vmatpush.bf16.msra.mxu1 %v1678_v0  ;;  %1712 = vmatpush.bf16.msra.mxu2 %v1678_v0  ;;  %v1702_v2 = vld [vmem:[%s2498_s1 + $0xf8] sm:$0xff]  ;;  %v1701_v3 = vld [vmem:[%s2498_s1 + $0xf0] sm:$0xff]  ;;  %v1700_v5 = vld [vmem:[%s2498_s1 + $0xe8] sm:$0xff]  ;;  %vm1175_vm2 = vcmask 1044224   ;;  %vm1176_vm3 = vcmask 261124   ;;  %vm1160_vm4 = vcmask 785408  }
  0x12   : > { %620 = vmatpush.bf16.msra.mxu0 %v1678_v0  ;;  %704 = vmatpush.bf16.msra.mxu3 %v1702_v2  ;;  %s1728_s6 = smul.u32 20, %s185_s28  ;;  %v1675_v13 = vld [vmem:[%s2498_s1 + $0x20] sm:$0xff]  ;;  %v1674_v22 = vld [vmem:[%s2498_s1 + $0x18] sm:$0xff]  ;;  %v1673_v29 = vld [vmem:[%s2498_s1 + $0x10] sm:$0xff]  ;;  %s1193_s12 = ssub.s32 (%p1997_p4), 13, %s2005_s23 }
  0x13   : > { %v1699_v21 = vld [vmem:[%s2498_s1 + $0xe0] sm:$0xff]  ;;  %v1698_v27 = vld [vmem:[%s2498_s1 + $0xd8] sm:$0xff]  ;;  %v1697_v31 = vld [vmem:[%s2498_s1 + $0xd0] sm:$0xff]  ;;  %s1727_s28 = smul.u32 56, %s175_s27  ;;  %p1194_p8 = scmp.lt.s32.totalorder (%p1997_p4), %s1193_s12, 7 }
  0x14   : > { %s2024_s9 = scalar_lea.vmem %s2497_s0, %s1728_s6  ;;  %v1672_v32 = vld [vmem:[%s2498_s1 + $0x8] sm:$0xff]  ;;  %v1671_v36 = vld [vmem:[%s2498_s1] sm:$0xff]  ;;  %v1694_v42 = vld [vmem:[%s2498_s1 + $0xb8] sm:$0xff]  ;;  %s1710_s30 = smul.u32 (%p1997_p4), 56, %s1985_s15 }
  0x15   : > { %1713 = vmatpush.bf16.msra.mxu1 %v1677_v1  ;;  %1714 = vmatpush.bf16.msra.mxu2 %v1677_v1  ;;  %v2030_v6 = vld [vmem:[%s2024_s9 + $0x50] sm:$0xff]  ;;  %v2033_v7 = vld [vmem:[%s2024_s9 + $0x64] sm:$0xff]  ;;  %v2054_v16 = vld [vmem:[%s2024_s9 + $0x78] sm:$0xff]  ;;  %s2381_s29 = scalar_lea.vmem [#allocation2], %s1727_s28  }
  0x16   : > { %621 = vmatpush.bf16.msra.mxu0 %v1677_v1  ;;  %v2036_v8 = vld [vmem:[%s2024_s9] sm:$0xff]  ;;  %705 = vmatpush.bf16.msra.mxu3 %v1701_v3  ;;  %v786_v9 = vunpack.c.l.bf16 %v2030_v6  ;;  %v787_v10 = vunpack.c.l.bf16 %v2033_v7  ;;  %v2041_v11 = vld [vmem:[%s2024_s9 + $0x14] sm:$0xff]  ;;  %v2051_v15 = vld [vmem:[%s2024_s9 + $0x8] sm:$0xff]  ;;  %v788_v23 = vunpack.c.l.bf16 %v2054_v16  ;;  %v350_v39 = vunpack.c.l.b16 %v2054_v16  ;;  %s2444_s6 = scalar_lea.vmem (%p1997_p4), %s2500_s3, %s1710_s30  }
  0x17   : > { %v782_v12 = vunpack.c.l.bf16 %v2036_v8  ;;  %v783_v14 = vunpack.c.l.bf16 %v2041_v11  ;;  %880 = vrot.lane.b32.xlu2 %v2036_v8, %s1950_s18  ;;  %v2061_v18 = vld [vmem:[%s2024_s9 + $0x28] sm:$0xff]  ;;  %v2064_v19 = vld [vmem:[%s2024_s9 + $0x3c] sm:$0xff]  ;;  %v936_v24 = vunpack.c.l.bf16 %v2051_v15  ;;  %v2110_v34 = vld [vmem:[%s2024_s9 + $0x30] sm:$0xff] }
  0x18   : > { %v1830_v17 = vpack.i.bf16 %v787_v10, %v786_v9  ;;  %v784_v25 = vunpack.c.l.bf16 %v2061_v18  ;;  %v785_v26 = vunpack.c.l.bf16 %v2064_v19  ;;  %v2107_v33 = vld [vmem:[%s2024_s9 + $0x1c] sm:$0xff]  ;;  %v1696_v35 = vld [vmem:[%s2498_s1 + $0xc8] sm:$0xff]  ;;  %v938_v41 = vunpack.c.l.bf16 %v2110_v34  ;;  %v1658_v47 = vld [vmem:[%s2024_s9 + $0x10] sm:$0xf0] }
  0x19   : > { %1715 = vmatpush.bf16.msra.mxu1 %v1676_v4  ;;  %1716 = vmatpush.bf16.msra.mxu2 %v1676_v4  ;;  %v1820_v20 = vpack.i.bf16 %v783_v14, %v782_v12  ;;  %v1835_v28 = vpack.i.bf16 %v936_v24, %v788_v23  ;;  %v1456_v37 = vld [vmem:[%s2024_s9 + $0x28] sm:$0xf]  ;;  %v1663_v38 = vld [vmem:[%s2024_s9 + $0x38] sm:$0xf0]  ;;  %v937_v40 = vunpack.c.l.bf16 %v2107_v33  ;;  %v370_v45 = vpack.c.b16 %v350_v39, %v350_v39  ;;  %v1436_v46 = vld [vmem:[%s2024_s9] sm:$0xf] }
  0x1a   : > { %622 = vmatpush.bf16.msra.mxu0 %v1676_v4  ;;  %706 = vmatpush.bf16.msra.mxu3 %v1700_v5  ;;  %v1825_v30 = vpack.i.bf16 %v785_v26, %v784_v25  ;;  %v1686_v43 = vld [vmem:[%s2498_s1 + $0x78] sm:$0xff]  ;;  %v1457_v44 = vor.u32 %v1663_v38, %v1456_v37  ;;  %v1693_v49 = vld [vmem:[%s2498_s1 + $0xb0] sm:$0xff]  ;;  %v1695_v51 = vld [vmem:[%s2498_s1 + $0xc0] sm:$0xff]  ;;  %v1437_v55 = vor.u32 %v1658_v47, %v1436_v46 }
  0x1b   : > { %1831 = vrot.lane.b32.xlu1 %v1830_v17, %s1950_s18  ;;  %1821 = vrot.lane.b32.xlu0 %v1820_v20, %s1950_s18  ;;  %v1706_v48 = vld [vmem:[%s2498_s1 + $0x118] sm:$0xff]  ;;  %v1840_v50 = vpack.i.bf16 %v938_v41, %v937_v40  ;;  %v1685_v52 = vld [vmem:[%s2498_s1 + $0x70] sm:$0xff]  ;;  %vm2405_vm5 = vmor %vm1176_vm3, %vm1175_vm2 }
  0x1c   : > { %v1657_v53 = vld [vmem:[%s2024_s9 + $0xc] sm:$0xf]  ;;  %v1446_v54 = vld [vmem:[%s2024_s9 + $0x1c] sm:$0xf0]  ;;  %v1705_v56 = vld [vmem:[%s2498_s1 + $0x110] sm:$0xff] }
  0x1d   : > { %1717 = vmatpush.bf16.msra.mxu1 %v1675_v13  ;;  %1718 = vmatpush.bf16.msra.mxu2 %v1675_v13  ;;  %v1692_v57 = vld [vmem:[%s2498_s1 + $0xa8] sm:$0xff]  ;;  %v2166_v59 = vld [vmem:[%s2024_s9 + $0x80] sm:$0xff]  ;;  %v1449_v60 = vor.u32 %v1657_v53, %v1446_v54  ;;  %v2175_v63 = vld [vmem:[%s2024_s9 + $0x58] sm:$0xff] }
  0x1e   : > { %623 = vmatpush.bf16.msra.mxu0 %v1675_v13  ;;  %707 = vmatpush.bf16.msra.mxu3 %v1699_v21  ;;  %v2163_v58 = vld [vmem:[%s2024_s9 + $0x6c] sm:$0xff]  ;;  %v2172_v62 = vld [vmem:[%s2024_s9 + $0x44] sm:$0xff]  ;;  %v942_v1 = vunpack.c.l.bf16 %v2166_v59  ;;  %v940_v4 = vunpack.c.l.bf16 %v2175_v63  ;;  %v1662_v37 = vld [vmem:[%s2024_s9 + $0x34] sm:$0xf] }
  0x1f   : > { %882 = vrot.lane.b32.xlu2 %v2041_v11, %s1950_s18  ;;  %v1684_v61 = vld [vmem:[%s2498_s1 + $0x68] sm:$0xff]  ;;  %v941_v0 = vunpack.c.l.bf16 %v2163_v58  ;;  %v939_v3 = vunpack.c.l.bf16 %v2172_v62  ;;  %v1691_v5 = vld [vmem:[%s2498_s1 + $0xa0] sm:$0xff]  ;;  %v1476_v20 = vld [vmem:[%s2024_s9 + $0x50] sm:$0xf] }
  0x20   : > { %v1704_v2 = vld [vmem:[%s2498_s1 + $0x108] sm:$0xff]  ;;  %v1683_v13 = vld [vmem:[%s2498_s1 + $0x60] sm:$0xff]  ;;  %v1472_v53 = vld [vmem:[%s2024_s9 + $0x38] sm:$0xf] }
  0x21   : > { %1719 = vmatpush.bf16.msra.mxu1 %v1674_v22  ;;  %1720 = vmatpush.bf16.msra.mxu2 %v1674_v22  ;;  %v1850_v17 = vpack.i.bf16 %v942_v1, %v941_v0  ;;  %v1668_v21 = vld [vmem:[%s2024_s9 + $0x60] sm:$0xf0]  ;;  %v1466_v38 = vld [vmem:[%s2024_s9 + $0x44] sm:$0xf0]  ;;  %v1665_v54 = vld [vmem:[%s2024_s9 + $0x48] sm:$0xf0] }
  0x22   : > { %624 = vmatpush.bf16.msra.mxu0 %v1674_v22  ;;  %708 = vmatpush.bf16.msra.mxu3 %v1698_v27  ;;  %v1703_v22 = vld [vmem:[%s2498_s1 + $0x100] sm:$0xff]  ;;  %v1845_v27 = vpack.i.bf16 %v940_v4, %v939_v3  ;;  %v1444_v47 = vld [vmem:[%s2024_s9 + $0x8] sm:$0xf] }
  0x23   : > { %1836 = vrot.lane.b32.xlu1 %v1835_v28, %s1950_s18  ;;  %1826 = vrot.lane.b32.xlu0 %v1825_v30, %s1950_s18  ;;  %v1690_v28 = vld [vmem:[%s2498_s1 + $0x98] sm:$0xff]  ;;  %v1477_v30 = vor.u32 %v1668_v21, %v1476_v20  ;;  %v1679_v46 = vld [vmem:[%s2498_s1 + $0x40] sm:$0xff] }
  0x24   : > { %v1492_v21 = vld [vmem:[%s2024_s9 + $0x60] sm:$0xf] }
  0x25   : > { %1721 = vmatpush.bf16.msra.mxu1 %v1673_v29  ;;  %1722 = vmatpush.bf16.msra.mxu2 %v1673_v29 }
  0x26   : > { %625 = vmatpush.bf16.msra.mxu0 %v1673_v29  ;;  %709 = vmatpush.bf16.msra.mxu3 %v1697_v31  ;;  %v1682_v29 = vld [vmem:[%s2498_s1 + $0x58] sm:$0xff]  ;;  %v1452_v31 = vld [vmem:[%s2024_s9 + $0x10] sm:$0xf] }
  0x27   : > { %888 = vrot.lane.b32.xlu2 %v2030_v6, %s1950_s18 }
  0x29   : > { %1723 = vmatpush.bf16.msra.mxu1 %v1672_v32  ;;  %1724 = vmatpush.bf16.msra.mxu2 %v1672_v32 }
  0x2a   : > { %626 = vmatpush.bf16.msra.mxu0 %v1672_v32  ;;  %710 = vmatpush.bf16.msra.mxu3 %v1696_v35  ;;  %v1660_v32 = vld [vmem:[%s2024_s9 + $0x20] sm:$0xf0]  ;;  %v1689_v35 = vld [vmem:[%s2498_s1 + $0x90] sm:$0xff] }
  0x2b   : > { %886 = vrot.lane.b32.xlu1 %v2064_v19, %s1950_s18  ;;  %884 = vrot.lane.b32.xlu0 %v2061_v18, %s1950_s18  ;;  %v1453_v39 = vor.u32 %v1660_v32, %v1452_v31  ;;  %v1669_v31 = vld [vmem:[%s2024_s9 + $0x68] sm:$0xf0]  ;;  %v1666_v32 = vld [vmem:[%s2024_s9 + $0x54] sm:$0xf] }
  0x2d   : > { %1725 = vmatpush.bf16.msra.mxu1 %v1671_v36  ;;  %1726 = vmatpush.bf16.msra.mxu2 %v1671_v36 }
  0x2e   : > { %627 = vmatpush.bf16.msra.mxu0 %v1671_v36  ;;  %711 = vmatpush.bf16.msra.mxu3 %v1695_v51  ;;  %v1681_v36 = vld [vmem:[%s2498_s1 + $0x50] sm:$0xff] }
  0x2f   : > { %1841 = vrot.lane.b32.xlu2 %v1840_v50, %s1950_s18  ;;  %v1438_v50 = vld [vmem:[%s2024_s9 + $0x14] sm:$0xf0] }
  0x30   : > { %633 = vmatmul.bf16.vlgmr.msra.gmra.mxu1 %v1457_v44  ;;  %643 = vmatmul.bf16.vlgmr.msra.gmra.mxu2 %v370_v45  ;;  %v1680_v44 = vld [vmem:[%s2498_s1 + $0x48] sm:$0xff]  ;;  %v1687_v45 = vld [vmem:[%s2498_s1 + $0x80] sm:$0xff] }
  0x31   : > { %676 = vmatpush.bf16.msrb.mxu2 %v1694_v42  ;;  %648 = vmatpush.bf16.msrb.mxu1 %v1686_v43  ;;  %v1469_v42 = vor.u32 %v1662_v37, %v1466_v38  ;;  %v1688_v43 = vld [vmem:[%s2498_s1 + $0x88] sm:$0xff] }
  0x32   : > { %736 = vmatpush.bf16.msrb.mxu0 %v1706_v48  ;;  %712 = vmatmul.bf16.vlgmr.msra.gmra.mxu3 %v1449_v60  ;;  %v1659_v48 = vld [vmem:[%s2024_s9 + $0x18] sm:$0xf0] }
  0x33   : > { %628 = vmatmul.bf16.vlgmr.msra.gmra.mxu0 %v1437_v55  ;;  %892 = vrot.lane.b32.xlu1 %v2054_v16, %s1950_s18  ;;  %v1445_v51 = vor.u32 %v1659_v48, %v1444_v47  ;;  %v1667_v55 = vld [vmem:[%s2024_s9 + $0x5c] sm:$0xf] }
  0x34   : > { %890 = vrot.lane.b32.xlu0 %v2033_v7, %s1950_s18 }
  0x35   : > { %677 = vmatpush.bf16.msrb.mxu2 %v1693_v49  ;;  %649 = vmatpush.bf16.msrb.mxu1 %v1685_v52  ;;  %v1656_v49 = vld [vmem:[%s2024_s9 + $0x4] sm:$0xf] }
  0x36   : > { %737 = vmatpush.bf16.msrb.mxu0 %v1705_v56  ;;  %v1441_v52 = vor.u32 %v1656_v49, %v1438_v50  ;;  %v1486_v56 = vld [vmem:[%s2024_s9 + $0x6c] sm:$0xf0] }
  0x37   : > { %1055 = vrot.lane.b32.xlu2 %v2051_v15, %s1950_s18  ;;  %v1489_v60 = vor.u32 %v1667_v55, %v1486_v56 }
  0x39   : > { %678 = vmatpush.bf16.msrb.mxu2 %v1692_v57  ;;  %650 = vmatpush.bf16.msrb.mxu1 %v1684_v61  ;;  %v1473_v57 = vor.u32 %v1665_v54, %v1472_v53  ;;  %v1464_v61 = vld [vmem:[%s2024_s9 + $0x30] sm:$0xf] }
  0x3a   : > { %738 = vmatpush.bf16.msrb.mxu0 %v1704_v2  ;;  %v1664_v2 = vld [vmem:[%s2024_s9 + $0x40] sm:$0xf0] }
  0x3b   : > { %1851 = vrot.lane.b32.xlu1 %v1850_v17, %s1950_s18  ;;  %v1465_v17 = vor.u32 %v1664_v2, %v1464_v61 }
  0x3c   : > { %1846 = vrot.lane.b32.xlu0 %v1845_v27, %s1950_s18  ;;  %v353_v27 = vunpack.c.h.b16 %v2166_v59 }
  0x3d   : > { %679 = vmatpush.bf16.msrb.mxu2 %v1691_v5  ;;  %651 = vmatpush.bf16.msrb.mxu1 %v1683_v13  ;;  %v1661_v5 = vld [vmem:[%s2024_s9 + $0x2c] sm:$0xf]  ;;  %v1458_v13 = vld [vmem:[%s2024_s9 + $0x3c] sm:$0xf0] }
  0x3e   : > { %739 = vmatpush.bf16.msrb.mxu0 %v1703_v22  ;;  %v1461_v20 = vor.u32 %v1661_v5, %v1458_v13  ;;  %v1670_v22 = vld [vmem:[%s2024_s9 + $0x70] sm:$0xf0]  ;;  %v1013_v5 = vrot.slane %v2051_v15, 4  ;;  %v841_v15 = vrot.slane %v2064_v19, 4 }
  0x3f   : > { %1061 = vrot.lane.b32.xlu2 %v2172_v62, %s1950_s18 }
  0x40   : > { %638 = vmatmul.bf16.gmra.mxu1 %v1477_v30  ;;  %v1484_v30 = vld [vmem:[%s2024_s9 + $0x58] sm:$0xf] }
  0x41   : > { %680 = vmatpush.bf16.msrb.mxu2 %v1690_v28  ;;  %652 = vmatpush.bf16.msrb.mxu1 %v1682_v29  ;;  %v1493_v28 = vor.u32 %v1670_v22, %v1492_v21  ;;  %v373_v29 = vpack.c.b16 %v353_v27, %v353_v27  ;;  %v1485_v37 = vor.u32 %v1669_v31, %v1484_v30 }
  0x42   : > { %717 = vmatmul.bf16.gmra.mxu3 %v1469_v42 }
  0x43   : > { %1638 = vmatmul.msk.bf16.vlgmr.msrb.gmra.mxu0 %vm607_vm0, %v1453_v39  ;;  %1059 = vrot.lane.b32.xlu1 %v2110_v34, %s1950_s18 }
  0x44   : > { %1057 = vrot.lane.b32.xlu0 %v2107_v33, %s1950_s18 }
  0x45   : > { %681 = vmatpush.bf16.msrb.mxu2 %v1689_v35  ;;  %653 = vmatpush.bf16.msrb.mxu1 %v1681_v36  ;;  %v1478_v35 = vld [vmem:[%s2024_s9 + $0x64] sm:$0xf0] }
  0x46   : > { %v2274_v36 = vld [vmem:[%s2024_s9 + $0x88] sm:$0xf]  ;;  %v1481_v38 = vor.u32 %v1666_v32, %v1478_v35 }
  0x47   : > { %1067 = vrot.lane.b32.xlu2 %v2166_v59, %s1950_s18  ;;  %v354_v39 = vunpack.c.l.b16 %v2274_v36 }
  0x49   : > { %682 = vmatpush.bf16.msrb.mxu2 %v1688_v43  ;;  %654 = vmatpush.bf16.msrb.mxu1 %v1680_v44  ;;  %v374_v42 = vpack.c.b16 %v354_v39, %v354_v39  ;;  %v352_v44 = vunpack.c.l.b16 %v2166_v59 }
  0x4b   : > { %1065 = vrot.lane.b32.xlu1 %v2163_v58, %s1950_s18 }
  0x4c   : > { %1063 = vrot.lane.b32.xlu0 %v2175_v63, %s1950_s18  ;;  %s1951_s18 = smov 96  }
  0x4d   : > { %683 = vmatpush.bf16.msrb.mxu2 %v1687_v45  ;;  %655 = vmatpush.bf16.msrb.mxu1 %v1679_v46  ;;  %v351_v45 = vunpack.c.h.b16 %v2054_v16  ;;  %v372_v46 = vpack.c.b16 %v352_v44, %v352_v44  ;;  %v844_v44 = vrot.slane %v2054_v16, 4 }
  0x4f   : > { %v371_v47 = vpack.c.b16 %v351_v45, %v351_v45 }
  0x50   : > { %684 = vmatmul.bf16.vlgmr.msrb.gmra.mxu2 %v1445_v51  ;;  %656 = vmatmul.bf16.vlgmr.msrb.gmra.mxu1 %v1441_v52  ;;  %v838_v51 = vrot.slane %v2036_v8, 4 }
  0x52   : > { %722 = vmatmul.bf16.gmra.mxu3 %v1489_v60  ;;  %v852_v55 = vunpack.c.l.bf16 %v838_v51 }
  0x53   : > { %1639 = vmatmul.msk.bf16.gmra.mxu0 %vm607_vm0, %v1473_v57 }
  0x60   : > { %689 = vmatmul.bf16.gmra.mxu2 %v1465_v17  ;;  %661 = vmatmul.bf16.gmra.mxu1 %v1461_v20 }
  0x62   : > { %727 = vmatmul.bf16.gmra.mxu3 %v373_v29  ;;  %v204_v29 = vld [vmem:[%s2024_s9 + $0x10] sm:$0xf] }
  0x63   : > { %1640 = vmatmul.msk.bf16.gmra.mxu0 %vm607_vm0, %v1493_v28  ;;  %v1027_v28 = vunpack.c.l.bf16 %v1013_v5  ;;  %v1111_v8 = vunpack.c.l.bf16 %v204_v29  ;;  %v843_v29 = vrot.slane %v2033_v7, 4 }
  0x70   : > { %694 = vmatmul.bf16.gmra.mxu2 %v1485_v37  ;;  %666 = vmatmul.bf16.gmra.mxu1 %v1481_v38  ;;  %v839_v37 = vrot.slane %v2041_v11, 4 }
  0x71   : > { %v881_v43 = vpop.permute.xlu2 %880 }
  0x72   : > { %v894_v54 = vrot.slane %v881_v43, 4 }
  0x73   : > { %1641 = vmatmul.msk.bf16.gmra.mxu0 %vm607_vm0, %v374_v42 }
  0x74   : > { %v908_v61 = vunpack.c.l.bf16 %v894_v54  ;;  %v840_v54 = vrot.slane %v2061_v18, 4 }
  0x79   : > { %v883_v48 = vpop.permute.xlu2 %882 }
  0x80   : > { %699 = vmatmul.bf16.gmra.mxu2 %v372_v46  ;;  %671 = vmatmul.bf16.gmra.mxu1 %v371_v47  ;;  %v895_v46 = vrot.slane %v883_v48, 4  ;;  %v853_v47 = vunpack.c.l.bf16 %v839_v37 }
  0x81   : > { %v2280_v49 = vpop.permute.xlu2 %888 }
  0x89   : > { %v2282_v50 = vpop.permute.xlu2 %1841 }
  0x8d   : > { %v2285_v52 = vpop.permute.xlu1 %1831  ;;  %v1822_v53 = vpop.permute.xlu0 %1821 }
  0x8e   : > { %v1823_v56 = vunpack.i.l.bf16 %v1822_v53  ;;  %v1824_v39 = vunpack.i.h.bf16 %v1822_v53  ;;  %v1834_v37 = vunpack.i.h.bf16 %v2285_v52 }
  0x90   : > { %v817_v57 = vmax.f32 %v782_v12, %v1823_v56 }
  0x91   : > { %v1056_v60 = vpop.permute.xlu2 %1055 }
  0x92   : > { %v859_v2 = vmax.f32 %v817_v57, %v852_v55  ;;  %v1069_v20 = vrot.slane %v1056_v60, 4  ;;  %v818_v55 = vmax.f32 %v783_v14, %v1824_v39  ;;  %v858_v57 = vunpack.c.l.bf16 %v844_v44 }
  0x93   : > { %v854_v14 = vunpack.c.l.bf16 %v840_v54  ;;  %v857_v39 = vunpack.c.l.bf16 %v843_v29  ;;  %v1843_v44 = vunpack.i.l.bf16 %v2282_v50  ;;  %v207_v29 = vld [vmem:[%s2024_s9 + $0x24] sm:$0xf] }
  0x94   : > { %v915_v17 = vmax.f32 %v859_v2, %v908_v61  ;;  %v1083_v31 = vunpack.c.l.bf16 %v1069_v20  ;;  %v855_v2 = vunpack.c.l.bf16 %v841_v15  ;;  %v860_v20 = vmax.f32 %v818_v55, %v853_v47 }
  0x95   : > { %v1837_v13 = vpop.permute.xlu1 %1836  ;;  %v1827_v22 = vpop.permute.xlu0 %1826 }
  0x96   : > { %v1839_v21 = vunpack.i.h.bf16 %v1837_v13  ;;  %v943_v27 = vmax.f32 %v915_v17, %v936_v24  ;;  %v1838_v42 = vunpack.i.l.bf16 %v1837_v13  ;;  %v1829_v45 = vunpack.i.h.bf16 %v1827_v22 }
  0x97   : > { %v1828_v51 = vunpack.i.l.bf16 %v1827_v22  ;;  %v842_v13 = vrot.slane %v2030_v6, 4  ;;  %v909_v17 = vunpack.c.l.bf16 %v895_v46 }
  0x98   : > { %v992_v30 = vmax.f32 %v943_v27, %v1839_v21  ;;  %v823_v56 = vmax.f32 %v788_v23, %v1838_v42  ;;  %v820_v48 = vmax.f32 %v785_v26, %v1829_v45  ;;  %v1019_v42 = vrot.slane %v2166_v59, 4 }
  0x99   : > { %v1062_v61 = vpop.permute.xlu2 %1061  ;;  %v819_v11 = vmax.f32 %v784_v25, %v1828_v51  ;;  %v856_v26 = vunpack.c.l.bf16 %v842_v13  ;;  %v916_v18 = vmax.f32 %v860_v20, %v909_v17  ;;  %v210_v17 = vld [vmem:[%s2024_s9 + $0x38] sm:$0xf] }
  0x9a   : > { %v1034_v32 = vmax.f32 %v992_v30, %v1027_v28  ;;  %v865_v22 = vmax.f32 %v823_v56, %v858_v57  ;;  %v862_v19 = vmax.f32 %v820_v48, %v855_v2  ;;  %v1833_v30 = vunpack.i.l.bf16 %v2285_v52 }
  0x9b   : > { %v1072_v45 = vrot.slane %v1062_v61, 4 }
  0x9c   : > { %v1090_v12 = vmax.f32 %v1034_v32, %v1083_v31  ;;  %v861_v31 = vmax.f32 %v819_v11, %v854_v14  ;;  %v1016_v32 = vrot.slane %v2172_v62, 4  ;;  %v821_v46 = vmax.f32 %v786_v9, %v1833_v30 }
  0x9d   : > { %v887_v35 = vpop.permute.xlu1 %886  ;;  %v885_v38 = vpop.permute.xlu0 %884  ;;  %v822_v9 = vmax.f32 %v787_v10, %v1834_v37  ;;  %v1086_v48 = vunpack.c.l.bf16 %v1072_v45 }
  0x9e   : > { %v1118_v43 = vmax.f32 %v1090_v12, %v1111_v8  ;;  %v897_v53 = vrot.slane %v887_v35, 4  ;;  %v896_v60 = vrot.slane %v885_v38, 4  ;;  %v1014_v35 = vrot.slane %v2107_v33, 4 }
  0x9f   : > { %v1030_v51 = vunpack.c.l.bf16 %v1016_v32  ;;  %v1033_v33 = vunpack.c.l.bf16 %v1019_v42  ;;  %v863_v2 = vmax.f32 %v821_v46, %v856_v26  ;;  %v1117_v32 = vunpack.c.l.bf16 %v2274_v36 }
  0xa0   : > { %v1125_v24 = vpack.c.bf16 %v1118_v43, %v1118_v43  ;;  %v911_v21 = vunpack.c.l.bf16 %v897_v53  ;;  %v910_v27 = vunpack.c.l.bf16 %v896_v60  ;;  %v898_v43 = vrot.slane %v2280_v49, 4 }
  0xa1   : > { %v1068_v55 = vpop.permute.xlu2 %1067  ;;  %v944_v49 = vmax.f32 %v916_v18, %v937_v40  ;;  %v1844_v60 = vunpack.i.h.bf16 %v2282_v50  ;;  %v213_v40 = vld [vmem:[%s2024_s9 + $0x4c] sm:$0xf]  ;;  %v1028_v50 = vunpack.c.l.bf16 %v1014_v35  ;;  %v1113_v35 = vunpack.c.l.bf16 %v210_v17 }
  0xa2   : > { %1139 = vrot.lane.b32.xlu0 %v1125_v24, %s1951_s18  ;;  %v918_v25 = vmax.f32 %v862_v19, %v911_v21  ;;  %v917_v38 = vmax.f32 %v861_v31, %v910_v27  ;;  %v1015_v24 = vrot.slane %v2110_v34, 4  ;;  %v1075_v59 = vrot.slane %v1068_v55, 4 }
  0xa3   : > { %v993_v7 = vmax.f32 %v944_v49, %v1843_v44  ;;  %v1114_v34 = vunpack.c.l.bf16 %v213_v40  ;;  %v1112_v44 = vunpack.c.l.bf16 %v207_v29 }
  0xa4   : > { %v946_v56 = vmax.f32 %v918_v25, %v939_v3  ;;  %v945_v61 = vmax.f32 %v917_v38, %v938_v41  ;;  %v864_v41 = vmax.f32 %v822_v9, %v857_v39  ;;  %v1029_v14 = vunpack.c.l.bf16 %v1015_v24 }
  0xa5   : > { %v893_v5 = vpop.permute.xlu1 %892  ;;  %v1089_v21 = vunpack.c.l.bf16 %v1075_v59  ;;  %v1035_v18 = vmax.f32 %v993_v7, %v1028_v50 }
  0xa6   : > { %v900_v16 = vrot.slane %v893_v5, 4  ;;  %v891_v23 = vpop.permute.xlu0 %890 }
  0xa7   : > { %v899_v47 = vrot.slane %v891_v23, 4  ;;  %v1018_v23 = vrot.slane %v2163_v58, 4 }
  0xa8   : > { %v914_v28 = vunpack.c.l.bf16 %v900_v16  ;;  %v994_v16 = vmax.f32 %v945_v61, %v1844_v60 }
  0xa9   : > { %v913_v5 = vunpack.c.l.bf16 %v899_v47 }
  0xaa   : > { %v921_v8 = vmax.f32 %v865_v22, %v914_v28  ;;  %v1017_v28 = vrot.slane %v2175_v63, 4  ;;  %v1036_v42 = vmax.f32 %v994_v16, %v1029_v14  ;;  %v216_v63 = vld [vmem:[%s2024_s9 + $0x60] sm:$0xf] }
  0xab   : > { %v920_v19 = vmax.f32 %v864_v41, %v913_v5 }
  0xac   : > { %v949_v53 = vmax.f32 %v921_v8, %v942_v1  ;;  %v912_v1 = vunpack.c.l.bf16 %v898_v43  ;;  %v1031_v60 = vunpack.c.l.bf16 %v1017_v28 }
  0xad   : > { %v2310_v12 = vpop.f32.mrf.mxu1  ;;  %v2317_v15 = vpop.permute.xlu1 %1851  ;;  %v948_v36 = vmax.f32 %v920_v19, %v941_v0  ;;  %v219_v0 = vld [vmem:[%s2024_s9 + $0x74] sm:$0xf] }
  0xae   : > { %v1854_v52 = vunpack.i.h.bf16 %v2317_v15  ;;  %v2323_v54 = vpop.permute.xlu0 %1846  ;;  %v919_v26 = vmax.f32 %v863_v2, %v912_v1  ;;  %v1853_v39 = vunpack.i.l.bf16 %v2317_v15  ;;  %v1116_v5 = vunpack.c.l.bf16 %v219_v0 }
  0xaf   : > { %v1848_v6 = vunpack.i.l.bf16 %v2323_v54  ;;  %v1849_v45 = vunpack.i.h.bf16 %v2323_v54  ;;  %v1032_v54 = vunpack.c.l.bf16 %v1018_v23 }
  0xb0   : > { %v2332_v57 = vpop.f32.mrf.mxu0  ;;  %v998_v62 = vmax.f32 %v949_v53, %v1854_v52  ;;  %v947_v55 = vmax.f32 %v919_v26, %v940_v4 }
  0xb1   : > { %v995_v3 = vmax.f32 %v946_v56, %v1848_v6  ;;  %v997_v56 = vmax.f32 %v948_v36, %v1853_v39 }
  0xb2   : > { %v1040_v20 = vmax.f32 %v998_v62, %v1033_v33  ;;  %v996_v6 = vmax.f32 %v947_v55, %v1849_v45 }
  0xb3   : > { %v2340_v13 = vpop.f32.mrf.mxu2  ;;  %v1037_v10 = vmax.f32 %v995_v3, %v1030_v51  ;;  %v1039_v1 = vmax.f32 %v997_v56, %v1032_v54 }
  0xb4   : > { %v1096_v24 = vmax.f32 %v1040_v20, %v1089_v21  ;;  %v1038_v7 = vmax.f32 %v996_v6, %v1031_v60  ;;  %v2370_v20 = vld [vmem:[%s2499_s2] ss:$0 sm:$0xff] }
  0xb5   : > { %v2342_v11 = vpop.f32.mrf.mxu1  ;;  %v1060_v22 = vpop.permute.xlu1 %1059  ;;  %v1093_v27 = vmax.f32 %v1037_v10, %v1086_v48  ;;  %v630_v29 = vadd.f32 %v2370_v20, %v2332_v57  ;;  %v635_v45 = vadd.f32 %v2370_v20, %v2310_v12 }
  0xb6   : > { %v1071_v30 = vrot.slane %v1060_v22, 4  ;;  %v1058_v31 = vpop.permute.xlu0 %1057  ;;  %v2349_v38 = vpop.f32.mrf.mxu3  ;;  %v1124_v61 = vmax.f32 %v1096_v24, %v1117_v32  ;;  %v637_v12 = vadd.f32 %v2370_v20, %v2342_v11 }
  0xb7   : > { %v1070_v25 = vrot.slane %v1058_v31, 4  ;;  %v1121_v8 = vmax.f32 %v1093_v27, %v1114_v34  ;;  %v1115_v34 = vunpack.c.l.bf16 %v216_v63 }
  0xb8   : > { %v631_v37 = vpop.f32.mrf.mxu0  ;;  %v1085_v43 = vunpack.c.l.bf16 %v1071_v30  ;;  %v1131_v50 = vpack.c.bf16 %v1124_v61, %v1124_v61 }
  0xb9   : > { %v1084_v46 = vunpack.c.l.bf16 %v1070_v25  ;;  %v1128_v47 = vpack.c.bf16 %v1121_v8, %v1121_v8  ;;  %v632_v32 = vadd.f32 %v2370_v20, %v631_v37 }
  0xba   : > { %v1092_v52 = vmax.f32 %v1036_v42, %v1085_v43 }
  0xbb   : > { %v646_v51 = vpop.f32.mrf.mxu2  ;;  %v1091_v49 = vmax.f32 %v1035_v18, %v1084_v46  ;;  %1145 = vrot.lane.b32.xlu0 %v1128_v47, %s1951_s18 }
  0xbc   : > { %v1120_v53 = vmax.f32 %v1092_v52, %v1113_v35 }
  0xbd   : > { %v2358_v15 = vpop.f32.mrf.mxu1  ;;  %v1066_v9 = vpop.permute.xlu1 %1065  ;;  %v1119_v58 = vmax.f32 %v1091_v49, %v1112_v44 }
  0xbe   : > { %v1074_v33 = vrot.slane %v1066_v9, 4  ;;  %v1064_v40 = vpop.permute.xlu0 %1063  ;;  %v1127_v48 = vpack.c.bf16 %v1120_v53, %v1120_v53  ;;  %v715_v59 = vpop.f32.mrf.mxu3 }
  0xbf   : > { %v1073_v4 = vrot.slane %v1064_v40, 4  ;;  %v1126_v62 = vpack.c.bf16 %v1119_v58, %v1119_v58  ;;  %v640_v40 = vadd.f32 %v2370_v20, %v2358_v15 }
  0xc0   : > { %v741_v3 = vpop.f32.mrf.mxu0  ;;  %v1088_v2 = vunpack.c.l.bf16 %v1074_v33  ;;  %1143 = vrot.lane.b32.xlu2 %v1127_v48, %s1951_s18 }
  0xc1   : > { %v1087_v10 = vunpack.c.l.bf16 %v1073_v4  ;;  %1141 = vrot.lane.b32.xlu1 %v1126_v62, %s1951_s18 }
  0xc2   : > { %v1095_v41 = vmax.f32 %v1039_v1, %v1088_v2 }
  0xc3   : > { %v1094_v14 = vmax.f32 %v1038_v7, %v1087_v10  ;;  %1151 = vrot.lane.b32.xlu0 %v1131_v50, %s1951_s18 }
  0xc4   : > { %v1123_v23 = vmax.f32 %v1095_v41, %v1116_v5 }
  0xc5   : > { %v2365_v16 = vpop.f32.mrf.mxu1  ;;  %v1122_v17 = vmax.f32 %v1094_v14, %v1115_v34 }
  0xc6   : > { %v1130_v21 = vpack.c.bf16 %v1123_v23, %v1123_v23  ;;  %v718_v28 = vpop.f32.mrf.mxu3  ;;  %v642_v7 = vadd.f32 %v2370_v20, %v2365_v16 }
  0xc7   : > { %v1129_v22 = vpack.c.bf16 %v1122_v17, %v1122_v17 }
  0xc8   : > { %v743_v27 = vpop.f32.mrf.mxu0  ;;  %1149 = vrot.lane.b32.xlu2 %v1130_v21, %s1951_s18 }
  0xc9   : > { %1147 = vrot.lane.b32.xlu1 %v1129_v22, %s1951_s18 }
  0xcd   : > { %v657_v19 = vpop.f32.mrf.mxu1 }
  0xce   : > { %v658_v26 = vadd.f32 %v657_v19, %v630_v29  ;;  %v720_v25 = vpop.f32.mrf.mxu3  ;;  %v645_v29 = vadd.f32 %v2370_v20, %v2340_v13 }
  0xd0   : > { %v746_v31 = vpop.f32.mrf.mxu0 }
  0xd3   : > { %v685_v30 = vpop.f32.mrf.mxu2 }
  0xd4   : > { %v686_v18 = vadd.f32 %v685_v30, %v658_v26 }
  0xd5   : > { %v659_v35 = vpop.f32.mrf.mxu1 }
  0xd6   : > { %v714_v8 = vadd.f32 %v2349_v38, %v686_v18  ;;  %v660_v42 = vadd.f32 %v659_v35, %v632_v32  ;;  %v723_v47 = vpop.f32.mrf.mxu3 }
  0xd8   : > { %v742_v39 = vadd.f32 %v741_v3, %v714_v8  ;;  %v748_v44 = vpop.f32.mrf.mxu0 }
  0xda   : > { %v760_v57 = vmax.f32 %v742_v39, 0.0 }
  0xdb   : > { %v687_v43 = vpop.f32.mrf.mxu2 }
  0xdc   : > { %v767_v24 = vpack.c.bf16 %v760_v57, %v760_v57  ;;  %v688_v46 = vadd.f32 %v687_v43, %v660_v42 }
  0xdd   : > { %v662_v38 = vpop.f32.mrf.mxu1 }
  0xde   : > { %775 = vst.msk [vmem:[%s2381_s29] sm:$0xf] %vm774_vm1, %v767_v24  ;;  %v716_v37 = vadd.f32 %v715_v59, %v688_v46  ;;  %v663_v52 = vadd.f32 %v662_v38, %v635_v45  ;;  %v725_v53 = vpop.f32.mrf.mxu3 }
  0xe0   : > { %v744_v36 = vadd.f32 %v743_v27, %v716_v37  ;;  %v751_v49 = vpop.f32.mrf.mxu0 }
  0xe2   : > { %v761_v51 = vmax.f32 %v744_v36, 0.0 }
  0xe3   : > { %v690_v55 = vpop.f32.mrf.mxu2 }
  0xe4   : > { %v768_v56 = vpack.c.bf16 %v761_v51, %v761_v51  ;;  %v691_v54 = vadd.f32 %v690_v55, %v663_v52 }
  0xe5   : > { %v664_v9 = vpop.f32.mrf.mxu1 }
  0xe6   : > { %776 = vst.msk [vmem:[%s2381_s29 + $0x8] sm:$0xf] %vm774_vm1, %v768_v56  ;;  %v719_v6 = vadd.f32 %v718_v28, %v691_v54  ;;  %v665_v58 = vadd.f32 %v664_v9, %v637_v12  ;;  %v728_v11 = vpop.f32.mrf.mxu3 }
  0xe8   : > { %v747_v60 = vadd.f32 %v746_v31, %v719_v6  ;;  %v753_v33 = vpop.f32.mrf.mxu0 }
  0xea   : > { %v762_v61 = vmax.f32 %v747_v60, 0.0 }
  0xeb   : > { %v692_v0 = vpop.f32.mrf.mxu2 }
  0xec   : > { %v769_v48 = vpack.c.bf16 %v762_v61, %v762_v61  ;;  %v693_v63 = vadd.f32 %v692_v0, %v665_v58 }
  0xed   : > { %v667_v62 = vpop.f32.mrf.mxu1 }
  0xee   : > { %777 = vst.msk [vmem:[%s2381_s29 + $0x10] sm:$0xf] %vm774_vm1, %v769_v48  ;;  %v721_v4 = vadd.f32 %v720_v25, %v693_v63  ;;  %v668_v59 = vadd.f32 %v667_v62, %v640_v40  ;;  %v730_v15 = vpop.f32.mrf.mxu3 }
  0xf0   : > { %v749_v3 = vadd.f32 %v748_v44, %v721_v4  ;;  %v756_v5 = vpop.f32.mrf.mxu0 }
  0xf2   : > { %v763_v1 = vmax.f32 %v749_v3, 0.0 }
  0xf3   : > { %v695_v2 = vpop.f32.mrf.mxu2 }
  0xf4   : > { %v770_v10 = vpack.c.bf16 %v763_v1, %v763_v1  ;;  %v696_v50 = vadd.f32 %v695_v2, %v668_v59 }
  0xf5   : > { %v669_v41 = vpop.f32.mrf.mxu1 }
  0xf6   : > { %778 = vst.msk [vmem:[%s2381_s29 + $0x18] sm:$0xf] %vm774_vm1, %v770_v10  ;;  %v724_v34 = vadd.f32 %v723_v47, %v696_v50  ;;  %v670_v23 = vadd.f32 %v669_v41, %v642_v7 }
  0xf8   : > { %v752_v14 = vadd.f32 %v751_v49, %v724_v34  ;;  %v758_v22 = vpop.f32.mrf.mxu0 }
  0xfa   : > { %v764_v17 = vmax.f32 %v752_v14, 0.0 }
  0xfb   : > { %v697_v21 = vpop.f32.mrf.mxu2 }
  0xfc   : > { %v771_v27 = vpack.c.bf16 %v764_v17, %v764_v17  ;;  %v698_v28 = vadd.f32 %v697_v21, %v670_v23 }
  0xfd   : > { %v672_v19 = vpop.f32.mrf.mxu1 }
  0xfe   : > { %779 = vst.msk [vmem:[%s2381_s29 + $0x20] sm:$0xf] %vm774_vm1, %v771_v27  ;;  %v726_v16 = vadd.f32 %v725_v53, %v698_v28  ;;  %v673_v30 = vadd.f32 %v672_v19, %v645_v29 }
 0x100   : > { %v754_v26 = vadd.f32 %v753_v33, %v726_v16 }
 0x102   : > { %v765_v31 = vmax.f32 %v754_v26, 0.0 }
 0x103   : > { %v700_v32 = vpop.f32.mrf.mxu2 }
 0x104   : > { %v772_v18 = vpack.c.bf16 %v765_v31, %v765_v31  ;;  %v701_v25 = vadd.f32 %v700_v32, %v673_v30 }
 0x105   : > { %v674_v35 = vpop.f32.mrf.mxu1 }
 0x106   : > { %780 = vst.msk [vmem:[%s2381_s29 + $0x28] sm:$0xf] %vm774_vm1, %v772_v18  ;;  %v729_v8 = vadd.f32 %v728_v11, %v701_v25 }
 0x108   : > { %v757_v39 = vadd.f32 %v756_v5, %v729_v8 }
 0x10a   : > { %v766_v42 = vmax.f32 %v757_v39, 0.0 }
 0x10b   : > { %v702_v13 = vpop.f32.mrf.mxu2 }
 0x10c   : > { %v773_v20 = vpack.c.bf16 %v766_v42, %v766_v42 }
 0x10e   : > { %781 = vst.msk [vmem:[%s2381_s29 + $0x30] sm:$0xf] %vm774_vm1, %v773_v20 }
 0x114   : > { %v1140_v57 = vpop.permute.xlu0 %1139 }
 0x115   : > { %v1153_v44 = vrot.slane %v1140_v57, 4 }
 0x117   : > { %v1161_v45 = vsel %vm1160_vm4, %v1153_v44, %v1140_v57 }
 0x118   : > { %1178 = vst.msk [vmem:[%s2381_s29] sm:$0xff] %vm2405_vm5, %v1161_v45 }
 0x11a   : > { %v1144_v24 = vpop.permute.xlu2 %1143 }
 0x11b   : > { %v1155_v46 = vrot.slane %v1144_v24, 4 }
 0x11d   : > { %v1163_v47 = vsel %vm1160_vm4, %v1155_v46, %v1144_v24 }
 0x11e   : > { %1180 = vst.msk [vmem:[%s2381_s29 + $0x10] sm:$0xff] %vm2405_vm5, %v1163_v47 }
 0x122   : > { %v1150_v37 = vpop.permute.xlu2 %1149 }
 0x123   : > { %v1158_v38 = vrot.slane %v1150_v37, 4 }
 0x125   : > { %v1166_v36 = vsel %vm1160_vm4, %v1158_v38, %v1150_v37 }
 0x126   : > { %1183 = vst.msk [vmem:[%s2381_s29 + $0x28] sm:$0xff] %vm2405_vm5, %v1166_v36 }
 0x12d   : > { %v1146_v52 = vpop.permute.xlu0 %1145 }
 0x12e   : > { %v1156_v51 = vrot.slane %v1146_v52, 4 }
 0x130   : > { %v1164_v55 = vsel %vm1160_vm4, %v1156_v51, %v1146_v52 }
 0x131   : > { %1181 = vst.msk [vmem:[%s2381_s29 + $0x18] sm:$0xff] %vm2405_vm5, %v1164_v55 }
 0x133   : > { %v1142_v49 = vpop.permute.xlu1 %1141 }
 0x134   : > { %v1154_v12 = vrot.slane %v1142_v49, 4 }
 0x135   : > { %v1152_v56 = vpop.permute.xlu0 %1151 }
 0x136   : > { %v1162_v54 = vsel %vm1160_vm4, %v1154_v12, %v1142_v49  ;;  %v1159_v53 = vrot.slane %v1152_v56, 4 }
 0x137   : > { %1179 = vst.msk [vmem:[%s2381_s29 + $0x8] sm:$0xff] %vm2405_vm5, %v1162_v54 }
 0x138   : > { %v1167_v6 = vsel %vm1160_vm4, %v1159_v53, %v1152_v56 }
 0x139   : > { %1184 = vst.msk [vmem:[%s2381_s29 + $0x30] sm:$0xff] %vm2405_vm5, %v1167_v6 }
 0x13b   : > { %v1148_v9 = vpop.permute.xlu1 %1147  ;;  %1191 = sbr.rel (!%p1997_p4) target bundleno = 374 (0x176), region = 36 }
 0x13c   : > { %v1157_v60 = vrot.slane %v1148_v9, 4 }
 0x13e   : > { %v1165_v58 = vsel %vm1160_vm4, %v1157_v60, %v1148_v9 }
 0x13f   : > { %1182 = vst.msk [vmem:[%s2381_s29 + $0x20] sm:$0xff] %vm2405_vm5, %v1165_v58 }
 0x140   : > { %s2511_s12 = smov (!%p1194_p8, %s1193_s12), 7 }
 0x141   : > { %s1707_s7 = sshll.u32 %s2511_s12, 3 }
 0x142   : > { %p1647_p9 = scmp.eq.s32.totalorder %s1707_s7, 0 }
 0x143   : > { %1856 = sdivrem.u32 (!%p1647_p9), %s2511_s12, 7 }
 0x144   : > { %1204 = sbr.rel (%p1647_p9) target bundleno = 374 (0x176), region = 40 }
 0x14c   : > { %s2450_s20 = spop.drf %1856 }
 0x14d   : > { %s1858_s8 = spop.drf %1856  ;;  %p1648_p10 = scmp.le.s32.totalorder %s2450_s20, 0 }
 0x14e   : > { %s2504_s15 = smov (!%p1648_p10), %s2444_s6  ;;  %s2505_s23 = smov (!%p1648_p10), %s2381_s29 }
 0x14f   : > { %1385 = sbr.rel (%p1648_p10) target bundleno = 348 (0x15c), region = 116  ;;  %s2459_s10 = smov (!%p1648_p10), 0  }
 0x150   : > { %s2461_s11 = smov (!%p1648_p10), 0  }
 0x154 LB: >> { %v1281_v61 = vld [vmem:[%s1924_s23] sm:$0xff]  ;;  %v1283_v0 = vld [vmem:[%s1924_s23 + $0x8] sm:$0xff]  ;;  %v1285_v33 = vld [vmem:[%s1924_s23 + $0x10] sm:$0xff]  ;;  %s1295_s14 = sadd.s32 1, %s1928_s10  ;;  %s1275_s11 = sadd.s32 1, %s1932_s11   ;;  %s1932_s11 = sphi %s2461_s11, %s1275_s11   ;;  %s1928_s10 = sphi %s2459_s10, %s2506_s10   ;;  %s1924_s23 = sphi %s2505_s23, %s1300_s23   ;;  %s1920_s15 = sphi %s2504_s15, %s1301_s15  }
 0x155   : >> { %1282 = vst [vmem:[%s1920_s15] sm:$0xff] %v1281_v61  ;;  %v1287_v40 = vld [vmem:[%s1924_s23 + $0x18] sm:$0xff]  ;;  %p1296_p11 = scmp.ge.s32.totalorder %s1295_s14, %s2450_s20  ;;  %v1289_v48 = vld [vmem:[%s1924_s23 + $0x20] sm:$0xff]  ;;  %v1291_v63 = vld [vmem:[%s1924_s23 + $0x28] sm:$0xff]  ;;  %p1274_p12 = scmp.ge.s32.totalorder %s1275_s11, %s2450_s20 }
 0x156   : >> { %1284 = vst [vmem:[%s1920_s15 + $0x8] sm:$0xff] %v1283_v0  ;;  %v1293_v11 = vld [vmem:[%s1924_s23 + $0x30] sm:$0xff] }
 0x157   : >> { %1286 = vst [vmem:[%s1920_s15 + $0x10] sm:$0xff] %v1285_v33  ;;  %s2513_s14 = smov (%p1296_p11, %s1295_s14), 0  ;;  %1277 = sbr.rel (!%p1274_p12) target bundleno = 340 (0x154), region = 122 }
 0x158   : >> { %1288 = vst [vmem:[%s1920_s15 + $0x18] sm:$0xff] %v1287_v40  ;;  %s1298_s17 = smul.u32 56, %s2513_s14  ;;  %s2506_s10 = smov %s2513_s14 }
 0x159   : >> { %1290 = vst [vmem:[%s1920_s15 + $0x20] sm:$0xff] %v1289_v48 }
 0x15a   : >> { %1292 = vst [vmem:[%s1920_s15 + $0x28] sm:$0xff] %v1291_v63  ;;  %s1300_s23 = scalar_lea.vmem %s2381_s29, %s1298_s17 [#allocation2]  }
 0x15b   : >> { %1294 = vst [vmem:[%s1920_s15 + $0x30] sm:$0xff] %v1293_v11  ;;  %s1301_s15 = scalar_lea.vmem %s2444_s6, %s1298_s17  }
 0x15c PF: > { %1859 = sdivrem.u32 %s2511_s12, 7 }
 0x15d   : > { %s1649_s21 = smul.u32 56, %s2450_s20 }
 0x15f   : > { %s2482_s22 = scalar_lea.vmem %s2381_s29, %s1649_s21 [#allocation2]   ;;  %s1308_s24 = scalar_lea.vmem %s2444_s6, %s1649_s21  }
 0x165   : > { %s1860_s25 = spop.drf %1859 }
 0x166   : > { %s1861_s18 = spop.drf %1859 }
 0x167   : > { %p1651_p13 = scmp.le.s32.totalorder %s1861_s18, 0 }
 0x168   : > { %s1934_s9 = smov (!%p1651_p13), %s1308_s24   ;;  %s1938_s26 = smov (!%p1651_p13), %s2482_s22  }
 0x169   : > { %1399 = sbr.rel (%p1651_p13) target bundleno = 374 (0x176), region = 127  ;;  %s1942_s27 = smov (!%p1651_p13), 0  }
 0x16a   : > { %s1946_s28 = smov (!%p1651_p13), 0  }
 0x16e LB: >> { %v1318_v4 = vld [vmem:[%s1940_s26] sm:$0xff]  ;;  %s1320_s29 = sadd.s32 1, %s1944_s27  ;;  %s1312_s28 = sadd.s32 1, %s1948_s28   ;;  %s1948_s28 = sphi %s1946_s28, %s1312_s28   ;;  %s1944_s27 = sphi %s1942_s27, %s1943_s27   ;;  %s1940_s26 = sphi %s1938_s26, %s1325_s26   ;;  %s1936_s9 = sphi %s1934_s9, %s1326_s9  }
 0x16f   : >> { %1319 = vst [vmem:[%s1936_s9] sm:$0xff] %v1318_v4  ;;  %p1321_p0 = scmp.ge.s32.totalorder %s1320_s29, %s1861_s18  ;;  %p1311_p1 = scmp.ge.s32.totalorder %s1312_s28, %s1861_s18 }
 0x171   : >> { %s2515_s29 = smov (%p1321_p0, %s1320_s29), 0  ;;  %1314 = sbr.rel (!%p1311_p1) target bundleno = 366 (0x16e), region = 133 }
 0x172   : >> { %s1652_s12 = sshll.u32 %s2515_s29, 3  ;;  %s1943_s27 = smov %s2515_s29  }
 0x173   : >> { %s1325_s26 = scalar_lea.vmem %s2482_s22, %s1652_s12 [#allocation2]   ;;  %s1326_s9 = scalar_lea.vmem %s1308_s24, %s1652_s12  }
 0x176 PF: > { %p10_p2 = scmp.ge.s32.totalorder %s1987_s16, 4   ;;  %s2507_s12 = smov %s1912_s13 }
 0x177   : > { %s2508_s13 = smov %s1995_s19  ;;  %s2509_s14 = smov %s1987_s16 }
 0x178   :  { %12 = sbr.rel (!%p10_p2) target bundleno = 2 (0x2), region = 144 }

// kernel: stem_forward.13
= control target key start
LH: loop header
LB: loop body
LE: loop exit
PB: predicated region body
PF: predicated region fallthrough
CT: control target
= control target key end

     0   :  { %s1656_s21 = smov 0   ;;  %s1658_s22 = smov 0   ;;  %s1943_s0 = inlined_call_operand.vmem [shape: bf16[98,160], index: 0, kind: input, shape index: {}]   ;;  %s1944_s1 = inlined_call_operand.vmem [shape: bf16[160,64], index: 1, kind: input, shape index: {}]   ;;  %s1945_s2 = inlined_call_operand.vmem [shape: bf16[160,64], index: 2, kind: input, shape index: {}]   ;;  %s1946_s3 = inlined_call_operand.vmem [shape: f32[1,64], index: 3, kind: input, shape index: {}]   ;;  %s1947_s4 = inlined_call_operand.vmem [shape: f32[1,64], index: 4, kind: input, shape index: {}]   ;;  %s1948_s5 = inlined_call_operand.vmem [shape: bf16[98,64], index: 5, kind: output, shape index: {0}]   ;;  %s1949_s6 = inlined_call_operand.vmem [shape: bf16[98,64], index: 6, kind: output, shape index: {1}]  }
   0x1   :  { %s1660_s23 = smov 0  }
   0x2 LB: > { %s1669_s24 = sadd.s32 4294967295, %s1555_s23   ;;  %s1671_s25 = sadd.s32 1, %s1555_s23   ;;  %s1555_s23 = sphi %s1660_s23, %s1959_s23   ;;  %s1551_s22 = sphi %s1658_s22, %s1958_s22   ;;  %s1547_s21 = sphi %s1656_s21, %s1957_s21  }
   0x3   : > { %s131_s26 = ssub.s32 %s1555_s23, %s1671_s25  ;;  %s134_s27 = sadd.s32 1, %s1551_s22 }
   0x4   : > { %p132_p0 = scmp.eq.s32.totalorder %s131_s26, 0  ;;  %p144_p1 = scmp.ne.s32.totalorder %s1551_s22, %s1547_s21 }
   0x5   : > { %p145_p2 = scmp.eq.s32.totalorder %s1669_s24, 1  ;;  %p1134_p3 = scmp.ge.s32.totalorder %s1555_s23, 1 }
   0x6   : > { %s1679_s28 = scalar_select %p132_p0, %s1551_s22, %s134_s27  }
   0x7   : > { %p1681_p4 = por %p145_p2, %p144_p1  ;;  %p227_p5 = scmp.lt.s32.totalorder %s1555_s23, 3 }
   0x9   : > { %p228_p6 = pnand %p1134_p3, %p227_p5 }
   0xa   : > { %s1692_s10 = smul.u32 (!%p228_p6), 7, %s1669_s24 }
   0xb   : > { %231 = sbr.rel (%p228_p6) target bundleno = 357 (0x165), region = 40 }
   0xc   : > { %p272_p7 = scmp.lt.s32.totalorder (!%p228_p6), %s1692_s10, 12 }
  0x10   : > { %v1285_v0 = vld [vmem:[%s1944_s1 + $0x38] sm:$0xff]  ;;  %v1284_v2 = vld [vmem:[%s1944_s1 + $0x30] sm:$0xff]  ;;  %v1297_v4 = vld [vmem:[%s1945_s2 + $0x48] sm:$0xff]  ;;  %s273_s19 = scalar_select %p272_p7, %s1692_s10, 12  ;;  %vm418_vm0 = vcmask 261120   ;;  %vm501_vm1 = vcmask 519168  }
  0x11   : > { %v1295_v1 = vld [vmem:[%s1945_s2 + $0x38] sm:$0xff]  ;;  %431 = vmatpush.bf16.msra.mxu0 %v1285_v0  ;;  %v1294_v3 = vld [vmem:[%s1945_s2 + $0x30] sm:$0xff]  ;;  %v1287_v5 = vld [vmem:[%s1944_s1 + $0x48] sm:$0xff]  ;;  %627 = vmatpush.bf16.msra.mxu3 %v1297_v4  ;;  %s682_s7 = ssub.s32 (%p1681_p4), 13, %s1692_s10 }
  0x12   : > { %593 = vmatpush.bf16.msra.mxu2 %v1295_v1  ;;  %v1296_v6 = vld [vmem:[%s1945_s2 + $0x40] sm:$0xff]  ;;  %v1283_v7 = vld [vmem:[%s1944_s1 + $0x28] sm:$0xff]  ;;  %s1271_s8 = sshll.u32 %s273_s19, 3  ;;  %465 = vmatpush.bf16.msra.mxu1 %v1287_v5  ;;  %v1281_v15 = vld [vmem:[%s1944_s1 + $0x18] sm:$0xff]  ;;  %p683_p8 = scmp.lt.s32.totalorder (%p1681_p4), %s682_s7, 7 }
  0x13   : > { %v1293_v8 = vld [vmem:[%s1945_s2 + $0x28] sm:$0xff]  ;;  %s1720_s12 = scalar_lea.vmem %s1943_s0, %s1271_s8  ;;  %v1286_v9 = vld [vmem:[%s1944_s1 + $0x40] sm:$0xff]  ;;  %v1291_v16 = vld [vmem:[%s1945_s2 + $0x18] sm:$0xff]  ;;  %s1298_s8 = smul.u32 (%p1681_p4), 28, %s1669_s24 }
  0x14   : > { %v1272_v10 = vld [vmem:[%s1720_s12 + $0x4] sm:$0xf]  ;;  %v1141_v11 = vld [vmem:[%s1720_s12 + $0x8] sm:$0xf0]  ;;  %v1280_v17 = vld [vmem:[%s1944_s1 + $0x10] sm:$0xff] }
  0x15   : > { %432 = vmatpush.bf16.msra.mxu0 %v1284_v2  ;;  %628 = vmatpush.bf16.msra.mxu3 %v1296_v6  ;;  %v1144_v12 = vor.u32 %v1272_v10, %v1141_v11  ;;  %v1282_v13 = vld [vmem:[%s1944_s1 + $0x20] sm:$0xff]  ;;  %v1290_v18 = vld [vmem:[%s1945_s2 + $0x10] sm:$0xff]  ;;  %v1149_v20 = vld [vmem:[%s1720_s12 + $0x18] sm:$0xf0]  ;;  %s1840_s13 = scalar_lea.vmem (%p1681_p4), %s1948_s5, %s1298_s8  }
  0x16   : > { %594 = vmatpush.bf16.msra.mxu2 %v1294_v3  ;;  %v1292_v14 = vld [vmem:[%s1945_s2 + $0x20] sm:$0xff]  ;;  %466 = vmatpush.bf16.msra.mxu1 %v1286_v9  ;;  %v1274_v19 = vld [vmem:[%s1720_s12 + $0x14] sm:$0xf]  ;;  %v1279_v21 = vld [vmem:[%s1944_s1 + $0x8] sm:$0xff] }
  0x17   : > { %v1289_v22 = vld [vmem:[%s1945_s2 + $0x8] sm:$0xff]  ;;  %v1152_v23 = vor.u32 %v1274_v19, %v1149_v20  ;;  %v1278_v24 = vld [vmem:[%s1944_s1] sm:$0xff]  ;;  %v1147_v32 = vld [vmem:[%s1720_s12 + $0x10] sm:$0xf] }
  0x18   : > { %1245 = vmatmul.msk.bf16.vlgmr.msra.gmra.mxu3 %vm418_vm0, %v1144_v12  ;;  %v1288_v25 = vld [vmem:[%s1945_s2] sm:$0xff]  ;;  %v1273_v27 = vld [vmem:[%s1720_s12 + $0x4] sm:$0xf0]  ;;  %v1157_v30 = vld [vmem:[%s1720_s12 + $0x28] sm:$0xf0] }
  0x19   : > { %433 = vmatpush.bf16.msra.mxu0 %v1283_v7  ;;  %1201 = vmatmul.msk.bf16.vlgmr.msra.gmra.mxu1 %vm418_vm0, %v1144_v12  ;;  %v1139_v26 = vld [vmem:[%s1720_s12] sm:$0xf]  ;;  %v1276_v29 = vld [vmem:[%s1720_s12 + $0x24] sm:$0xf]  ;;  %v1275_v33 = vld [vmem:[%s1720_s12 + $0x14] sm:$0xf0] }
  0x1a   : > { %595 = vmatpush.bf16.msra.mxu2 %v1293_v8  ;;  %v1140_v28 = vor.u32 %v1273_v27, %v1139_v26  ;;  %v1160_v31 = vor.u32 %v1276_v29, %v1157_v30  ;;  %v1148_v34 = vor.u32 %v1275_v33, %v1147_v32  ;;  %v300_v35 = vld [vmem:[%s1720_s12 + $0x30] sm:$0xff]  ;;  %v1155_v38 = vld [vmem:[%s1720_s12 + $0x20] sm:$0xf]  ;;  %v1277_v39 = vld [vmem:[%s1720_s12 + $0x24] sm:$0xf0]  ;;  %s257_s12 = sand.u32 1, %s1547_s21  }
  0x1b   : > { %v345_v36 = vunpack.c.h.b16 %v300_v35  ;;  %v1156_v40 = vor.u32 %v1277_v39, %v1155_v38  ;;  %v344_v41 = vunpack.c.l.b16 %v300_v35  ;;  %v1779_v47 = vld [vmem:[%s1946_s3] ss:$0 sm:$0xff]  ;;  %s1300_s23 = smul.u32 28, %s257_s12 }
  0x1c   : > { %v1786_v53 = vld [vmem:[%s1947_s4] ss:$0 sm:$0xff] }
  0x1d   : > { %434 = vmatpush.bf16.msra.mxu0 %v1282_v13  ;;  %v353_v37 = vpack.c.b16 %v345_v36, %v345_v36  ;;  %v352_v42 = vpack.c.b16 %v344_v41, %v344_v41  ;;  %s1789_s21 = scalar_lea.vmem [#allocation2], %s1300_s23   ;;  %s1794_s30 = scalar_lea.vmem [#allocation3], %s1300_s23  }
  0x1e   : > { %596 = vmatpush.bf16.msra.mxu2 %v1292_v14 }
  0x21   : > { %435 = vmatpush.bf16.msra.mxu0 %v1281_v15 }
  0x22   : > { %597 = vmatpush.bf16.msra.mxu2 %v1291_v16 }
  0x25   : > { %436 = vmatpush.bf16.msra.mxu0 %v1280_v17 }
  0x26   : > { %598 = vmatpush.bf16.msra.mxu2 %v1290_v18 }
  0x28   : > { %1246 = vmatmul.msk.bf16.gmra.mxu3 %vm418_vm0, %v1152_v23 }
  0x29   : > { %437 = vmatpush.bf16.msra.mxu0 %v1279_v21  ;;  %1202 = vmatmul.msk.bf16.gmra.mxu1 %vm418_vm0, %v1152_v23 }
  0x2a   : > { %599 = vmatpush.bf16.msra.mxu2 %v1289_v22 }
  0x2d   : > { %438 = vmatpush.bf16.msra.mxu0 %v1278_v24 }
  0x2e   : > { %600 = vmatpush.bf16.msra.mxu2 %v1288_v25 }
  0x30   : > { %439 = vmatmul.bf16.vlgmr.msra.gmra.mxu0 %v1140_v28 }
  0x31   : > { %601 = vmatmul.bf16.vlgmr.msra.gmra.mxu2 %v1140_v28 }
  0x38   : > { %1247 = vmatmul.msk.bf16.gmra.mxu3 %vm418_vm0, %v1160_v31 }
  0x39   : > { %1203 = vmatmul.msk.bf16.gmra.mxu1 %vm418_vm0, %v1160_v31 }
  0x40   : > { %444 = vmatmul.bf16.gmra.mxu0 %v1148_v34 }
  0x41   : > { %606 = vmatmul.bf16.gmra.mxu2 %v1148_v34 }
  0x48   : > { %1248 = vmatmul.msk.bf16.gmra.mxu3 %vm418_vm0, %v353_v37 }
  0x49   : > { %1204 = vmatmul.msk.bf16.gmra.mxu1 %vm418_vm0, %v353_v37 }
  0x50   : > { %449 = vmatmul.bf16.gmra.mxu0 %v1156_v40 }
  0x51   : > { %611 = vmatmul.bf16.gmra.mxu2 %v1156_v40 }
  0x60   : > { %454 = vmatmul.bf16.gmra.mxu0 %v352_v42 }
  0x61   : > { %616 = vmatmul.bf16.gmra.mxu2 %v352_v42 }
  0x96   : > { %v468_v43 = vpop.f32.mrf.mxu1 }
  0x9b   : > { %v630_v44 = vpop.f32.mrf.mxu3 }
  0x9e   : > { %v470_v45 = vpop.f32.mrf.mxu1 }
  0xa3   : > { %v632_v46 = vpop.f32.mrf.mxu3 }
  0xa6   : > { %v473_v48 = vpop.f32.mrf.mxu1 }
  0xab   : > { %v635_v51 = vpop.f32.mrf.mxu3 }
  0xad   : > { %v440_v49 = vpop.f32.mrf.mxu0 }
  0xae   : > { %v441_v50 = vadd.f32 %v1779_v47, %v440_v49  ;;  %v475_v56 = vpop.f32.mrf.mxu1 }
  0xb0   : > { %v469_v52 = vadd.f32 %v468_v43, %v441_v50 }
  0xb2   : > { %v487_v54 = vmax.f32 %v469_v52, 0.0 }
  0xb3   : > { %v637_v62 = vpop.f32.mrf.mxu3 }
  0xb4   : > { %v602_v55 = vpop.f32.mrf.mxu2  ;;  %v494_v57 = vpack.c.bf16 %v487_v54, %v487_v54 }
  0xb5   : > { %v603_v58 = vadd.f32 %v1786_v53, %v602_v55  ;;  %v442_v59 = vpop.f32.mrf.mxu0 }
  0xb6   : > { %502 = vst.msk [vmem:[%s1789_s21] sm:$0xf] %vm501_vm1, %v494_v57  ;;  %v443_v61 = vadd.f32 %v1779_v47, %v442_v59  ;;  %v478_v4 = vpop.f32.mrf.mxu1 }
  0xb7   : > { %v631_v60 = vadd.f32 %v630_v44, %v603_v58 }
  0xb8   : > { %v471_v0 = vadd.f32 %v470_v45, %v443_v61 }
  0xb9   : > { %v649_v63 = vmax.f32 %v631_v60, 0.0 }
  0xba   : > { %v488_v2 = vmax.f32 %v471_v0, 0.0 }
  0xbb   : > { %v656_v1 = vpack.c.bf16 %v649_v63, %v649_v63  ;;  %v640_v10 = vpop.f32.mrf.mxu3 }
  0xbc   : > { %v604_v3 = vpop.f32.mrf.mxu2  ;;  %v495_v5 = vpack.c.bf16 %v488_v2, %v488_v2 }
  0xbd   : > { %663 = vst.msk [vmem:[%s1794_s30] sm:$0xf] %vm501_vm1, %v656_v1  ;;  %v605_v6 = vadd.f32 %v1786_v53, %v604_v3  ;;  %v445_v7 = vpop.f32.mrf.mxu0 }
  0xbe   : > { %503 = vst.msk [vmem:[%s1789_s21 + $0x4] sm:$0xf] %vm501_vm1, %v495_v5  ;;  %v446_v9 = vadd.f32 %v1779_v47, %v445_v7  ;;  %v480_v16 = vpop.f32.mrf.mxu1 }
  0xbf   : > { %v633_v8 = vadd.f32 %v632_v46, %v605_v6 }
  0xc0   : > { %v474_v12 = vadd.f32 %v473_v48, %v446_v9 }
  0xc1   : > { %v650_v11 = vmax.f32 %v633_v8, 0.0 }
  0xc2   : > { %v489_v14 = vmax.f32 %v474_v12, 0.0 }
  0xc3   : > { %v657_v13 = vpack.c.bf16 %v650_v11, %v650_v11  ;;  %v642_v22 = vpop.f32.mrf.mxu3 }
  0xc4   : > { %v607_v15 = vpop.f32.mrf.mxu2  ;;  %v496_v17 = vpack.c.bf16 %v489_v14, %v489_v14 }
  0xc5   : > { %664 = vst.msk [vmem:[%s1794_s30 + $0x4] sm:$0xf] %vm501_vm1, %v657_v13  ;;  %v608_v18 = vadd.f32 %v1786_v53, %v607_v15  ;;  %v447_v19 = vpop.f32.mrf.mxu0 }
  0xc6   : > { %504 = vst.msk [vmem:[%s1789_s21 + $0x8] sm:$0xf] %vm501_vm1, %v496_v17  ;;  %v448_v21 = vadd.f32 %v1779_v47, %v447_v19  ;;  %v483_v28 = vpop.f32.mrf.mxu1 }
  0xc7   : > { %v636_v20 = vadd.f32 %v635_v51, %v608_v18 }
  0xc8   : > { %v476_v24 = vadd.f32 %v475_v56, %v448_v21 }
  0xc9   : > { %v651_v23 = vmax.f32 %v636_v20, 0.0 }
  0xca   : > { %v490_v26 = vmax.f32 %v476_v24, 0.0 }
  0xcb   : > { %v658_v25 = vpack.c.bf16 %v651_v23, %v651_v23  ;;  %v645_v34 = vpop.f32.mrf.mxu3 }
  0xcc   : > { %v609_v27 = vpop.f32.mrf.mxu2  ;;  %v497_v29 = vpack.c.bf16 %v490_v26, %v490_v26 }
  0xcd   : > { %665 = vst.msk [vmem:[%s1794_s30 + $0x8] sm:$0xf] %vm501_vm1, %v658_v25  ;;  %v610_v30 = vadd.f32 %v1786_v53, %v609_v27  ;;  %v450_v31 = vpop.f32.mrf.mxu0 }
  0xce   : > { %505 = vst.msk [vmem:[%s1789_s21 + $0xc] sm:$0xf] %vm501_vm1, %v497_v29  ;;  %v451_v33 = vadd.f32 %v1779_v47, %v450_v31  ;;  %v485_v40 = vpop.f32.mrf.mxu1 }
  0xcf   : > { %v638_v32 = vadd.f32 %v637_v62, %v610_v30 }
  0xd0   : > { %v479_v36 = vadd.f32 %v478_v4, %v451_v33 }
  0xd1   : > { %v652_v35 = vmax.f32 %v638_v32, 0.0 }
  0xd2   : > { %v491_v38 = vmax.f32 %v479_v36, 0.0 }
  0xd3   : > { %v659_v37 = vpack.c.bf16 %v652_v35, %v652_v35  ;;  %v647_v46 = vpop.f32.mrf.mxu3 }
  0xd4   : > { %v612_v39 = vpop.f32.mrf.mxu2  ;;  %v498_v41 = vpack.c.bf16 %v491_v38, %v491_v38 }
  0xd5   : > { %666 = vst.msk [vmem:[%s1794_s30 + $0xc] sm:$0xf] %vm501_vm1, %v659_v37  ;;  %v613_v42 = vadd.f32 %v1786_v53, %v612_v39  ;;  %v452_v43 = vpop.f32.mrf.mxu0 }
  0xd6   : > { %506 = vst.msk [vmem:[%s1789_s21 + $0x10] sm:$0xf] %vm501_vm1, %v498_v41  ;;  %v453_v45 = vadd.f32 %v1779_v47, %v452_v43 }
  0xd7   : > { %v641_v44 = vadd.f32 %v640_v10, %v613_v42 }
  0xd8   : > { %v481_v49 = vadd.f32 %v480_v16, %v453_v45 }
  0xd9   : > { %v653_v48 = vmax.f32 %v641_v44, 0.0 }
  0xda   : > { %v492_v51 = vmax.f32 %v481_v49, 0.0 }
  0xdb   : > { %v660_v50 = vpack.c.bf16 %v653_v48, %v653_v48 }
  0xdc   : > { %v614_v52 = vpop.f32.mrf.mxu2  ;;  %v499_v54 = vpack.c.bf16 %v492_v51, %v492_v51 }
  0xdd   : > { %667 = vst.msk [vmem:[%s1794_s30 + $0x10] sm:$0xf] %vm501_vm1, %v660_v50  ;;  %v615_v55 = vadd.f32 %v1786_v53, %v614_v52  ;;  %v455_v56 = vpop.f32.mrf.mxu0 }
  0xde   : > { %507 = vst.msk [vmem:[%s1789_s21 + $0x14] sm:$0xf] %vm501_vm1, %v499_v54  ;;  %v456_v58 = vadd.f32 %v1779_v47, %v455_v56 }
  0xdf   : > { %v643_v57 = vadd.f32 %v642_v22, %v615_v55 }
  0xe0   : > { %v484_v60 = vadd.f32 %v483_v28, %v456_v58 }
  0xe1   : > { %v654_v59 = vmax.f32 %v643_v57, 0.0 }
  0xe2   : > { %v493_v62 = vmax.f32 %v484_v60, 0.0 }
  0xe3   : > { %v661_v61 = vpack.c.bf16 %v654_v59, %v654_v59 }
  0xe4   : > { %v617_v63 = vpop.f32.mrf.mxu2  ;;  %v500_v0 = vpack.c.bf16 %v493_v62, %v493_v62 }
  0xe5   : > { %668 = vst.msk [vmem:[%s1794_s30 + $0x14] sm:$0xf] %vm501_vm1, %v661_v61  ;;  %v618_v1 = vadd.f32 %v1786_v53, %v617_v63  ;;  %v457_v2 = vpop.f32.mrf.mxu0 }
  0xe6   : > { %508 = vst.msk [vmem:[%s1789_s21 + $0x18] sm:$0xf] %vm501_vm1, %v500_v0 }
  0xe7   : > { %v646_v3 = vadd.f32 %v645_v34, %v618_v1 }
  0xe9   : > { %v655_v4 = vmax.f32 %v646_v3, 0.0  ;;  %680 = sbr.rel (!%p1681_p4) target bundleno = 295 (0x127), region = 44 }
  0xeb   : > { %v662_v5 = vpack.c.bf16 %v655_v4, %v655_v4 }
  0xec   : > { %v619_v6 = vpop.f32.mrf.mxu2 }
  0xed   : > { %669 = vst.msk [vmem:[%s1794_s30 + $0x18] sm:$0xf] %vm501_vm1, %v662_v5 }
  0xee   : > { %s1961_s7 = smov (!%p683_p8, %s682_s7), 7 }
  0xef   : > { %s1249_s14 = sshll.u32 %s1961_s7, 2 }
  0xf0   : > { %p1252_p9 = scmp.eq.s32.totalorder %s1249_s14, 0 }
  0xf1   : > { %1457 = sdivrem.u32 (!%p1252_p9), %s1961_s7, 7 }
  0xf2   : > { %691 = sbr.rel (%p1252_p9) target bundleno = 295 (0x127), region = 48 }
  0xfa   : > { %s1846_s15 = spop.drf %1457 }
  0xfb   : > { %s1459_s16 = spop.drf %1457  ;;  %p1253_p10 = scmp.le.s32.totalorder %s1846_s15, 0 }
  0xfc   : > { %s1951_s17 = smov (!%p1253_p10), %s1840_s13  ;;  %s1952_s18 = smov (!%p1253_p10), %s1789_s21 }
  0xfd   : > { %1050 = sbr.rel (%p1253_p10) target bundleno = 269 (0x10d), region = 188  ;;  %s1855_s19 = smov (!%p1253_p10), 0  }
  0xfe   : > { %s1857_s20 = smov (!%p1253_p10), 0  }
 0x102 LB: >> { %v709_v47 = vld [vmem:[%s1563_s18] sm:$0xf]  ;;  %v711_v53 = vld [vmem:[%s1563_s18 + $0x4] sm:$0xf]  ;;  %v713_v7 = vld [vmem:[%s1563_s18 + $0x8] sm:$0xf]  ;;  %s1571_s20 = sphi %s1857_s20, %s703_s20   ;;  %s1567_s19 = sphi %s1855_s19, %s1953_s19   ;;  %s1563_s18 = sphi %s1952_s18, %s728_s18   ;;  %s1559_s17 = sphi %s1951_s17, %s729_s17  }
 0x103   : >> { %710 = vst [vmem:[%s1559_s17] sm:$0xf] %v709_v47  ;;  %v715_v8 = vld [vmem:[%s1563_s18 + $0xc] sm:$0xf]  ;;  %s723_s12 = sadd.s32 1, %s1567_s19  ;;  %v717_v9 = vld [vmem:[%s1563_s18 + $0x10] sm:$0xf] }
 0x104   : >> { %712 = vst [vmem:[%s1559_s17 + $0x4] sm:$0xf] %v711_v53  ;;  %p724_p11 = scmp.ge.s32.totalorder %s723_s12, %s1846_s15  ;;  %v719_v10 = vld [vmem:[%s1563_s18 + $0x14] sm:$0xf]  ;;  %v721_v11 = vld [vmem:[%s1563_s18 + $0x18] sm:$0xf] }
 0x105   : >> { %714 = vst [vmem:[%s1559_s17 + $0x8] sm:$0xf] %v713_v7  ;;  %s703_s20 = sadd.s32 1, %s1571_s20  }
 0x106   : >> { %716 = vst [vmem:[%s1559_s17 + $0xc] sm:$0xf] %v715_v8  ;;  %s1963_s12 = smov (%p724_p11, %s723_s12), 0  ;;  %p702_p12 = scmp.ge.s32.totalorder %s703_s20, %s1846_s15 }
 0x107   : >> { %718 = vst [vmem:[%s1559_s17 + $0x10] sm:$0xf] %v717_v9  ;;  %s726_s23 = smul.u32 28, %s1963_s12  ;;  %s1953_s19 = smov %s1963_s12 }
 0x108   : >> { %720 = vst [vmem:[%s1559_s17 + $0x14] sm:$0xf] %v719_v10  ;;  %705 = sbr.rel (!%p702_p12) target bundleno = 258 (0x102), region = 194 }
 0x109   : >> { %722 = vst [vmem:[%s1559_s17 + $0x18] sm:$0xf] %v721_v11  ;;  %s728_s18 = scalar_lea.vmem %s1789_s21, %s726_s23 [#allocation2]   ;;  %s729_s17 = scalar_lea.vmem %s1840_s13, %s726_s23  }
 0x10d PF: > { %1460 = sdivrem.u32 %s1961_s7, 7 }
 0x10e   : > { %s1254_s26 = smul.u32 28, %s1846_s15 }
 0x110   : > { %s1878_s27 = scalar_lea.vmem %s1789_s21, %s1254_s26 [#allocation2]   ;;  %s736_s8 = scalar_lea.vmem %s1840_s13, %s1254_s26  }
 0x116   : > { %s1461_s9 = spop.drf %1460 }
 0x117   : > { %s1462_s11 = spop.drf %1460 }
 0x118   : > { %p1256_p13 = scmp.le.s32.totalorder %s1462_s11, 0 }
 0x119   : > { %s1573_s14 = smov (!%p1256_p13), %s736_s8   ;;  %s1577_s16 = smov (!%p1256_p13), %s1878_s27  }
 0x11a   : > { %1064 = sbr.rel (%p1256_p13) target bundleno = 295 (0x127), region = 199  ;;  %s1581_s12 = smov (!%p1256_p13), 0  }
 0x11b   : > { %s1585_s20 = smov (!%p1256_p13), 0  }
 0x11f LB: >> { %v746_v12 = vld [vmem:[%s1579_s16] sm:$0xf]  ;;  %s748_s21 = sadd.s32 1, %s1583_s12  ;;  %s740_s20 = sadd.s32 1, %s1587_s20   ;;  %s1587_s20 = sphi %s1585_s20, %s740_s20   ;;  %s1583_s12 = sphi %s1581_s12, %s1582_s12   ;;  %s1579_s16 = sphi %s1577_s16, %s753_s16   ;;  %s1575_s14 = sphi %s1573_s14, %s754_s14  }
 0x120   : >> { %747 = vst [vmem:[%s1575_s14] sm:$0xf] %v746_v12  ;;  %p749_p0 = scmp.ge.s32.totalorder %s748_s21, %s1462_s11  ;;  %p739_p1 = scmp.ge.s32.totalorder %s740_s20, %s1462_s11 }
 0x122   : >> { %s1965_s21 = smov (%p749_p0, %s748_s21), 0  ;;  %742 = sbr.rel (!%p739_p1) target bundleno = 287 (0x11f), region = 205 }
 0x123   : >> { %s1257_s7 = sshll.u32 %s1965_s21, 2  ;;  %s1582_s12 = smov %s1965_s21  }
 0x124   : >> { %s753_s16 = scalar_lea.vmem %s1878_s27, %s1257_s7 [#allocation2]   ;;  %s754_s14 = scalar_lea.vmem %s736_s8, %s1257_s7  }
 0x127 PF: > { %819 = sbr.rel (!%p1681_p4) target bundleno = 357 (0x165), region = 92  ;;  %s821_s13 = ssub.s32 (%p1681_p4), 13, %s1692_s10 }
 0x128   : > { %s1299_s15 = smul.u32 (%p1681_p4), 28, %s1669_s24  ;;  %p822_p2 = scmp.lt.s32.totalorder (%p1681_p4), %s821_s13, 7 }
 0x12a   : > { %s1890_s19 = scalar_lea.vmem (%p1681_p4), %s1949_s6, %s1299_s15  }
 0x12c   : > { %s1967_s13 = smov (!%p822_p2, %s821_s13), 7 }
 0x12d   : > { %s1259_s23 = sshll.u32 %s1967_s13, 2 }
 0x12e   : > { %p1262_p3 = scmp.eq.s32.totalorder %s1259_s23, 0 }
 0x12f   : > { %1463 = sdivrem.u32 (!%p1262_p3), %s1967_s13, 7 }
 0x130   : > { %830 = sbr.rel (%p1262_p3) target bundleno = 357 (0x165), region = 96 }
 0x138   : > { %s1896_s29 = spop.drf %1463 }
 0x139   : > { %s1465_s26 = spop.drf %1463  ;;  %p1263_p4 = scmp.le.s32.totalorder %s1896_s29, 0 }
 0x13a   : > { %s1954_s24 = smov (!%p1263_p4), %s1890_s19  ;;  %s1955_s10 = smov (!%p1263_p4), %s1794_s30 }
 0x13b   : > { %1078 = sbr.rel (%p1263_p4) target bundleno = 331 (0x14b), region = 210  ;;  %s1905_s27 = smov (!%p1263_p4), 0  }
 0x13c   : > { %s1907_s8 = smov (!%p1263_p4), 0  }
 0x140 LB: >> { %v848_v13 = vld [vmem:[%s1595_s10] sm:$0xf]  ;;  %v850_v14 = vld [vmem:[%s1595_s10 + $0x4] sm:$0xf]  ;;  %v852_v15 = vld [vmem:[%s1595_s10 + $0x8] sm:$0xf]  ;;  %s1603_s8 = sphi %s1907_s8, %s842_s8   ;;  %s1599_s27 = sphi %s1905_s27, %s1956_s27   ;;  %s1595_s10 = sphi %s1955_s10, %s867_s10   ;;  %s1591_s24 = sphi %s1954_s24, %s868_s24  }
 0x141   : >> { %849 = vst [vmem:[%s1591_s24] sm:$0xf] %v848_v13  ;;  %v854_v16 = vld [vmem:[%s1595_s10 + $0xc] sm:$0xf]  ;;  %s862_s9 = sadd.s32 1, %s1599_s27  ;;  %v856_v17 = vld [vmem:[%s1595_s10 + $0x10] sm:$0xf] }
 0x142   : >> { %851 = vst [vmem:[%s1591_s24 + $0x4] sm:$0xf] %v850_v14  ;;  %p863_p5 = scmp.ge.s32.totalorder %s862_s9, %s1896_s29  ;;  %v858_v18 = vld [vmem:[%s1595_s10 + $0x14] sm:$0xf]  ;;  %v860_v19 = vld [vmem:[%s1595_s10 + $0x18] sm:$0xf] }
 0x143   : >> { %853 = vst [vmem:[%s1591_s24 + $0x8] sm:$0xf] %v852_v15  ;;  %s842_s8 = sadd.s32 1, %s1603_s8  }
 0x144   : >> { %855 = vst [vmem:[%s1591_s24 + $0xc] sm:$0xf] %v854_v16  ;;  %s1969_s9 = smov (%p863_p5, %s862_s9), 0  ;;  %p841_p6 = scmp.ge.s32.totalorder %s842_s8, %s1896_s29 }
 0x145   : >> { %857 = vst [vmem:[%s1591_s24 + $0x10] sm:$0xf] %v856_v17  ;;  %s865_s11 = smul.u32 28, %s1969_s9  ;;  %s1956_s27 = smov %s1969_s9 }
 0x146   : >> { %859 = vst [vmem:[%s1591_s24 + $0x14] sm:$0xf] %v858_v18  ;;  %844 = sbr.rel (!%p841_p6) target bundleno = 320 (0x140), region = 216 }
 0x147   : >> { %861 = vst [vmem:[%s1591_s24 + $0x18] sm:$0xf] %v860_v19  ;;  %s867_s10 = scalar_lea.vmem %s1794_s30, %s865_s11 [#allocation3]   ;;  %s868_s24 = scalar_lea.vmem %s1890_s19, %s865_s11  }
 0x14b PF: > { %1466 = sdivrem.u32 %s1967_s13, 7 }
 0x14c   : > { %s1264_s14 = smul.u32 28, %s1896_s29 }
 0x14e   : > { %s1928_s16 = scalar_lea.vmem %s1794_s30, %s1264_s14 [#allocation3]   ;;  %s875_s12 = scalar_lea.vmem %s1890_s19, %s1264_s14  }
 0x154   : > { %s1467_s20 = spop.drf %1466 }
 0x155   : > { %s1468_s21 = spop.drf %1466 }
 0x156   : > { %p1266_p7 = scmp.le.s32.totalorder %s1468_s21, 0 }
 0x157   : > { %s1605_s7 = smov (!%p1266_p7), %s875_s12   ;;  %s1609_s15 = smov (!%p1266_p7), %s1928_s16  }
 0x158   : > { %1092 = sbr.rel (%p1266_p7) target bundleno = 357 (0x165), region = 221  ;;  %s1613_s17 = smov (!%p1266_p7), 0  }
 0x159   : > { %s1617_s18 = smov (!%p1266_p7), 0  }
 0x15d LB: >> { %v885_v20 = vld [vmem:[%s1611_s15] sm:$0xf]  ;;  %s887_s30 = sadd.s32 1, %s1615_s17  ;;  %s879_s18 = sadd.s32 1, %s1619_s18   ;;  %s1619_s18 = sphi %s1617_s18, %s879_s18   ;;  %s1615_s17 = sphi %s1613_s17, %s1614_s17   ;;  %s1611_s15 = sphi %s1609_s15, %s892_s15   ;;  %s1607_s7 = sphi %s1605_s7, %s893_s7  }
 0x15e   : >> { %886 = vst [vmem:[%s1607_s7] sm:$0xf] %v885_v20  ;;  %p888_p8 = scmp.ge.s32.totalorder %s887_s30, %s1468_s21  ;;  %p878_p9 = scmp.ge.s32.totalorder %s879_s18, %s1468_s21 }
 0x160   : >> { %s1971_s30 = smov (%p888_p8, %s887_s30), 0  ;;  %881 = sbr.rel (!%p878_p9) target bundleno = 349 (0x15d), region = 227 }
 0x161   : >> { %s1267_s13 = sshll.u32 %s1971_s30, 2  ;;  %s1614_s17 = smov %s1971_s30  }
 0x162   : >> { %s892_s15 = scalar_lea.vmem %s1928_s16, %s1267_s13 [#allocation3]   ;;  %s893_s7 = scalar_lea.vmem %s875_s12, %s1267_s13  }
 0x165 PF: > { %p14_p10 = scmp.ge.s32.totalorder %s1671_s25, 4   ;;  %s1957_s21 = smov %s1551_s22 }
 0x166   : > { %s1958_s22 = smov %s1679_s28  ;;  %s1959_s23 = smov %s1671_s25 }
 0x167   :  { %16 = sbr.rel (!%p14_p10) target bundleno = 2 (0x2), region = 238 }

// kernel: stem_forward.14
= control target key start
LH: loop header
LB: loop body
LE: loop exit
PB: predicated region body
PF: predicated region fallthrough
CT: control target
= control target key end

     0   :  { %s1331_s12 = smov 0   ;;  %s1333_s13 = smov 0   ;;  %s1573_s0 = inlined_call_operand.vmem [shape: bf16[98,448], index: 0, kind: input, shape index: {}]   ;;  %s1574_s1 = inlined_call_operand.vmem [shape: bf16[448,64], index: 1, kind: input, shape index: {}]   ;;  %s1575_s2 = inlined_call_operand.vmem [shape: f32[1,64], index: 2, kind: input, shape index: {}]   ;;  %s1576_s3 = inlined_call_operand.vmem [shape: bf16[98,64], index: 3, kind: output, shape index: {}]  }
   0x1   :  { %s1335_s14 = smov 0  }
   0x2 LB: > { %s1344_s15 = sadd.s32 4294967295, %s1277_s14   ;;  %s1346_s16 = sadd.s32 1, %s1277_s14   ;;  %s1277_s14 = sphi %s1335_s14, %s1583_s14   ;;  %s1273_s13 = sphi %s1333_s13, %s1582_s13   ;;  %s1269_s12 = sphi %s1331_s12, %s1581_s12  }
   0x3   : > { %s85_s17 = ssub.s32 %s1277_s14, %s1346_s16  ;;  %s88_s18 = sadd.s32 1, %s1273_s13 }
   0x4   : > { %p86_p0 = scmp.eq.s32.totalorder %s85_s17, 0  ;;  %p98_p1 = scmp.ne.s32.totalorder %s1273_s13, %s1269_s12 }
   0x5   : > { %p99_p2 = scmp.eq.s32.totalorder %s1344_s15, 1  ;;  %p905_p3 = scmp.ge.s32.totalorder %s1277_s14, 1 }
   0x6   : > { %s1354_s19 = scalar_select %p86_p0, %s1273_s13, %s88_s18  }
   0x7   : > { %p1356_p4 = por %p99_p2, %p98_p1  ;;  %p149_p5 = scmp.lt.s32.totalorder %s1277_s14, 3 }
   0x9   : > { %p150_p6 = pnand %p905_p3, %p149_p5 }
   0xa   : > { %s1370_s27 = smul.u32 (!%p150_p6), 7, %s1344_s15 }
   0xb   : > { %153 = sbr.rel (%p150_p6) target bundleno = 296 (0x128), region = 32 }
   0xc   : > { %p184_p7 = scmp.lt.s32.totalorder (!%p150_p6), %s1370_s27, 12 }
  0x10   : > { %v1104_v0 = vld [vmem:[%s1574_s1 + $0x38] sm:$0xff]  ;;  %v1103_v3 = vld [vmem:[%s1574_s1 + $0x30] sm:$0xff]  ;;  %s185_s9 = scalar_select %p184_p7, %s1370_s27, 12  ;;  %v1102_v8 = vld [vmem:[%s1574_s1 + $0x28] sm:$0xff]  ;;  %vm513_vm0 = vcmask 523264   ;;  %vm652_vm1 = vcmask 519168  }
  0x11   : > { %v1112_v1 = vld [vmem:[%s1574_s1 + $0x78] sm:$0xff]  ;;  %526 = vmatpush.bf16.msra.mxu0 %v1104_v0  ;;  %v1111_v4 = vld [vmem:[%s1574_s1 + $0x70] sm:$0xff]  ;;  %v1110_v9 = vld [vmem:[%s1574_s1 + $0x68] sm:$0xff]  ;;  %s1125_s28 = smul.u32 (%p1356_p4), 28, %s1344_s15 }
  0x12   : > { %v1120_v2 = vld [vmem:[%s1574_s1 + $0xb8] sm:$0xff]  ;;  %554 = vmatpush.bf16.msra.mxu1 %v1112_v1  ;;  %v1119_v5 = vld [vmem:[%s1574_s1 + $0xb0] sm:$0xff]  ;;  %v1118_v10 = vld [vmem:[%s1574_s1 + $0xa8] sm:$0xff]  ;;  %s1084_s24 = sshll.u32 %s185_s9, 4 }
  0x13   : > { %582 = vmatpush.bf16.msra.mxu2 %v1120_v2  ;;  %v1124_v6 = vld [vmem:[%s1574_s1 + $0xd8] sm:$0xff]  ;;  %v1123_v7 = vld [vmem:[%s1574_s1 + $0xd0] sm:$0xff]  ;;  %v1122_v11 = vld [vmem:[%s1574_s1 + $0xc8] sm:$0xff]  ;;  %s1410_s7 = scalar_lea.vmem %s1573_s0, %s1084_s24  ;;  %s1520_s4 = scalar_lea.vmem (%p1356_p4), %s1576_s3, %s1125_s28  }
  0x14   : > { %614 = vmatpush.bf16.msra.mxu3 %v1124_v6  ;;  %v1101_v12 = vld [vmem:[%s1574_s1 + $0x20] sm:$0xff]  ;;  %v1086_v16 = vld [vmem:[%s1410_s7 + $0xc] sm:$0xf]  ;;  %v920_v17 = vld [vmem:[%s1410_s7 + $0x18] sm:$0xf0] }
  0x15   : > { %527 = vmatpush.bf16.msra.mxu0 %v1103_v3  ;;  %v1109_v13 = vld [vmem:[%s1574_s1 + $0x60] sm:$0xff]  ;;  %v1100_v18 = vld [vmem:[%s1574_s1 + $0x18] sm:$0xff]  ;;  %v923_v21 = vor.u32 %v1086_v16, %v920_v17  ;;  %v1099_v22 = vld [vmem:[%s1574_s1 + $0x10] sm:$0xff] }
  0x16   : > { %555 = vmatpush.bf16.msra.mxu1 %v1111_v4  ;;  %v1117_v14 = vld [vmem:[%s1574_s1 + $0xa0] sm:$0xff]  ;;  %v1108_v19 = vld [vmem:[%s1574_s1 + $0x58] sm:$0xff]  ;;  %v1107_v23 = vld [vmem:[%s1574_s1 + $0x50] sm:$0xff] }
  0x17   : > { %583 = vmatpush.bf16.msra.mxu2 %v1119_v5  ;;  %v1121_v15 = vld [vmem:[%s1574_s1 + $0xc0] sm:$0xff]  ;;  %v1116_v20 = vld [vmem:[%s1574_s1 + $0x98] sm:$0xff]  ;;  %v1115_v24 = vld [vmem:[%s1574_s1 + $0x90] sm:$0xff] }
  0x18   : > { %615 = vmatpush.bf16.msra.mxu3 %v1123_v7  ;;  %v1098_v25 = vld [vmem:[%s1574_s1 + $0x8] sm:$0xff]  ;;  %v1097_v28 = vld [vmem:[%s1574_s1] sm:$0xff]  ;;  %v1087_v31 = vld [vmem:[%s1410_s7 + $0xc] sm:$0xf0] }
  0x19   : > { %528 = vmatpush.bf16.msra.mxu0 %v1102_v8  ;;  %v1106_v26 = vld [vmem:[%s1574_s1 + $0x48] sm:$0xff]  ;;  %v1105_v29 = vld [vmem:[%s1574_s1 + $0x40] sm:$0xff]  ;;  %v912_v33 = vld [vmem:[%s1410_s7 + $0x10] sm:$0xf0] }
  0x1a   : > { %556 = vmatpush.bf16.msra.mxu1 %v1110_v9  ;;  %v1114_v27 = vld [vmem:[%s1574_s1 + $0x88] sm:$0xff]  ;;  %v910_v30 = vld [vmem:[%s1410_s7] sm:$0xf]  ;;  %v1085_v32 = vld [vmem:[%s1410_s7 + $0x4] sm:$0xf] }
  0x1b   : > { %584 = vmatpush.bf16.msra.mxu2 %v1118_v10  ;;  %v1113_v34 = vld [vmem:[%s1574_s1 + $0x80] sm:$0xff]  ;;  %v918_v35 = vld [vmem:[%s1410_s7 + $0x8] sm:$0xf]  ;;  %v1088_v36 = vld [vmem:[%s1410_s7 + $0x14] sm:$0xf0]  ;;  %v911_v37 = vor.u32 %v1087_v31, %v910_v30  ;;  %v915_v38 = vor.u32 %v1085_v32, %v912_v33 }
  0x1c   : > { %616 = vmatpush.bf16.msra.mxu3 %v1122_v11  ;;  %v1090_v39 = vld [vmem:[%s1410_s7 + $0x2c] sm:$0xf]  ;;  %v936_v40 = vld [vmem:[%s1410_s7 + $0x38] sm:$0xf0]  ;;  %v919_v41 = vor.u32 %v1088_v36, %v918_v35  ;;  %v926_v43 = vld [vmem:[%s1410_s7 + $0x20] sm:$0xf] }
  0x1d   : > { %529 = vmatpush.bf16.msra.mxu0 %v1101_v12  ;;  %v939_v42 = vor.u32 %v1090_v39, %v936_v40  ;;  %v1091_v44 = vld [vmem:[%s1410_s7 + $0x2c] sm:$0xf0]  ;;  %v1089_v45 = vld [vmem:[%s1410_s7 + $0x24] sm:$0xf]  ;;  %v928_v46 = vld [vmem:[%s1410_s7 + $0x30] sm:$0xf0] }
  0x1e   : > { %557 = vmatpush.bf16.msra.mxu1 %v1109_v13  ;;  %v934_v47 = vld [vmem:[%s1410_s7 + $0x28] sm:$0xf]  ;;  %v1092_v48 = vld [vmem:[%s1410_s7 + $0x34] sm:$0xf0]  ;;  %v927_v49 = vor.u32 %v1091_v44, %v926_v43  ;;  %v931_v50 = vor.u32 %v1089_v45, %v928_v46  ;;  %v1094_v51 = vld [vmem:[%s1410_s7 + $0x4c] sm:$0xf] }
  0x1f   : > { %585 = vmatpush.bf16.msra.mxu2 %v1117_v14  ;;  %v952_v52 = vld [vmem:[%s1410_s7 + $0x58] sm:$0xf0]  ;;  %v935_v53 = vor.u32 %v1092_v48, %v934_v47  ;;  %v942_v55 = vld [vmem:[%s1410_s7 + $0x40] sm:$0xf]  ;;  %v214_v56 = vld [vmem:[%s1410_s7 + $0x68] sm:$0xff] }
  0x20   : > { %617 = vmatpush.bf16.msra.mxu3 %v1121_v15  ;;  %v955_v54 = vor.u32 %v1094_v51, %v952_v52  ;;  %v1095_v57 = vld [vmem:[%s1410_s7 + $0x4c] sm:$0xf0]  ;;  %v1093_v58 = vld [vmem:[%s1410_s7 + $0x44] sm:$0xf]  ;;  %v944_v59 = vld [vmem:[%s1410_s7 + $0x50] sm:$0xf0]  ;;  %v316_v62 = vunpack.c.h.b16 %v214_v56  ;;  %v315_v6 = vunpack.c.l.b16 %v214_v56 }
  0x21   : > { %530 = vmatpush.bf16.msra.mxu0 %v1100_v18  ;;  %v950_v60 = vld [vmem:[%s1410_s7 + $0x48] sm:$0xf]  ;;  %v1096_v61 = vld [vmem:[%s1410_s7 + $0x54] sm:$0xf0]  ;;  %v943_v63 = vor.u32 %v1095_v57, %v942_v55  ;;  %v947_v0 = vor.u32 %v1093_v58, %v944_v59  ;;  %v213_v3 = vld [vmem:[%s1410_s7 + $0x60] sm:$0xff]  ;;  %s175_s7 = sand.u32 1, %s1269_s12  }
  0x22   : > { %558 = vmatpush.bf16.msra.mxu1 %v1108_v19  ;;  %v951_v1 = vor.u32 %v1096_v61, %v950_v60  ;;  %v332_v2 = vpack.c.b16 %v316_v62, %v316_v62  ;;  %v313_v4 = vunpack.c.l.b16 %v213_v3  ;;  %v314_v5 = vunpack.c.h.b16 %v213_v3  ;;  %v1487_v11 = vld [vmem:[%s1575_s2] ss:$0 sm:$0xff]  ;;  %s1126_s25 = smul.u32 28, %s175_s7  ;;  %s668_s12 = ssub.s32 (%p1356_p4), 13, %s1370_s27 }
  0x23   : > { %586 = vmatpush.bf16.msra.mxu2 %v1116_v20  ;;  %1068 = vmatmul.msk.bf16.vlgmr.msra.gmra.mxu3 %vm513_vm0, %v923_v21  ;;  %v331_v9 = vpack.c.b16 %v315_v6, %v315_v6  ;;  %p669_p8 = scmp.lt.s32.totalorder (%p1356_p4), %s668_s12, 7 }
  0x24   : > { %v329_v7 = vpack.c.b16 %v313_v4, %v313_v4  ;;  %v330_v8 = vpack.c.b16 %v314_v5, %v314_v5  ;;  %s1492_s26 = scalar_lea.vmem [#allocation2], %s1126_s25  }
  0x25   : > { %531 = vmatpush.bf16.msra.mxu0 %v1099_v22 }
  0x26   : > { %559 = vmatpush.bf16.msra.mxu1 %v1107_v23 }
  0x27   : > { %587 = vmatpush.bf16.msra.mxu2 %v1115_v24 }
  0x29   : > { %532 = vmatpush.bf16.msra.mxu0 %v1098_v25 }
  0x2a   : > { %560 = vmatpush.bf16.msra.mxu1 %v1106_v26 }
  0x2b   : > { %588 = vmatpush.bf16.msra.mxu2 %v1114_v27 }
  0x2d   : > { %533 = vmatpush.bf16.msra.mxu0 %v1097_v28 }
  0x2e   : > { %561 = vmatpush.bf16.msra.mxu1 %v1105_v29 }
  0x2f   : > { %589 = vmatpush.bf16.msra.mxu2 %v1113_v34 }
  0x30   : > { %534 = vmatmul.bf16.vlgmr.msra.gmra.mxu0 %v911_v37 }
  0x31   : > { %562 = vmatmul.bf16.vlgmr.msra.gmra.mxu1 %v915_v38 }
  0x32   : > { %590 = vmatmul.bf16.vlgmr.msra.gmra.mxu2 %v919_v41 }
  0x33   : > { %1069 = vmatmul.msk.bf16.gmra.mxu3 %vm513_vm0, %v939_v42 }
  0x40   : > { %539 = vmatmul.bf16.gmra.mxu0 %v927_v49 }
  0x41   : > { %567 = vmatmul.bf16.gmra.mxu1 %v931_v50 }
  0x42   : > { %595 = vmatmul.bf16.gmra.mxu2 %v935_v53 }
  0x43   : > { %1070 = vmatmul.msk.bf16.gmra.mxu3 %vm513_vm0, %v955_v54 }
  0x50   : > { %544 = vmatmul.bf16.gmra.mxu0 %v943_v63 }
  0x51   : > { %572 = vmatmul.bf16.gmra.mxu1 %v947_v0 }
  0x52   : > { %600 = vmatmul.bf16.gmra.mxu2 %v951_v1 }
  0x53   : > { %1071 = vmatmul.msk.bf16.gmra.mxu3 %vm513_vm0, %v332_v2 }
  0x60   : > { %549 = vmatmul.bf16.gmra.mxu0 %v329_v7 }
  0x61   : > { %577 = vmatmul.bf16.gmra.mxu1 %v330_v8 }
  0x62   : > { %605 = vmatmul.bf16.gmra.mxu2 %v331_v9 }
  0xa6   : > { %v619_v10 = vpop.f32.mrf.mxu3 }
  0xad   : > { %v535_v12 = vpop.f32.mrf.mxu0 }
  0xae   : > { %v563_v13 = vpop.f32.mrf.mxu1  ;;  %v536_v14 = vadd.f32 %v1487_v11, %v535_v12  ;;  %v621_v15 = vpop.f32.mrf.mxu3 }
  0xb0   : > { %v564_v16 = vadd.f32 %v563_v13, %v536_v14 }
  0xb5   : > { %v591_v17 = vpop.f32.mrf.mxu2  ;;  %v537_v19 = vpop.f32.mrf.mxu0 }
  0xb6   : > { %v592_v18 = vadd.f32 %v591_v17, %v564_v16  ;;  %v565_v20 = vpop.f32.mrf.mxu1  ;;  %v624_v21 = vpop.f32.mrf.mxu3  ;;  %v538_v23 = vadd.f32 %v1487_v11, %v537_v19 }
  0xb8   : > { %v620_v22 = vadd.f32 %v619_v10, %v592_v18  ;;  %v566_v26 = vadd.f32 %v565_v20, %v538_v23 }
  0xba   : > { %v638_v24 = vmax.f32 %v620_v22, 0.0 }
  0xbc   : > { %v645_v25 = vpack.c.bf16 %v638_v24, %v638_v24 }
  0xbd   : > { %v593_v27 = vpop.f32.mrf.mxu2  ;;  %v540_v29 = vpop.f32.mrf.mxu0 }
  0xbe   : > { %653 = vst.msk [vmem:[%s1492_s26] sm:$0xf] %vm652_vm1, %v645_v25  ;;  %v594_v28 = vadd.f32 %v593_v27, %v566_v26  ;;  %v568_v30 = vpop.f32.mrf.mxu1  ;;  %v541_v31 = vadd.f32 %v1487_v11, %v540_v29  ;;  %v626_v32 = vpop.f32.mrf.mxu3 }
  0xc0   : > { %v622_v33 = vadd.f32 %v621_v15, %v594_v28  ;;  %v569_v35 = vadd.f32 %v568_v30, %v541_v31 }
  0xc2   : > { %v639_v34 = vmax.f32 %v622_v33, 0.0 }
  0xc4   : > { %v646_v36 = vpack.c.bf16 %v639_v34, %v639_v34 }
  0xc5   : > { %v596_v37 = vpop.f32.mrf.mxu2  ;;  %v542_v39 = vpop.f32.mrf.mxu0 }
  0xc6   : > { %654 = vst.msk [vmem:[%s1492_s26 + $0x4] sm:$0xf] %vm652_vm1, %v646_v36  ;;  %v597_v38 = vadd.f32 %v596_v37, %v569_v35  ;;  %v570_v40 = vpop.f32.mrf.mxu1  ;;  %v629_v41 = vpop.f32.mrf.mxu3  ;;  %v543_v43 = vadd.f32 %v1487_v11, %v542_v39 }
  0xc8   : > { %v625_v42 = vadd.f32 %v624_v21, %v597_v38  ;;  %v571_v46 = vadd.f32 %v570_v40, %v543_v43 }
  0xca   : > { %v640_v44 = vmax.f32 %v625_v42, 0.0 }
  0xcc   : > { %v647_v45 = vpack.c.bf16 %v640_v44, %v640_v44 }
  0xcd   : > { %v598_v47 = vpop.f32.mrf.mxu2  ;;  %v545_v49 = vpop.f32.mrf.mxu0 }
  0xce   : > { %655 = vst.msk [vmem:[%s1492_s26 + $0x8] sm:$0xf] %vm652_vm1, %v647_v45  ;;  %v599_v48 = vadd.f32 %v598_v47, %v571_v46  ;;  %v573_v50 = vpop.f32.mrf.mxu1  ;;  %v546_v51 = vadd.f32 %v1487_v11, %v545_v49  ;;  %v631_v52 = vpop.f32.mrf.mxu3 }
  0xd0   : > { %v627_v53 = vadd.f32 %v626_v32, %v599_v48  ;;  %v574_v55 = vadd.f32 %v573_v50, %v546_v51 }
  0xd2   : > { %v641_v54 = vmax.f32 %v627_v53, 0.0 }
  0xd4   : > { %v648_v56 = vpack.c.bf16 %v641_v54, %v641_v54 }
  0xd5   : > { %v601_v57 = vpop.f32.mrf.mxu2  ;;  %v547_v59 = vpop.f32.mrf.mxu0 }
  0xd6   : > { %656 = vst.msk [vmem:[%s1492_s26 + $0xc] sm:$0xf] %vm652_vm1, %v648_v56  ;;  %v602_v58 = vadd.f32 %v601_v57, %v574_v55  ;;  %v575_v60 = vpop.f32.mrf.mxu1  ;;  %v634_v61 = vpop.f32.mrf.mxu3  ;;  %v548_v63 = vadd.f32 %v1487_v11, %v547_v59 }
  0xd8   : > { %v630_v62 = vadd.f32 %v629_v41, %v602_v58  ;;  %v576_v2 = vadd.f32 %v575_v60, %v548_v63 }
  0xda   : > { %v642_v0 = vmax.f32 %v630_v62, 0.0 }
  0xdc   : > { %v649_v1 = vpack.c.bf16 %v642_v0, %v642_v0 }
  0xdd   : > { %v603_v3 = vpop.f32.mrf.mxu2  ;;  %v550_v5 = vpop.f32.mrf.mxu0 }
  0xde   : > { %657 = vst.msk [vmem:[%s1492_s26 + $0x10] sm:$0xf] %vm652_vm1, %v649_v1  ;;  %v604_v4 = vadd.f32 %v603_v3, %v576_v2  ;;  %v578_v6 = vpop.f32.mrf.mxu1  ;;  %v551_v7 = vadd.f32 %v1487_v11, %v550_v5  ;;  %v636_v8 = vpop.f32.mrf.mxu3 }
  0xe0   : > { %v632_v9 = vadd.f32 %v631_v52, %v604_v4  ;;  %v579_v12 = vadd.f32 %v578_v6, %v551_v7 }
  0xe2   : > { %v643_v10 = vmax.f32 %v632_v9, 0.0 }
  0xe4   : > { %v650_v13 = vpack.c.bf16 %v643_v10, %v643_v10 }
  0xe5   : > { %v606_v14 = vpop.f32.mrf.mxu2  ;;  %v552_v16 = vpop.f32.mrf.mxu0 }
  0xe6   : > { %658 = vst.msk [vmem:[%s1492_s26 + $0x14] sm:$0xf] %vm652_vm1, %v650_v13  ;;  %v607_v15 = vadd.f32 %v606_v14, %v579_v12  ;;  %v580_v17 = vpop.f32.mrf.mxu1 }
  0xe8   : > { %v635_v18 = vadd.f32 %v634_v61, %v607_v15 }
  0xea   : > { %v644_v19 = vmax.f32 %v635_v18, 0.0  ;;  %666 = sbr.rel (!%p1356_p4) target bundleno = 296 (0x128), region = 36 }
  0xec   : > { %v651_v20 = vpack.c.bf16 %v644_v19, %v644_v19 }
  0xed   : > { %v608_v21 = vpop.f32.mrf.mxu2 }
  0xee   : > { %659 = vst.msk [vmem:[%s1492_s26 + $0x18] sm:$0xf] %vm652_vm1, %v651_v20 }
  0xef   : > { %s1585_s12 = smov (!%p669_p8, %s668_s12), 7 }
  0xf0   : > { %s1072_s5 = sshll.u32 %s1585_s12, 2 }
  0xf1   : > { %p1075_p9 = scmp.eq.s32.totalorder %s1072_s5, 0 }
  0xf2   : > { %1217 = sdivrem.u32 (!%p1075_p9), %s1585_s12, 7 }
  0xf3   : > { %677 = sbr.rel (%p1075_p9) target bundleno = 296 (0x128), region = 40 }
  0xfb   : > { %s1526_s20 = spop.drf %1217 }
  0xfc   : > { %s1219_s6 = spop.drf %1217  ;;  %p1076_p10 = scmp.le.s32.totalorder %s1526_s20, 0 }
  0xfd   : > { %s1578_s15 = smov (!%p1076_p10), %s1520_s4  ;;  %s1579_s27 = smov (!%p1076_p10), %s1492_s26 }
  0xfe   : > { %858 = sbr.rel (%p1076_p10) target bundleno = 270 (0x10e), region = 112  ;;  %s1535_s8 = smov (!%p1076_p10), 0  }
  0xff   : > { %s1537_s9 = smov (!%p1076_p10), 0  }
 0x103 LB: >> { %v695_v11 = vld [vmem:[%s1285_s27] sm:$0xf]  ;;  %v697_v22 = vld [vmem:[%s1285_s27 + $0x4] sm:$0xf]  ;;  %v699_v23 = vld [vmem:[%s1285_s27 + $0x8] sm:$0xf]  ;;  %s1293_s9 = sphi %s1537_s9, %s689_s9   ;;  %s1289_s8 = sphi %s1535_s8, %s1580_s8   ;;  %s1285_s27 = sphi %s1579_s27, %s714_s27   ;;  %s1281_s15 = sphi %s1578_s15, %s715_s15  }
 0x104   : >> { %696 = vst [vmem:[%s1281_s15] sm:$0xf] %v695_v11  ;;  %v701_v24 = vld [vmem:[%s1285_s27 + $0xc] sm:$0xf]  ;;  %s709_s10 = sadd.s32 1, %s1289_s8  ;;  %v703_v25 = vld [vmem:[%s1285_s27 + $0x10] sm:$0xf] }
 0x105   : >> { %698 = vst [vmem:[%s1281_s15 + $0x4] sm:$0xf] %v697_v22  ;;  %p710_p11 = scmp.ge.s32.totalorder %s709_s10, %s1526_s20  ;;  %v705_v26 = vld [vmem:[%s1285_s27 + $0x14] sm:$0xf]  ;;  %v707_v27 = vld [vmem:[%s1285_s27 + $0x18] sm:$0xf] }
 0x106   : >> { %700 = vst [vmem:[%s1281_s15 + $0x8] sm:$0xf] %v699_v23  ;;  %s689_s9 = sadd.s32 1, %s1293_s9  }
 0x107   : >> { %702 = vst [vmem:[%s1281_s15 + $0xc] sm:$0xf] %v701_v24  ;;  %s1587_s10 = smov (%p710_p11, %s709_s10), 0  ;;  %p688_p12 = scmp.ge.s32.totalorder %s689_s9, %s1526_s20 }
 0x108   : >> { %704 = vst [vmem:[%s1281_s15 + $0x10] sm:$0xf] %v703_v25  ;;  %s712_s11 = smul.u32 28, %s1587_s10  ;;  %s1580_s8 = smov %s1587_s10 }
 0x109   : >> { %706 = vst [vmem:[%s1281_s15 + $0x14] sm:$0xf] %v705_v26  ;;  %691 = sbr.rel (!%p688_p12) target bundleno = 259 (0x103), region = 118 }
 0x10a   : >> { %708 = vst [vmem:[%s1281_s15 + $0x18] sm:$0xf] %v707_v27  ;;  %s714_s27 = scalar_lea.vmem %s1492_s26, %s712_s11 [#allocation2]   ;;  %s715_s15 = scalar_lea.vmem %s1520_s4, %s712_s11  }
 0x10e PF: > { %1220 = sdivrem.u32 %s1585_s12, 7 }
 0x10f   : > { %s1077_s14 = smul.u32 28, %s1526_s20 }
 0x111   : > { %s1558_s17 = scalar_lea.vmem %s1492_s26, %s1077_s14 [#allocation2]   ;;  %s722_s18 = scalar_lea.vmem %s1520_s4, %s1077_s14  }
 0x117   : > { %s1221_s21 = spop.drf %1220 }
 0x118   : > { %s1222_s22 = spop.drf %1220 }
 0x119   : > { %p1079_p13 = scmp.le.s32.totalorder %s1222_s22, 0 }
 0x11a   : > { %s1295_s23 = smov (!%p1079_p13), %s722_s18   ;;  %s1299_s24 = smov (!%p1079_p13), %s1558_s17  }
 0x11b   : > { %872 = sbr.rel (%p1079_p13) target bundleno = 296 (0x128), region = 123  ;;  %s1303_s7 = smov (!%p1079_p13), 0  }
 0x11c   : > { %s1307_s25 = smov (!%p1079_p13), 0  }
 0x120 LB: >> { %v732_v28 = vld [vmem:[%s1301_s24] sm:$0xf]  ;;  %s734_s26 = sadd.s32 1, %s1305_s7  ;;  %s726_s25 = sadd.s32 1, %s1309_s25   ;;  %s1309_s25 = sphi %s1307_s25, %s726_s25   ;;  %s1305_s7 = sphi %s1303_s7, %s1304_s7   ;;  %s1301_s24 = sphi %s1299_s24, %s739_s24   ;;  %s1297_s23 = sphi %s1295_s23, %s740_s23  }
 0x121   : >> { %733 = vst [vmem:[%s1297_s23] sm:$0xf] %v732_v28  ;;  %p735_p0 = scmp.ge.s32.totalorder %s734_s26, %s1222_s22  ;;  %p725_p1 = scmp.ge.s32.totalorder %s726_s25, %s1222_s22 }
 0x123   : >> { %s1589_s26 = smov (%p735_p0, %s734_s26), 0  ;;  %728 = sbr.rel (!%p725_p1) target bundleno = 288 (0x120), region = 129 }
 0x124   : >> { %s1080_s12 = sshll.u32 %s1589_s26, 2  ;;  %s1304_s7 = smov %s1589_s26  }
 0x125   : >> { %s739_s24 = scalar_lea.vmem %s1558_s17, %s1080_s12 [#allocation2]   ;;  %s740_s23 = scalar_lea.vmem %s722_s18, %s1080_s12  }
 0x128 PF: > { %p10_p2 = scmp.ge.s32.totalorder %s1346_s16, 4   ;;  %s1581_s12 = smov %s1273_s13 }
 0x129   : > { %s1582_s13 = smov %s1354_s19  ;;  %s1583_s14 = smov %s1346_s16 }
 0x12a   :  { %12 = sbr.rel (!%p10_p2) target bundleno = 2 (0x2), region = 140 }

// kernel: stem_forward.16
= control target key start
LH: loop header
LB: loop body
LE: loop exit
PB: predicated region body
PF: predicated region fallthrough
CT: control target
= control target key end

     0   :  { %s2264_s21 = smov 0   ;;  %s2266_s22 = smov 0   ;;  %s2656_s0 = inlined_call_operand.vmem [shape: bf16[50,576], index: 0, kind: input, shape index: {}]   ;;  %s2657_s1 = inlined_call_operand.vmem [shape: bf16[50,576], index: 1, kind: input, shape index: {}]   ;;  %s2658_s2 = inlined_call_operand.vmem [shape: bf16[576,96], index: 2, kind: input, shape index: {}]   ;;  %s2659_s3 = inlined_call_operand.vmem [shape: bf16[576,96], index: 3, kind: input, shape index: {}]   ;;  %s2660_s4 = inlined_call_operand.vmem [shape: f32[1,96], index: 4, kind: input, shape index: {}]   ;;  %s2661_s5 = inlined_call_operand.vmem [shape: f32[1,96], index: 5, kind: input, shape index: {}]   ;;  %s2662_s6 = inlined_call_operand.vmem [shape: bf16[50,192], index: 6, kind: output, shape index: {}]  }
   0x1   :  { %s2268_s23 = smov 0  }
   0x2 LB: > { %s2277_s24 = sadd.s32 4294967295, %s2194_s23   ;;  %s2279_s25 = sadd.s32 1, %s2194_s23   ;;  %s2194_s23 = sphi %s2268_s23, %s2669_s23   ;;  %s2190_s22 = sphi %s2266_s22, %s2668_s22   ;;  %s2186_s21 = sphi %s2264_s21, %s2667_s21  }
   0x3   : > { %s156_s26 = ssub.s32 %s2194_s23, %s2279_s25  ;;  %s159_s27 = sadd.s32 1, %s2190_s22 }
   0x4   : > { %p157_p0 = scmp.eq.s32.totalorder %s156_s26, 0  ;;  %p169_p1 = scmp.ne.s32.totalorder %s2190_s22, %s2186_s21 }
   0x5   : > { %p170_p2 = scmp.eq.s32.totalorder %s2277_s24, 1  ;;  %p1542_p3 = scmp.ge.s32.totalorder %s2194_s23, 1 }
   0x6   : > { %s2287_s28 = scalar_select %p157_p0, %s2190_s22, %s159_s27  }
   0x7   : > { %p2289_p4 = por %p170_p2, %p169_p1  ;;  %p246_p5 = scmp.lt.s32.totalorder %s2194_s23, 3 }
   0x9   : > { %p247_p6 = pnand %p1542_p3, %p246_p5 }
   0xa   : > { %s2330_s12 = sshll.u32 (!%p247_p6), %s2277_s24, 2  ;;  %s2228_s10 = smov (!%p247_p6), 96  }
   0xb   : > { %250 = sbr.rel (%p247_p6) target bundleno = 420 (0x1a4), region = 44  ;;  %p298_p7 = scmp.lt.s32.totalorder (!%p247_p6), %s2330_s12, 6 }
  0x10   : > { %v1956_v0 = vld [vmem:[%s2658_s2 + $0x38] sm:$0xff]  ;;  %v1955_v4 = vld [vmem:[%s2658_s2 + $0x30] sm:$0xff]  ;;  %v1954_v8 = vld [vmem:[%s2658_s2 + $0x28] sm:$0xff]  ;;  %s2352_s7 = scalar_select %p298_p7, %s2330_s12, 6  ;;  %vm687_vm0 = vcmask 523264   ;;  %vm797_vm1 = vcmask 781312  }
  0x11   : > { %v1964_v1 = vld [vmem:[%s2658_s2 + $0x78] sm:$0xff]  ;;  %694 = vmatpush.bf16.msra.mxu0 %v1956_v0  ;;  %v1963_v5 = vld [vmem:[%s2658_s2 + $0x70] sm:$0xff]  ;;  %v1962_v9 = vld [vmem:[%s2658_s2 + $0x68] sm:$0xff]  ;;  %vm1290_vm2 = vcmask 1044224   ;;  %vm1291_vm3 = vcmask 523268   ;;  %vm1281_vm4 = vcmask 785408  }
  0x12   : > { %v1972_v2 = vld [vmem:[%s2658_s2 + $0xb8] sm:$0xff]  ;;  %713 = vmatpush.bf16.msra.mxu1 %v1964_v1  ;;  %v1971_v6 = vld [vmem:[%s2658_s2 + $0xb0] sm:$0xff]  ;;  %v1970_v10 = vld [vmem:[%s2658_s2 + $0xa8] sm:$0xff]  ;;  %s2048_s17 = smul.u32 20, %s2352_s7  ;;  %s1305_s13 = ssub.s32 (%p2289_p4), 7, %s2330_s12 }
  0x13   : > { %v1980_v3 = vld [vmem:[%s2658_s2 + $0xf8] sm:$0xff]  ;;  %732 = vmatpush.bf16.msra.mxu2 %v1972_v2  ;;  %v1979_v7 = vld [vmem:[%s2658_s2 + $0xf0] sm:$0xff]  ;;  %v1978_v11 = vld [vmem:[%s2658_s2 + $0xe8] sm:$0xff]  ;;  %s2033_s7 = sshll.u32 (%p2289_p4), %s2277_s24, 5  ;;  %p1306_p8 = scmp.lt.s32.totalorder (%p2289_p4), %s1305_s13, 4 }
  0x14   : > { %751 = vmatpush.bf16.msra.mxu3 %v1980_v3  ;;  %v1953_v12 = vld [vmem:[%s2658_s2 + $0x20] sm:$0xff]  ;;  %v1952_v16 = vld [vmem:[%s2658_s2 + $0x18] sm:$0xff]  ;;  %v1951_v20 = vld [vmem:[%s2658_s2 + $0x10] sm:$0xff]  ;;  %s2384_s11 = scalar_lea.vmem %s2656_s0, %s2048_s17  ;;  %s2503_s30 = scalar_lea.vmem %s2657_s1, %s2048_s17 }
  0x15   : > { %695 = vmatpush.bf16.msra.mxu0 %v1955_v4  ;;  %v1961_v13 = vld [vmem:[%s2658_s2 + $0x60] sm:$0xff]  ;;  %v1960_v17 = vld [vmem:[%s2658_s2 + $0x58] sm:$0xff]  ;;  %v1959_v21 = vld [vmem:[%s2658_s2 + $0x50] sm:$0xff]  ;;  %s2607_s15 = scalar_lea.vmem (%p2289_p4), %s2662_s6, %s2033_s7  }
  0x16   : > { %714 = vmatpush.bf16.msra.mxu1 %v1963_v5  ;;  %v1969_v14 = vld [vmem:[%s2658_s2 + $0xa0] sm:$0xff]  ;;  %v1968_v18 = vld [vmem:[%s2658_s2 + $0x98] sm:$0xff]  ;;  %v1967_v22 = vld [vmem:[%s2658_s2 + $0x90] sm:$0xff] }
  0x17   : > { %733 = vmatpush.bf16.msra.mxu2 %v1971_v6  ;;  %v1977_v15 = vld [vmem:[%s2658_s2 + $0xe0] sm:$0xff]  ;;  %v1976_v19 = vld [vmem:[%s2658_s2 + $0xd8] sm:$0xff]  ;;  %v1975_v23 = vld [vmem:[%s2658_s2 + $0xd0] sm:$0xff] }
  0x18   : > { %752 = vmatpush.bf16.msra.mxu3 %v1979_v7  ;;  %v1950_v24 = vld [vmem:[%s2658_s2 + $0x8] sm:$0xff]  ;;  %v1949_v28 = vld [vmem:[%s2658_s2] sm:$0xff]  ;;  %v1941_v33 = vld [vmem:[%s2384_s11 + $0x10] sm:$0xf0] }
  0x19   : > { %696 = vmatpush.bf16.msra.mxu0 %v1954_v8  ;;  %v1958_v25 = vld [vmem:[%s2658_s2 + $0x48] sm:$0xff]  ;;  %v1957_v29 = vld [vmem:[%s2658_s2 + $0x40] sm:$0xff]  ;;  %v1552_v35 = vld [vmem:[%s2384_s11 + $0x14] sm:$0xf0] }
  0x1a   : > { %715 = vmatpush.bf16.msra.mxu1 %v1962_v9  ;;  %v1966_v26 = vld [vmem:[%s2658_s2 + $0x88] sm:$0xff]  ;;  %v1965_v30 = vld [vmem:[%s2658_s2 + $0x80] sm:$0xff]  ;;  %v1942_v37 = vld [vmem:[%s2384_s11 + $0x18] sm:$0xf0] }
  0x1b   : > { %734 = vmatpush.bf16.msra.mxu2 %v1970_v10  ;;  %v1974_v27 = vld [vmem:[%s2658_s2 + $0xc8] sm:$0xff]  ;;  %v1973_v31 = vld [vmem:[%s2658_s2 + $0xc0] sm:$0xff]  ;;  %v2010_v40 = vld [vmem:[%s2659_s3 + $0x78] sm:$0xff] }
  0x1c   : > { %753 = vmatpush.bf16.msra.mxu3 %v1978_v11  ;;  %v1550_v32 = vld [vmem:[%s2384_s11] sm:$0xf]  ;;  %v1939_v34 = vld [vmem:[%s2384_s11 + $0x4] sm:$0xf]  ;;  %v1558_v36 = vld [vmem:[%s2384_s11 + $0x8] sm:$0xf] }
  0x1d   : > { %697 = vmatpush.bf16.msra.mxu0 %v1953_v12  ;;  %v1940_v38 = vld [vmem:[%s2384_s11 + $0xc] sm:$0xf]  ;;  %v1560_v39 = vld [vmem:[%s2384_s11 + $0x1c] sm:$0xf0]  ;;  %v2002_v41 = vld [vmem:[%s2659_s3 + $0x38] sm:$0xff]  ;;  %v1551_v42 = vor.u32 %v1941_v33, %v1550_v32  ;;  %v1555_v43 = vor.u32 %v1939_v34, %v1552_v35  ;;  %v1559_v44 = vor.u32 %v1942_v37, %v1558_v36 }
  0x1e   : > { %716 = vmatpush.bf16.msra.mxu1 %v1961_v13  ;;  %v1563_v45 = vor.u32 %v1940_v38, %v1560_v39  ;;  %v2018_v46 = vld [vmem:[%s2659_s3 + $0xb8] sm:$0xff]  ;;  %v2009_v48 = vld [vmem:[%s2659_s3 + $0x70] sm:$0xff]  ;;  %v2008_v52 = vld [vmem:[%s2659_s3 + $0x68] sm:$0xff] }
  0x1f   : > { %735 = vmatpush.bf16.msra.mxu2 %v1969_v14  ;;  %v1984_v47 = vld [vmem:[%s2658_s2 + $0x118] sm:$0xff]  ;;  %v2001_v49 = vld [vmem:[%s2659_s3 + $0x30] sm:$0xff]  ;;  %v2000_v53 = vld [vmem:[%s2659_s3 + $0x28] sm:$0xff] }
  0x20   : > { %754 = vmatpush.bf16.msra.mxu3 %v1977_v15  ;;  %v2017_v50 = vld [vmem:[%s2659_s3 + $0xb0] sm:$0xff]  ;;  %v2016_v54 = vld [vmem:[%s2659_s3 + $0xa8] sm:$0xff]  ;;  %v2007_v56 = vld [vmem:[%s2659_s3 + $0x60] sm:$0xff] }
  0x21   : > { %698 = vmatpush.bf16.msra.mxu0 %v1952_v16  ;;  %v1983_v51 = vld [vmem:[%s2658_s2 + $0x110] sm:$0xff]  ;;  %v1982_v55 = vld [vmem:[%s2658_s2 + $0x108] sm:$0xff]  ;;  %v1999_v57 = vld [vmem:[%s2659_s3 + $0x20] sm:$0xff] }
  0x22   : > { %717 = vmatpush.bf16.msra.mxu1 %v1960_v17  ;;  %v2015_v58 = vld [vmem:[%s2659_s3 + $0xa0] sm:$0xff]  ;;  %v1570_v59 = vld [vmem:[%s2384_s11 + $0x28] sm:$0xf]  ;;  %v1946_v60 = vld [vmem:[%s2384_s11 + $0x38] sm:$0xf0] }
  0x23   : > { %736 = vmatpush.bf16.msra.mxu2 %v1968_v18  ;;  %v1944_v61 = vld [vmem:[%s2384_s11 + $0x2c] sm:$0xf]  ;;  %v1572_v62 = vld [vmem:[%s2384_s11 + $0x3c] sm:$0xf0]  ;;  %v1578_v63 = vld [vmem:[%s2384_s11 + $0x30] sm:$0xf]  ;;  %v1571_v6 = vor.u32 %v1946_v60, %v1570_v59 }
  0x24   : > { %755 = vmatpush.bf16.msra.mxu3 %v1976_v19  ;;  %v1947_v0 = vld [vmem:[%s2384_s11 + $0x40] sm:$0xf0]  ;;  %v1945_v1 = vld [vmem:[%s2384_s11 + $0x34] sm:$0xf]  ;;  %v1580_v2 = vld [vmem:[%s2384_s11 + $0x44] sm:$0xf0]  ;;  %v1575_v7 = vor.u32 %v1944_v61, %v1572_v62 }
  0x25   : > { %699 = vmatpush.bf16.msra.mxu0 %v1951_v20  ;;  %v1981_v3 = vld [vmem:[%s2658_s2 + $0x100] sm:$0xff]  ;;  %v2006_v4 = vld [vmem:[%s2659_s3 + $0x58] sm:$0xff]  ;;  %v1579_v8 = vor.u32 %v1947_v0, %v1578_v63  ;;  %v1583_v9 = vor.u32 %v1945_v1, %v1580_v2  ;;  %v2005_v12 = vld [vmem:[%s2659_s3 + $0x50] sm:$0xff] }
  0x26   : > { %718 = vmatpush.bf16.msra.mxu1 %v1959_v21  ;;  %v1998_v5 = vld [vmem:[%s2659_s3 + $0x18] sm:$0xff]  ;;  %v1997_v13 = vld [vmem:[%s2659_s3 + $0x10] sm:$0xff]  ;;  %v2004_v16 = vld [vmem:[%s2659_s3 + $0x48] sm:$0xff] }
  0x27   : > { %737 = vmatpush.bf16.msra.mxu2 %v1967_v22  ;;  %v2014_v10 = vld [vmem:[%s2659_s3 + $0x98] sm:$0xff]  ;;  %v2013_v14 = vld [vmem:[%s2659_s3 + $0x90] sm:$0xff]  ;;  %v1996_v17 = vld [vmem:[%s2659_s3 + $0x8] sm:$0xff] }
  0x28   : > { %756 = vmatpush.bf16.msra.mxu3 %v1975_v23  ;;  %v2026_v11 = vld [vmem:[%s2659_s3 + $0xf8] sm:$0xff]  ;;  %v2025_v15 = vld [vmem:[%s2659_s3 + $0xf0] sm:$0xff]  ;;  %v2012_v18 = vld [vmem:[%s2659_s3 + $0x88] sm:$0xff] }
  0x29   : > { %700 = vmatpush.bf16.msra.mxu0 %v1950_v24  ;;  %v2024_v19 = vld [vmem:[%s2659_s3 + $0xe8] sm:$0xff]  ;;  %v2003_v20 = vld [vmem:[%s2659_s3 + $0x40] sm:$0xff]  ;;  %v1566_v22 = vld [vmem:[%s2384_s11 + $0x10] sm:$0xf] }
  0x2a   : > { %719 = vmatpush.bf16.msra.mxu1 %v1958_v25  ;;  %v1995_v21 = vld [vmem:[%s2659_s3] sm:$0xff]  ;;  %v2029_v37 = vld [vmem:[%s2659_s3 + $0x110] sm:$0xff]  ;;  %v2022_v38 = vld [vmem:[%s2659_s3 + $0xd8] sm:$0xff] }
  0x2b   : > { %738 = vmatpush.bf16.msra.mxu2 %v1966_v26  ;;  %v2011_v23 = vld [vmem:[%s2659_s3 + $0x80] sm:$0xff]  ;;  %v2030_v26 = vld [vmem:[%s2659_s3 + $0x118] sm:$0xff]  ;;  %v2028_v39 = vld [vmem:[%s2659_s3 + $0x108] sm:$0xff] }
  0x2c   : > { %757 = vmatpush.bf16.msra.mxu3 %v1974_v27  ;;  %v1943_v24 = vld [vmem:[%s2384_s11 + $0x20] sm:$0xf0]  ;;  %v1736_v25 = vld [vmem:[%s2503_s30] sm:$0xf]  ;;  %v1987_v27 = vld [vmem:[%s2503_s30 + $0x10] sm:$0xf0] }
  0x2d   : > { %701 = vmatpush.bf16.msra.mxu0 %v1949_v28  ;;  %v1985_v28 = vld [vmem:[%s2503_s30 + $0x4] sm:$0xf]  ;;  %v1567_v33 = vor.u32 %v1943_v24, %v1566_v22  ;;  %v1737_v34 = vor.u32 %v1987_v27, %v1736_v25  ;;  %v1752_v59 = vld [vmem:[%s2503_s30 + $0x10] sm:$0xf]  ;;  %v1766_v61 = vld [vmem:[%s2503_s30 + $0x44] sm:$0xf0] }
  0x2e   : > { %720 = vmatpush.bf16.msra.mxu1 %v1957_v29  ;;  %v1738_v29 = vld [vmem:[%s2503_s30 + $0x14] sm:$0xf0]  ;;  %v2023_v32 = vld [vmem:[%s2659_s3 + $0xe0] sm:$0xff]  ;;  %v1994_v63 = vld [vmem:[%s2503_s30 + $0x48] sm:$0xf0] }
  0x2f   : > { %739 = vmatpush.bf16.msra.mxu2 %v1965_v30  ;;  %v1744_v30 = vld [vmem:[%s2503_s30 + $0x8] sm:$0xf]  ;;  %v1741_v35 = vor.u32 %v1985_v28, %v1738_v29  ;;  %v1989_v60 = vld [vmem:[%s2503_s30 + $0x20] sm:$0xf0]  ;;  %v1772_v62 = vld [vmem:[%s2503_s30 + $0x38] sm:$0xf] }
  0x30   : > { %758 = vmatpush.bf16.msra.mxu3 %v1973_v31  ;;  %702 = vmatmul.bf16.vlgmr.msra.gmra.mxu0 %v1551_v42  ;;  %v1988_v31 = vld [vmem:[%s2503_s30 + $0x18] sm:$0xf0]  ;;  %v2020_v42 = vld [vmem:[%s2659_s3 + $0xc8] sm:$0xff]  ;;  %v1753_v1 = vor.u32 %v1989_v60, %v1752_v59  ;;  %vm1292_vm5 = vmor %vm1291_vm3, %vm1290_vm2 }
  0x31   : > { %721 = vmatmul.bf16.vlgmr.msra.gmra.mxu1 %v1555_v43  ;;  %774 = vmatpush.bf16.msrb.mxu0 %v1984_v47  ;;  %v1745_v36 = vor.u32 %v1988_v31, %v1744_v30  ;;  %v1586_v43 = vld [vmem:[%s2384_s11 + $0x38] sm:$0xf]  ;;  %v1990_v47 = vld [vmem:[%s2503_s30 + $0x2c] sm:$0xf] }
  0x32   : > { %1162 = vmatpush.bf16.msrb.mxu1 %v2002_v41  ;;  %740 = vmatmul.bf16.vlgmr.msra.gmra.mxu2 %v1559_v44  ;;  %v2027_v41 = vld [vmem:[%s2659_s3 + $0x100] sm:$0xff]  ;;  %v1948_v44 = vld [vmem:[%s2384_s11 + $0x48] sm:$0xf0] }
  0x33   : > { %1181 = vmatpush.bf16.msrb.mxu2 %v2010_v40  ;;  %759 = vmatmul.bf16.vlgmr.msra.gmra.mxu3 %v1563_v45  ;;  %v2021_v40 = vld [vmem:[%s2659_s3 + $0xd0] sm:$0xff]  ;;  %v1756_v45 = vld [vmem:[%s2503_s30 + $0x28] sm:$0xf] }
  0x34   : > { %1200 = vmatpush.bf16.msrb.mxu3 %v2018_v46  ;;  %v1992_v46 = vld [vmem:[%s2503_s30 + $0x38] sm:$0xf0] }
  0x35   : > { %775 = vmatpush.bf16.msrb.mxu0 %v1983_v51  ;;  %v2019_v51 = vld [vmem:[%s2659_s3 + $0xc0] sm:$0xff] }
  0x36   : > { %1163 = vmatpush.bf16.msrb.mxu1 %v2001_v49  ;;  %v1764_v49 = vld [vmem:[%s2503_s30 + $0x30] sm:$0xf] }
  0x37   : > { %1182 = vmatpush.bf16.msrb.mxu2 %v2009_v48  ;;  %v1758_v48 = vld [vmem:[%s2503_s30 + $0x3c] sm:$0xf0] }
  0x38   : > { %1201 = vmatpush.bf16.msrb.mxu3 %v2017_v50  ;;  %v1993_v50 = vld [vmem:[%s2503_s30 + $0x40] sm:$0xf0] }
  0x39   : > { %776 = vmatpush.bf16.msrb.mxu0 %v1982_v55  ;;  %v1765_v55 = vor.u32 %v1993_v50, %v1764_v49 }
  0x3a   : > { %1164 = vmatpush.bf16.msrb.mxu1 %v2000_v53  ;;  %v1757_v53 = vor.u32 %v1992_v46, %v1756_v45 }
  0x3b   : > { %1183 = vmatpush.bf16.msrb.mxu2 %v2008_v52  ;;  %v1587_v52 = vor.u32 %v1948_v44, %v1586_v43 }
  0x3c   : > { %1202 = vmatpush.bf16.msrb.mxu3 %v2016_v54  ;;  %v1761_v54 = vor.u32 %v1990_v47, %v1758_v48 }
  0x3d   : > { %777 = vmatpush.bf16.msrb.mxu0 %v1981_v3  ;;  %v1773_v3 = vor.u32 %v1994_v63, %v1772_v62 }
  0x3e   : > { %1165 = vmatpush.bf16.msrb.mxu1 %v1999_v57  ;;  %v1746_v57 = vld [vmem:[%s2503_s30 + $0x1c] sm:$0xf0] }
  0x3f   : > { %1184 = vmatpush.bf16.msrb.mxu2 %v2007_v56  ;;  %v1986_v56 = vld [vmem:[%s2503_s30 + $0xc] sm:$0xf] }
  0x40   : > { %1203 = vmatpush.bf16.msrb.mxu3 %v2015_v58  ;;  %707 = vmatmul.bf16.gmra.mxu0 %v1571_v6  ;;  %v1991_v58 = vld [vmem:[%s2503_s30 + $0x34] sm:$0xf]  ;;  %v1749_v0 = vor.u32 %v1986_v56, %v1746_v57  ;;  %s289_s30 = sand.u32 1, %s2186_s21  }
  0x41   : > { %726 = vmatmul.bf16.gmra.mxu1 %v1575_v7  ;;  %1219 = vmatpush.bf16.msra.mxu0 %v2026_v11  ;;  %v1769_v2 = vor.u32 %v1991_v58, %v1766_v61  ;;  %s1543_s27 = sshll.u32 %s289_s30, 5 }
  0x42   : > { %1166 = vmatpush.bf16.msrb.mxu1 %v1998_v5  ;;  %745 = vmatmul.bf16.gmra.mxu2 %v1579_v8  ;;  %s2579_s8 = scalar_lea.vmem [#allocation2], %s1543_s27  }
  0x43   : > { %1185 = vmatpush.bf16.msrb.mxu2 %v2006_v4  ;;  %764 = vmatmul.bf16.gmra.mxu3 %v1583_v9 }
  0x44   : > { %1204 = vmatpush.bf16.msrb.mxu3 %v2014_v10  ;;  %v2138_v10 = vld [vmem:[%s2660_s4] ss:$0 sm:$0xff] }
  0x45   : > { %1220 = vmatpush.bf16.msra.mxu0 %v2025_v15 }
  0x46   : > { %1167 = vmatpush.bf16.msrb.mxu1 %v1997_v13 }
  0x47   : > { %1186 = vmatpush.bf16.msrb.mxu2 %v2005_v12 }
  0x48   : > { %1205 = vmatpush.bf16.msrb.mxu3 %v2013_v14 }
  0x49   : > { %1221 = vmatpush.bf16.msra.mxu0 %v2024_v19 }
  0x4a   : > { %1168 = vmatpush.bf16.msrb.mxu1 %v1996_v17 }
  0x4b   : > { %1187 = vmatpush.bf16.msrb.mxu2 %v2004_v16 }
  0x4c   : > { %1206 = vmatpush.bf16.msrb.mxu3 %v2012_v18 }
  0x4d   : > { %1222 = vmatpush.bf16.msra.mxu0 %v2023_v32 }
  0x4e   : > { %1169 = vmatpush.bf16.msrb.mxu1 %v1995_v21 }
  0x4f   : > { %1188 = vmatpush.bf16.msrb.mxu2 %v2003_v20 }
  0x50   : > { %1207 = vmatpush.bf16.msrb.mxu3 %v2011_v23  ;;  %1732 = vmatmul.msk.bf16.vlgmr.msrb.gmra.mxu0 %vm687_vm0, %v1567_v33 }
  0x51   : > { %1170 = vmatmul.bf16.vlgmr.msrb.gmra.mxu1 %v1737_v34  ;;  %1223 = vmatpush.bf16.msra.mxu0 %v2022_v38 }
  0x52   : > { %1242 = vmatpush.bf16.msra.mxu1 %v2030_v26  ;;  %1189 = vmatmul.bf16.vlgmr.msrb.gmra.mxu2 %v1741_v35 }
  0x53   : > { %2036 = vmatpush.bf16.msra.mxu2 %v2026_v11  ;;  %1208 = vmatmul.bf16.vlgmr.msrb.gmra.mxu3 %v1745_v36 }
  0x54   : > { %2044 = vmatpush.bf16.msra.mxu3 %v2030_v26 }
  0x55   : > { %1224 = vmatpush.bf16.msra.mxu0 %v2021_v40 }
  0x56   : > { %1243 = vmatpush.bf16.msra.mxu1 %v2029_v37 }
  0x57   : > { %2037 = vmatpush.bf16.msra.mxu2 %v2025_v15 }
  0x58   : > { %2045 = vmatpush.bf16.msra.mxu3 %v2029_v37 }
  0x59   : > { %1225 = vmatpush.bf16.msra.mxu0 %v2020_v42 }
  0x5a   : > { %1244 = vmatpush.bf16.msra.mxu1 %v2028_v39 }
  0x5b   : > { %2038 = vmatpush.bf16.msra.mxu2 %v2024_v19 }
  0x5c   : > { %2046 = vmatpush.bf16.msra.mxu3 %v2028_v39 }
  0x5d   : > { %1226 = vmatpush.bf16.msra.mxu0 %v2019_v51 }
  0x5e   : > { %1245 = vmatpush.bf16.msra.mxu1 %v2027_v41 }
  0x5f   : > { %2039 = vmatpush.bf16.msra.mxu2 %v2023_v32 }
  0x60   : > { %2047 = vmatpush.bf16.msra.mxu3 %v2027_v41  ;;  %1733 = vmatmul.msk.bf16.gmra.mxu0 %vm687_vm0, %v1587_v52 }
  0x61   : > { %1175 = vmatmul.bf16.gmra.mxu1 %v1757_v53  ;;  %v2139_v53 = vld [vmem:[%s2661_s5] ss:$0 sm:$0xff] }
  0x62   : > { %1194 = vmatmul.bf16.gmra.mxu2 %v1761_v54 }
  0x63   : > { %2040 = vmatpush.bf16.msra.mxu2 %v2022_v38  ;;  %1213 = vmatmul.bf16.gmra.mxu3 %v1765_v55 }
  0x67   : > { %2041 = vmatpush.bf16.msra.mxu2 %v2021_v40 }
  0x6b   : > { %2042 = vmatpush.bf16.msra.mxu2 %v2020_v42 }
  0x6f   : > { %2043 = vmatpush.bf16.msra.mxu2 %v2019_v51 }
  0x70   : > { %1227 = vmatmul.bf16.vlgmr.msra.gmra.mxu0 %v1749_v0 }
  0x71   : > { %1918 = vmatmul.msk.bf16.vlgmr.msra.gmra.mxu1 %vm687_vm0, %v1753_v1 }
  0x72   : > { %1232 = vmatmul.bf16.vlgmr.msra.gmra.mxu2 %v1769_v2 }
  0x73   : > { %1919 = vmatmul.msk.bf16.vlgmr.msra.gmra.mxu3 %vm687_vm0, %v1773_v3 }
  0xad   : > { %v703_v4 = vpop.f32.mrf.mxu0 }
  0xae   : > { %v722_v5 = vpop.f32.mrf.mxu1  ;;  %v704_v15 = vadd.f32 %v2138_v10, %v703_v4 }
  0xb0   : > { %v723_v16 = vadd.f32 %v722_v5, %v704_v15 }
  0xb5   : > { %v741_v6 = vpop.f32.mrf.mxu2  ;;  %v705_v8 = vpop.f32.mrf.mxu0 }
  0xb6   : > { %v760_v7 = vpop.f32.mrf.mxu3  ;;  %v724_v9 = vpop.f32.mrf.mxu1  ;;  %v742_v21 = vadd.f32 %v741_v6, %v723_v16  ;;  %v706_v22 = vadd.f32 %v2138_v10, %v705_v8 }
  0xb8   : > { %v761_v23 = vadd.f32 %v760_v7, %v742_v21  ;;  %v725_v28 = vadd.f32 %v724_v9, %v706_v22 }
  0xbd   : > { %v743_v11 = vpop.f32.mrf.mxu2  ;;  %v708_v13 = vpop.f32.mrf.mxu0 }
  0xbe   : > { %v762_v12 = vpop.f32.mrf.mxu3  ;;  %v727_v14 = vpop.f32.mrf.mxu1  ;;  %v744_v30 = vadd.f32 %v743_v11, %v725_v28  ;;  %v709_v31 = vadd.f32 %v2138_v10, %v708_v13 }
  0xc0   : > { %v763_v34 = vadd.f32 %v762_v12, %v744_v30  ;;  %v728_v35 = vadd.f32 %v727_v14, %v709_v31 }
  0xc5   : > { %v746_v17 = vpop.f32.mrf.mxu2  ;;  %v710_v19 = vpop.f32.mrf.mxu0 }
  0xc6   : > { %v765_v18 = vpop.f32.mrf.mxu3  ;;  %v729_v20 = vpop.f32.mrf.mxu1  ;;  %v747_v41 = vadd.f32 %v746_v17, %v728_v35  ;;  %v711_v43 = vadd.f32 %v2138_v10, %v710_v19 }
  0xc8   : > { %v766_v45 = vadd.f32 %v765_v18, %v747_v41  ;;  %v730_v50 = vadd.f32 %v729_v20, %v711_v43 }
  0xcd   : > { %v748_v24 = vpop.f32.mrf.mxu2  ;;  %v779_v26 = vpop.f32.mrf.mxu0 }
  0xce   : > { %v767_v25 = vpop.f32.mrf.mxu3  ;;  %v1171_v27 = vpop.f32.mrf.mxu1  ;;  %v780_v29 = vadd.f32 %v779_v26, %v761_v23  ;;  %v749_v52 = vadd.f32 %v748_v24, %v730_v50 }
  0xcf   : > { %v1172_v57 = vadd.f32 %v2139_v53, %v1171_v27 }
  0xd0   : > { %v789_v32 = vmax.f32 %v780_v29, 0.0  ;;  %v768_v56 = vadd.f32 %v767_v25, %v749_v52 }
  0xd2   : > { %v793_v33 = vpack.c.bf16 %v789_v32, %v789_v32 }
  0xd4   : > { %798 = vst.msk [vmem:[%s2579_s8] sm:$0xf] %vm797_vm1, %v793_v33 }
  0xd5   : > { %v1190_v36 = vpop.f32.mrf.mxu2  ;;  %v781_v38 = vpop.f32.mrf.mxu0 }
  0xd6   : > { %v1209_v37 = vpop.f32.mrf.mxu3  ;;  %v1173_v39 = vpop.f32.mrf.mxu1  ;;  %v782_v40 = vadd.f32 %v781_v38, %v763_v34  ;;  %v1191_v63 = vadd.f32 %v1190_v36, %v1172_v57 }
  0xd7   : > { %v1174_v8 = vadd.f32 %v2139_v53, %v1173_v39 }
  0xd8   : > { %v790_v42 = vmax.f32 %v782_v40, 0.0  ;;  %v1210_v3 = vadd.f32 %v1209_v37, %v1191_v63 }
  0xda   : > { %v794_v44 = vpack.c.bf16 %v790_v42, %v790_v42 }
  0xdc   : > { %799 = vst.msk [vmem:[%s2579_s8 + $0x8] sm:$0xf] %vm797_vm1, %v794_v44 }
  0xdd   : > { %v1192_v46 = vpop.f32.mrf.mxu2  ;;  %v784_v48 = vpop.f32.mrf.mxu0 }
  0xde   : > { %v1211_v47 = vpop.f32.mrf.mxu3  ;;  %v1176_v49 = vpop.f32.mrf.mxu1  ;;  %v785_v51 = vadd.f32 %v784_v48, %v766_v45  ;;  %v1193_v11 = vadd.f32 %v1192_v46, %v1174_v8 }
  0xdf   : > { %v1177_v2 = vadd.f32 %v2139_v53, %v1176_v49 }
  0xe0   : > { %v791_v54 = vmax.f32 %v785_v51, 0.0  ;;  %v1212_v15 = vadd.f32 %v1211_v47, %v1193_v11 }
  0xe2   : > { %v795_v55 = vpack.c.bf16 %v791_v54, %v791_v54 }
  0xe4   : > { %800 = vst.msk [vmem:[%s2579_s8 + $0x10] sm:$0xf] %vm797_vm1, %v795_v55 }
  0xe5   : > { %v1195_v58 = vpop.f32.mrf.mxu2  ;;  %v786_v60 = vpop.f32.mrf.mxu0 }
  0xe6   : > { %v1214_v59 = vpop.f32.mrf.mxu3  ;;  %v1178_v61 = vpop.f32.mrf.mxu1  ;;  %v787_v62 = vadd.f32 %v786_v60, %v768_v56  ;;  %v1196_v10 = vadd.f32 %v1195_v58, %v1177_v2 }
  0xe7   : > { %v1179_v19 = vadd.f32 %v2139_v53, %v1178_v61 }
  0xe8   : > { %v792_v0 = vmax.f32 %v787_v62, 0.0  ;;  %v1215_v14 = vadd.f32 %v1214_v59, %v1196_v10 }
  0xea   : > { %v796_v1 = vpack.c.bf16 %v792_v0, %v792_v0 }
  0xec   : > { %801 = vst.msk [vmem:[%s2579_s8 + $0x18] sm:$0xf] %vm797_vm1, %v796_v1 }
  0xed   : > { %v1197_v4 = vpop.f32.mrf.mxu2  ;;  %v1228_v6 = vpop.f32.mrf.mxu0 }
  0xee   : > { %v1216_v5 = vpop.f32.mrf.mxu3  ;;  %v1247_v7 = vpop.f32.mrf.mxu1  ;;  %v1229_v9 = vadd.f32 %v1228_v6, %v1210_v3  ;;  %v1198_v23 = vadd.f32 %v1197_v4, %v1179_v19 }
  0xf0   : > { %v1248_v12 = vadd.f32 %v1247_v7, %v1229_v9  ;;  %v1217_v29 = vadd.f32 %v1216_v5, %v1198_v23 }
  0xf2   : > { %v1257_v13 = vmax.f32 %v1248_v12, 0.0 }
  0xf4   : > { %v1261_v18 = vpack.c.bf16 %v1257_v13, %v1257_v13 }
  0xf5   : > { %v1233_v16 = vpop.f32.mrf.mxu2  ;;  %v1230_v21 = vpop.f32.mrf.mxu0 }
  0xf6   : > { %v1252_v17 = vpop.f32.mrf.mxu3  ;;  %v1234_v20 = vadd.f32 %v1233_v16, %v1215_v14  ;;  %v1231_v22 = vadd.f32 %v1230_v21, %v1212_v15  ;;  %1269 = vrot.lane.b32.xlu0 %v1261_v18, %s2228_s10  ;;  %v1249_v25 = vpop.f32.mrf.mxu1 }
  0xf8   : > { %v1253_v24 = vadd.f32 %v1252_v17, %v1234_v20  ;;  %v1250_v26 = vadd.f32 %v1249_v25, %v1231_v22 }
  0xfa   : > { %v1259_v27 = vmax.f32 %v1253_v24, 0.0  ;;  %v1258_v28 = vmax.f32 %v1250_v26, 0.0 }
  0xfc   : > { %v1263_v30 = vpack.c.bf16 %v1259_v27, %v1259_v27  ;;  %v1262_v31 = vpack.c.bf16 %v1258_v28, %v1258_v28 }
  0xfd   : > { %v1235_v32 = vpop.f32.mrf.mxu2 }
  0xfe   : > { %v1236_v33 = vadd.f32 %v1235_v32, %v1217_v29  ;;  %1273 = vrot.lane.b32.xlu1 %v1263_v30, %s2228_s10  ;;  %v1254_v34 = vpop.f32.mrf.mxu3  ;;  %1271 = vrot.lane.b32.xlu0 %v1262_v31, %s2228_s10 }
 0x100   : > { %v1255_v35 = vadd.f32 %v1254_v34, %v1236_v33 }
 0x102   : > { %v1260_v36 = vmax.f32 %v1255_v35, 0.0 }
 0x104   : > { %v1264_v37 = vpack.c.bf16 %v1260_v36, %v1260_v36 }
 0x106   : > { %1275 = vrot.lane.b32.xlu1 %v1264_v37, %s2228_s10 }
 0x168   : > { %v1270_v38 = vpop.permute.xlu0 %1269 }
 0x169   : > { %v1277_v39 = vrot.slane %v1270_v38, 4 }
 0x16b   : > { %v1282_v40 = vsel %vm1281_vm4, %v1277_v39, %v1270_v38 }
 0x16c   : > { %1293 = vst.msk [vmem:[%s2579_s8] sm:$0xff] %vm1292_vm5, %v1282_v40 }
 0x170   : > { %v1274_v41 = vpop.permute.xlu1 %1273  ;;  %v1272_v43 = vpop.permute.xlu0 %1271 }
 0x171   : > { %v1279_v42 = vrot.slane %v1274_v41, 4  ;;  %v1278_v44 = vrot.slane %v1272_v43, 4 }
 0x173   : > { %v1284_v45 = vsel %vm1281_vm4, %v1279_v42, %v1274_v41  ;;  %v1283_v46 = vsel %vm1281_vm4, %v1278_v44, %v1272_v43 }
 0x174   : > { %1295 = vst.msk [vmem:[%s2579_s8 + $0x10] sm:$0xff] %vm1292_vm5, %v1284_v45 }
 0x175   : > { %1294 = vst.msk [vmem:[%s2579_s8 + $0x8] sm:$0xff] %vm1292_vm5, %v1283_v46 }
 0x178   : > { %v1276_v47 = vpop.permute.xlu1 %1275  ;;  %1303 = sbr.rel (!%p2289_p4) target bundleno = 420 (0x1a4), region = 48 }
 0x179   : > { %v1280_v48 = vrot.slane %v1276_v47, 4 }
 0x17b   : > { %v1285_v49 = vsel %vm1281_vm4, %v1280_v48, %v1276_v47 }
 0x17c   : > { %1296 = vst.msk [vmem:[%s2579_s8 + $0x18] sm:$0xff] %vm1292_vm5, %v1285_v49 }
 0x17d   : > { %s2671_s13 = smov (!%p1306_p8, %s1305_s13), 4 }
 0x17e   : > { %s2031_s16 = sshll.u32 %s2671_s13, 3 }
 0x17f   : > { %p1927_p9 = scmp.eq.s32.totalorder %s2031_s16, 0 }
 0x180   : > { %s2613_s18 = sshrl.u32 (!%p1927_p9), %s2671_s13, 2 }
 0x181   : > { %1316 = sbr.rel (%p1927_p9) target bundleno = 420 (0x1a4), region = 52  ;;  %p1928_p10 = scmp.le.s32.totalorder (!%p1927_p9), %s2613_s18, 0 }
 0x186   : > { %1489 = sbr.rel (%p1928_p10) target bundleno = 403 (0x193), region = 131  ;;  %s2664_s24 = smov (!%p1928_p10), %s2607_s15 }
 0x187   : > { %s2665_s29 = smov (!%p1928_p10), %s2579_s8  ;;  %s2622_s12 = smov (!%p1928_p10), 0  }
 0x188   : > { %s2208_s19 = smov (!%p1928_p10), 0  }
 0x18b LB: >> { %v1385_v50 = vld [vmem:[%s2202_s29] sm:$0xff]  ;;  %v1387_v51 = vld [vmem:[%s2202_s29 + $0x8] sm:$0xff]  ;;  %v1389_v52 = vld [vmem:[%s2202_s29 + $0x10] sm:$0xff]  ;;  %s1393_s20 = sadd.s32 1, %s2206_s12  ;;  %s1379_s19 = sadd.s32 1, %s2210_s19   ;;  %s2210_s19 = sphi %s2208_s19, %s1379_s19   ;;  %s2206_s12 = sphi %s2622_s12, %s2666_s12   ;;  %s2202_s29 = sphi %s2665_s29, %s1398_s29   ;;  %s2198_s24 = sphi %s2664_s24, %s1399_s24  }
 0x18c   : >> { %1386 = vst [vmem:[%s2198_s24] sm:$0xff] %v1385_v50  ;;  %v1391_v53 = vld [vmem:[%s2202_s29 + $0x18] sm:$0xff]  ;;  %p1394_p11 = scmp.ge.s32.totalorder %s1393_s20, %s2613_s18  ;;  %p1378_p12 = scmp.ge.s32.totalorder %s1379_s19, %s2613_s18 }
 0x18d   : >> { %1388 = vst [vmem:[%s2198_s24 + $0x8] sm:$0xff] %v1387_v51 }
 0x18e   : >> { %1390 = vst [vmem:[%s2198_s24 + $0x10] sm:$0xff] %v1389_v52  ;;  %s2673_s20 = smov (%p1394_p11, %s1393_s20), 0  ;;  %1381 = sbr.rel (!%p1378_p12) target bundleno = 395 (0x18b), region = 137 }
 0x18f   : >> { %1392 = vst [vmem:[%s2198_s24 + $0x18] sm:$0xff] %v1391_v53  ;;  %s1929_s23 = sshll.u32 %s2673_s20, 5  ;;  %s2666_s12 = smov %s2673_s20 }
 0x190   : >> { %s1398_s29 = scalar_lea.vmem %s2579_s8, %s1929_s23 [#allocation2]   ;;  %s1399_s24 = scalar_lea.vmem %s2607_s15, %s1929_s23  }
 0x193 PF: > { %s2638_s11 = sand.u32 3, %s2671_s13   ;;  %s2034_s26 = sshll.u32 %s2613_s18, 5 }
 0x194   : > { %s1404_s30 = scalar_lea.vmem %s2579_s8, %s2034_s26 [#allocation2]   ;;  %s1406_s27 = scalar_lea.vmem %s2607_s15, %s2034_s26  }
 0x195   : > { %p1934_p13 = scmp.le.s32.totalorder %s2638_s11, 0 }
 0x196   : > { %s2212_s21 = smov (!%p1934_p13), %s1406_s27   ;;  %s2216_s9 = smov (!%p1934_p13), %s1404_s30  }
 0x197   : > { %1503 = sbr.rel (%p1934_p13) target bundleno = 420 (0x1a4), region = 142  ;;  %s2220_s10 = smov (!%p1934_p13), 0  }
 0x198   : > { %s2224_s7 = smov (!%p1934_p13), 0  }
 0x19c LB: >> { %v1416_v54 = vld [vmem:[%s2218_s9] sm:$0xff]  ;;  %s1418_s13 = sadd.s32 1, %s2222_s10  ;;  %s1410_s7 = sadd.s32 1, %s2226_s7   ;;  %s2226_s7 = sphi %s2224_s7, %s1410_s7   ;;  %s2222_s10 = sphi %s2220_s10, %s2221_s10   ;;  %s2218_s9 = sphi %s2216_s9, %s1423_s9   ;;  %s2214_s21 = sphi %s2212_s21, %s1424_s21  }
 0x19d   : >> { %1417 = vst [vmem:[%s2214_s21] sm:$0xff] %v1416_v54  ;;  %p1419_p0 = scmp.ge.s32.totalorder %s1418_s13, %s2638_s11  ;;  %p1409_p1 = scmp.ge.s32.totalorder %s1410_s7, %s2638_s11 }
 0x19f   : >> { %s2675_s13 = smov (%p1419_p0, %s1418_s13), 0  ;;  %1412 = sbr.rel (!%p1409_p1) target bundleno = 412 (0x19c), region = 148 }
 0x1a0   : >> { %s1935_s8 = sshll.u32 %s2675_s13, 3  ;;  %s2221_s10 = smov %s2675_s13  }
 0x1a1   : >> { %s1423_s9 = scalar_lea.vmem %s1404_s30, %s1935_s8 [#allocation2]   ;;  %s1424_s21 = scalar_lea.vmem %s1406_s27, %s1935_s8  }
 0x1a4 PF: > { %p13_p2 = scmp.ge.s32.totalorder %s2279_s25, 4   ;;  %s2667_s21 = smov %s2190_s22 }
 0x1a5   : > { %s2668_s22 = smov %s2287_s28  ;;  %s2669_s23 = smov %s2279_s25 }
 0x1a6   :  { %15 = sbr.rel (!%p13_p2) target bundleno = 2 (0x2), region = 159 }

// kernel: stem_forward.17
= control target key start
LH: loop header
LB: loop body
LE: loop exit
PB: predicated region body
PF: predicated region fallthrough
CT: control target
= control target key end

     0   :  { %s2961_s11 = smov 64   ;;  %vm1372_vm0 = vcmask 523264   ;;  %vm1743_vm1 = vcmask 1043456   ;;  %vm1744_vm2 = vcmask 523268   ;;  %vm1855_vm3 = vcmask 1043968   ;;  %s4440_s1 = inlined_call_operand.vmem [shape: bf16[1728,192], index: 1, kind: input, shape index: {}]   ;;  %s4441_s0 = inlined_call_operand.vmem [shape: bf16[8,1728], index: 0, kind: input, shape index: {}]   ;;  %s4442_s2 = inlined_call_operand.vmem [shape: f32[1,192], index: 2, kind: input, shape index: {}]   ;;  %s4443_s3 = inlined_call_operand.vmem [shape: bf16[8,384], index: 3, kind: output, shape index: {}]  }
   0x1   :  { %v1921_v0 = vld [vmem:[%s4440_s1 + $0x70] sm:$0xf]  ;;  %v2744_v1 = vld [vmem:[%s4440_s1 + $0x74] sm:$0xf0]  ;;  %v1913_v11 = vld [vmem:[%s4440_s1 + $0x60] sm:$0xf] }
   0x2   :  { %v1985_v2 = vld [vmem:[%s4440_s1 + $0xf0] sm:$0xf]  ;;  %v1922_v3 = vor.u32 %v2744_v1, %v1921_v0  ;;  %v2760_v4 = vld [vmem:[%s4440_s1 + $0xf4] sm:$0xf0]  ;;  %v2742_v13 = vld [vmem:[%s4440_s1 + $0x64] sm:$0xf0] }
   0x3   :  { %v2049_v5 = vld [vmem:[%s4440_s1 + $0x170] sm:$0xf]  ;;  %v2776_v6 = vld [vmem:[%s4440_s1 + $0x174] sm:$0xf0]  ;;  %v1986_v7 = vor.u32 %v2760_v4, %v1985_v2  ;;  %v1977_v14 = vld [vmem:[%s4440_s1 + $0xe0] sm:$0xf]  ;;  %v1914_v16 = vor.u32 %v2742_v13, %v1913_v11 }
   0x4   :  { %v2050_v8 = vor.u32 %v2776_v6, %v2049_v5  ;;  %v2113_v9 = vld [vmem:[%s4440_s1 + $0x1f0] sm:$0xf]  ;;  %v2792_v10 = vld [vmem:[%s4440_s1 + $0x1f4] sm:$0xf0]  ;;  %1376 = vmatpush.bf16.msra.mxu0 %v1922_v3  ;;  %v2758_v15 = vld [vmem:[%s4440_s1 + $0xe4] sm:$0xf0] }
   0x5   :  { %v2114_v12 = vor.u32 %v2792_v10, %v2113_v9  ;;  %1389 = vmatpush.bf16.msra.mxu1 %v1986_v7  ;;  %v1978_v17 = vor.u32 %v2758_v15, %v1977_v14  ;;  %v2041_v18 = vld [vmem:[%s4440_s1 + $0x160] sm:$0xf]  ;;  %v2774_v19 = vld [vmem:[%s4440_s1 + $0x164] sm:$0xf0]  ;;  %v1905_v23 = vld [vmem:[%s4440_s1 + $0x50] sm:$0xf] }
   0x6   :  { %1402 = vmatpush.bf16.msra.mxu2 %v2050_v8  ;;  %v2105_v20 = vld [vmem:[%s4440_s1 + $0x1e0] sm:$0xf]  ;;  %v2042_v21 = vor.u32 %v2774_v19, %v2041_v18  ;;  %v2790_v22 = vld [vmem:[%s4440_s1 + $0x1e4] sm:$0xf0]  ;;  %v2740_v24 = vld [vmem:[%s4440_s1 + $0x54] sm:$0xf0] }
   0x7   :  { %1415 = vmatpush.bf16.msra.mxu3 %v2114_v12  ;;  %v2106_v25 = vor.u32 %v2790_v22, %v2105_v20  ;;  %v1969_v26 = vld [vmem:[%s4440_s1 + $0xd0] sm:$0xf]  ;;  %v2756_v27 = vld [vmem:[%s4440_s1 + $0xd4] sm:$0xf0]  ;;  %v1906_v29 = vor.u32 %v2740_v24, %v1905_v23  ;;  %v1897_v35 = vld [vmem:[%s4440_s1 + $0x40] sm:$0xf] }
   0x8   :  { %v2033_v28 = vld [vmem:[%s4440_s1 + $0x150] sm:$0xf]  ;;  %1377 = vmatpush.bf16.msra.mxu0 %v1914_v16  ;;  %v2772_v30 = vld [vmem:[%s4440_s1 + $0x154] sm:$0xf0]  ;;  %v1970_v33 = vor.u32 %v2756_v27, %v1969_v26  ;;  %v2738_v36 = vld [vmem:[%s4440_s1 + $0x44] sm:$0xf0] }
   0x9   :  { %v2097_v31 = vld [vmem:[%s4440_s1 + $0x1d0] sm:$0xf]  ;;  %v2788_v32 = vld [vmem:[%s4440_s1 + $0x1d4] sm:$0xf0]  ;;  %1390 = vmatpush.bf16.msra.mxu1 %v1978_v17  ;;  %v2034_v34 = vor.u32 %v2772_v30, %v2033_v28  ;;  %v1961_v37 = vld [vmem:[%s4440_s1 + $0xc0] sm:$0xf]  ;;  %v1898_v44 = vor.u32 %v2738_v36, %v1897_v35 }
   0xa   :  { %1403 = vmatpush.bf16.msra.mxu2 %v2042_v21  ;;  %v2098_v38 = vor.u32 %v2788_v32, %v2097_v31  ;;  %v2754_v39 = vld [vmem:[%s4440_s1 + $0xc4] sm:$0xf0]  ;;  %v2025_v40 = vld [vmem:[%s4440_s1 + $0x140] sm:$0xf]  ;;  %v1889_v47 = vld [vmem:[%s4440_s1 + $0x30] sm:$0xf] }
   0xb   :  { %1416 = vmatpush.bf16.msra.mxu3 %v2106_v25  ;;  %v2770_v41 = vld [vmem:[%s4440_s1 + $0x144] sm:$0xf0]  ;;  %v2089_v42 = vld [vmem:[%s4440_s1 + $0x1c0] sm:$0xf]  ;;  %v1962_v45 = vor.u32 %v2754_v39, %v1961_v37  ;;  %v2736_v48 = vld [vmem:[%s4440_s1 + $0x34] sm:$0xf0] }
   0xc   :  { %v2786_v43 = vld [vmem:[%s4440_s1 + $0x1c4] sm:$0xf0]  ;;  %1378 = vmatpush.bf16.msra.mxu0 %v1906_v29  ;;  %v2026_v46 = vor.u32 %v2770_v41, %v2025_v40  ;;  %v1953_v49 = vld [vmem:[%s4440_s1 + $0xb0] sm:$0xf]  ;;  %v2752_v51 = vld [vmem:[%s4440_s1 + $0xb4] sm:$0xf0]  ;;  %v1890_v56 = vor.u32 %v2736_v48, %v1889_v47 }
   0xd   :  { %1391 = vmatpush.bf16.msra.mxu1 %v1970_v33  ;;  %v2090_v50 = vor.u32 %v2786_v43, %v2089_v42  ;;  %v2017_v52 = vld [vmem:[%s4440_s1 + $0x130] sm:$0xf]  ;;  %v2768_v53 = vld [vmem:[%s4440_s1 + $0x134] sm:$0xf0]  ;;  %v1954_v57 = vor.u32 %v2752_v51, %v1953_v49  ;;  %v1881_v59 = vld [vmem:[%s4440_s1 + $0x20] sm:$0xf] }
   0xe   :  { %1404 = vmatpush.bf16.msra.mxu2 %v2034_v34  ;;  %v2081_v54 = vld [vmem:[%s4440_s1 + $0x1b0] sm:$0xf]  ;;  %v2784_v55 = vld [vmem:[%s4440_s1 + $0x1b4] sm:$0xf0]  ;;  %v2018_v58 = vor.u32 %v2768_v53, %v2017_v52  ;;  %v2734_v60 = vld [vmem:[%s4440_s1 + $0x24] sm:$0xf0] }
   0xf   :  { %1417 = vmatpush.bf16.msra.mxu3 %v2098_v38  ;;  %v1945_v61 = vld [vmem:[%s4440_s1 + $0xa0] sm:$0xf]  ;;  %v2082_v62 = vor.u32 %v2784_v55, %v2081_v54  ;;  %v2750_v63 = vld [vmem:[%s4440_s1 + $0xa4] sm:$0xf0]  ;;  %v1882_v4 = vor.u32 %v2734_v60, %v1881_v59  ;;  %v1873_v7 = vld [vmem:[%s4440_s1 + $0x10] sm:$0xf] }
  0x10   :  { %1379 = vmatpush.bf16.msra.mxu0 %v1898_v44  ;;  %v2009_v0 = vld [vmem:[%s4440_s1 + $0x120] sm:$0xf]  ;;  %v2766_v1 = vld [vmem:[%s4440_s1 + $0x124] sm:$0xf0]  ;;  %v1946_v5 = vor.u32 %v2750_v63, %v1945_v61  ;;  %v2732_v8 = vld [vmem:[%s4440_s1 + $0x14] sm:$0xf0] }
  0x11   :  { %1392 = vmatpush.bf16.msra.mxu1 %v1962_v45  ;;  %v2073_v2 = vld [vmem:[%s4440_s1 + $0x1a0] sm:$0xf]  ;;  %v2782_v3 = vld [vmem:[%s4440_s1 + $0x1a4] sm:$0xf0]  ;;  %v2010_v6 = vor.u32 %v2766_v1, %v2009_v0  ;;  %v1937_v9 = vld [vmem:[%s4440_s1 + $0x90] sm:$0xf]  ;;  %v1874_v16 = vor.u32 %v2732_v8, %v1873_v7 }
  0x12   :  { %1405 = vmatpush.bf16.msra.mxu2 %v2026_v46  ;;  %v2074_v10 = vor.u32 %v2782_v3, %v2073_v2  ;;  %v2748_v11 = vld [vmem:[%s4440_s1 + $0x94] sm:$0xf0]  ;;  %v2001_v12 = vld [vmem:[%s4440_s1 + $0x110] sm:$0xf]  ;;  %v1865_v17 = vld [vmem:[%s4440_s1] sm:$0xf] }
  0x13   :  { %1418 = vmatpush.bf16.msra.mxu3 %v2090_v50  ;;  %v2764_v13 = vld [vmem:[%s4440_s1 + $0x114] sm:$0xf0]  ;;  %v2065_v14 = vld [vmem:[%s4440_s1 + $0x190] sm:$0xf]  ;;  %v2730_v18 = vld [vmem:[%s4440_s1 + $0x4] sm:$0xf0]  ;;  %v1938_v19 = vor.u32 %v2748_v11, %v1937_v9 }
  0x14   :  { %1380 = vmatpush.bf16.msra.mxu0 %v1890_v56  ;;  %v2780_v15 = vld [vmem:[%s4440_s1 + $0x194] sm:$0xf0]  ;;  %v2002_v20 = vor.u32 %v2764_v13, %v2001_v12  ;;  %v1929_v21 = vld [vmem:[%s4440_s1 + $0x80] sm:$0xf]  ;;  %v2746_v22 = vld [vmem:[%s4440_s1 + $0x84] sm:$0xf0]  ;;  %v1866_v31 = vor.u32 %v2730_v18, %v1865_v17 }
  0x15   :  { %1393 = vmatpush.bf16.msra.mxu1 %v1954_v57  ;;  %v1993_v23 = vld [vmem:[%s4440_s1 + $0x100] sm:$0xf]  ;;  %v2066_v24 = vor.u32 %v2780_v15, %v2065_v14  ;;  %v2762_v25 = vld [vmem:[%s4440_s1 + $0x104] sm:$0xf0]  ;;  %v2177_v26 = vld [vmem:[%s4440_s1 + $0x270] sm:$0xf]  ;;  %v1930_v35 = vor.u32 %v2746_v22, %v1929_v21 }
  0x16   :  { %1406 = vmatpush.bf16.msra.mxu2 %v2018_v58  ;;  %v2808_v27 = vld [vmem:[%s4440_s1 + $0x274] sm:$0xf0]  ;;  %v2241_v28 = vld [vmem:[%s4440_s1 + $0x2f0] sm:$0xf]  ;;  %v2057_v33 = vld [vmem:[%s4440_s1 + $0x180] sm:$0xf]  ;;  %v1994_v36 = vor.u32 %v2762_v25, %v1993_v23 }
  0x17   :  { %1419 = vmatpush.bf16.msra.mxu3 %v2082_v62  ;;  %v2824_v29 = vld [vmem:[%s4440_s1 + $0x2f4] sm:$0xf0]  ;;  %v2305_v30 = vld [vmem:[%s4440_s1 + $0x370] sm:$0xf]  ;;  %v2778_v34 = vld [vmem:[%s4440_s1 + $0x184] sm:$0xf0]  ;;  %v2178_v39 = vor.u32 %v2808_v27, %v2177_v26 }
  0x18   :  { %1381 = vmatpush.bf16.msra.mxu0 %v1882_v4  ;;  %v2840_v32 = vld [vmem:[%s4440_s1 + $0x374] sm:$0xf0]  ;;  %v2369_v37 = vld [vmem:[%s4440_s1 + $0x3f0] sm:$0xf]  ;;  %v2242_v40 = vor.u32 %v2824_v29, %v2241_v28  ;;  %v2169_v41 = vld [vmem:[%s4440_s1 + $0x260] sm:$0xf]  ;;  %v2058_v43 = vor.u32 %v2778_v34, %v2057_v33 }
  0x19   :  { %1394 = vmatpush.bf16.msra.mxu1 %v1946_v5  ;;  %v2856_v38 = vld [vmem:[%s4440_s1 + $0x3f4] sm:$0xf0]  ;;  %v2306_v42 = vor.u32 %v2840_v32, %v2305_v30  ;;  %v2806_v44 = vld [vmem:[%s4440_s1 + $0x264] sm:$0xf0]  ;;  %v2233_v45 = vld [vmem:[%s4440_s1 + $0x2e0] sm:$0xf] }
  0x1a   :  { %1407 = vmatpush.bf16.msra.mxu2 %v2010_v6  ;;  %v2822_v46 = vld [vmem:[%s4440_s1 + $0x2e4] sm:$0xf0]  ;;  %v2370_v47 = vor.u32 %v2856_v38, %v2369_v37  ;;  %v2297_v48 = vld [vmem:[%s4440_s1 + $0x360] sm:$0xf]  ;;  %v2170_v52 = vor.u32 %v2806_v44, %v2169_v41  ;;  %v2161_v54 = vld [vmem:[%s4440_s1 + $0x250] sm:$0xf] }
  0x1b   :  { %1420 = vmatpush.bf16.msra.mxu3 %v2074_v10  ;;  %v2838_v49 = vld [vmem:[%s4440_s1 + $0x364] sm:$0xf0]  ;;  %v2361_v50 = vld [vmem:[%s4440_s1 + $0x3e0] sm:$0xf]  ;;  %v2234_v53 = vor.u32 %v2822_v46, %v2233_v45  ;;  %v2804_v56 = vld [vmem:[%s4440_s1 + $0x254] sm:$0xf0] }
  0x1c   :  { %1382 = vmatpush.bf16.msra.mxu0 %v1874_v16  ;;  %v2854_v51 = vld [vmem:[%s4440_s1 + $0x3e4] sm:$0xf0]  ;;  %v2298_v55 = vor.u32 %v2838_v49, %v2297_v48  ;;  %v2225_v57 = vld [vmem:[%s4440_s1 + $0x2d0] sm:$0xf]  ;;  %v2820_v58 = vld [vmem:[%s4440_s1 + $0x2d4] sm:$0xf0]  ;;  %v2162_v1 = vor.u32 %v2804_v56, %v2161_v54 }
  0x1d   :  { %1395 = vmatpush.bf16.msra.mxu1 %v1938_v19  ;;  %v2362_v59 = vor.u32 %v2854_v51, %v2361_v50  ;;  %v2289_v60 = vld [vmem:[%s4440_s1 + $0x350] sm:$0xf]  ;;  %v2836_v61 = vld [vmem:[%s4440_s1 + $0x354] sm:$0xf0]  ;;  %v16_v0 = vld [vmem:[%s4441_s0 + $0x8] sm:$0xff]  ;;  %v2226_v2 = vor.u32 %v2820_v58, %v2225_v57  ;;  %vm1856_vm4 = vcmask 1047556  }
  0x1e   :  { %1408 = vmatpush.bf16.msra.mxu2 %v2002_v20  ;;  %v2353_v62 = vld [vmem:[%s4440_s1 + $0x3d0] sm:$0xf]  ;;  %v2852_v63 = vld [vmem:[%s4440_s1 + $0x3d4] sm:$0xf0]  ;;  %v2153_v3 = vld [vmem:[%s4440_s1 + $0x240] sm:$0xf]  ;;  %v253_v4 = vunpack.c.l.b16 %v16_v0  ;;  %v254_v6 = vunpack.c.h.b16 %v16_v0  ;;  %v2290_v7 = vor.u32 %v2836_v61, %v2289_v60 }
  0x1f   :  { %1421 = vmatpush.bf16.msra.mxu3 %v2066_v24  ;;  %v15_v5 = vld [vmem:[%s4441_s0] sm:$0xff]  ;;  %v2802_v8 = vld [vmem:[%s4440_s1 + $0x244] sm:$0xf0]  ;;  %v2354_v13 = vor.u32 %v2852_v63, %v2353_v62  ;;  %v2145_v24 = vld [vmem:[%s4440_s1 + $0x230] sm:$0xf] }
  0x20   :  { %1383 = vmatpush.bf16.msra.mxu0 %v1866_v31  ;;  %v2217_v9 = vld [vmem:[%s4440_s1 + $0x2c0] sm:$0xf]  ;;  %v2818_v10 = vld [vmem:[%s4440_s1 + $0x2c4] sm:$0xf0]  ;;  %v251_v11 = vunpack.c.l.b16 %v15_v5  ;;  %v252_v12 = vunpack.c.h.b16 %v15_v5  ;;  %1749 = vrot.lane.b32.xlu0 %v15_v5, %s2961_s11  ;;  %v3271_v16 = vpack.c.b16 %v253_v4, %v253_v4  ;;  %v3281_v20 = vpack.c.b16 %v254_v6, %v254_v6  ;;  %v2800_v26 = vld [vmem:[%s4440_s1 + $0x234] sm:$0xf0] }
  0x21   :  { %1396 = vmatpush.bf16.msra.mxu1 %v1930_v35  ;;  %v2281_v14 = vld [vmem:[%s4440_s1 + $0x340] sm:$0xf]  ;;  %v2834_v15 = vld [vmem:[%s4440_s1 + $0x344] sm:$0xf0]  ;;  %v2154_v22 = vor.u32 %v2802_v8, %v2153_v3  ;;  %v2218_v23 = vor.u32 %v2818_v10, %v2217_v9  ;;  %v2209_v27 = vld [vmem:[%s4440_s1 + $0x2b0] sm:$0xf]  ;;  %v2146_v34 = vor.u32 %v2800_v26, %v2145_v24 }
  0x22   :  { %1409 = vmatpush.bf16.msra.mxu2 %v1994_v36  ;;  %v2345_v17 = vld [vmem:[%s4440_s1 + $0x3c0] sm:$0xf]  ;;  %v2850_v18 = vld [vmem:[%s4440_s1 + $0x3c4] sm:$0xf0]  ;;  %v3279_v19 = vpack.c.b16 %v251_v11, %v251_v11  ;;  %v3283_v21 = vpack.c.b16 %v252_v12, %v252_v12  ;;  %v2282_v25 = vor.u32 %v2834_v15, %v2281_v14  ;;  %v2816_v28 = vld [vmem:[%s4440_s1 + $0x2b4] sm:$0xf0] }
  0x23   :  { %1422 = vmatpush.bf16.msra.mxu3 %v2058_v43  ;;  %v2346_v29 = vor.u32 %v2850_v18, %v2345_v17  ;;  %v2273_v30 = vld [vmem:[%s4440_s1 + $0x330] sm:$0xf]  ;;  %v2832_v31 = vld [vmem:[%s4440_s1 + $0x334] sm:$0xf0]  ;;  %v2210_v35 = vor.u32 %v2816_v28, %v2209_v27  ;;  %v2137_v36 = vld [vmem:[%s4440_s1 + $0x220] sm:$0xf] }
  0x24   :  { %1428 = vmatpush.bf16.msrb.mxu0 %v2178_v39  ;;  %v2337_v32 = vld [vmem:[%s4440_s1 + $0x3b0] sm:$0xf]  ;;  %v2848_v33 = vld [vmem:[%s4440_s1 + $0x3b4] sm:$0xf0]  ;;  %1397 = vmatmul.bf16.vlgmr.msra.gmra.mxu1 %v3283_v21  ;;  %v2274_v37 = vor.u32 %v2832_v31, %v2273_v30  ;;  %v2798_v38 = vld [vmem:[%s4440_s1 + $0x224] sm:$0xf0] }
  0x25   :  { %1441 = vmatpush.bf16.msrb.mxu1 %v2242_v40  ;;  %1384 = vmatmul.bf16.vlgmr.msra.gmra.mxu0 %v3279_v19  ;;  %v2201_v39 = vld [vmem:[%s4440_s1 + $0x2a0] sm:$0xf]  ;;  %v2814_v40 = vld [vmem:[%s4440_s1 + $0x2a4] sm:$0xf0]  ;;  %v2338_v41 = vor.u32 %v2848_v33, %v2337_v32  ;;  %v2138_v46 = vor.u32 %v2798_v38, %v2137_v36  ;;  %v2129_v48 = vld [vmem:[%s4440_s1 + $0x210] sm:$0xf] }
  0x26   :  { %1454 = vmatpush.bf16.msrb.mxu2 %v2306_v42  ;;  %1423 = vmatmul.bf16.vlgmr.msra.gmra.mxu3 %v3281_v20  ;;  %v2265_v42 = vld [vmem:[%s4440_s1 + $0x320] sm:$0xf]  ;;  %v2830_v43 = vld [vmem:[%s4440_s1 + $0x324] sm:$0xf0]  ;;  %v3344_v49 = vld [vmem:[%s4441_s0 + $0x18] sm:$0xff] }
  0x27   :  { %1467 = vmatpush.bf16.msrb.mxu3 %v2370_v47  ;;  %1410 = vmatmul.bf16.vlgmr.msra.gmra.mxu2 %v3271_v16  ;;  %v2329_v44 = vld [vmem:[%s4440_s1 + $0x3a0] sm:$0xf]  ;;  %v2846_v45 = vld [vmem:[%s4440_s1 + $0x3a4] sm:$0xf0]  ;;  %v2202_v47 = vor.u32 %v2814_v40, %v2201_v39  ;;  %v2266_v50 = vor.u32 %v2830_v43, %v2265_v42  ;;  %v2796_v51 = vld [vmem:[%s4440_s1 + $0x214] sm:$0xf0]  ;;  %v257_v18 = vunpack.c.l.b16 %v3344_v49 }
  0x28   :  { %1429 = vmatpush.bf16.msrb.mxu0 %v2170_v52  ;;  %1751 = vrot.lane.b32.xlu0 %v16_v0, %s2961_s11  ;;  %v2193_v52 = vld [vmem:[%s4440_s1 + $0x290] sm:$0xf]  ;;  %v2330_v54 = vor.u32 %v2846_v45, %v2329_v44  ;;  %v2828_v56 = vld [vmem:[%s4440_s1 + $0x314] sm:$0xf0]  ;;  %v2130_v60 = vor.u32 %v2796_v51, %v2129_v48  ;;  %v2794_v62 = vld [vmem:[%s4440_s1 + $0x204] sm:$0xf0] }
  0x29   :  { %1442 = vmatpush.bf16.msrb.mxu1 %v2234_v53  ;;  %v2812_v53 = vld [vmem:[%s4440_s1 + $0x294] sm:$0xf0]  ;;  %1801 = vrot.lane.b32.xlu1 %v3344_v49, %s2961_s11  ;;  %v2321_v57 = vld [vmem:[%s4440_s1 + $0x390] sm:$0xf]  ;;  %v2185_v63 = vld [vmem:[%s4440_s1 + $0x280] sm:$0xf]  ;;  %v3446_v39 = vpack.c.b16 %v257_v18, %v257_v18 }
  0x2a   :  { %1455 = vmatpush.bf16.msrb.mxu2 %v2298_v55  ;;  %v2257_v55 = vld [vmem:[%s4440_s1 + $0x310] sm:$0xf]  ;;  %v2844_v58 = vld [vmem:[%s4440_s1 + $0x394] sm:$0xf0]  ;;  %v2194_v61 = vor.u32 %v2812_v53, %v2193_v52  ;;  %v2249_v3 = vld [vmem:[%s4440_s1 + $0x300] sm:$0xf] }
  0x2b   :  { %1468 = vmatpush.bf16.msrb.mxu3 %v2362_v59  ;;  %v2121_v59 = vld [vmem:[%s4440_s1 + $0x200] sm:$0xf]  ;;  %v3381_v0 = vld [vmem:[%s4441_s0 + $0x10] sm:$0xff]  ;;  %v2826_v4 = vld [vmem:[%s4440_s1 + $0x304] sm:$0xf0]  ;;  %v2322_v5 = vor.u32 %v2844_v58, %v2321_v57 }
  0x2c   :  { %1430 = vmatpush.bf16.msrb.mxu0 %v2162_v1  ;;  %v2258_v1 = vor.u32 %v2828_v56, %v2257_v55  ;;  %v2433_v6 = vld [vmem:[%s4440_s1 + $0x470] sm:$0xf]  ;;  %v2888_v9 = vld [vmem:[%s4440_s1 + $0x4f4] sm:$0xf0]  ;;  %v255_v12 = vunpack.c.l.b16 %v3381_v0  ;;  %v2313_v15 = vld [vmem:[%s4440_s1 + $0x380] sm:$0xf]  ;;  %v256_v26 = vunpack.c.h.b16 %v3381_v0 }
  0x2d   :  { %1443 = vmatpush.bf16.msrb.mxu1 %v2226_v2  ;;  %v2810_v2 = vld [vmem:[%s4440_s1 + $0x284] sm:$0xf0]  ;;  %v2497_v8 = vld [vmem:[%s4440_s1 + $0x4f0] sm:$0xf]  ;;  %v2904_v11 = vld [vmem:[%s4440_s1 + $0x574] sm:$0xf0] }
  0x2e   :  { %1456 = vmatpush.bf16.msrb.mxu2 %v2290_v7  ;;  %v2872_v7 = vld [vmem:[%s4440_s1 + $0x474] sm:$0xf0]  ;;  %v2561_v10 = vld [vmem:[%s4440_s1 + $0x570] sm:$0xf]  ;;  %v2186_v14 = vor.u32 %v2810_v2, %v2185_v63  ;;  %v2842_v17 = vld [vmem:[%s4440_s1 + $0x384] sm:$0xf0]  ;;  %v2498_v27 = vor.u32 %v2888_v9, %v2497_v8  ;;  %v3443_v36 = vpack.c.b16 %v255_v12, %v255_v12  ;;  %v3454_v43 = vpack.c.b16 %v256_v26, %v256_v26 }
  0x2f   :  { %1469 = vmatpush.bf16.msrb.mxu3 %v2354_v13  ;;  %v2122_v13 = vor.u32 %v2794_v62, %v2121_v59  ;;  %v2625_v24 = vld [vmem:[%s4440_s1 + $0x5f0] sm:$0xf]  ;;  %v2562_v28 = vor.u32 %v2904_v11, %v2561_v10  ;;  %v2870_v30 = vld [vmem:[%s4440_s1 + $0x464] sm:$0xf0]  ;;  %v2489_v31 = vld [vmem:[%s4440_s1 + $0x4e0] sm:$0xf]  ;;  %v2314_v32 = vor.u32 %v2842_v17, %v2313_v15 }
  0x30   :  { %1431 = vmatpush.bf16.msrb.mxu0 %v2154_v22  ;;  %v2250_v22 = vor.u32 %v2826_v4, %v2249_v3  ;;  %v2886_v33 = vld [vmem:[%s4440_s1 + $0x4e4] sm:$0xf0]  ;;  %v2481_v48 = vld [vmem:[%s4440_s1 + $0x4d0] sm:$0xf]  ;;  %v2900_v51 = vld [vmem:[%s4440_s1 + $0x554] sm:$0xf0] }
  0x31   :  { %1444 = vmatpush.bf16.msrb.mxu1 %v2218_v23  ;;  %v2434_v23 = vor.u32 %v2872_v7, %v2433_v6  ;;  %v2918_v42 = vld [vmem:[%s4440_s1 + $0x5e4] sm:$0xf0]  ;;  %v2490_v44 = vor.u32 %v2886_v33, %v2489_v31  ;;  %v2609_v55 = vld [vmem:[%s4440_s1 + $0x5d0] sm:$0xf]  ;;  %v2916_v56 = vld [vmem:[%s4440_s1 + $0x5d4] sm:$0xf0] }
  0x32   :  { %1457 = vmatpush.bf16.msrb.mxu2 %v2282_v25  ;;  %v2920_v25 = vld [vmem:[%s4440_s1 + $0x5f4] sm:$0xf0]  ;;  %v2409_v57 = vld [vmem:[%s4440_s1 + $0x440] sm:$0xf]  ;;  %v2882_v63 = vld [vmem:[%s4440_s1 + $0x4c4] sm:$0xf0]  ;;  %v2610_v3 = vor.u32 %v2916_v56, %v2609_v55 }
  0x33   :  { %1470 = vmatpush.bf16.msrb.mxu3 %v2346_v29  ;;  %v2425_v29 = vld [vmem:[%s4440_s1 + $0x460] sm:$0xf]  ;;  %v2626_v38 = vor.u32 %v2920_v25, %v2625_v24  ;;  %v2898_v2 = vld [vmem:[%s4440_s1 + $0x544] sm:$0xf0]  ;;  %v2401_v9 = vld [vmem:[%s4440_s1 + $0x430] sm:$0xf] }
  0x34   :  { %1432 = vmatpush.bf16.msrb.mxu0 %v2146_v34  ;;  %v2553_v34 = vld [vmem:[%s4440_s1 + $0x560] sm:$0xf]  ;;  %v2426_v40 = vor.u32 %v2870_v30, %v2425_v29  ;;  %v2914_v6 = vld [vmem:[%s4440_s1 + $0x5c4] sm:$0xf0]  ;;  %v2864_v10 = vld [vmem:[%s4440_s1 + $0x434] sm:$0xf0] }
  0x35   :  { %1445 = vmatpush.bf16.msrb.mxu1 %v2210_v35  ;;  %v2902_v35 = vld [vmem:[%s4440_s1 + $0x564] sm:$0xf0]  ;;  %v3497_v62 = vld [vmem:[%s4441_s0 + $0x20] sm:$0xff]  ;;  %v2465_v11 = vld [vmem:[%s4440_s1 + $0x4b0] sm:$0xf]  ;;  %v2402_v17 = vor.u32 %v2864_v10, %v2401_v9 }
  0x36   :  { %1458 = vmatpush.bf16.msrb.mxu2 %v2274_v37  ;;  %v258_v37 = vunpack.c.h.b16 %v3344_v49  ;;  %v2554_v45 = vor.u32 %v2902_v35, %v2553_v34  ;;  %v2884_v49 = vld [vmem:[%s4440_s1 + $0x4d4] sm:$0xf0]  ;;  %1803 = vrot.lane.b32.xlu1 %v3497_v62, %s2961_s11  ;;  %v2593_v18 = vld [vmem:[%s4440_s1 + $0x5b0] sm:$0xf]  ;;  %v2393_v25 = vld [vmem:[%s4440_s1 + $0x420] sm:$0xf] }
  0x37   :  { %1471 = vmatpush.bf16.msrb.mxu3 %v2338_v41  ;;  %v2617_v41 = vld [vmem:[%s4440_s1 + $0x5e0] sm:$0xf]  ;;  %v2482_v58 = vor.u32 %v2884_v49, %v2481_v48  ;;  %v2880_v12 = vld [vmem:[%s4440_s1 + $0x4b4] sm:$0xf0]  ;;  %v2862_v26 = vld [vmem:[%s4440_s1 + $0x424] sm:$0xf0] }
  0x38   :  { %1433 = vmatpush.bf16.msrb.mxu0 %v2138_v46  ;;  %v2417_v46 = vld [vmem:[%s4440_s1 + $0x450] sm:$0xf]  ;;  %v3475_v52 = vpack.c.b16 %v258_v37, %v258_v37  ;;  %v2618_v53 = vor.u32 %v2918_v42, %v2617_v41  ;;  %v2521_v29 = vld [vmem:[%s4440_s1 + $0x520] sm:$0xf]  ;;  %v2894_v30 = vld [vmem:[%s4440_s1 + $0x524] sm:$0xf0] }
  0x39   :  { %1446 = vmatpush.bf16.msrb.mxu1 %v2202_v47  ;;  %v2868_v47 = vld [vmem:[%s4440_s1 + $0x454] sm:$0xf0]  ;;  %v2585_v33 = vld [vmem:[%s4440_s1 + $0x5a0] sm:$0xf]  ;;  %v2910_v34 = vld [vmem:[%s4440_s1 + $0x5a4] sm:$0xf0]  ;;  %v2522_v37 = vor.u32 %v2894_v30, %v2521_v29 }
  0x3a   :  { %1459 = vmatpush.bf16.msrb.mxu2 %v2266_v50  ;;  %v2545_v50 = vld [vmem:[%s4440_s1 + $0x550] sm:$0xf]  ;;  %v2876_v42 = vld [vmem:[%s4440_s1 + $0x494] sm:$0xf0]  ;;  %v2586_v48 = vor.u32 %v2910_v34, %v2585_v33  ;;  %v2569_v9 = vld [vmem:[%s4440_s1 + $0x580] sm:$0xf] }
  0x3b   :  { %1472 = vmatpush.bf16.msrb.mxu3 %v2330_v54  ;;  %v2418_v54 = vor.u32 %v2868_v47, %v2417_v46  ;;  %v2546_v59 = vor.u32 %v2900_v51, %v2545_v50  ;;  %v2449_v41 = vld [vmem:[%s4440_s1 + $0x490] sm:$0xf]  ;;  %v1778_v46 = vunpack.c.l.bf16 %v3381_v0  ;;  %v1779_v47 = vunpack.c.h.bf16 %v3381_v0  ;;  %v2908_v50 = vld [vmem:[%s4440_s1 + $0x594] sm:$0xf0]  ;;  %v2858_v0 = vld [vmem:[%s4440_s1 + $0x404] sm:$0xf0] }
  0x3c   :  { %1434 = vmatpush.bf16.msrb.mxu0 %v2130_v60  ;;  %v2866_v60 = vld [vmem:[%s4440_s1 + $0x444] sm:$0xf0]  ;;  %v2577_v49 = vld [vmem:[%s4440_s1 + $0x590] sm:$0xf]  ;;  %v2450_v56 = vor.u32 %v2876_v42, %v2449_v41  ;;  %v2757_v41 = vld [vmem:[%s4440_s1 + $0xe4] sm:$0xf] }
  0x3d   :  { %1447 = vmatpush.bf16.msrb.mxu1 %v2194_v61  ;;  %v2473_v61 = vld [vmem:[%s4440_s1 + $0x4c0] sm:$0xf]  ;;  %v2410_v4 = vor.u32 %v2866_v60, %v2409_v57  ;;  %v2946_v55 = vpack.i.bf16 %v1779_v47, %v1778_v46  ;;  %v3609_v60 = vld [vmem:[%s4441_s0 + $0x28] sm:$0xff]  ;;  %v2673_v46 = vld [vmem:[%s4440_s1 + $0x650] sm:$0xf] }
  0x3e   :  { %1460 = vmatpush.bf16.msrb.mxu2 %v2258_v1  ;;  %v2537_v1 = vld [vmem:[%s4440_s1 + $0x540] sm:$0xf]  ;;  %v2474_v7 = vor.u32 %v2882_v63, %v2473_v61  ;;  %v2890_v61 = vld [vmem:[%s4440_s1 + $0x504] sm:$0xf0]  ;;  %v2689_v63 = vld [vmem:[%s4440_s1 + $0x670] sm:$0xf]  ;;  %v1828_v33 = vunpack.c.l.bf16 %v3609_v60  ;;  %v1829_v34 = vunpack.c.h.bf16 %v3609_v60 }
  0x3f   :  { %1473 = vmatpush.bf16.msrb.mxu3 %v2322_v5  ;;  %v2601_v5 = vld [vmem:[%s4440_s1 + $0x5c0] sm:$0xf]  ;;  %v2538_v8 = vor.u32 %v2898_v2, %v2537_v1  ;;  %v2936_v1 = vld [vmem:[%s4440_s1 + $0x674] sm:$0xf0]  ;;  %2947 = vrot.lane.b32.xlu2 %v2946_v55, %s2961_s11  ;;  %v2578_v2 = vor.u32 %v2908_v50, %v2577_v49  ;;  %v2906_v10 = vld [vmem:[%s4440_s1 + $0x584] sm:$0xf0] }
  0x40   :  { %1435 = vmatpush.bf16.msrb.mxu0 %v2122_v13  ;;  %v2529_v13 = vld [vmem:[%s4440_s1 + $0x530] sm:$0xf]  ;;  %v2602_v15 = vor.u32 %v2914_v6, %v2601_v5  ;;  %v2743_v5 = vld [vmem:[%s4440_s1 + $0x74] sm:$0xf]  ;;  %v2942_v30 = vld [vmem:[%s4440_s1 + $0x6a4] sm:$0xf0] }
  0x41   :  { %1448 = vmatpush.bf16.msrb.mxu1 %v2186_v14  ;;  %v2896_v14 = vld [vmem:[%s4440_s1 + $0x534] sm:$0xf0]  ;;  %v1979_v42 = vld [vmem:[%s4440_s1 + $0xe8] sm:$0xf0]  ;;  %v2739_v50 = vld [vmem:[%s4440_s1 + $0x54] sm:$0xf] }
  0x42   :  { %1461 = vmatpush.bf16.msrb.mxu2 %v2250_v22  ;;  %v2912_v22 = vld [vmem:[%s4440_s1 + $0x5b4] sm:$0xf0]  ;;  %v2530_v24 = vor.u32 %v2896_v14, %v2529_v13  ;;  %v260_v14 = vunpack.c.h.b16 %v3497_v62  ;;  %v2755_v55 = vld [vmem:[%s4440_s1 + $0xd4] sm:$0xf]  ;;  %vm1745_vm5 = vmor %vm1744_vm2, %vm1743_vm1 }
  0x43   :  { %1474 = vmatpush.bf16.msrb.mxu3 %v2314_v32  ;;  %1436 = vmatmul.bf16.vlgmr.msrb.gmra.mxu0 %v3443_v36  ;;  %v2594_v31 = vor.u32 %v2912_v22, %v2593_v18  ;;  %v2394_v32 = vor.u32 %v2862_v26, %v2393_v25  ;;  %v2759_v18 = vld [vmem:[%s4440_s1 + $0xf4] sm:$0xf]  ;;  %v1987_v22 = vld [vmem:[%s4440_s1 + $0xf8] sm:$0xf0]  ;;  %v2570_v25 = vor.u32 %v2906_v10, %v2569_v9  ;;  %v2681_v26 = vld [vmem:[%s4440_s1 + $0x660] sm:$0xf] }
  0x44   :  { %1480 = vmatpush.bf16.msra.mxu0 %v2434_v23  ;;  %1449 = vmatmul.bf16.vlgmr.msrb.gmra.mxu1 %v3454_v43  ;;  %v2466_v23 = vor.u32 %v2880_v12, %v2465_v11  ;;  %v261_v11 = vunpack.c.l.b16 %v3609_v60  ;;  %v2932_v47 = vld [vmem:[%s4440_s1 + $0x654] sm:$0xf0]  ;;  %v1963_v9 = vld [vmem:[%s4440_s1 + $0xc8] sm:$0xf0]  ;;  %vm1857_vm6 = vmor %vm1856_vm4, %vm1855_vm3 }
  0x45   :  { %1493 = vmatpush.bf16.msra.mxu1 %v2498_v27  ;;  %1462 = vmatmul.bf16.vlgmr.msrb.gmra.mxu2 %v3446_v39  ;;  %v2457_v27 = vld [vmem:[%s4440_s1 + $0x4a0] sm:$0xf]  ;;  %v2940_v49 = vld [vmem:[%s4440_s1 + $0x694] sm:$0xf0] }
  0x46   :  { %1506 = vmatpush.bf16.msra.mxu2 %v2562_v28  ;;  %1475 = vmatmul.bf16.vlgmr.msrb.gmra.mxu3 %v3475_v52  ;;  %v2878_v28 = vld [vmem:[%s4440_s1 + $0x4a4] sm:$0xf0]  ;;  %v3660_v29 = vpack.c.b16 %v261_v11, %v261_v11 }
  0x47   :  { %1519 = vmatpush.bf16.msra.mxu3 %v2626_v38  ;;  %v2458_v35 = vor.u32 %v2878_v28, %v2457_v27  ;;  %v2385_v38 = vld [vmem:[%s4440_s1 + $0x410] sm:$0xf]  ;;  %v2713_v27 = vld [vmem:[%s4440_s1 + $0x6a0] sm:$0xf] }
  0x48   :  { %1481 = vmatpush.bf16.msra.mxu0 %v2426_v40  ;;  %v2860_v40 = vld [vmem:[%s4440_s1 + $0x414] sm:$0xf0] }
  0x49   :  { %1494 = vmatpush.bf16.msra.mxu1 %v2490_v44  ;;  %v2513_v44 = vld [vmem:[%s4440_s1 + $0x510] sm:$0xf]  ;;  %v2386_v51 = vor.u32 %v2860_v40, %v2385_v38 }
  0x4a   :  { %1507 = vmatpush.bf16.msra.mxu2 %v2554_v45  ;;  %v2892_v45 = vld [vmem:[%s4440_s1 + $0x514] sm:$0xf0] }
  0x4b   :  { %1520 = vmatpush.bf16.msra.mxu3 %v2618_v53  ;;  %v2377_v53 = vld [vmem:[%s4440_s1 + $0x400] sm:$0xf]  ;;  %v2514_v57 = vor.u32 %v2892_v45, %v2513_v44  ;;  %v2714_v44 = vor.u32 %v2942_v30, %v2713_v27  ;;  %v1955_v27 = vld [vmem:[%s4440_s1 + $0xb8] sm:$0xf0] }
  0x4c   :  { %1482 = vmatpush.bf16.msra.mxu0 %v2418_v54  ;;  %v2441_v54 = vld [vmem:[%s4440_s1 + $0x480] sm:$0xf]  ;;  %v2378_v6 = vor.u32 %v2858_v0, %v2377_v53  ;;  %v2951_v53 = vpack.i.bf16 %v1829_v34, %v1828_v33  ;;  %v1982_v0 = vor.u32 %v2757_v41, %v1979_v42  ;;  %v2733_v34 = vld [vmem:[%s4440_s1 + $0x24] sm:$0xf]  ;;  %v2771_v41 = vld [vmem:[%s4440_s1 + $0x154] sm:$0xf] }
  0x4d   :  { %1495 = vmatpush.bf16.msra.mxu1 %v2482_v58  ;;  %v2874_v58 = vld [vmem:[%s4440_s1 + $0x484] sm:$0xf0]  ;;  %v2035_v42 = vld [vmem:[%s4440_s1 + $0x158] sm:$0xf0] }
  0x4e   :  { %1508 = vmatpush.bf16.msra.mxu2 %v2546_v59  ;;  %v2505_v59 = vld [vmem:[%s4440_s1 + $0x500] sm:$0xf]  ;;  %v2442_v12 = vor.u32 %v2874_v58, %v2441_v54  ;;  %v2674_v54 = vor.u32 %v2932_v47, %v2673_v46  ;;  %2952 = vrot.lane.b32.xlu2 %v2951_v53, %s2961_s11  ;;  %v2749_v46 = vld [vmem:[%s4440_s1 + $0xa4] sm:$0xf]  ;;  %v1947_v47 = vld [vmem:[%s4440_s1 + $0xa8] sm:$0xf0] }
  0x4f   :  { %1521 = vmatpush.bf16.msra.mxu3 %v2610_v3  ;;  %v2721_v3 = vld [vmem:[%s4440_s1 + $0x6b0] sm:$0xf]  ;;  %v2506_v13 = vor.u32 %v2890_v61, %v2505_v59  ;;  %v2665_v59 = vld [vmem:[%s4440_s1 + $0x640] sm:$0xf]  ;;  %v2930_v61 = vld [vmem:[%s4440_s1 + $0x644] sm:$0xf0] }
  0x50   :  { %1483 = vmatpush.bf16.msra.mxu0 %v2410_v4  ;;  %v2944_v4 = vld [vmem:[%s4440_s1 + $0x6b4] sm:$0xf0]  ;;  %v2731_v53 = vld [vmem:[%s4440_s1 + $0x14] sm:$0xf] }
  0x51   :  { %1496 = vmatpush.bf16.msra.mxu1 %v2474_v7  ;;  %v259_v7 = vunpack.c.l.b16 %v3497_v62  ;;  %v2934_v62 = vld [vmem:[%s4440_s1 + $0x664] sm:$0xf0] }
  0x52   :  { %1509 = vmatpush.bf16.msra.mxu2 %v2538_v8  ;;  %v1923_v8 = vld [vmem:[%s4440_s1 + $0x78] sm:$0xf0]  ;;  %v2682_v40 = vor.u32 %v2934_v62, %v2681_v26  ;;  %v2751_v62 = vld [vmem:[%s4440_s1 + $0xb4] sm:$0xf] }
  0x53   :  { %1522 = vmatpush.bf16.msra.mxu3 %v2602_v15  ;;  %v2690_v15 = vor.u32 %v2936_v1, %v2689_v63  ;;  %v3658_v28 = vpack.c.b16 %v259_v7, %v259_v7  ;;  %v2697_v63 = vld [vmem:[%s4440_s1 + $0x680] sm:$0xf]  ;;  %v2938_v1 = vld [vmem:[%s4440_s1 + $0x684] sm:$0xf0]  ;;  %v2666_v7 = vor.u32 %v2930_v61, %v2665_v59  ;;  %v1939_v59 = vld [vmem:[%s4440_s1 + $0x98] sm:$0xf0] }
  0x54   :  { %1484 = vmatpush.bf16.msra.mxu0 %v2402_v17  ;;  %v2722_v17 = vor.u32 %v2944_v4, %v2721_v3  ;;  %v1899_v3 = vld [vmem:[%s4440_s1 + $0x48] sm:$0xf0]  ;;  %v2698_v10 = vor.u32 %v2938_v1, %v2697_v63  ;;  %v2633_v61 = vld [vmem:[%s4440_s1 + $0x600] sm:$0xf]  ;;  %v2922_v1 = vld [vmem:[%s4440_s1 + $0x604] sm:$0xf0] }
  0x55   :  { %1497 = vmatpush.bf16.msra.mxu1 %v2466_v23  ;;  %v262_v23 = vunpack.c.h.b16 %v3609_v60 }
  0x56   :  { %1510 = vmatpush.bf16.msra.mxu2 %v2530_v24  ;;  %v1926_v24 = vor.u32 %v2743_v5, %v1923_v8  ;;  %v2775_v5 = vld [vmem:[%s4440_s1 + $0x174] sm:$0xf]  ;;  %v2753_v8 = vld [vmem:[%s4440_s1 + $0xc4] sm:$0xf] }
  0x57   :  { %1523 = vmatpush.bf16.msra.mxu3 %v2594_v31  ;;  %v2741_v31 = vld [vmem:[%s4440_s1 + $0x64] sm:$0xf]  ;;  %v3675_v38 = vpack.c.b16 %v262_v23, %v262_v23 }
  0x58   :  { %1485 = vmatpush.bf16.msra.mxu0 %v2394_v32  ;;  %v1915_v32 = vld [vmem:[%s4440_s1 + $0x68] sm:$0xf0]  ;;  %v2773_v23 = vld [vmem:[%s4440_s1 + $0x164] sm:$0xf] }
  0x59   :  { %1498 = vmatpush.bf16.msra.mxu1 %v2458_v35  ;;  %v1990_v35 = vor.u32 %v2759_v18, %v1987_v22  ;;  %v1918_v45 = vor.u32 %v2741_v31, %v1915_v32  ;;  %v3757_v18 = vld [vmem:[%s4441_s0 + $0x30] sm:$0xff]  ;;  %v1966_v22 = vor.u32 %v2753_v8, %v1963_v9  ;;  %v2649_v31 = vld [vmem:[%s4440_s1 + $0x620] sm:$0xf]  ;;  %v2926_v32 = vld [vmem:[%s4440_s1 + $0x624] sm:$0xf0] }
  0x5a   :  { %1511 = vmatpush.bf16.msra.mxu2 %v2522_v37  ;;  %v3673_v37 = vpack.c.b16 %v260_v14, %v260_v14  ;;  %v2019_v9 = vld [vmem:[%s4440_s1 + $0x138] sm:$0xf0] }
  0x5b   :  { %1524 = vmatpush.bf16.msra.mxu3 %v2586_v48  ;;  %v2705_v48 = vld [vmem:[%s4440_s1 + $0x690] sm:$0xf] }
  0x5c   :  { %1486 = vmatpush.bf16.msra.mxu0 %v2386_v51  ;;  %v1907_v51 = vld [vmem:[%s4440_s1 + $0x58] sm:$0xf0] }
  0x5d   :  { %1499 = vmatpush.bf16.msra.mxu1 %v2450_v56  ;;  %v1971_v56 = vld [vmem:[%s4440_s1 + $0xd8] sm:$0xf0]  ;;  %v1910_v58 = vor.u32 %v2739_v50, %v1907_v51  ;;  %v2924_v50 = vld [vmem:[%s4440_s1 + $0x614] sm:$0xf0]  ;;  %v2038_v51 = vor.u32 %v2771_v41, %v2035_v42  ;;  %v2821_v42 = vld [vmem:[%s4440_s1 + $0x2e4] sm:$0xf] }
  0x5e   :  { %1512 = vmatpush.bf16.msra.mxu2 %v2514_v57  ;;  %v2706_v57 = vor.u32 %v2940_v49, %v2705_v48  ;;  %v1974_v4 = vor.u32 %v2755_v55, %v1971_v56  ;;  %v2641_v49 = vld [vmem:[%s4440_s1 + $0x610] sm:$0xf]  ;;  %v2769_v55 = vld [vmem:[%s4440_s1 + $0x144] sm:$0xf]  ;;  %v2027_v56 = vld [vmem:[%s4440_s1 + $0x148] sm:$0xf0] }
  0x5f   :  { %1525 = vmatpush.bf16.msra.mxu3 %v2578_v2  ;;  %v2737_v2 = vld [vmem:[%s4440_s1 + $0x44] sm:$0xf] }
  0x60   :  { %1487 = vmatpush.bf16.msra.mxu0 %v2378_v6  ;;  %v2051_v6 = vld [vmem:[%s4440_s1 + $0x178] sm:$0xf0]  ;;  %v1902_v11 = vor.u32 %v2737_v2, %v1899_v3  ;;  %v2729_v2 = vld [vmem:[%s4440_s1 + $0x4] sm:$0xf]  ;;  %v1867_v3 = vld [vmem:[%s4440_s1 + $0x8] sm:$0xf0] }
  0x61   :  { %1500 = vmatpush.bf16.msra.mxu1 %v2442_v12  ;;  %v2657_v12 = vld [vmem:[%s4440_s1 + $0x630] sm:$0xf]  ;;  %v2054_v14 = vor.u32 %v2775_v5, %v2051_v6  ;;  %v2767_v5 = vld [vmem:[%s4440_s1 + $0x134] sm:$0xf] }
  0x62   :  { %1513 = vmatpush.bf16.msra.mxu2 %v2506_v13  ;;  %v2928_v13 = vld [vmem:[%s4440_s1 + $0x634] sm:$0xf0]  ;;  %v2791_v6 = vld [vmem:[%s4440_s1 + $0x1f4] sm:$0xf] }
  0x63   :  { %1526 = vmatpush.bf16.msra.mxu3 %v2570_v25  ;;  %1488 = vmatmul.bf16.vlgmr.msra.gmra.mxu0 %v3658_v28  ;;  %v264_v25 = vunpack.c.h.b16 %v3757_v18  ;;  %v2658_v26 = vor.u32 %v2928_v13, %v2657_v12  ;;  %v263_v12 = vunpack.c.l.b16 %v3757_v18  ;;  %v2634_v13 = vor.u32 %v2922_v1, %v2633_v61  ;;  %v2761_v61 = vld [vmem:[%s4440_s1 + $0x104] sm:$0xf]  ;;  %v1995_v1 = vld [vmem:[%s4440_s1 + $0x108] sm:$0xf0] }
  0x64   :  { %1532 = vmatpush.bf16.msrb.mxu0 %v2690_v15  ;;  %1501 = vmatmul.bf16.vlgmr.msra.gmra.mxu1 %v3673_v37  ;;  %v2735_v15 = vld [vmem:[%s4440_s1 + $0x34] sm:$0xf] }
  0x65   :  { %1549 = vmatpush.bf16.msrb.mxu1 %v2722_v17  ;;  %1514 = vmatmul.bf16.vlgmr.msra.gmra.mxu2 %v3660_v29  ;;  %v1891_v17 = vld [vmem:[%s4440_s1 + $0x38] sm:$0xf0] }
  0x66   :  { %1558 = vmatpush.bf16.msrb.mxu2 %v1926_v24  ;;  %1527 = vmatmul.bf16.vlgmr.msra.gmra.mxu3 %v3675_v38  ;;  %v2043_v24 = vld [vmem:[%s4440_s1 + $0x168] sm:$0xf0]  ;;  %v1894_v30 = vor.u32 %v2735_v15, %v1891_v17  ;;  %v1870_v17 = vor.u32 %v2729_v2, %v1867_v3  ;;  %v2801_v2 = vld [vmem:[%s4440_s1 + $0x244] sm:$0xf] }
  0x67   :  { %1571 = vmatpush.bf16.msrb.mxu3 %v1990_v35  ;;  %v2046_v33 = vor.u32 %v2773_v23, %v2043_v24  ;;  %v1883_v35 = vld [vmem:[%s4440_s1 + $0x28] sm:$0xf0]  ;;  %v2823_v23 = vld [vmem:[%s4440_s1 + $0x2f4] sm:$0xf]  ;;  %v2243_v24 = vld [vmem:[%s4440_s1 + $0x2f8] sm:$0xf0] }
  0x68   :  { %1533 = vmatpush.bf16.msrb.mxu0 %v2682_v40  ;;  %v1958_v40 = vor.u32 %v2751_v62, %v1955_v27  ;;  %v1886_v48 = vor.u32 %v2733_v34, %v1883_v35  ;;  %v1931_v15 = vld [vmem:[%s4440_s1 + $0x88] sm:$0xf0]  ;;  %v2765_v62 = vld [vmem:[%s4440_s1 + $0x124] sm:$0xf] }
  0x69   :  { %1550 = vmatpush.bf16.msrb.mxu1 %v2714_v44  ;;  %v3790_v44 = vpack.c.b16 %v264_v25, %v264_v25  ;;  %v2022_v25 = vor.u32 %v2767_v5, %v2019_v9  ;;  %v2789_v27 = vld [vmem:[%s4440_s1 + $0x1e4] sm:$0xf]  ;;  %v2171_v35 = vld [vmem:[%s4440_s1 + $0x268] sm:$0xf0]  ;;  %v2839_v5 = vld [vmem:[%s4440_s1 + $0x374] sm:$0xf]  ;;  %v1998_v9 = vor.u32 %v2761_v61, %v1995_v1 }
  0x6a   :  { %1559 = vmatpush.bf16.msrb.mxu2 %v1918_v45  ;;  %v2650_v45 = vor.u32 %v2926_v32, %v2649_v31  ;;  %v3876_v32 = vpack.c.b16 %v263_v12, %v263_v12  ;;  %v2805_v34 = vld [vmem:[%s4440_s1 + $0x264] sm:$0xf]  ;;  %v2155_v3 = vld [vmem:[%s4440_s1 + $0x248] sm:$0xf0]  ;;  %v2083_v12 = vld [vmem:[%s4440_s1 + $0x1b8] sm:$0xf0] }
  0x6b   :  { %1572 = vmatpush.bf16.msrb.mxu3 %v1982_v0  ;;  %v1875_v0 = vld [vmem:[%s4440_s1 + $0x18] sm:$0xf0]  ;;  %v2059_v61 = vld [vmem:[%s4440_s1 + $0x188] sm:$0xf0] }
  0x6c   :  { %1534 = vmatpush.bf16.msrb.mxu0 %v2674_v54  ;;  %v1950_v54 = vor.u32 %v2749_v46, %v1947_v47  ;;  %v1878_v63 = vor.u32 %v2731_v53, %v1875_v0  ;;  %v2174_v47 = vor.u32 %v2805_v34, %v2171_v35  ;;  %v2803_v53 = vld [vmem:[%s4440_s1 + $0x254] sm:$0xf]  ;;  %v2163_v0 = vld [vmem:[%s4440_s1 + $0x258] sm:$0xf0]  ;;  %v2139_v34 = vld [vmem:[%s4440_s1 + $0x228] sm:$0xf0] }
  0x6d   :  { %1551 = vmatpush.bf16.msrb.mxu1 %v2706_v57  ;;  %v2642_v57 = vor.u32 %v2924_v50, %v2641_v49  ;;  %v2787_v49 = vld [vmem:[%s4440_s1 + $0x1d4] sm:$0xf]  ;;  %v2099_v50 = vld [vmem:[%s4440_s1 + $0x1d8] sm:$0xf0] }
  0x6e   :  { %1560 = vmatpush.bf16.msrb.mxu2 %v1910_v58  ;;  %v2747_v58 = vld [vmem:[%s4440_s1 + $0x94] sm:$0xf] }
  0x6f   :  { %1573 = vmatpush.bf16.msrb.mxu3 %v1974_v4  ;;  %v2030_v4 = vor.u32 %v2769_v55, %v2027_v56  ;;  %v1942_v8 = vor.u32 %v2747_v58, %v1939_v59  ;;  %v2102_v55 = vor.u32 %v2787_v49, %v2099_v50  ;;  %v2819_v56 = vld [vmem:[%s4440_s1 + $0x2d4] sm:$0xf]  ;;  %v2166_v59 = vor.u32 %v2803_v53, %v2163_v0  ;;  %v2067_v49 = vld [vmem:[%s4440_s1 + $0x198] sm:$0xf0]  ;;  %v2833_v0 = vld [vmem:[%s4440_s1 + $0x344] sm:$0xf] }
  0x70   :  { %1535 = vmatpush.bf16.msrb.mxu0 %v2666_v7  ;;  %v2115_v7 = vld [vmem:[%s4440_s1 + $0x1f8] sm:$0xf0] }
  0x71   :  { %1552 = vmatpush.bf16.msrb.mxu1 %v2698_v10  ;;  %v2807_v10 = vld [vmem:[%s4440_s1 + $0x274] sm:$0xf] }
  0x72   :  { %1561 = vmatpush.bf16.msrb.mxu2 %v1902_v11  ;;  %v2179_v11 = vld [vmem:[%s4440_s1 + $0x278] sm:$0xf0] }
  0x73   :  { %1574 = vmatpush.bf16.msrb.mxu3 %v1966_v22  ;;  %v2118_v22 = vor.u32 %v2791_v6, %v2115_v7  ;;  %v2307_v6 = vld [vmem:[%s4440_s1 + $0x378] sm:$0xf0] }
  0x74   :  { %1536 = vmatpush.bf16.msrb.mxu0 %v2658_v26  ;;  %2727 = vmatmul.msk.bf16.vlgmr.msrb.gmra.mxu1 %vm1372_vm0, %v3790_v44  ;;  %v2182_v26 = vor.u32 %v2807_v10, %v2179_v11  ;;  %v2158_v10 = vor.u32 %v2801_v2, %v2155_v3  ;;  %v2783_v11 = vld [vmem:[%s4440_s1 + $0x1b4] sm:$0xf] }
  0x75   :  { %1584 = vmatpush.bf16.msra.mxu1 %v2054_v14  ;;  %v2745_v14 = vld [vmem:[%s4440_s1 + $0x84] sm:$0xf]  ;;  %v2831_v2 = vld [vmem:[%s4440_s1 + $0x334] sm:$0xf] }
  0x76   :  { %1562 = vmatpush.bf16.msrb.mxu2 %v1894_v30  ;;  %v2107_v30 = vld [vmem:[%s4440_s1 + $0x1e8] sm:$0xf0]  ;;  %v1934_v31 = vor.u32 %v2745_v14, %v1931_v15  ;;  %v2799_v14 = vld [vmem:[%s4440_s1 + $0x234] sm:$0xf]  ;;  %v2147_v15 = vld [vmem:[%s4440_s1 + $0x238] sm:$0xf0] }
  0x77   :  { %1575 = vmatpush.bf16.msrb.mxu3 %v1958_v40  ;;  %v2246_v40 = vor.u32 %v2823_v23, %v2243_v24  ;;  %v2110_v41 = vor.u32 %v2789_v27, %v2107_v30  ;;  %v2299_v23 = vld [vmem:[%s4440_s1 + $0x368] sm:$0xf0]  ;;  %v2086_v24 = vor.u32 %v2783_v11, %v2083_v12  ;;  %v2781_v27 = vld [vmem:[%s4440_s1 + $0x1a4] sm:$0xf]  ;;  %v2855_v3 = vld [vmem:[%s4440_s1 + $0x3f4] sm:$0xf] }
  0x78   :  { %1537 = vmatpush.bf16.msrb.mxu0 %v2650_v45  ;;  %v2235_v45 = vld [vmem:[%s4440_s1 + $0x2e8] sm:$0xf0] }
  0x79   :  { %1585 = vmatpush.bf16.msra.mxu1 %v2046_v33  ;;  %v2011_v33 = vld [vmem:[%s4440_s1 + $0x128] sm:$0xf0] }
  0x7a   :  { %1563 = vmatpush.bf16.msrb.mxu2 %v1886_v48  ;;  %v2014_v46 = vor.u32 %v2765_v62, %v2011_v33  ;;  %v2763_v48 = vld [vmem:[%s4440_s1 + $0x114] sm:$0xf]  ;;  %v2150_v62 = vor.u32 %v2799_v14, %v2147_v15  ;;  %v2075_v30 = vld [vmem:[%s4440_s1 + $0x1a8] sm:$0xf0]  ;;  %v2797_v33 = vld [vmem:[%s4440_s1 + $0x224] sm:$0xf] }
  0x7b   :  { %1576 = vmatpush.bf16.msrb.mxu3 %v1950_v54  ;;  %v2238_v54 = vor.u32 %v2821_v42, %v2235_v45  ;;  %v2078_v42 = vor.u32 %v2781_v27, %v2075_v30  ;;  %v2813_v45 = vld [vmem:[%s4440_s1 + $0x2a4] sm:$0xf]  ;;  %v2499_v14 = vld [vmem:[%s4440_s1 + $0x4f8] sm:$0xf0]  ;;  %v2427_v27 = vld [vmem:[%s4440_s1 + $0x468] sm:$0xf0] }
  0x7c   :  { %1538 = vmatpush.bf16.msrb.mxu0 %v2642_v57  ;;  %v2227_v57 = vld [vmem:[%s4440_s1 + $0x2d8] sm:$0xf0] }
  0x7d   :  { %1586 = vmatpush.bf16.msra.mxu1 %v2038_v51  ;;  %v2003_v51 = vld [vmem:[%s4440_s1 + $0x118] sm:$0xf0] }
  0x7e   :  { %1564 = vmatpush.bf16.msrb.mxu2 %v1878_v63  ;;  %v2006_v58 = vor.u32 %v2763_v48, %v2003_v51  ;;  %v2091_v63 = vld [vmem:[%s4440_s1 + $0x1c8] sm:$0xf0]  ;;  %v2779_v48 = vld [vmem:[%s4440_s1 + $0x194] sm:$0xf] }
  0x7f   :  { %1577 = vmatpush.bf16.msrb.mxu3 %v1942_v8  ;;  %v2817_v8 = vld [vmem:[%s4440_s1 + $0x2c4] sm:$0xf]  ;;  %v2795_v51 = vld [vmem:[%s4440_s1 + $0x214] sm:$0xf] }
  0x80   :  { %1539 = vmatpush.bf16.msrb.mxu0 %v2634_v13  ;;  %v2310_v13 = vor.u32 %v2839_v5, %v2307_v6  ;;  %v2275_v6 = vld [vmem:[%s4440_s1 + $0x338] sm:$0xf0] }
  0x81   :  { %1587 = vmatpush.bf16.msra.mxu1 %v2030_v4  ;;  %v2230_v4 = vor.u32 %v2819_v56, %v2227_v57  ;;  %v2811_v56 = vld [vmem:[%s4440_s1 + $0x294] sm:$0xf]  ;;  %v2195_v57 = vld [vmem:[%s4440_s1 + $0x298] sm:$0xf0]  ;;  %v2278_v15 = vor.u32 %v2831_v2, %v2275_v6 }
  0x82   :  { %1565 = vmatpush.bf16.msrb.mxu2 %v1870_v17  ;;  %v2198_v5 = vor.u32 %v2811_v56, %v2195_v57  ;;  %v2865_v56 = vld [vmem:[%s4440_s1 + $0x444] sm:$0xf]  ;;  %v2411_v57 = vld [vmem:[%s4440_s1 + $0x448] sm:$0xf0] }
  0x83   :  { %1578 = vmatpush.bf16.msrb.mxu3 %v1934_v31  ;;  %1540 = vmatmul.bf16.vlgmr.msrb.gmra.mxu0 %v3876_v32 }
  0x84   :  { %1597 = vmatpush.bf16.msra.mxu0 %v2118_v22  ;;  %v2837_v22 = vld [vmem:[%s4440_s1 + $0x364] sm:$0xf] }
  0x85   :  { %1588 = vmatpush.bf16.msra.mxu1 %v2022_v25  ;;  %1566 = vmatmul.bf16.vlgmr.msrb.gmra.mxu2 %v3279_v19  ;;  %v2785_v19 = vld [vmem:[%s4440_s1 + $0x1c4] sm:$0xf]  ;;  %v2815_v25 = vld [vmem:[%s4440_s1 + $0x2b4] sm:$0xf]  ;;  %v2302_v31 = vor.u32 %v2837_v22, %v2299_v23 }
  0x86   :  { %1610 = vmatpush.bf16.msra.mxu2 %v2182_v26  ;;  %1579 = vmatmul.bf16.vlgmr.msrb.gmra.mxu3 %v3283_v21  ;;  %v2094_v7 = vor.u32 %v2785_v19, %v2091_v63  ;;  %v2219_v21 = vld [vmem:[%s4440_s1 + $0x2c8] sm:$0xf0]  ;;  %v2211_v26 = vld [vmem:[%s4440_s1 + $0x2b8] sm:$0xf0]  ;;  %v2793_v19 = vld [vmem:[%s4440_s1 + $0x204] sm:$0xf] }
  0x87   :  { %1623 = vmatpush.bf16.msra.mxu3 %v2246_v40  ;;  %v2222_v17 = vor.u32 %v2817_v8, %v2219_v21  ;;  %v2214_v35 = vor.u32 %v2815_v25, %v2211_v26  ;;  %v2835_v40 = vld [vmem:[%s4440_s1 + $0x354] sm:$0xf]  ;;  %v2123_v63 = vld [vmem:[%s4440_s1 + $0x208] sm:$0xf0]  ;;  %v2435_v8 = vld [vmem:[%s4440_s1 + $0x478] sm:$0xf0] }
  0x88   :  { %1598 = vmatpush.bf16.msra.mxu0 %v2110_v41  ;;  %v2291_v41 = vld [vmem:[%s4440_s1 + $0x358] sm:$0xf0]  ;;  %v2126_v11 = vor.u32 %v2793_v19, %v2123_v63  ;;  %v2829_v22 = vld [vmem:[%s4440_s1 + $0x324] sm:$0xf]  ;;  %v2267_v26 = vld [vmem:[%s4440_s1 + $0x328] sm:$0xf0] }
  0x89   :  { %1589 = vmatpush.bf16.msra.mxu1 %v2014_v46  ;;  %v2203_v46 = vld [vmem:[%s4440_s1 + $0x2a8] sm:$0xf0]  ;;  %v2294_v50 = vor.u32 %v2835_v40, %v2291_v41  ;;  %v2853_v23 = vld [vmem:[%s4440_s1 + $0x3e4] sm:$0xf]  ;;  %v2827_v41 = vld [vmem:[%s4440_s1 + $0x314] sm:$0xf] }
  0x8a   :  { %1611 = vmatpush.bf16.msra.mxu2 %v2174_v47  ;;  %v2142_v47 = vor.u32 %v2797_v33, %v2139_v34  ;;  %v2206_v53 = vor.u32 %v2813_v45, %v2203_v46  ;;  %v2885_v33 = vld [vmem:[%s4440_s1 + $0x4e4] sm:$0xf]  ;;  %v2491_v34 = vld [vmem:[%s4440_s1 + $0x4e8] sm:$0xf0]  ;;  %v2355_v45 = vld [vmem:[%s4440_s1 + $0x3d8] sm:$0xf0] }
  0x8b   :  { %1624 = vmatpush.bf16.msra.mxu3 %v2238_v54  ;;  %v2283_v54 = vld [vmem:[%s4440_s1 + $0x348] sm:$0xf0]  ;;  %v2259_v46 = vld [vmem:[%s4440_s1 + $0x318] sm:$0xf0]  ;;  %v2881_v63 = vld [vmem:[%s4440_s1 + $0x4c4] sm:$0xf] }
  0x8c   :  { %1599 = vmatpush.bf16.msra.mxu0 %v2102_v55  ;;  %v2070_v55 = vor.u32 %v2779_v48, %v2067_v49  ;;  %v2286_v1 = vor.u32 %v2833_v0, %v2283_v54  ;;  %v2419_v48 = vld [vmem:[%s4440_s1 + $0x458] sm:$0xf0]  ;;  %v2494_v49 = vor.u32 %v2885_v33, %v2491_v34  ;;  %v2347_v54 = vld [vmem:[%s4440_s1 + $0x3c8] sm:$0xf0] }
  0x8d   :  { %1590 = vmatpush.bf16.msra.mxu1 %v2006_v58  ;;  %v2777_v58 = vld [vmem:[%s4440_s1 + $0x184] sm:$0xf] }
  0x8e   :  { %1612 = vmatpush.bf16.msra.mxu2 %v2166_v59  ;;  %v2062_v21 = vor.u32 %v2777_v58, %v2059_v61 }
  0x8f   :  { %1625 = vmatpush.bf16.msra.mxu3 %v2230_v4  ;;  %v2371_v4 = vld [vmem:[%s4440_s1 + $0x3f8] sm:$0xf0] }
  0x90   :  { %1600 = vmatpush.bf16.msra.mxu0 %v2094_v7  ;;  %v2871_v7 = vld [vmem:[%s4440_s1 + $0x474] sm:$0xf]  ;;  %v2374_v12 = vor.u32 %v2855_v3, %v2371_v4  ;;  %v2414_v3 = vor.u32 %v2865_v56, %v2411_v57  ;;  %v2539_v56 = vld [vmem:[%s4440_s1 + $0x548] sm:$0xf0] }
  0x91   :  { %1591 = vmatpush.bf16.msra.mxu1 %v1998_v9  ;;  %v2809_v9 = vld [vmem:[%s4440_s1 + $0x284] sm:$0xf]  ;;  %v2847_v4 = vld [vmem:[%s4440_s1 + $0x3b4] sm:$0xf] }
  0x92   :  { %1613 = vmatpush.bf16.msra.mxu2 %v2158_v10  ;;  %v2187_v10 = vld [vmem:[%s4440_s1 + $0x288] sm:$0xf0]  ;;  %v4140_v61 = vpop.permute.xlu0 %1749  ;;  %v2875_v57 = vld [vmem:[%s4440_s1 + $0x494] sm:$0xf] }
  0x93   :  { %1626 = vmatpush.bf16.msra.mxu3 %v2222_v17  ;;  %v2438_v17 = vor.u32 %v2871_v7, %v2435_v8  ;;  %v2190_v25 = vor.u32 %v2809_v9, %v2187_v10  ;;  %v2863_v7 = vld [vmem:[%s4440_s1 + $0x434] sm:$0xf]  ;;  %v2403_v8 = vld [vmem:[%s4440_s1 + $0x438] sm:$0xf0]  ;;  %v2901_v9 = vld [vmem:[%s4440_s1 + $0x564] sm:$0xf] }
  0x94   :  { %1601 = vmatpush.bf16.msra.mxu0 %v2086_v24  ;;  %1592 = vmatmul.bf16.vlgmr.msra.gmra.mxu1 %v3271_v16  ;;  %v2131_v16 = vld [vmem:[%s4440_s1 + $0x218] sm:$0xf0]  ;;  %v2363_v24 = vld [vmem:[%s4440_s1 + $0x3e8] sm:$0xf0] }
  0x95   :  { %1636 = vmatpush.bf16.msrb.mxu1 %v2310_v13  ;;  %v2134_v59 = vor.u32 %v2795_v51, %v2131_v16  ;;  %v2887_v13 = vld [vmem:[%s4440_s1 + $0x4f4] sm:$0xf]  ;;  %v2483_v16 = vld [vmem:[%s4440_s1 + $0x4d8] sm:$0xf0]  ;;  %v2555_v10 = vld [vmem:[%s4440_s1 + $0x568] sm:$0xf0] }
  0x96   :  { %1614 = vmatpush.bf16.msra.mxu2 %v2150_v62  ;;  %v2869_v62 = vld [vmem:[%s4440_s1 + $0x464] sm:$0xf]  ;;  %v2502_v30 = vor.u32 %v2887_v13, %v2499_v14  ;;  %v2883_v51 = vld [vmem:[%s4440_s1 + $0x4d4] sm:$0xf]  ;;  %v2467_v14 = vld [vmem:[%s4440_s1 + $0x4b8] sm:$0xf0] }
  0x97   :  { %1627 = vmatpush.bf16.msra.mxu3 %v2214_v35  ;;  %v2270_v35 = vor.u32 %v2829_v22, %v2267_v26  ;;  %v2430_v40 = vor.u32 %v2869_v62, %v2427_v27  ;;  %v2486_v58 = vor.u32 %v2883_v51, %v2483_v16  ;;  %v2879_v13 = vld [vmem:[%s4440_s1 + $0x4b4] sm:$0xf]  ;;  %v2331_v22 = vld [vmem:[%s4440_s1 + $0x3a8] sm:$0xf0]  ;;  %v2547_v62 = vld [vmem:[%s4440_s1 + $0x558] sm:$0xf0] }
  0x98   :  { %1602 = vmatpush.bf16.msra.mxu0 %v2078_v42  ;;  %v2851_v42 = vld [vmem:[%s4440_s1 + $0x3d4] sm:$0xf]  ;;  %v2470_v34 = vor.u32 %v2879_v13, %v2467_v14  ;;  %v2627_v14 = vld [vmem:[%s4440_s1 + $0x5f8] sm:$0xf0] }
  0x99   :  { %1637 = vmatpush.bf16.msrb.mxu1 %v2302_v31  ;;  %v2366_v31 = vor.u32 %v2853_v23, %v2363_v24  ;;  %v2861_v23 = vld [vmem:[%s4440_s1 + $0x424] sm:$0xf]  ;;  %v2395_v24 = vld [vmem:[%s4440_s1 + $0x428] sm:$0xf0]  ;;  %v2899_v26 = vld [vmem:[%s4440_s1 + $0x554] sm:$0xf] }
  0x9a   :  { %1615 = vmatpush.bf16.msra.mxu2 %v2142_v47  ;;  %v2867_v47 = vld [vmem:[%s4440_s1 + $0x454] sm:$0xf] }
  0x9b   :  { %1628 = vmatpush.bf16.msra.mxu3 %v2206_v53  ;;  %v2262_v53 = vor.u32 %v2827_v41, %v2259_v46  ;;  %v2422_v0 = vor.u32 %v2867_v47, %v2419_v48  ;;  %v1752_v41 = vpop.permute.xlu0 %1751  ;;  %v2323_v46 = vld [vmem:[%s4440_s1 + $0x398] sm:$0xf0]  ;;  %v2957_v47 = vld [vmem:[%s4441_s0 + $0x10] sm:$0xff] }
  0x9c   :  { %1603 = vmatpush.bf16.msra.mxu0 %v2070_v55  ;;  %v2251_v55 = vld [vmem:[%s4440_s1 + $0x308] sm:$0xf0]  ;;  %v1768_v48 = vrot.slane %v2957_v47, 4  ;;  %v2919_v13 = vld [vmem:[%s4440_s1 + $0x5f4] sm:$0xf] }
  0x9d   :  { %1638 = vmatpush.bf16.msrb.mxu1 %v2294_v50  ;;  %v2358_v50 = vor.u32 %v2851_v42, %v2355_v45  ;;  %v2843_v45 = vld [vmem:[%s4440_s1 + $0x394] sm:$0xf] }
  0x9e   :  { %1616 = vmatpush.bf16.msra.mxu2 %v2134_v59  ;;  %v2903_v59 = vld [vmem:[%s4440_s1 + $0x574] sm:$0xf] }
  0x9f   :  { %1629 = vmatpush.bf16.msra.mxu3 %v2198_v5  ;;  %v2339_v5 = vld [vmem:[%s4440_s1 + $0x3b8] sm:$0xf0] }
  0xa0   :  { %1604 = vmatpush.bf16.msra.mxu0 %v2062_v21 }
  0xa1   :  { %1639 = vmatpush.bf16.msrb.mxu1 %v2286_v1  ;;  %v2475_v1 = vld [vmem:[%s4440_s1 + $0x4c8] sm:$0xf0] }
  0xa2   :  { %1617 = vmatpush.bf16.msra.mxu2 %v2126_v11  ;;  %v2478_v21 = vor.u32 %v2881_v63, %v2475_v1  ;;  %v4169_v11 = vld [vmem:[%s4442_s2] sm:$0x3]  ;;  %v1385_v51 = vpop.f32.mrf.mxu0  ;;  %v2841_v1 = vld [vmem:[%s4440_s1 + $0x384] sm:$0xf] }
  0xa3   :  { %1630 = vmatpush.bf16.msra.mxu3 %v2190_v25  ;;  %1605 = vmatmul.bf16.vlgmr.msra.gmra.mxu0 %v3281_v20  ;;  %v2825_v20 = vld [vmem:[%s4440_s1 + $0x304] sm:$0xf]  ;;  %v2558_v25 = vor.u32 %v2901_v9, %v2555_v10  ;;  %v240_v27 = vperm.slane %v4169_v11, 0 }
  0xa4   :  { %1649 = vmatpush.bf16.msrb.mxu0 %v2374_v12  ;;  %v2254_v2 = vor.u32 %v2825_v20, %v2251_v55  ;;  %v2342_v12 = vor.u32 %v2847_v4, %v2339_v5  ;;  %v2897_v20 = vld [vmem:[%s4440_s1 + $0x544] sm:$0xf]  ;;  %v2326_v55 = vor.u32 %v2843_v45, %v2323_v46  ;;  %v2943_v45 = vld [vmem:[%s4440_s1 + $0x6b4] sm:$0xf]  ;;  %v2723_v46 = vld [vmem:[%s4440_s1 + $0x6b8] sm:$0xf0] }
  0xa5   :  { %1640 = vmatpush.bf16.msrb.mxu1 %v2278_v15  ;;  %1618 = vmatmul.bf16.vlgmr.msra.gmra.mxu2 %v3443_v36  ;;  %v2849_v36 = vld [vmem:[%s4440_s1 + $0x3c4] sm:$0xf]  ;;  %v2542_v9 = vor.u32 %v2897_v20, %v2539_v56  ;;  %v2523_v20 = vld [vmem:[%s4440_s1 + $0x528] sm:$0xf0] }
  0xa6   :  { %1662 = vmatpush.bf16.msrb.mxu2 %v2438_v17  ;;  %1631 = vmatmul.bf16.vlgmr.msra.gmra.mxu3 %v3454_v43  ;;  %v2563_v43 = vld [vmem:[%s4440_s1 + $0x578] sm:$0xf0]  ;;  %v2350_v19 = vor.u32 %v2849_v36, %v2347_v54  ;;  %v2845_v15 = vld [vmem:[%s4440_s1 + $0x3a4] sm:$0xf]  ;;  %v2406_v17 = vor.u32 %v2863_v7, %v2403_v8  ;;  %v1386_v36 = vadd.f32 %v1385_v51, %v240_v27  ;;  %v2315_v7 = vld [vmem:[%s4440_s1 + $0x388] sm:$0xf0] }
  0xa7   :  { %1675 = vmatpush.bf16.msrb.mxu3 %v2502_v30  ;;  %v2566_v6 = vor.u32 %v2903_v59, %v2563_v43  ;;  %v1753_v30 = vrot.slane %v4140_v61, 4  ;;  %v2334_v42 = vor.u32 %v2845_v15, %v2331_v22  ;;  %v1398_v59 = vpop.f32.mrf.mxu1  ;;  %v2958_v43 = vld [vmem:[%s4441_s0] sm:$0xff]  ;;  %v4261_v15 = vpop.permute.xlu1 %1801  ;;  %v2935_v22 = vld [vmem:[%s4440_s1 + $0x674] sm:$0xf]  ;;  %v2318_v27 = vor.u32 %v2841_v1, %v2315_v7 }
  0xa8   :  { %1650 = vmatpush.bf16.msrb.mxu0 %v2366_v31  ;;  %v2956_v31 = vld [vmem:[%s4441_s0 + $0x8] sm:$0xff]  ;;  %v1747_v61 = vunpack.c.l.bf16 %v2958_v43  ;;  %v2857_v8 = vld [vmem:[%s4440_s1 + $0x404] sm:$0xf]  ;;  %v1805_v7 = vrot.slane %v4261_v15, 4  ;;  %v2675_v15 = vld [vmem:[%s4440_s1 + $0x658] sm:$0xf0] }
  0xa9   :  { %1641 = vmatpush.bf16.msrb.mxu1 %v2270_v35  ;;  %v1767_v33 = vrot.slane %v2956_v31, 4  ;;  %v2877_v35 = vld [vmem:[%s4440_s1 + $0x4a4] sm:$0xf] }
  0xaa   :  { %1663 = vmatpush.bf16.msrb.mxu2 %v2430_v40  ;;  %v2459_v40 = vld [vmem:[%s4440_s1 + $0x4a8] sm:$0xf0]  ;;  %v2873_v31 = vld [vmem:[%s4440_s1 + $0x484] sm:$0xf]  ;;  %v1387_v47 = vpop.f32.mrf.mxu0 }
  0xab   :  { %1676 = vmatpush.bf16.msrb.mxu3 %v2494_v49  ;;  %v1754_v49 = vrot.slane %v1752_v41, 4  ;;  %v2462_v16 = vor.u32 %v2877_v35, %v2459_v40  ;;  %v2948_v35 = vpop.permute.xlu2 %2947  ;;  %v2630_v40 = vor.u32 %v2919_v13, %v2627_v14  ;;  %v2941_v1 = vld [vmem:[%s4440_s1 + $0x6a4] sm:$0xf] }
  0xac   :  { %1651 = vmatpush.bf16.msrb.mxu0 %v2358_v50  ;;  %v2398_v50 = vor.u32 %v2861_v23, %v2395_v24  ;;  %v2691_v23 = vld [vmem:[%s4440_s1 + $0x678] sm:$0xf0] }
  0xad   :  { %1642 = vmatpush.bf16.msrb.mxu1 %v2262_v53  ;;  %v2859_v53 = vld [vmem:[%s4440_s1 + $0x414] sm:$0xf]  ;;  %v1756_v54 = vsel %vm1743_vm1, %v1753_v30, %v1754_v49  ;;  %v2949_v49 = vunpack.i.l.bf16 %v2948_v35  ;;  %v2694_v51 = vor.u32 %v2935_v22, %v2691_v23  ;;  %v2603_v22 = vld [vmem:[%s4440_s1 + $0x5c8] sm:$0xf0] }
  0xae   :  { %1664 = vmatpush.bf16.msrb.mxu2 %v2422_v0  ;;  %v2387_v0 = vld [vmem:[%s4440_s1 + $0x418] sm:$0xf0]  ;;  %v1758_v63 = vsel %vm1372_vm0, %v1756_v54, %v1752_v41  ;;  %v2683_v54 = vld [vmem:[%s4440_s1 + $0x668] sm:$0xf0] }
  0xaf   :  { %1677 = vmatpush.bf16.msrb.mxu3 %v2486_v58  ;;  %v2451_v58 = vld [vmem:[%s4440_s1 + $0x498] sm:$0xf0]  ;;  %v1760_v4 = vunpack.c.l.bf16 %v1758_v63  ;;  %v1761_v5 = vunpack.c.h.bf16 %v1758_v63  ;;  %v1400_v56 = vpop.f32.mrf.mxu1 }
  0xb0   :  { %1652 = vmatpush.bf16.msrb.mxu0 %v2350_v19  ;;  %v1748_v19 = vunpack.c.h.bf16 %v2958_v43  ;;  %v2454_v10 = vor.u32 %v2875_v57, %v2451_v58 }
  0xb1   :  { %1643 = vmatpush.bf16.msrb.mxu1 %v2254_v2  ;;  %v1399_v2 = vadd.f32 %v1398_v59, %v1386_v36  ;;  %v2933_v36 = vld [vmem:[%s4440_s1 + $0x664] sm:$0xf]  ;;  %v2726_v59 = vor.u32 %v2943_v45, %v2723_v46 }
  0xb2   :  { %1665 = vmatpush.bf16.msrb.mxu2 %v2414_v3  ;;  %v1769_v3 = vsel %vm1743_vm1, %v1767_v33, %v1768_v48  ;;  %v2443_v33 = vld [vmem:[%s4440_s1 + $0x488] sm:$0xf0]  ;;  %v2950_v48 = vunpack.i.h.bf16 %v2948_v35 }
  0xb3   :  { %1678 = vmatpush.bf16.msrb.mxu3 %v2478_v21  ;;  %v2379_v21 = vld [vmem:[%s4440_s1 + $0x408] sm:$0xf0]  ;;  %v1771_v24 = vunpack.c.l.bf16 %v1769_v3 }
  0xb4   :  { %1653 = vmatpush.bf16.msrb.mxu0 %v2342_v12  ;;  %1644 = vmatmul.bf16.vlgmr.msrb.gmra.mxu1 %v3446_v39  ;;  %v2550_v39 = vor.u32 %v2899_v26, %v2547_v62  ;;  %v2895_v12 = vld [vmem:[%s4440_s1 + $0x534] sm:$0xf]  ;;  %v1763_v26 = vmax.f32 %v1748_v19, %v1761_v5  ;;  %v1772_v62 = vunpack.c.h.bf16 %v1769_v3  ;;  %v2382_v30 = vor.u32 %v2857_v8, %v2379_v21 }
  0xb5   :  { %1688 = vmatpush.bf16.msra.mxu1 %v2566_v6  ;;  %v2390_v6 = vor.u32 %v2859_v53, %v2387_v0  ;;  %v2619_v53 = vld [vmem:[%s4440_s1 + $0x5e8] sm:$0xf0]  ;;  %v2446_v0 = vor.u32 %v2873_v31, %v2443_v33  ;;  %v1786_v43 = vsel %vm1372_vm0, %v2949_v49, %v2950_v48  ;;  %v2915_v5 = vld [vmem:[%s4440_s1 + $0x5d4] sm:$0xf]  ;;  %v1818_v8 = vrot.slane %v3609_v60, 4 }
  0xb6   :  { %1666 = vmatpush.bf16.msrb.mxu2 %v2406_v17  ;;  %v2531_v17 = vld [vmem:[%s4440_s1 + $0x538] sm:$0xf0]  ;;  %v1774_v58 = vmax.f32 %v1763_v26, %v1772_v62  ;;  %v2891_v21 = vld [vmem:[%s4440_s1 + $0x514] sm:$0xf]  ;;  %v2889_v33 = vld [vmem:[%s4440_s1 + $0x504] sm:$0xf] }
  0xb7   :  { %1679 = vmatpush.bf16.msrb.mxu3 %v2470_v34  ;;  %v1411_v34 = vpop.f32.mrf.mxu2 }
  0xb8   :  { %1654 = vmatpush.bf16.msrb.mxu0 %v2334_v42  ;;  %v1412_v41 = vadd.f32 %v1411_v34, %v1399_v2  ;;  %v1424_v42 = vpop.f32.mrf.mxu3  ;;  %v2715_v2 = vld [vmem:[%s4440_s1 + $0x6a8] sm:$0xf0]  ;;  %v1790_v14 = vmax.f32 %v1774_v58, %v2950_v48  ;;  %v2911_v48 = vld [vmem:[%s4440_s1 + $0x5b4] sm:$0xf] }
  0xb9   :  { %1689 = vmatpush.bf16.msra.mxu1 %v2558_v25  ;;  %v1762_v25 = vmax.f32 %v1747_v61, %v1760_v4  ;;  %v2959_v61 = vld [vmem:[%s4441_s0 + $0x20] sm:$0xff]  ;;  %v2686_v4 = vor.u32 %v2933_v36, %v2683_v54  ;;  %v2718_v23 = vor.u32 %v2941_v1, %v2715_v2  ;;  %v2927_v1 = vld [vmem:[%s4440_s1 + $0x634] sm:$0xf]  ;;  %v2659_v2 = vld [vmem:[%s4440_s1 + $0x638] sm:$0xf0] }
  0xba   :  { %1667 = vmatpush.bf16.msrb.mxu2 %v2398_v50  ;;  %v2534_v50 = vor.u32 %v2895_v12, %v2531_v17  ;;  %v1817_v19 = vrot.slane %v2959_v61, 4  ;;  %v2960_v12 = vld [vmem:[%s4441_s0 + $0x18] sm:$0xff]  ;;  %v2913_v17 = vld [vmem:[%s4440_s1 + $0x5c4] sm:$0xf] }
  0xbb   :  { %1680 = vmatpush.bf16.msrb.mxu3 %v2462_v16  ;;  %v2917_v16 = vld [vmem:[%s4440_s1 + $0x5e4] sm:$0xf]  ;;  %v1773_v57 = vmax.f32 %v1762_v25, %v1771_v24  ;;  %v1795_v60 = vunpack.c.h.bf16 %v2960_v12  ;;  %v1804_v25 = vpop.permute.xlu1 %1803  ;;  %v2606_v47 = vor.u32 %v2913_v17, %v2603_v22 }
  0xbc   :  { %1655 = vmatpush.bf16.msrb.mxu0 %v2326_v55  ;;  %v4302_v55 = vadd.f32 %v1424_v42, %v1412_v41  ;;  %v2622_v63 = vor.u32 %v2917_v16, %v2619_v53  ;;  %v1819_v34 = vsel %vm1743_vm1, %v1817_v19, %v1818_v8  ;;  %v2929_v41 = vld [vmem:[%s4440_s1 + $0x644] sm:$0xf]  ;;  %v2699_v16 = vld [vmem:[%s4440_s1 + $0x688] sm:$0xf0] }
  0xbd   :  { %1690 = vmatpush.bf16.msra.mxu1 %v2550_v39  ;;  %v2893_v39 = vld [vmem:[%s4440_s1 + $0x524] sm:$0xf]  ;;  %v1789_v13 = vmax.f32 %v1773_v57, %v1786_v43  ;;  %v1797_v42 = vmax.f32 %v1790_v14, %v1795_v60  ;;  %v1821_v53 = vunpack.c.l.bf16 %v1819_v34  ;;  %v1822_v36 = vunpack.c.h.bf16 %v1819_v34  ;;  %v2953_v57 = vpop.permute.xlu2 %2952 }
  0xbe   :  { %1668 = vmatpush.bf16.msrb.mxu2 %v2390_v6  ;;  %v2526_v3 = vor.u32 %v2893_v39, %v2523_v20  ;;  %v2611_v6 = vld [vmem:[%s4440_s1 + $0x5d8] sm:$0xf0]  ;;  %v2937_v39 = vld [vmem:[%s4440_s1 + $0x684] sm:$0xf]  ;;  %v2955_v61 = vunpack.i.h.bf16 %v2953_v57  ;;  %v2954_v19 = vunpack.i.l.bf16 %v2953_v57  ;;  %v2662_v60 = vor.u32 %v2927_v1, %v2659_v2 }
  0xbf   :  { %1681 = vmatpush.bf16.msrb.mxu3 %v2454_v10  ;;  %v2931_v10 = vld [vmem:[%s4440_s1 + $0x654] sm:$0xf]  ;;  %v1413_v24 = vpop.f32.mrf.mxu2  ;;  %v2614_v26 = vor.u32 %v2915_v5, %v2611_v6  ;;  %v1845_v5 = vunpack.c.h.bf16 %v3757_v18 }
  0xc0   :  { %1656 = vmatpush.bf16.msrb.mxu0 %v2318_v27  ;;  %v1426_v62 = vpop.f32.mrf.mxu3  ;;  %v2707_v27 = vld [vmem:[%s4440_s1 + $0x698] sm:$0xf0]  ;;  %v2678_v35 = vor.u32 %v2931_v10, %v2675_v15  ;;  %v1437_v58 = vpop.f32.mrf.mxu0  ;;  %v2909_v10 = vld [vmem:[%s4440_s1 + $0x5a4] sm:$0xf]  ;;  %v2907_v24 = vld [vmem:[%s4440_s1 + $0x594] sm:$0xf] }
  0xc1   :  { %1691 = vmatpush.bf16.msra.mxu1 %v2542_v9  ;;  %v2515_v9 = vld [vmem:[%s4440_s1 + $0x518] sm:$0xf0]  ;;  %v1450_v6 = vpop.f32.mrf.mxu1 }
  0xc2   :  { %1669 = vmatpush.bf16.msrb.mxu2 %v2382_v30  ;;  %v1806_v30 = vrot.slane %v1804_v25, 4  ;;  %v2518_v31 = vor.u32 %v2891_v21, %v2515_v9  ;;  %v1836_v21 = vsel %vm1372_vm0, %v2954_v19, %v2955_v61  ;;  %v1844_v9 = vunpack.c.l.bf16 %v3757_v18  ;;  %v2651_v18 = vld [vmem:[%s4440_s1 + $0x628] sm:$0xf0] }
  0xc3   :  { %1682 = vmatpush.bf16.msrb.mxu3 %v2446_v0  ;;  %1657 = vmatmul.bf16.vlgmr.msrb.gmra.mxu0 %v3475_v52  ;;  %v1794_v52 = vunpack.c.l.bf16 %v2960_v12 }
  0xc4   :  { %1701 = vmatpush.bf16.msra.mxu0 %v2630_v40  ;;  %v2507_v40 = vld [vmem:[%s4440_s1 + $0x508] sm:$0xf0]  ;;  %v1807_v46 = vsel %vm1743_vm1, %v1805_v7, %v1806_v30  ;;  %v2643_v30 = vld [vmem:[%s4440_s1 + $0x618] sm:$0xf0] }
  0xc5   :  { %1692 = vmatpush.bf16.msra.mxu1 %v2534_v50  ;;  %1670 = vmatmul.bf16.vlgmr.msrb.gmra.mxu2 %v3658_v28  ;;  %v2939_v28 = vld [vmem:[%s4440_s1 + $0x694] sm:$0xf]  ;;  %v1796_v45 = vmax.f32 %v1789_v13, %v1794_v52  ;;  %v1808_v50 = vsel %vm1372_vm0, %v1807_v46, %v1804_v25  ;;  %v2510_v54 = vor.u32 %v2889_v33, %v2507_v40  ;;  %v2925_v52 = vld [vmem:[%s4440_s1 + $0x624] sm:$0xf]  ;;  %v2579_v25 = vld [vmem:[%s4440_s1 + $0x598] sm:$0xf0] }
  0xc6   :  { %1714 = vmatpush.bf16.msra.mxu2 %v2694_v51  ;;  %1683 = vmatmul.bf16.vlgmr.msrb.gmra.mxu3 %v3673_v37  ;;  %v2667_v37 = vld [vmem:[%s4440_s1 + $0x648] sm:$0xf0]  ;;  %v2710_v49 = vor.u32 %v2939_v28, %v2707_v27  ;;  %v2595_v51 = vld [vmem:[%s4440_s1 + $0x5b8] sm:$0xf0]  ;;  %v1810_v0 = vunpack.c.l.bf16 %v1808_v50  ;;  %v1811_v20 = vunpack.c.h.bf16 %v1808_v50  ;;  %v2905_v40 = vld [vmem:[%s4440_s1 + $0x584] sm:$0xf] }
  0xc7   :  { %1731 = vmatpush.bf16.msra.mxu3 %v2726_v59  ;;  %v2670_v56 = vor.u32 %v2929_v41, %v2667_v37  ;;  %v2571_v41 = vld [vmem:[%s4440_s1 + $0x588] sm:$0xf0] }
  0xc8   :  { %1702 = vmatpush.bf16.msra.mxu0 %v2622_v63  ;;  %v1812_v59 = vmax.f32 %v1796_v45, %v1810_v0  ;;  %v1813_v43 = vmax.f32 %v1797_v42, %v1811_v20  ;;  %v2598_v63 = vor.u32 %v2911_v48, %v2595_v51  ;;  %v1439_v28 = vpop.f32.mrf.mxu0  ;;  %v2921_v42 = vld [vmem:[%s4440_s1 + $0x604] sm:$0xf]  ;;  %v2635_v45 = vld [vmem:[%s4440_s1 + $0x608] sm:$0xf0] }
  0xc9   :  { %1693 = vmatpush.bf16.msra.mxu1 %v2526_v3  ;;  %v1438_v3 = vadd.f32 %v1437_v58, %v4302_v55  ;;  %v2587_v55 = vld [vmem:[%s4440_s1 + $0x5a8] sm:$0xf0]  ;;  %v1476_v33 = vpop.f32.mrf.mxu3  ;;  %v1452_v34 = vpop.f32.mrf.mxu1 }
  0xca   :  { %1715 = vmatpush.bf16.msra.mxu2 %v2686_v4  ;;  %v2702_v4 = vor.u32 %v2937_v39, %v2699_v16  ;;  %v1823_v7 = vmax.f32 %v1812_v59, %v1821_v53  ;;  %v1824_v8 = vmax.f32 %v1813_v43, %v1822_v36  ;;  %v2590_v15 = vor.u32 %v2909_v10, %v2587_v55 }
  0xcb   :  { %1732 = vmatpush.bf16.msra.mxu3 %v2718_v23  ;;  %v1451_v12 = vadd.f32 %v1450_v6, %v1438_v3  ;;  %v1463_v23 = vpop.f32.mrf.mxu2 }
  0xcc   :  { %1703 = vmatpush.bf16.msra.mxu0 %v2614_v26  ;;  %v1839_v13 = vmax.f32 %v1823_v7, %v1836_v21  ;;  %v1840_v14 = vmax.f32 %v1824_v8, %v2955_v61  ;;  %v2654_v26 = vor.u32 %v2925_v52, %v2651_v18 }
  0xcd   :  { %1694 = vmatpush.bf16.msra.mxu1 %v2518_v31  ;;  %v1464_v62 = vadd.f32 %v1463_v23, %v1451_v12  ;;  %v2582_v31 = vor.u32 %v2907_v24, %v2579_v25  ;;  %v241_v12 = vperm.slane %v4169_v11, 1 }
  0xce   :  { %1716 = vmatpush.bf16.msra.mxu2 %v2678_v35  ;;  %v1847_v17 = vmax.f32 %v1840_v14, %v1845_v5  ;;  %v1846_v22 = vmax.f32 %v1839_v13, %v1844_v9 }
  0xcf   :  { %1733 = vmatpush.bf16.msra.mxu3 %v2710_v49  ;;  %v1477_v35 = vadd.f32 %v1476_v33, %v1464_v62 }
  0xd0   :  { %1704 = vmatpush.bf16.msra.mxu0 %v2606_v47  ;;  %v1848_v27 = vpack.c.bf16 %v1847_v17, %v1846_v22  ;;  %v2638_v47 = vor.u32 %v2921_v42, %v2635_v45 }
  0xd1   :  { %1695 = vmatpush.bf16.msra.mxu1 %v2510_v54  ;;  %v1478_v48 = vpop.f32.mrf.mxu3 }
  0xd2   :  { %1717 = vmatpush.bf16.msra.mxu2 %v2670_v56  ;;  %1850 = vrot.lane.b32.xlu0 %v1848_v27, %s2961_s11 }
  0xd3   :  { %1734 = vmatpush.bf16.msra.mxu3 %v2702_v4  ;;  %v1465_v46 = vpop.f32.mrf.mxu2 }
  0xd4   :  { %1696 = vmatmul.bf16.vlgmr.msra.gmra.mxu1 %v3660_v29  ;;  %1705 = vmatpush.bf16.msra.mxu0 %v2598_v63  ;;  %v2923_v29 = vld [vmem:[%s4440_s1 + $0x614] sm:$0xf] }
  0xd5   :  { %v2646_v37 = vor.u32 %v2923_v29, %v2643_v30 }
  0xd6   :  { %1718 = vmatpush.bf16.msra.mxu2 %v2662_v60  ;;  %2728 = vmatmul.msk.bf16.vlgmr.msra.gmra.mxu3 %vm1372_vm0, %v3790_v44  ;;  %v2574_v44 = vor.u32 %v2905_v40, %v2571_v41 }
  0xd8   :  { %1706 = vmatpush.bf16.msra.mxu0 %v2590_v15 }
  0xda   :  { %1719 = vmatpush.bf16.msra.mxu2 %v2654_v26 }
  0xdc   :  { %1707 = vmatpush.bf16.msra.mxu0 %v2582_v31 }
  0xde   :  { %1720 = vmatpush.bf16.msra.mxu2 %v2646_v37 }
  0xe0   :  { %1708 = vmatpush.bf16.msra.mxu0 %v2574_v44  ;;  %v1489_v49 = vpop.f32.mrf.mxu0 }
  0xe1   :  { %v1490_v50 = vadd.f32 %v1489_v49, %v1477_v35  ;;  %v1502_v51 = vpop.f32.mrf.mxu1 }
  0xe2   :  { %1721 = vmatpush.bf16.msra.mxu2 %v2638_v47 }
  0xe3   :  { %1709 = vmatmul.bf16.vlgmr.msra.gmra.mxu0 %v3675_v38  ;;  %v1503_v39 = vadd.f32 %v1502_v51, %v1490_v50 }
  0xe5   :  { %1722 = vmatmul.bf16.vlgmr.msra.gmra.mxu2 %v3876_v32 }
  0xe8   :  { %v1515_v16 = vpop.f32.mrf.mxu2  ;;  %v1491_v20 = vpop.f32.mrf.mxu0 }
  0xe9   :  { %v1516_v53 = vadd.f32 %v1515_v16, %v1503_v39  ;;  %v1528_v0 = vpop.f32.mrf.mxu3  ;;  %v1504_v54 = vpop.f32.mrf.mxu1 }
  0xeb   :  { %v1529_v36 = vadd.f32 %v1528_v0, %v1516_v53 }
  0xf0   :  { %v1517_v56 = vpop.f32.mrf.mxu2 }
  0xf1   :  { %v1530_v57 = vpop.f32.mrf.mxu3  ;;  %v1554_v58 = vpop.f32.mrf.mxu1 }
  0xf9   :  { %v1556_v59 = vpop.f32.mrf.mxu1 }
 0x100   :  { %v1541_v43 = vpop.f32.mrf.mxu0 }
 0x101   :  { %v1542_v61 = vadd.f32 %v1541_v43, %v1529_v36 }
 0x103   :  { %v1555_v19 = vadd.f32 %v1554_v58, %v1542_v61 }
 0x105   :  { %v1740_v46 = vmax.f32 %v1555_v19, 0.0 }
 0x108   :  { %v1567_v38 = vpop.f32.mrf.mxu2  ;;  %v1543_v63 = vpop.f32.mrf.mxu0 }
 0x109   :  { %v1580_v32 = vpop.f32.mrf.mxu3  ;;  %v1568_v60 = vadd.f32 %v1567_v38, %v241_v12 }
 0x10b   :  { %v1581_v14 = vadd.f32 %v1580_v32, %v1568_v60 }
 0x110   :  { %v1569_v2 = vpop.f32.mrf.mxu2 }
 0x111   :  { %v1593_v1 = vpop.f32.mrf.mxu1  ;;  %v1582_v3 = vpop.f32.mrf.mxu3 }
 0x112   :  { %v1594_v18 = vadd.f32 %v1593_v1, %v1581_v14 }
 0x119   :  { %v1595_v4 = vpop.f32.mrf.mxu1 }
 0x120   :  { %v1606_v5 = vpop.f32.mrf.mxu0 }
 0x121   :  { %v1607_v22 = vadd.f32 %v1606_v5, %v1594_v18 }
 0x128   :  { %v1619_v6 = vpop.f32.mrf.mxu2  ;;  %v1608_v7 = vpop.f32.mrf.mxu0 }
 0x129   :  { %v1632_v8 = vpop.f32.mrf.mxu3  ;;  %v1620_v25 = vadd.f32 %v1619_v6, %v1607_v22 }
 0x12b   :  { %v1633_v62 = vadd.f32 %v1632_v8, %v1620_v25 }
 0x130   :  { %v1621_v9 = vpop.f32.mrf.mxu2 }
 0x131   :  { %v1645_v21 = vpop.f32.mrf.mxu1  ;;  %v1634_v10 = vpop.f32.mrf.mxu3 }
 0x132   :  { %v1646_v27 = vadd.f32 %v1645_v21, %v1633_v62 }
 0x139   :  { %v1647_v55 = vpop.f32.mrf.mxu1 }
 0x140   :  { %v1658_v13 = vpop.f32.mrf.mxu0 }
 0x141   :  { %v1659_v30 = vadd.f32 %v1658_v13, %v1646_v27 }
 0x144   :  { %v1851_v45 = vpop.permute.xlu0 %1850 }
 0x145   :  { %v1852_v47 = vrot.slane %v1851_v45, 4 }
 0x147   :  { %v1853_v51 = vsel %vm1372_vm0, %v1852_v47, %v1851_v45 }
 0x148   :  { %v1671_v52 = vpop.f32.mrf.mxu2  ;;  %v1660_v15 = vpop.f32.mrf.mxu0 }
 0x149   :  { %v1684_v17 = vpop.f32.mrf.mxu3  ;;  %v1672_v31 = vadd.f32 %v1671_v52, %v1659_v30 }
 0x14b   :  { %v1685_v11 = vadd.f32 %v1684_v17, %v1672_v31 }
 0x150   :  { %v1673_v24 = vpop.f32.mrf.mxu2 }
 0x151   :  { %v1697_v23 = vpop.f32.mrf.mxu1  ;;  %v1686_v26 = vpop.f32.mrf.mxu3 }
 0x152   :  { %v1698_v35 = vadd.f32 %v1697_v23, %v1685_v11 }
 0x159   :  { %v1699_v28 = vpop.f32.mrf.mxu1  ;;  %v1736_v29 = vpop.f32.mrf.mxu3 }
 0x160   :  { %v1710_v33 = vpop.f32.mrf.mxu0 }
 0x161   :  { %v1738_v34 = vpop.f32.mrf.mxu3  ;;  %v1711_v40 = vadd.f32 %v1710_v33, %v1698_v35 }
 0x168   :  { %v1723_v41 = vpop.f32.mrf.mxu2  ;;  %v1712_v37 = vpop.f32.mrf.mxu0 }
 0x169   :  { %v1724_v42 = vadd.f32 %v1723_v41, %v1711_v40 }
 0x16b   :  { %v1737_v44 = vadd.f32 %v1736_v29, %v1724_v42 }
 0x16d   :  { %v1741_v48 = vmax.f32 %v1737_v44, 0.0 }
 0x16f   :  { %v1742_v49 = vpack.c.bf16 %v1741_v48, %v1740_v46 }
 0x170   :  { %v1725_v50 = vpop.f32.mrf.mxu2 }
 0x171   :  { %1746 = vst.msk [vmem:[%s4443_s3] sm:$0xff] %vm1745_vm5, %v1742_v49 }
 0x172   :  { %1858 = vst.msk [vmem:[%s4443_s3 + $0x4] sm:$0xff] %vm1857_vm6, %v1853_v51 }

</bundles_post_ra>
